<compile_context>
chip_gen: v7x
topology: tpu7x:2x2x1
jax: 0.10.0
libtpu: 0.0.40
codegen_flags: <defaults>
</compile_context>

<pallas_src>
import jax
import jax.numpy as jnp
import numpy as np
from jax.experimental import pallas as pl
from jax.experimental.pallas import tpu as pltpu


# Model geometry (fixed by the PyTorch module: fc1 expects 32*8*8 features).
H0 = W0 = 32          # input spatial size
C0 = 3                # input channels
C0P = 4               # input channels padded to 4 for dense 128-lane rows
C1 = 16               # conv1 out channels
C2 = 32               # conv2 out channels
H1 = W1 = 16          # after pool1
H2 = W2 = 8           # after pool2
FC1 = 256
FC2 = 10
FC2_PAD = 128         # fc2 outputs padded to a full lane group

IN_LANES = W0 * C0P       # 128  conv1 input lanes  (x, ci)
CONV1_LANES = W0 * C1     # 512  conv1 output lanes (x, co)
POOL1_LANES = W1 * C1     # 256  pooled-1 lanes (compact)
CONV2_LANES = W1 * C2     # 512  conv2 output lanes
POOL2_LANES = W2 * C2     # 256  pooled-2 lanes (compact)


# ----------------------------------------------------------------------------
# Fused forward kernel
# ----------------------------------------------------------------------------
def _fused_forward_kernel(
    x_ref,        # ((H0+2)*n, 128) bf16  y/c-padded input, rows = (y_pad, b)
    wb1_ref,      # (3, 128, 512)   bf16  conv1 banded weights (VMEM)
    b1_ref,       # (1, 512)        f32
    b2_ref,       # (1, 512)        f32
    fb1_ref,      # (1, 256)        f32
    fb2_ref,      # (1, 128)        f32
    sel1_hbm,     # (512, 512)      bf16  pool1 even||odd selector   (ANY/HBM)
    wb2_hbm,      # (3, 256, 512)   bf16  conv2 banded weights       (ANY/HBM)
    sel2_hbm,     # (512, 512)      bf16  pool2 even||odd selector   (ANY/HBM)
    fw1_hbm,      # (2048, 256)     bf16  fc1 weights                (ANY/HBM)
    fw2_hbm,      # (256, 128)      bf16  fc2 weights (lane-padded)  (ANY/HBM)
    o_ref,        # (n, 128)        f32   output
    pad2_ref,     # ((H1+2)*n, 256) bf16  scratch: y-padded conv2 input
    fcin_ref,     # (n, 2048)       bf16  scratch: flattened fc1 input
    sel1_v, wb2_v, sel2_v, fw1_v, fw2_v,  # VMEM landing buffers for weights
    sem,          # DMA semaphores (5,)
):
    n = o_ref.shape[0]

    # Kick off all large-weight DMAs immediately so they overlap conv compute.
    copies = [
        pltpu.make_async_copy(sel1_hbm, sel1_v, sem.at[0]),
        pltpu.make_async_copy(wb2_hbm, wb2_v, sem.at[1]),
        pltpu.make_async_copy(sel2_hbm, sel2_v, sem.at[2]),
        pltpu.make_async_copy(fw1_hbm, fw1_v, sem.at[3]),
        pltpu.make_async_copy(fw2_hbm, fw2_v, sem.at[4]),
    ]
    for cp in copies:
        cp.start()

    def mm(a, b):  # bf16 MXU matmul, f32 accumulation
        return jnp.dot(a, b, preferred_element_type=jnp.float32)

    def band_conv3x3(src_ref, wb_ref, rows):
        # 3x3 conv = 3 wide-K matmuls (one per vertical tap); horizontal taps
        # and x zero-padding are folded into the banded weight matrices.
        # Rows are (y, b), so each tap is a contiguous sublane window.
        acc = None
        for ky in range(3):
            lhs = src_ref[ky * n:(ky + rows) * n, :]          # bf16 already
            part = mm(lhs, wb_ref[ky])
            acc = part if acc is None else acc + part
        return acc

    def max_pool_2x2(act, rows, lanes, sel):
        # act: (rows*n, lanes) f32 with rows = (y, b), lanes = (x, c).
        # Vertical pairs: sublane regroup + max (VPU).  Horizontal pairs: ONE
        # merged even||odd 0/1 selector matmul, then max of the lane halves.
        half = lanes // 2
        v = act.reshape(rows // 2, 2, n, lanes)
        v = jnp.maximum(v[:, 0], v[:, 1]).reshape((rows // 2) * n, lanes)
        r = mm(v.astype(jnp.bfloat16), sel)
        return jnp.maximum(r[:, :half], r[:, half:])          # f32, compact

    # ---- conv1 (3->16, 3x3, pad 1) + bias + ReLU + 2x2 max pool ------------
    a1 = jnp.maximum(band_conv3x3(x_ref, wb1_ref, H0) + b1_ref[...], 0.0)
    copies[0].wait()                                          # sel1 ready
    p1 = max_pool_2x2(a1, H0, CONV1_LANES, sel1_v[...])       # (H1*n, 256)

    # ---- conv2 (16->32, 3x3, pad 1) + bias + ReLU + 2x2 max pool -----------
    zrow = jnp.zeros((n, POOL1_LANES), jnp.bfloat16)
    pad2_ref[0:n, :] = zrow                                   # y = -1 pad
    pad2_ref[(H1 + 1) * n:(H1 + 2) * n, :] = zrow             # y = H1 pad
    pad2_ref[n:(H1 + 1) * n, :] = p1.astype(jnp.bfloat16)
    copies[1].wait()                                          # wb2 ready
    a2 = jnp.maximum(band_conv3x3(pad2_ref, wb2_v, H1) + b2_ref[...], 0.0)
    copies[2].wait()                                          # sel2 ready
    p2 = max_pool_2x2(a2, H1, CONV2_LANES, sel2_v[...])       # (H2*n, 256)

    # ---- fc1 + ReLU: single K=2048 matmul ----------------------------------
    # 8 small lane-offset stores build the (n, 2048) bf16 LHS in (h, w, c)
    # feature order matching the pre-permuted fc1 weights.
    for hh in range(H2):
        fcin_ref[:, hh * POOL2_LANES:(hh + 1) * POOL2_LANES] = (
            p2[hh * n:(hh + 1) * n, :].astype(jnp.bfloat16))
    copies[3].wait()                                          # fw1 ready
    h = jnp.maximum(mm(fcin_ref[...], fw1_v[...]) + fb1_ref[...], 0.0)

    # ---- fc2 (padded to 128 output lanes -> dense unmasked store) ----------
    copies[4].wait()                                          # fw2 ready
    o_ref[...] = mm(h.astype(jnp.bfloat16), fw2_v[...]) + fb2_ref[...]


def _vmem():
    return pl.BlockSpec(memory_space=pltpu.MemorySpace.VMEM)


def _any():
    return pl.BlockSpec(memory_space=pl.ANY)


@jax.jit
def simple_cnn_forward(x_nchw, packed):
    """Forward pass matching SimpleCNN; x_nchw: (N, 3, 32, 32) float32."""
    n = x_nchw.shape[0]
    # NCHW -> (y, n, x, c); pad y by 1 row each side and channels 3 -> 4, then
    # flatten to lane-dense, y-major bf16 rows: ((y_pad, b) x (x, c)).
    x = jnp.transpose(x_nchw, (2, 0, 3, 1))                      # (H, N, W, C)
    x = jnp.pad(x, ((1, 1), (0, 0), (0, 0), (0, C0P - C0)))
    x = x.reshape((H0 + 2) * n, IN_LANES).astype(jnp.bfloat16)

    out = pl.pallas_call(
        _fused_forward_kernel,
        out_shape=jax.ShapeDtypeStruct((n, FC2_PAD), jnp.float32),
        in_specs=[_vmem()] * 6 + [_any()] * 5,
        out_specs=_vmem(),
        scratch_shapes=[
            pltpu.VMEM(((H1 + 2) * n, POOL1_LANES), jnp.bfloat16),    # pad2
            pltpu.VMEM((n, H2 * POOL2_LANES), jnp.bfloat16),          # fc1 LHS
            pltpu.VMEM((CONV1_LANES, CONV1_LANES), jnp.bfloat16),     # sel1
            pltpu.VMEM((3, POOL1_LANES, CONV2_LANES), jnp.bfloat16),  # wb2
            pltpu.VMEM((CONV2_LANES, CONV2_LANES), jnp.bfloat16),     # sel2
            pltpu.VMEM((H2 * W2 * C2, FC1), jnp.bfloat16),            # fw1
            pltpu.VMEM((FC1, FC2_PAD), jnp.bfloat16),                 # fw2
            pltpu.SemaphoreType.DMA((5,)),
        ],
    )(x, packed["wb1"], packed["b1"], packed["b2"], packed["fb1"], packed["fb2"],
      packed["sel1"], packed["wb2"], packed["sel2"], packed["fw1"], packed["fw2"])
    return out[:, :FC2]


# ----------------------------------------------------------------------------
# One-time parameter packing (PyTorch layouts -> kernel layouts), in numpy
# ----------------------------------------------------------------------------
def _conv_band(w_oihw, width, cin_pad=None):
    """Banded conv weights: (3, width*cin_pad, width*cout).  band[ky] maps an
    input row laid out as lanes (xi*cin_pad+ci) to an output row laid out as
    lanes (x*cout+co), folding in horizontal taps + 1-pixel x zero padding."""
    cout, cin, kh, kw = w_oihw.shape
    cin_p = cin if cin_pad is None else cin_pad
    w = np.transpose(np.asarray(w_oihw, np.float32), (2, 3, 1, 0))  # ky,kx,ci,co
    band = np.zeros((kh, width * cin_p, width * cout), np.float32)
    for x in range(width):
        for kx in range(kw):
            xi = x + kx - 1
            if 0 <= xi < width:
                band[:, xi * cin_p:xi * cin_p + cin,
                     x * cout:(x + 1) * cout] = w[:, kx]
    return band


def _pool_selector(width, c):
    """Merged even||odd 0/1 selector: lanes (x, c) -> [even (x//2, c) || odd]."""
    eye = np.eye(c, dtype=np.float32)
    half = (width // 2) * c
    sel = np.zeros((width * c, width * c), np.float32)
    for xo in range(width // 2):
        sel[(2 * xo) * c:(2 * xo + 1) * c, xo * c:(xo + 1) * c] = eye
        sel[(2 * xo + 1) * c:(2 * xo + 2) * c,
            half + xo * c:half + (xo + 1) * c] = eye
    return sel


def pack_params(p, mxu_dtype=jnp.bfloat16):
    wb1 = _conv_band(p["conv1_w"], W0, cin_pad=C0P)            # (3, 128, 512)
    wb2 = _conv_band(p["conv2_w"], W1)                         # (3, 256, 512)
    b1 = np.tile(np.asarray(p["conv1_b"], np.float32), W0)[None, :]   # (1, 512)
    b2 = np.tile(np.asarray(p["conv2_b"], np.float32), W1)[None, :]   # (1, 512)
    sel1 = _pool_selector(W0, C1)                              # (512, 512)
    sel2 = _pool_selector(W1, C2)                              # (512, 512)

    # fc1: torch weight (256, 2048) over features flattened as (c, h, w).
    # Re-index to row = h*256 + w*32 + c so it contracts against the kernel's
    # (h, w, c) flattened pooled activations with a single K=2048 matmul.
    fw1 = np.asarray(p["fc1_w"], np.float32).reshape(FC1, C2, H2, W2)
    fw1 = np.transpose(fw1, (2, 3, 1, 0)).reshape(H2 * W2 * C2, FC1)  # (2048,256)
    fb1 = np.asarray(p["fc1_b"], np.float32)[None, :]

    # fc2 padded to 128 output lanes.
    fw2 = np.zeros((FC1, FC2_PAD), np.float32)
    fw2[:, :FC2] = np.asarray(p["fc2_w"], np.float32).T
    fb2 = np.zeros((1, FC2_PAD), np.float32)
    fb2[0, :FC2] = np.asarray(p["fc2_b"], np.float32)

    return {
        "wb1": jnp.asarray(wb1, mxu_dtype), "b1": jnp.asarray(b1),
        "b2": jnp.asarray(b2), "fb1": jnp.asarray(fb1), "fb2": jnp.asarray(fb2),
        "sel1": jnp.asarray(sel1, mxu_dtype), "wb2": jnp.asarray(wb2, mxu_dtype),
        "sel2": jnp.asarray(sel2, mxu_dtype), "fw1": jnp.asarray(fw1, mxu_dtype),
        "fw2": jnp.asarray(fw2, mxu_dtype),
    }


# ----------------------------------------------------------------------------
# Pure-JAX f32 reference (mirrors the PyTorch forward exactly)
# ----------------------------------------------------------------------------
def reference_forward(x_nchw, p):
    def conv(x, w, b):
        y = jax.lax.conv_general_dilated(
            x, w, (1, 1), ((1, 1), (1, 1)),
            dimension_numbers=("NCHW", "OIHW", "NCHW"))
        return y + b[None, :, None, None]

    def pool(x):
        return jax.lax.reduce_window(x, -jnp.inf, jax.lax.max,
                                     (1, 1, 2, 2), (1, 1, 2, 2), "VALID")

    h = pool(jnp.maximum(conv(x_nchw, p["conv1_w"], p["conv1_b"]), 0.0))
    h = pool(jnp.maximum(conv(h, p["conv2_w"], p["conv2_b"]), 0.0))
    h = h.reshape(h.shape[0], -1)                          # (c, h, w) flatten
    h = jnp.maximum(h @ p["fc1_w"].T + p["fc1_b"], 0.0)
    return h @ p["fc2_w"].T + p["fc2_b"]


if __name__ == "__main__":
    key = jax.random.PRNGKey(0)
    ks = jax.random.split(key, 9)

    # Deterministic synthetic parameters in PyTorch layouts.
    params = {
        "conv1_w": 0.05 * jax.random.normal(ks[0], (C1, C0, 3, 3), jnp.float32),
        "conv1_b": 0.05 * jax.random.normal(ks[1], (C1,), jnp.float32),
        "conv2_w": 0.05 * jax.random.normal(ks[2], (C2, C1, 3, 3), jnp.float32),
        "conv2_b": 0.05 * jax.random.normal(ks[3], (C2,), jnp.float32),
        "fc1_w": 0.05 * jax.random.normal(ks[4], (FC1, C2 * H2 * W2), jnp.float32),
        "fc1_b": 0.05 * jax.random.normal(ks[5], (FC1,), jnp.float32),
        "fc2_w": 0.05 * jax.random.normal(ks[6], (FC2, FC1), jnp.float32),
        "fc2_b": 0.05 * jax.random.normal(ks[7], (FC2,), jnp.float32),
    }
    packed = pack_params(params)

    # fc1 expects 32*8*8 features -> spatial input must be 3x32x32.
    x = jax.random.normal(ks[8], (2, C0, H0, W0), jnp.float32)

    out = jax.block_until_ready(simple_cnn_forward(x, packed))
    ref = jax.block_until_ready(reference_forward(x, params))

    assert out.shape == (2, FC2), out.shape
    max_err = float(jnp.max(jnp.abs(out - ref)))
    # bf16 MXU inputs (f32 accumulation) -> slightly loosened tolerance.
    assert jnp.allclose(out, ref, rtol=2e-2, atol=2e-2), max_err

    print("KERNEL_OK")
</pallas_src>

<mosaic_0001>
module attributes {stable_mosaic.version = 11 : i64} {
  func.func @_fused_forward_kernel(%arg0: memref<68x128xbf16, #tpu.memory_space<vmem>>, %arg1: memref<3x128x512xbf16, #tpu.memory_space<vmem>>, %arg2: memref<1x512xf32, #tpu.memory_space<vmem>>, %arg3: memref<1x512xf32, #tpu.memory_space<vmem>>, %arg4: memref<1x256xf32, #tpu.memory_space<vmem>>, %arg5: memref<1x128xf32, #tpu.memory_space<vmem>>, %arg6: memref<512x512xbf16, #tpu.memory_space<any>>, %arg7: memref<3x256x512xbf16, #tpu.memory_space<any>>, %arg8: memref<512x512xbf16, #tpu.memory_space<any>>, %arg9: memref<2048x256xbf16, #tpu.memory_space<any>>, %arg10: memref<256x128xbf16, #tpu.memory_space<any>>, %arg11: memref<2x128xf32, #tpu.memory_space<vmem>>, %arg12: memref<36x256xbf16, #tpu.memory_space<vmem>>, %arg13: memref<2x2048xbf16, #tpu.memory_space<vmem>>, %arg14: memref<512x512xbf16, #tpu.memory_space<vmem>>, %arg15: memref<3x256x512xbf16, #tpu.memory_space<vmem>>, %arg16: memref<512x512xbf16, #tpu.memory_space<vmem>>, %arg17: memref<2048x256xbf16, #tpu.memory_space<vmem>>, %arg18: memref<256x128xbf16, #tpu.memory_space<vmem>>, %arg19: memref<5x!tpu.dma_semaphore, #tpu.memory_space<semaphore_mem>>) attributes {dimension_semantics = [], scalar_prefetch = 0 : i64, scratch_operands = 8 : i64, tpu.core_type = #tpu.core_type<tc>} {
    %c0_i32 = arith.constant 0 : i32
    %0 = tpu.memref_slice %arg19[%c0_i32] : memref<5x!tpu.dma_semaphore, #tpu.memory_space<semaphore_mem>> -> memref<1x!tpu.dma_semaphore, #tpu.memory_space<semaphore_mem>>
    %1 = tpu.memref_squeeze %0 : memref<1x!tpu.dma_semaphore, #tpu.memory_space<semaphore_mem>> -> memref<!tpu.dma_semaphore, #tpu.memory_space<semaphore_mem>>
    tpu.enqueue_dma source(%arg6 : memref<512x512xbf16, #tpu.memory_space<any>>) target(%arg14 : memref<512x512xbf16, #tpu.memory_space<vmem>>) target_semaphore(%1 : memref<!tpu.dma_semaphore, #tpu.memory_space<semaphore_mem>>)
    %c1_i32 = arith.constant 1 : i32
    %2 = tpu.memref_slice %arg19[%c1_i32] : memref<5x!tpu.dma_semaphore, #tpu.memory_space<semaphore_mem>> -> memref<1x!tpu.dma_semaphore, #tpu.memory_space<semaphore_mem>>
    %3 = tpu.memref_squeeze %2 : memref<1x!tpu.dma_semaphore, #tpu.memory_space<semaphore_mem>> -> memref<!tpu.dma_semaphore, #tpu.memory_space<semaphore_mem>>
    tpu.enqueue_dma source(%arg7 : memref<3x256x512xbf16, #tpu.memory_space<any>>) target(%arg15 : memref<3x256x512xbf16, #tpu.memory_space<vmem>>) target_semaphore(%3 : memref<!tpu.dma_semaphore, #tpu.memory_space<semaphore_mem>>)
    %c2_i32 = arith.constant 2 : i32
    %4 = tpu.memref_slice %arg19[%c2_i32] : memref<5x!tpu.dma_semaphore, #tpu.memory_space<semaphore_mem>> -> memref<1x!tpu.dma_semaphore, #tpu.memory_space<semaphore_mem>>
    %5 = tpu.memref_squeeze %4 : memref<1x!tpu.dma_semaphore, #tpu.memory_space<semaphore_mem>> -> memref<!tpu.dma_semaphore, #tpu.memory_space<semaphore_mem>>
    tpu.enqueue_dma source(%arg8 : memref<512x512xbf16, #tpu.memory_space<any>>) target(%arg16 : memref<512x512xbf16, #tpu.memory_space<vmem>>) target_semaphore(%5 : memref<!tpu.dma_semaphore, #tpu.memory_space<semaphore_mem>>)
    %c3_i32 = arith.constant 3 : i32
    %6 = tpu.memref_slice %arg19[%c3_i32] : memref<5x!tpu.dma_semaphore, #tpu.memory_space<semaphore_mem>> -> memref<1x!tpu.dma_semaphore, #tpu.memory_space<semaphore_mem>>
    %7 = tpu.memref_squeeze %6 : memref<1x!tpu.dma_semaphore, #tpu.memory_space<semaphore_mem>> -> memref<!tpu.dma_semaphore, #tpu.memory_space<semaphore_mem>>
    tpu.enqueue_dma source(%arg9 : memref<2048x256xbf16, #tpu.memory_space<any>>) target(%arg17 : memref<2048x256xbf16, #tpu.memory_space<vmem>>) target_semaphore(%7 : memref<!tpu.dma_semaphore, #tpu.memory_space<semaphore_mem>>)
    %c4_i32 = arith.constant 4 : i32
    %8 = tpu.memref_slice %arg19[%c4_i32] : memref<5x!tpu.dma_semaphore, #tpu.memory_space<semaphore_mem>> -> memref<1x!tpu.dma_semaphore, #tpu.memory_space<semaphore_mem>>
    %9 = tpu.memref_squeeze %8 : memref<1x!tpu.dma_semaphore, #tpu.memory_space<semaphore_mem>> -> memref<!tpu.dma_semaphore, #tpu.memory_space<semaphore_mem>>
    tpu.enqueue_dma source(%arg10 : memref<256x128xbf16, #tpu.memory_space<any>>) target(%arg18 : memref<256x128xbf16, #tpu.memory_space<vmem>>) target_semaphore(%9 : memref<!tpu.dma_semaphore, #tpu.memory_space<semaphore_mem>>)
    %c0 = arith.constant 0 : index
    %c0_0 = arith.constant 0 : index
    %10 = vector.load %arg0[%c0, %c0_0] : memref<68x128xbf16, #tpu.memory_space<vmem>>, vector<64x128xbf16>
    %c0_1 = arith.constant 0 : index
    %c0_2 = arith.constant 0 : index
    %c0_3 = arith.constant 0 : index
    %11 = vector.load %arg1[%c0_1, %c0_2, %c0_3] : memref<3x128x512xbf16, #tpu.memory_space<vmem>>, vector<1x128x512xbf16>
    %12 = vector.shape_cast %11 : vector<1x128x512xbf16> to vector<128x512xbf16>
    %cst = arith.constant dense<0.000000e+00> : vector<64x512xf32>
    %13 = tpu.matmul %10, %12, %cst {dimension_numbers = #tpu.dot_dimension_numbers<[1], [0], [0], [1], [0, 0, 1, 1], [], []>} : vector<64x128xbf16>, vector<128x512xbf16>, vector<64x512xf32> -> vector<64x512xf32>
    %c2 = arith.constant 2 : index
    %c0_4 = arith.constant 0 : index
    %14 = vector.load %arg0[%c2, %c0_4] : memref<68x128xbf16, #tpu.memory_space<vmem>>, vector<64x128xbf16>
    %c1 = arith.constant 1 : index
    %c0_5 = arith.constant 0 : index
    %c0_6 = arith.constant 0 : index
    %15 = vector.load %arg1[%c1, %c0_5, %c0_6] : memref<3x128x512xbf16, #tpu.memory_space<vmem>>, vector<1x128x512xbf16>
    %16 = vector.shape_cast %15 : vector<1x128x512xbf16> to vector<128x512xbf16>
    %cst_7 = arith.constant dense<0.000000e+00> : vector<64x512xf32>
    %17 = tpu.matmul %14, %16, %cst_7 {dimension_numbers = #tpu.dot_dimension_numbers<[1], [0], [0], [1], [0, 0, 1, 1], [], []>} : vector<64x128xbf16>, vector<128x512xbf16>, vector<64x512xf32> -> vector<64x512xf32>
    %18 = arith.addf %13, %17 : vector<64x512xf32>
    %c4 = arith.constant 4 : index
    %c0_8 = arith.constant 0 : index
    %19 = vector.load %arg0[%c4, %c0_8] : memref<68x128xbf16, #tpu.memory_space<vmem>>, vector<64x128xbf16>
    %c2_9 = arith.constant 2 : index
    %c0_10 = arith.constant 0 : index
    %c0_11 = arith.constant 0 : index
    %20 = vector.load %arg1[%c2_9, %c0_10, %c0_11] : memref<3x128x512xbf16, #tpu.memory_space<vmem>>, vector<1x128x512xbf16>
    %21 = vector.shape_cast %20 : vector<1x128x512xbf16> to vector<128x512xbf16>
    %cst_12 = arith.constant dense<0.000000e+00> : vector<64x512xf32>
    %22 = tpu.matmul %19, %21, %cst_12 {dimension_numbers = #tpu.dot_dimension_numbers<[1], [0], [0], [1], [0, 0, 1, 1], [], []>} : vector<64x128xbf16>, vector<128x512xbf16>, vector<64x512xf32> -> vector<64x512xf32>
    %23 = arith.addf %18, %22 : vector<64x512xf32>
    %c0_13 = arith.constant 0 : index
    %c0_14 = arith.constant 0 : index
    %24 = vector.load %arg2[%c0_13, %c0_14] : memref<1x512xf32, #tpu.memory_space<vmem>>, vector<1x512xf32>
    %25 = vector.broadcast %24 : vector<1x512xf32> to vector<64x512xf32>
    %26 = arith.addf %23, %25 : vector<64x512xf32>
    %cst_15 = arith.constant 0.000000e+00 : f32
    %27 = vector.broadcast %cst_15 : f32 to vector<64x512xf32>
    %28 = arith.maximumf %26, %27 : vector<64x512xf32>
    %c0_i32_16 = arith.constant 0 : i32
    %29 = tpu.memref_slice %arg19[%c0_i32_16] : memref<5x!tpu.dma_semaphore, #tpu.memory_space<semaphore_mem>> -> memref<1x!tpu.dma_semaphore, #tpu.memory_space<semaphore_mem>>
    %30 = tpu.memref_squeeze %29 : memref<1x!tpu.dma_semaphore, #tpu.memory_space<semaphore_mem>> -> memref<!tpu.dma_semaphore, #tpu.memory_space<semaphore_mem>>
    tpu.wait_dma2 semaphore(%30 : memref<!tpu.dma_semaphore, #tpu.memory_space<semaphore_mem>>) src(%arg6 : memref<512x512xbf16, #tpu.memory_space<any>>) dst(%arg14 : memref<512x512xbf16, #tpu.memory_space<vmem>>)
    %c0_17 = arith.constant 0 : index
    %c0_18 = arith.constant 0 : index
    %31 = vector.load %arg14[%c0_17, %c0_18] : memref<512x512xbf16, #tpu.memory_space<vmem>>, vector<512x512xbf16>
    %32 = vector.shape_cast %28 : vector<64x512xf32> to vector<16x2x2x512xf32>
    %33 = vector.extract_strided_slice %32 {offsets = [0, 0, 0, 0], sizes = [16, 1, 2, 512], strides = [1, 1, 1, 1]} : vector<16x2x2x512xf32> to vector<16x1x2x512xf32>
    %34 = vector.shape_cast %33 : vector<16x1x2x512xf32> to vector<16x2x512xf32>
    %35 = vector.extract_strided_slice %32 {offsets = [0, 1, 0, 0], sizes = [16, 1, 2, 512], strides = [1, 1, 1, 1]} : vector<16x2x2x512xf32> to vector<16x1x2x512xf32>
    %36 = vector.shape_cast %35 : vector<16x1x2x512xf32> to vector<16x2x512xf32>
    %37 = arith.maximumf %34, %36 : vector<16x2x512xf32>
    %38 = vector.shape_cast %37 : vector<16x2x512xf32> to vector<32x512xf32>
    %39 = arith.truncf %38 : vector<32x512xf32> to vector<32x512xbf16>
    %cst_19 = arith.constant dense<0.000000e+00> : vector<32x512xf32>
    %40 = tpu.matmul %39, %31, %cst_19 {dimension_numbers = #tpu.dot_dimension_numbers<[1], [0], [0], [1], [0, 0, 1, 1], [], []>} : vector<32x512xbf16>, vector<512x512xbf16>, vector<32x512xf32> -> vector<32x512xf32>
    %41 = vector.extract_strided_slice %40 {offsets = [0, 0], sizes = [32, 256], strides = [1, 1]} : vector<32x512xf32> to vector<32x256xf32>
    %42 = vector.extract_strided_slice %40 {offsets = [0, 256], sizes = [32, 256], strides = [1, 1]} : vector<32x512xf32> to vector<32x256xf32>
    %43 = arith.maximumf %41, %42 : vector<32x256xf32>
    %cst_20 = arith.constant 0.000000e+00 : bf16
    %44 = vector.broadcast %cst_20 : bf16 to vector<2x256xbf16>
    %c0_21 = arith.constant 0 : index
    %c0_22 = arith.constant 0 : index
    %45 = vector.load %arg12[%c0_21, %c0_22] : memref<36x256xbf16, #tpu.memory_space<vmem>>, vector<2x256xbf16>
    tpu.vector_store %arg12[%c0_21, %c0_22], %44 {strides = array<i32>} : memref<36x256xbf16, #tpu.memory_space<vmem>>, vector<2x256xbf16>,
    %c34 = arith.constant 34 : index
    %c0_23 = arith.constant 0 : index
    %46 = vector.load %arg12[%c34, %c0_23] : memref<36x256xbf16, #tpu.memory_space<vmem>>, vector<2x256xbf16>
    tpu.vector_store %arg12[%c34, %c0_23], %44 {strides = array<i32>} : memref<36x256xbf16, #tpu.memory_space<vmem>>, vector<2x256xbf16>,
    %47 = arith.truncf %43 : vector<32x256xf32> to vector<32x256xbf16>
    %c2_24 = arith.constant 2 : index
    %c0_25 = arith.constant 0 : index
    %48 = vector.load %arg12[%c2_24, %c0_25] : memref<36x256xbf16, #tpu.memory_space<vmem>>, vector<32x256xbf16>
    tpu.vector_store %arg12[%c2_24, %c0_25], %47 {strides = array<i32>} : memref<36x256xbf16, #tpu.memory_space<vmem>>, vector<32x256xbf16>,
    %c1_i32_26 = arith.constant 1 : i32
    %49 = tpu.memref_slice %arg19[%c1_i32_26] : memref<5x!tpu.dma_semaphore, #tpu.memory_space<semaphore_mem>> -> memref<1x!tpu.dma_semaphore, #tpu.memory_space<semaphore_mem>>
    %50 = tpu.memref_squeeze %49 : memref<1x!tpu.dma_semaphore, #tpu.memory_space<semaphore_mem>> -> memref<!tpu.dma_semaphore, #tpu.memory_space<semaphore_mem>>
    tpu.wait_dma2 semaphore(%50 : memref<!tpu.dma_semaphore, #tpu.memory_space<semaphore_mem>>) src(%arg7 : memref<3x256x512xbf16, #tpu.memory_space<any>>) dst(%arg15 : memref<3x256x512xbf16, #tpu.memory_space<vmem>>)
    %c0_27 = arith.constant 0 : index
    %c0_28 = arith.constant 0 : index
    %51 = vector.load %arg12[%c0_27, %c0_28] : memref<36x256xbf16, #tpu.memory_space<vmem>>, vector<32x256xbf16>
    %c0_29 = arith.constant 0 : index
    %c0_30 = arith.constant 0 : index
    %c0_31 = arith.constant 0 : index
    %52 = vector.load %arg15[%c0_29, %c0_30, %c0_31] : memref<3x256x512xbf16, #tpu.memory_space<vmem>>, vector<1x256x512xbf16>
    %53 = vector.shape_cast %52 : vector<1x256x512xbf16> to vector<256x512xbf16>
    %cst_32 = arith.constant dense<0.000000e+00> : vector<32x512xf32>
    %54 = tpu.matmul %51, %53, %cst_32 {dimension_numbers = #tpu.dot_dimension_numbers<[1], [0], [0], [1], [0, 0, 1, 1], [], []>} : vector<32x256xbf16>, vector<256x512xbf16>, vector<32x512xf32> -> vector<32x512xf32>
    %c2_33 = arith.constant 2 : index
    %c0_34 = arith.constant 0 : index
    %55 = vector.load %arg12[%c2_33, %c0_34] : memref<36x256xbf16, #tpu.memory_space<vmem>>, vector<32x256xbf16>
    %c1_35 = arith.constant 1 : index
    %c0_36 = arith.constant 0 : index
    %c0_37 = arith.constant 0 : index
    %56 = vector.load %arg15[%c1_35, %c0_36, %c0_37] : memref<3x256x512xbf16, #tpu.memory_space<vmem>>, vector<1x256x512xbf16>
    %57 = vector.shape_cast %56 : vector<1x256x512xbf16> to vector<256x512xbf16>
    %cst_38 = arith.constant dense<0.000000e+00> : vector<32x512xf32>
    %58 = tpu.matmul %55, %57, %cst_38 {dimension_numbers = #tpu.dot_dimension_numbers<[1], [0], [0], [1], [0, 0, 1, 1], [], []>} : vector<32x256xbf16>, vector<256x512xbf16>, vector<32x512xf32> -> vector<32x512xf32>
    %59 = arith.addf %54, %58 : vector<32x512xf32>
    %c4_39 = arith.constant 4 : index
    %c0_40 = arith.constant 0 : index
    %60 = vector.load %arg12[%c4_39, %c0_40] : memref<36x256xbf16, #tpu.memory_space<vmem>>, vector<32x256xbf16>
    %c2_41 = arith.constant 2 : index
    %c0_42 = arith.constant 0 : index
    %c0_43 = arith.constant 0 : index
    %61 = vector.load %arg15[%c2_41, %c0_42, %c0_43] : memref<3x256x512xbf16, #tpu.memory_space<vmem>>, vector<1x256x512xbf16>
    %62 = vector.shape_cast %61 : vector<1x256x512xbf16> to vector<256x512xbf16>
    %cst_44 = arith.constant dense<0.000000e+00> : vector<32x512xf32>
    %63 = tpu.matmul %60, %62, %cst_44 {dimension_numbers = #tpu.dot_dimension_numbers<[1], [0], [0], [1], [0, 0, 1, 1], [], []>} : vector<32x256xbf16>, vector<256x512xbf16>, vector<32x512xf32> -> vector<32x512xf32>
    %64 = arith.addf %59, %63 : vector<32x512xf32>
    %c0_45 = arith.constant 0 : index
    %c0_46 = arith.constant 0 : index
    %65 = vector.load %arg3[%c0_45, %c0_46] : memref<1x512xf32, #tpu.memory_space<vmem>>, vector<1x512xf32>
    %66 = vector.broadcast %65 : vector<1x512xf32> to vector<32x512xf32>
    %67 = arith.addf %64, %66 : vector<32x512xf32>
    %cst_47 = arith.constant 0.000000e+00 : f32
    %68 = vector.broadcast %cst_47 : f32 to vector<32x512xf32>
    %69 = arith.maximumf %67, %68 : vector<32x512xf32>
    %c2_i32_48 = arith.constant 2 : i32
    %70 = tpu.memref_slice %arg19[%c2_i32_48] : memref<5x!tpu.dma_semaphore, #tpu.memory_space<semaphore_mem>> -> memref<1x!tpu.dma_semaphore, #tpu.memory_space<semaphore_mem>>
    %71 = tpu.memref_squeeze %70 : memref<1x!tpu.dma_semaphore, #tpu.memory_space<semaphore_mem>> -> memref<!tpu.dma_semaphore, #tpu.memory_space<semaphore_mem>>
    tpu.wait_dma2 semaphore(%71 : memref<!tpu.dma_semaphore, #tpu.memory_space<semaphore_mem>>) src(%arg8 : memref<512x512xbf16, #tpu.memory_space<any>>) dst(%arg16 : memref<512x512xbf16, #tpu.memory_space<vmem>>)
    %c0_49 = arith.constant 0 : index
    %c0_50 = arith.constant 0 : index
    %72 = vector.load %arg16[%c0_49, %c0_50] : memref<512x512xbf16, #tpu.memory_space<vmem>>, vector<512x512xbf16>
    %73 = vector.shape_cast %69 : vector<32x512xf32> to vector<8x2x2x512xf32>
    %74 = vector.extract_strided_slice %73 {offsets = [0, 0, 0, 0], sizes = [8, 1, 2, 512], strides = [1, 1, 1, 1]} : vector<8x2x2x512xf32> to vector<8x1x2x512xf32>
    %75 = vector.shape_cast %74 : vector<8x1x2x512xf32> to vector<8x2x512xf32>
    %76 = vector.extract_strided_slice %73 {offsets = [0, 1, 0, 0], sizes = [8, 1, 2, 512], strides = [1, 1, 1, 1]} : vector<8x2x2x512xf32> to vector<8x1x2x512xf32>
    %77 = vector.shape_cast %76 : vector<8x1x2x512xf32> to vector<8x2x512xf32>
    %78 = arith.maximumf %75, %77 : vector<8x2x512xf32>
    %79 = vector.shape_cast %78 : vector<8x2x512xf32> to vector<16x512xf32>
    %80 = arith.truncf %79 : vector<16x512xf32> to vector<16x512xbf16>
    %cst_51 = arith.constant dense<0.000000e+00> : vector<16x512xf32>
    %81 = tpu.matmul %80, %72, %cst_51 {dimension_numbers = #tpu.dot_dimension_numbers<[1], [0], [0], [1], [0, 0, 1, 1], [], []>} : vector<16x512xbf16>, vector<512x512xbf16>, vector<16x512xf32> -> vector<16x512xf32>
    %82 = vector.extract_strided_slice %81 {offsets = [0, 0], sizes = [16, 256], strides = [1, 1]} : vector<16x512xf32> to vector<16x256xf32>
    %83 = vector.extract_strided_slice %81 {offsets = [0, 256], sizes = [16, 256], strides = [1, 1]} : vector<16x512xf32> to vector<16x256xf32>
    %84 = arith.maximumf %82, %83 : vector<16x256xf32>
    %85 = vector.extract_strided_slice %84 {offsets = [0, 0], sizes = [2, 256], strides = [1, 1]} : vector<16x256xf32> to vector<2x256xf32>
    %86 = arith.truncf %85 : vector<2x256xf32> to vector<2x256xbf16>
    %c0_52 = arith.constant 0 : index
    %c0_53 = arith.constant 0 : index
    %87 = vector.load %arg13[%c0_52, %c0_53] : memref<2x2048xbf16, #tpu.memory_space<vmem>>, vector<2x256xbf16>
    tpu.vector_store %arg13[%c0_52, %c0_53], %86 {strides = array<i32>} : memref<2x2048xbf16, #tpu.memory_space<vmem>>, vector<2x256xbf16>,
    %88 = vector.extract_strided_slice %84 {offsets = [2, 0], sizes = [2, 256], strides = [1, 1]} : vector<16x256xf32> to vector<2x256xf32>
    %89 = arith.truncf %88 : vector<2x256xf32> to vector<2x256xbf16>
    %c0_54 = arith.constant 0 : index
    %c256 = arith.constant 256 : index
    %90 = vector.load %arg13[%c0_54, %c256] : memref<2x2048xbf16, #tpu.memory_space<vmem>>, vector<2x256xbf16>
    tpu.vector_store %arg13[%c0_54, %c256], %89 {strides = array<i32>} : memref<2x2048xbf16, #tpu.memory_space<vmem>>, vector<2x256xbf16>,
    %91 = vector.extract_strided_slice %84 {offsets = [4, 0], sizes = [2, 256], strides = [1, 1]} : vector<16x256xf32> to vector<2x256xf32>
    %92 = arith.truncf %91 : vector<2x256xf32> to vector<2x256xbf16>
    %c0_55 = arith.constant 0 : index
    %c512 = arith.constant 512 : index
    %93 = vector.load %arg13[%c0_55, %c512] : memref<2x2048xbf16, #tpu.memory_space<vmem>>, vector<2x256xbf16>
    tpu.vector_store %arg13[%c0_55, %c512], %92 {strides = array<i32>} : memref<2x2048xbf16, #tpu.memory_space<vmem>>, vector<2x256xbf16>,
    %94 = vector.extract_strided_slice %84 {offsets = [6, 0], sizes = [2, 256], strides = [1, 1]} : vector<16x256xf32> to vector<2x256xf32>
    %95 = arith.truncf %94 : vector<2x256xf32> to vector<2x256xbf16>
    %c0_56 = arith.constant 0 : index
    %c768 = arith.constant 768 : index
    %96 = vector.load %arg13[%c0_56, %c768] : memref<2x2048xbf16, #tpu.memory_space<vmem>>, vector<2x256xbf16>
    tpu.vector_store %arg13[%c0_56, %c768], %95 {strides = array<i32>} : memref<2x2048xbf16, #tpu.memory_space<vmem>>, vector<2x256xbf16>,
    %97 = vector.extract_strided_slice %84 {offsets = [8, 0], sizes = [2, 256], strides = [1, 1]} : vector<16x256xf32> to vector<2x256xf32>
    %98 = arith.truncf %97 : vector<2x256xf32> to vector<2x256xbf16>
    %c0_57 = arith.constant 0 : index
    %c1024 = arith.constant 1024 : index
    %99 = vector.load %arg13[%c0_57, %c1024] : memref<2x2048xbf16, #tpu.memory_space<vmem>>, vector<2x256xbf16>
    tpu.vector_store %arg13[%c0_57, %c1024], %98 {strides = array<i32>} : memref<2x2048xbf16, #tpu.memory_space<vmem>>, vector<2x256xbf16>,
    %100 = vector.extract_strided_slice %84 {offsets = [10, 0], sizes = [2, 256], strides = [1, 1]} : vector<16x256xf32> to vector<2x256xf32>
    %101 = arith.truncf %100 : vector<2x256xf32> to vector<2x256xbf16>
    %c0_58 = arith.constant 0 : index
    %c1280 = arith.constant 1280 : index
    %102 = vector.load %arg13[%c0_58, %c1280] : memref<2x2048xbf16, #tpu.memory_space<vmem>>, vector<2x256xbf16>
    tpu.vector_store %arg13[%c0_58, %c1280], %101 {strides = array<i32>} : memref<2x2048xbf16, #tpu.memory_space<vmem>>, vector<2x256xbf16>,
    %103 = vector.extract_strided_slice %84 {offsets = [12, 0], sizes = [2, 256], strides = [1, 1]} : vector<16x256xf32> to vector<2x256xf32>
    %104 = arith.truncf %103 : vector<2x256xf32> to vector<2x256xbf16>
    %c0_59 = arith.constant 0 : index
    %c1536 = arith.constant 1536 : index
    %105 = vector.load %arg13[%c0_59, %c1536] : memref<2x2048xbf16, #tpu.memory_space<vmem>>, vector<2x256xbf16>
    tpu.vector_store %arg13[%c0_59, %c1536], %104 {strides = array<i32>} : memref<2x2048xbf16, #tpu.memory_space<vmem>>, vector<2x256xbf16>,
    %106 = vector.extract_strided_slice %84 {offsets = [14, 0], sizes = [2, 256], strides = [1, 1]} : vector<16x256xf32> to vector<2x256xf32>
    %107 = arith.truncf %106 : vector<2x256xf32> to vector<2x256xbf16>
    %c0_60 = arith.constant 0 : index
    %c1792 = arith.constant 1792 : index
    %108 = vector.load %arg13[%c0_60, %c1792] : memref<2x2048xbf16, #tpu.memory_space<vmem>>, vector<2x256xbf16>
    tpu.vector_store %arg13[%c0_60, %c1792], %107 {strides = array<i32>} : memref<2x2048xbf16, #tpu.memory_space<vmem>>, vector<2x256xbf16>,
    %c3_i32_61 = arith.constant 3 : i32
    %109 = tpu.memref_slice %arg19[%c3_i32_61] : memref<5x!tpu.dma_semaphore, #tpu.memory_space<semaphore_mem>> -> memref<1x!tpu.dma_semaphore, #tpu.memory_space<semaphore_mem>>
    %110 = tpu.memref_squeeze %109 : memref<1x!tpu.dma_semaphore, #tpu.memory_space<semaphore_mem>> -> memref<!tpu.dma_semaphore, #tpu.memory_space<semaphore_mem>>
    tpu.wait_dma2 semaphore(%110 : memref<!tpu.dma_semaphore, #tpu.memory_space<semaphore_mem>>) src(%arg9 : memref<2048x256xbf16, #tpu.memory_space<any>>) dst(%arg17 : memref<2048x256xbf16, #tpu.memory_space<vmem>>)
    %c0_62 = arith.constant 0 : index
    %c0_63 = arith.constant 0 : index
    %111 = vector.load %arg13[%c0_62, %c0_63] : memref<2x2048xbf16, #tpu.memory_space<vmem>>, vector<2x2048xbf16>
    %c0_64 = arith.constant 0 : index
    %c0_65 = arith.constant 0 : index
    %112 = vector.load %arg17[%c0_64, %c0_65] : memref<2048x256xbf16, #tpu.memory_space<vmem>>, vector<2048x256xbf16>
    %cst_66 = arith.constant dense<0.000000e+00> : vector<2x256xf32>
    %113 = tpu.matmul %111, %112, %cst_66 {dimension_numbers = #tpu.dot_dimension_numbers<[1], [0], [0], [1], [0, 0, 1, 1], [], []>} : vector<2x2048xbf16>, vector<2048x256xbf16>, vector<2x256xf32> -> vector<2x256xf32>
    %c0_67 = arith.constant 0 : index
    %c0_68 = arith.constant 0 : index
    %114 = vector.load %arg4[%c0_67, %c0_68] : memref<1x256xf32, #tpu.memory_space<vmem>>, vector<1x256xf32>
    %115 = vector.broadcast %114 : vector<1x256xf32> to vector<2x256xf32>
    %116 = arith.addf %113, %115 : vector<2x256xf32>
    %cst_69 = arith.constant 0.000000e+00 : f32
    %117 = vector.broadcast %cst_69 : f32 to vector<2x256xf32>
    %118 = arith.maximumf %116, %117 : vector<2x256xf32>
    %c4_i32_70 = arith.constant 4 : i32
    %119 = tpu.memref_slice %arg19[%c4_i32_70] : memref<5x!tpu.dma_semaphore, #tpu.memory_space<semaphore_mem>> -> memref<1x!tpu.dma_semaphore, #tpu.memory_space<semaphore_mem>>
    %120 = tpu.memref_squeeze %119 : memref<1x!tpu.dma_semaphore, #tpu.memory_space<semaphore_mem>> -> memref<!tpu.dma_semaphore, #tpu.memory_space<semaphore_mem>>
    tpu.wait_dma2 semaphore(%120 : memref<!tpu.dma_semaphore, #tpu.memory_space<semaphore_mem>>) src(%arg10 : memref<256x128xbf16, #tpu.memory_space<any>>) dst(%arg18 : memref<256x128xbf16, #tpu.memory_space<vmem>>)
    %121 = arith.truncf %118 : vector<2x256xf32> to vector<2x256xbf16>
    %c0_71 = arith.constant 0 : index
    %c0_72 = arith.constant 0 : index
    %122 = vector.load %arg18[%c0_71, %c0_72] : memref<256x128xbf16, #tpu.memory_space<vmem>>, vector<256x128xbf16>
    %cst_73 = arith.constant dense<0.000000e+00> : vector<2x128xf32>
    %123 = tpu.matmul %121, %122, %cst_73 {dimension_numbers = #tpu.dot_dimension_numbers<[1], [0], [0], [1], [0, 0, 1, 1], [], []>} : vector<2x256xbf16>, vector<256x128xbf16>, vector<2x128xf32> -> vector<2x128xf32>
    %c0_74 = arith.constant 0 : index
    %c0_75 = arith.constant 0 : index
    %124 = vector.load %arg5[%c0_74, %c0_75] : memref<1x128xf32, #tpu.memory_space<vmem>>, vector<1x128xf32>
    %125 = vector.broadcast %124 : vector<1x128xf32> to vector<2x128xf32>
    %126 = arith.addf %123, %125 : vector<2x128xf32>
    %c0_76 = arith.constant 0 : index
    %c0_77 = arith.constant 0 : index
    %127 = vector.load %arg11[%c0_76, %c0_77] : memref<2x128xf32, #tpu.memory_space<vmem>>, vector<2x128xf32>
    tpu.vector_store %arg11[%c0_76, %c0_77], %126 {strides = array<i32>} : memref<2x128xf32, #tpu.memory_space<vmem>>, vector<2x128xf32>,
    return
  }
}

</mosaic_0001>

<bundles_post_ra>
// kernel: simple_cnn_forward.1
= control target key start
LH: loop header
LB: loop body
LE: loop exit
PB: predicated region body
PF: predicated region fallthrough
CT: control target
= control target key end

     0   :  { %16 = vsyncpa [#allocation11], 0  ;;  %s15613_s0 = inlined_call_operand.vmem [shape: bf16[68,128], index: 0, kind: input, shape index: {}]   ;;  %s15614_s1 = inlined_call_operand.hbm [shape: bf16[3,128,512], index: 1, kind: input, shape index: {}]   ;;  %s15615_s2 = inlined_call_operand.vmem [shape: f32[1,512], index: 2, kind: input, shape index: {}]   ;;  %s15616_s3 = inlined_call_operand.vmem [shape: f32[1,512], index: 3, kind: input, shape index: {}]   ;;  %s15617_s4 = inlined_call_operand.vmem [shape: f32[1,256], index: 4, kind: input, shape index: {}]   ;;  %s15618_s5 = inlined_call_operand.vmem [shape: f32[1,128], index: 5, kind: input, shape index: {}]   ;;  %s15619_s6 = inlined_call_operand.vmem [shape: bf16[512,512], index: 6, kind: input, shape index: {}]   ;;  %s15620_s7 = inlined_call_operand.vmem [shape: bf16[3,256,512], index: 7, kind: input, shape index: {}]   ;;  %s15621_s8 = inlined_call_operand.hbm [shape: bf16[512,512], index: 8, kind: input, shape index: {}]   ;;  %s15622_s9 = inlined_call_operand.vmem [shape: bf16[2048,256], index: 9, kind: input, shape index: {}]   ;;  %s15623_s10 = inlined_call_operand.hbm [shape: bf16[256,128], index: 10, kind: input, shape index: {}]   ;;  %s15624_s11 = inlined_call_operand.hbm [shape: f32[2,128], index: 11, kind: output, shape index: {}]  }
   0x1   :  { %17 = vsyncpa [#allocation12], 0  ;;  %s11896_s17 = smov [#allocation10]   ;;  %s11816_s21 = scalar_lea.hbm %s15614_s1, 12288 }
   0x2   :  { %s25_s18 = sshll.u32 %s11896_s17, 4  ;;  %p11817_p0 = scmp.ne.s32.totalorder %s15614_s1, %s11816_s21  ;;  %s26_s18 = int_to_ptr.vmem [resolvable:$true] %s25_s18 }
   0x3   :  { %p11820_p1 = scmp.lt.u32.totalorder %s11816_s21, %s15614_s1 }
   0x5   :  { %p11822_p2 = pnand %p11820_p1, %p11817_p0 }
   0x7   :  { %11825 = shalt.err (!%p11822_p2)
}
   0x8   :  { %s11826_s26 = scalar_lea.vmem %s26_s18, 12288  ;;  %p11831_p4 = scmp.lt.s32.totalorder %s26_s18, %s26_s18 }
   0x9   :  { %p11827_p3 = scmp.ne.s32.totalorder %s26_s18, %s11826_s26  ;;  %p11832_p5 = scmp.lt.s32.totalorder %s11826_s26, %s11826_s26 }
   0xb   :  { %p11833_p6 = por %p11832_p5, %p11831_p4 }
   0xd   :  { %p11834_p7 = pnand %p11833_p6, %p11827_p3 }
   0xf   :  { %11837 = shalt.err (!%p11834_p7)
}
  0x10   :  { %s11897_s27 = smov 256   ;;  %s11898_s28 = smov 16  }
  0x11   :  { %31 = dma.hbm_to_vmem [thread:$0]  %s15614_s1, 12288, %s26_s18, [#allocation11], %s11897_s27, %s11897_s27, %s11898_s28  }
  0x12   :  { %11882 = dma.done.wait [#allocation11], 12288  }
  0x13   :  { %11883 = vsyncadd [#allocation11], 4294955008  ;;  %v61_v0 = vld [vmem:[%s15619_s6] sm:$0xf]  ;;  %v63_v1 = vld [vmem:[%s15619_s6 + $0x10] sm:$0xf] }
  0x14   :  { %v65_v2 = vld [vmem:[%s15619_s6 + $0x4] sm:$0xf]  ;;  %62 = vst [vmem:[#allocation4] sm:$0xf] %v61_v0  ;;  %64 = vst [vmem:[#allocation4 + $0x4] sm:$0xf] %v63_v1 }
  0x15   :  { %66 = vst [vmem:[#allocation4 + $0x8] sm:$0xf] %v65_v2  ;;  %v67_v3 = vld [vmem:[%s15619_s6 + $0x14] sm:$0xf]  ;;  %v69_v4 = vld [vmem:[%s15619_s6 + $0x8] sm:$0xf] }
  0x16   :  { %v71_v5 = vld [vmem:[%s15619_s6 + $0x18] sm:$0xf]  ;;  %68 = vst [vmem:[#allocation4 + $0xc] sm:$0xf] %v67_v3  ;;  %70 = vst [vmem:[#allocation4 + $0x10] sm:$0xf] %v69_v4 }
  0x17   :  { %72 = vst [vmem:[#allocation4 + $0x14] sm:$0xf] %v71_v5  ;;  %v73_v6 = vld [vmem:[%s15619_s6 + $0xc] sm:$0xf]  ;;  %v75_v7 = vld [vmem:[%s15619_s6 + $0x1c] sm:$0xff]  }
  0x18   :  { %v79_v8 = vld [vmem:[%s15619_s6 + $0x30] sm:$0xf]  ;;  %74 = vst [vmem:[#allocation4 + $0x18] sm:$0xf] %v73_v6  ;;  %76 = vst [vmem:[#allocation4 + $0x1c] sm:$0xff] %v75_v7   ;;  %v91_v14 = vld [vmem:[%s15619_s6 + $0x3c] sm:$0xff]  }
  0x19   :  { %80 = vst [vmem:[#allocation4 + $0x24] sm:$0xf] %v79_v8  ;;  %v81_v9 = vld [vmem:[%s15619_s6 + $0x24] sm:$0xf]  ;;  %v83_v10 = vld [vmem:[%s15619_s6 + $0x34] sm:$0xf] }
  0x1a   :  { %v85_v11 = vld [vmem:[%s15619_s6 + $0x28] sm:$0xf]  ;;  %82 = vst [vmem:[#allocation4 + $0x28] sm:$0xf] %v81_v9  ;;  %84 = vst [vmem:[#allocation4 + $0x2c] sm:$0xf] %v83_v10 }
  0x1b   :  { %86 = vst [vmem:[#allocation4 + $0x30] sm:$0xf] %v85_v11  ;;  %v87_v12 = vld [vmem:[%s15619_s6 + $0x38] sm:$0xf]  ;;  %v89_v13 = vld [vmem:[%s15619_s6 + $0x2c] sm:$0xf] }
  0x1c   :  { %88 = vst [vmem:[#allocation4 + $0x34] sm:$0xf] %v87_v12  ;;  %90 = vst [vmem:[#allocation4 + $0x38] sm:$0xf] %v89_v13  ;;  %v95_v15 = vld [vmem:[%s15619_s6 + $0x50] sm:$0xf] }
  0x1d   :  { %92 = vst [vmem:[#allocation4 + $0x3c] sm:$0xff] %v91_v14   ;;  %v97_v16 = vld [vmem:[%s15619_s6 + $0x44] sm:$0xf]  ;;  %v99_v17 = vld [vmem:[%s15619_s6 + $0x54] sm:$0xf]  ;;  %v107_v21 = vld [vmem:[%s15619_s6 + $0x5c] sm:$0xff]  }
  0x1e   :  { %96 = vst [vmem:[#allocation4 + $0x44] sm:$0xf] %v95_v15  ;;  %98 = vst [vmem:[#allocation4 + $0x48] sm:$0xf] %v97_v16  ;;  %v101_v18 = vld [vmem:[%s15619_s6 + $0x48] sm:$0xf] }
  0x1f   :  { %100 = vst [vmem:[#allocation4 + $0x4c] sm:$0xf] %v99_v17  ;;  %v103_v19 = vld [vmem:[%s15619_s6 + $0x58] sm:$0xf]  ;;  %v105_v20 = vld [vmem:[%s15619_s6 + $0x4c] sm:$0xf] }
  0x20   :  { %102 = vst [vmem:[#allocation4 + $0x50] sm:$0xf] %v101_v18  ;;  %104 = vst [vmem:[#allocation4 + $0x54] sm:$0xf] %v103_v19  ;;  %v111_v22 = vld [vmem:[%s15619_s6 + $0x70] sm:$0xf] }
  0x21   :  { %106 = vst [vmem:[#allocation4 + $0x58] sm:$0xf] %v105_v20  ;;  %v113_v23 = vld [vmem:[%s15619_s6 + $0x64] sm:$0xf]  ;;  %108 = vst [vmem:[#allocation4 + $0x5c] sm:$0xff] %v107_v21   ;;  %v123_v28 = vld [vmem:[%s15619_s6 + $0x7c] sm:$0xff]  }
  0x22   :  { %112 = vst [vmem:[#allocation4 + $0x64] sm:$0xf] %v111_v22  ;;  %114 = vst [vmem:[#allocation4 + $0x68] sm:$0xf] %v113_v23  ;;  %v115_v24 = vld [vmem:[%s15619_s6 + $0x74] sm:$0xf] }
  0x23   :  { %v117_v25 = vld [vmem:[%s15619_s6 + $0x68] sm:$0xf]  ;;  %v119_v26 = vld [vmem:[%s15619_s6 + $0x78] sm:$0xf]  ;;  %116 = vst [vmem:[#allocation4 + $0x6c] sm:$0xf] %v115_v24 }
  0x24   :  { %118 = vst [vmem:[#allocation4 + $0x70] sm:$0xf] %v117_v25  ;;  %120 = vst [vmem:[#allocation4 + $0x74] sm:$0xf] %v119_v26  ;;  %v121_v27 = vld [vmem:[%s15619_s6 + $0x6c] sm:$0xf] }
  0x25   :  { %v127_v29 = vld [vmem:[%s15619_s6 + $0x90] sm:$0xf]  ;;  %122 = vst [vmem:[#allocation4 + $0x78] sm:$0xf] %v121_v27  ;;  %124 = vst [vmem:[#allocation4 + $0x7c] sm:$0xff] %v123_v28   ;;  %v139_v35 = vld [vmem:[%s15619_s6 + $0x9c] sm:$0xff]  }
  0x26   :  { %128 = vst [vmem:[#allocation4 + $0x84] sm:$0xf] %v127_v29  ;;  %v129_v30 = vld [vmem:[%s15619_s6 + $0x84] sm:$0xf]  ;;  %v131_v31 = vld [vmem:[%s15619_s6 + $0x94] sm:$0xf] }
  0x27   :  { %v133_v32 = vld [vmem:[%s15619_s6 + $0x88] sm:$0xf]  ;;  %130 = vst [vmem:[#allocation4 + $0x88] sm:$0xf] %v129_v30  ;;  %132 = vst [vmem:[#allocation4 + $0x8c] sm:$0xf] %v131_v31 }
  0x28   :  { %134 = vst [vmem:[#allocation4 + $0x90] sm:$0xf] %v133_v32  ;;  %v135_v33 = vld [vmem:[%s15619_s6 + $0x98] sm:$0xf]  ;;  %v137_v34 = vld [vmem:[%s15619_s6 + $0x8c] sm:$0xf] }
  0x29   :  { %136 = vst [vmem:[#allocation4 + $0x94] sm:$0xf] %v135_v33  ;;  %138 = vst [vmem:[#allocation4 + $0x98] sm:$0xf] %v137_v34  ;;  %v143_v36 = vld [vmem:[%s15619_s6 + $0xb0] sm:$0xf] }
  0x2a   :  { %140 = vst [vmem:[#allocation4 + $0x9c] sm:$0xff] %v139_v35   ;;  %v145_v37 = vld [vmem:[%s15619_s6 + $0xa4] sm:$0xf]  ;;  %v147_v38 = vld [vmem:[%s15619_s6 + $0xb4] sm:$0xf]  ;;  %v155_v42 = vld [vmem:[%s15619_s6 + $0xbc] sm:$0xff]  }
  0x2b   :  { %144 = vst [vmem:[#allocation4 + $0xa4] sm:$0xf] %v143_v36  ;;  %146 = vst [vmem:[#allocation4 + $0xa8] sm:$0xf] %v145_v37  ;;  %v149_v39 = vld [vmem:[%s15619_s6 + $0xa8] sm:$0xf] }
  0x2c   :  { %148 = vst [vmem:[#allocation4 + $0xac] sm:$0xf] %v147_v38  ;;  %v151_v40 = vld [vmem:[%s15619_s6 + $0xb8] sm:$0xf]  ;;  %v153_v41 = vld [vmem:[%s15619_s6 + $0xac] sm:$0xf] }
  0x2d   :  { %150 = vst [vmem:[#allocation4 + $0xb0] sm:$0xf] %v149_v39  ;;  %152 = vst [vmem:[#allocation4 + $0xb4] sm:$0xf] %v151_v40  ;;  %v159_v43 = vld [vmem:[%s15619_s6 + $0xd0] sm:$0xf] }
  0x2e   :  { %154 = vst [vmem:[#allocation4 + $0xb8] sm:$0xf] %v153_v41  ;;  %v161_v44 = vld [vmem:[%s15619_s6 + $0xc4] sm:$0xf]  ;;  %156 = vst [vmem:[#allocation4 + $0xbc] sm:$0xff] %v155_v42   ;;  %v171_v49 = vld [vmem:[%s15619_s6 + $0xdc] sm:$0xff]  }
  0x2f   :  { %160 = vst [vmem:[#allocation4 + $0xc4] sm:$0xf] %v159_v43  ;;  %162 = vst [vmem:[#allocation4 + $0xc8] sm:$0xf] %v161_v44  ;;  %v163_v45 = vld [vmem:[%s15619_s6 + $0xd4] sm:$0xf] }
  0x30   :  { %v165_v46 = vld [vmem:[%s15619_s6 + $0xc8] sm:$0xf]  ;;  %v167_v47 = vld [vmem:[%s15619_s6 + $0xd8] sm:$0xf]  ;;  %164 = vst [vmem:[#allocation4 + $0xcc] sm:$0xf] %v163_v45 }
  0x31   :  { %166 = vst [vmem:[#allocation4 + $0xd0] sm:$0xf] %v165_v46  ;;  %168 = vst [vmem:[#allocation4 + $0xd4] sm:$0xf] %v167_v47  ;;  %v169_v48 = vld [vmem:[%s15619_s6 + $0xcc] sm:$0xf] }
  0x32   :  { %v175_v50 = vld [vmem:[%s15619_s6 + $0xf0] sm:$0xf]  ;;  %170 = vst [vmem:[#allocation4 + $0xd8] sm:$0xf] %v169_v48  ;;  %172 = vst [vmem:[#allocation4 + $0xdc] sm:$0xff] %v171_v49   ;;  %v187_v56 = vld [vmem:[%s15619_s6 + $0xfc] sm:$0xff]  }
  0x33   :  { %176 = vst [vmem:[#allocation4 + $0xe4] sm:$0xf] %v175_v50  ;;  %v177_v51 = vld [vmem:[%s15619_s6 + $0xe4] sm:$0xf]  ;;  %v179_v52 = vld [vmem:[%s15619_s6 + $0xf4] sm:$0xf] }
  0x34   :  { %v181_v53 = vld [vmem:[%s15619_s6 + $0xe8] sm:$0xf]  ;;  %178 = vst [vmem:[#allocation4 + $0xe8] sm:$0xf] %v177_v51  ;;  %180 = vst [vmem:[#allocation4 + $0xec] sm:$0xf] %v179_v52 }
  0x35   :  { %182 = vst [vmem:[#allocation4 + $0xf0] sm:$0xf] %v181_v53  ;;  %v183_v54 = vld [vmem:[%s15619_s6 + $0xf8] sm:$0xf]  ;;  %v185_v55 = vld [vmem:[%s15619_s6 + $0xec] sm:$0xf] }
  0x36   :  { %184 = vst [vmem:[#allocation4 + $0xf4] sm:$0xf] %v183_v54  ;;  %186 = vst [vmem:[#allocation4 + $0xf8] sm:$0xf] %v185_v55  ;;  %v191_v57 = vld [vmem:[%s15619_s6 + $0x110] sm:$0xf] }
  0x37   :  { %188 = vst [vmem:[#allocation4 + $0xfc] sm:$0xff] %v187_v56   ;;  %v193_v58 = vld [vmem:[%s15619_s6 + $0x104] sm:$0xf]  ;;  %v195_v59 = vld [vmem:[%s15619_s6 + $0x114] sm:$0xf]  ;;  %v203_v63 = vld [vmem:[%s15619_s6 + $0x11c] sm:$0xff]  }
  0x38   :  { %192 = vst [vmem:[#allocation4 + $0x104] sm:$0xf] %v191_v57  ;;  %194 = vst [vmem:[#allocation4 + $0x108] sm:$0xf] %v193_v58  ;;  %v197_v60 = vld [vmem:[%s15619_s6 + $0x108] sm:$0xf] }
  0x39   :  { %196 = vst [vmem:[#allocation4 + $0x10c] sm:$0xf] %v195_v59  ;;  %v199_v61 = vld [vmem:[%s15619_s6 + $0x118] sm:$0xf]  ;;  %v201_v62 = vld [vmem:[%s15619_s6 + $0x10c] sm:$0xf] }
  0x3a   :  { %198 = vst [vmem:[#allocation4 + $0x110] sm:$0xf] %v197_v60  ;;  %200 = vst [vmem:[#allocation4 + $0x114] sm:$0xf] %v199_v61  ;;  %v207_v0 = vld [vmem:[%s15619_s6 + $0x130] sm:$0xf] }
  0x3b   :  { %202 = vst [vmem:[#allocation4 + $0x118] sm:$0xf] %v201_v62  ;;  %v209_v1 = vld [vmem:[%s15619_s6 + $0x124] sm:$0xf]  ;;  %204 = vst [vmem:[#allocation4 + $0x11c] sm:$0xff] %v203_v63   ;;  %v219_v6 = vld [vmem:[%s15619_s6 + $0x13c] sm:$0xff]  }
  0x3c   :  { %208 = vst [vmem:[#allocation4 + $0x124] sm:$0xf] %v207_v0  ;;  %210 = vst [vmem:[#allocation4 + $0x128] sm:$0xf] %v209_v1  ;;  %v211_v2 = vld [vmem:[%s15619_s6 + $0x134] sm:$0xf] }
  0x3d   :  { %v213_v3 = vld [vmem:[%s15619_s6 + $0x128] sm:$0xf]  ;;  %v215_v4 = vld [vmem:[%s15619_s6 + $0x138] sm:$0xf]  ;;  %212 = vst [vmem:[#allocation4 + $0x12c] sm:$0xf] %v211_v2 }
  0x3e   :  { %214 = vst [vmem:[#allocation4 + $0x130] sm:$0xf] %v213_v3  ;;  %216 = vst [vmem:[#allocation4 + $0x134] sm:$0xf] %v215_v4  ;;  %v217_v5 = vld [vmem:[%s15619_s6 + $0x12c] sm:$0xf] }
  0x3f   :  { %v223_v7 = vld [vmem:[%s15619_s6 + $0x150] sm:$0xf]  ;;  %218 = vst [vmem:[#allocation4 + $0x138] sm:$0xf] %v217_v5  ;;  %220 = vst [vmem:[#allocation4 + $0x13c] sm:$0xff] %v219_v6   ;;  %v235_v13 = vld [vmem:[%s15619_s6 + $0x15c] sm:$0xff]  }
  0x40   :  { %224 = vst [vmem:[#allocation4 + $0x144] sm:$0xf] %v223_v7  ;;  %v225_v8 = vld [vmem:[%s15619_s6 + $0x144] sm:$0xf]  ;;  %v227_v9 = vld [vmem:[%s15619_s6 + $0x154] sm:$0xf] }
  0x41   :  { %v229_v10 = vld [vmem:[%s15619_s6 + $0x148] sm:$0xf]  ;;  %226 = vst [vmem:[#allocation4 + $0x148] sm:$0xf] %v225_v8  ;;  %228 = vst [vmem:[#allocation4 + $0x14c] sm:$0xf] %v227_v9 }
  0x42   :  { %230 = vst [vmem:[#allocation4 + $0x150] sm:$0xf] %v229_v10  ;;  %v231_v11 = vld [vmem:[%s15619_s6 + $0x158] sm:$0xf]  ;;  %v233_v12 = vld [vmem:[%s15619_s6 + $0x14c] sm:$0xf] }
  0x43   :  { %232 = vst [vmem:[#allocation4 + $0x154] sm:$0xf] %v231_v11  ;;  %234 = vst [vmem:[#allocation4 + $0x158] sm:$0xf] %v233_v12  ;;  %v239_v14 = vld [vmem:[%s15619_s6 + $0x170] sm:$0xf] }
  0x44   :  { %236 = vst [vmem:[#allocation4 + $0x15c] sm:$0xff] %v235_v13   ;;  %v241_v15 = vld [vmem:[%s15619_s6 + $0x164] sm:$0xf]  ;;  %v243_v16 = vld [vmem:[%s15619_s6 + $0x174] sm:$0xf]  ;;  %v251_v20 = vld [vmem:[%s15619_s6 + $0x17c] sm:$0xff]  }
  0x45   :  { %240 = vst [vmem:[#allocation4 + $0x164] sm:$0xf] %v239_v14  ;;  %242 = vst [vmem:[#allocation4 + $0x168] sm:$0xf] %v241_v15  ;;  %v245_v17 = vld [vmem:[%s15619_s6 + $0x168] sm:$0xf] }
  0x46   :  { %244 = vst [vmem:[#allocation4 + $0x16c] sm:$0xf] %v243_v16  ;;  %v247_v18 = vld [vmem:[%s15619_s6 + $0x178] sm:$0xf]  ;;  %v249_v19 = vld [vmem:[%s15619_s6 + $0x16c] sm:$0xf] }
  0x47   :  { %246 = vst [vmem:[#allocation4 + $0x170] sm:$0xf] %v245_v17  ;;  %248 = vst [vmem:[#allocation4 + $0x174] sm:$0xf] %v247_v18  ;;  %v255_v21 = vld [vmem:[%s15619_s6 + $0x190] sm:$0xf] }
  0x48   :  { %250 = vst [vmem:[#allocation4 + $0x178] sm:$0xf] %v249_v19  ;;  %v257_v22 = vld [vmem:[%s15619_s6 + $0x184] sm:$0xf]  ;;  %252 = vst [vmem:[#allocation4 + $0x17c] sm:$0xff] %v251_v20   ;;  %v267_v27 = vld [vmem:[%s15619_s6 + $0x19c] sm:$0xff]  }
  0x49   :  { %256 = vst [vmem:[#allocation4 + $0x184] sm:$0xf] %v255_v21  ;;  %258 = vst [vmem:[#allocation4 + $0x188] sm:$0xf] %v257_v22  ;;  %v259_v23 = vld [vmem:[%s15619_s6 + $0x194] sm:$0xf] }
  0x4a   :  { %v261_v24 = vld [vmem:[%s15619_s6 + $0x188] sm:$0xf]  ;;  %v263_v25 = vld [vmem:[%s15619_s6 + $0x198] sm:$0xf]  ;;  %260 = vst [vmem:[#allocation4 + $0x18c] sm:$0xf] %v259_v23 }
  0x4b   :  { %262 = vst [vmem:[#allocation4 + $0x190] sm:$0xf] %v261_v24  ;;  %264 = vst [vmem:[#allocation4 + $0x194] sm:$0xf] %v263_v25  ;;  %v265_v26 = vld [vmem:[%s15619_s6 + $0x18c] sm:$0xf] }
  0x4c   :  { %v271_v28 = vld [vmem:[%s15619_s6 + $0x1b0] sm:$0xf]  ;;  %266 = vst [vmem:[#allocation4 + $0x198] sm:$0xf] %v265_v26  ;;  %268 = vst [vmem:[#allocation4 + $0x19c] sm:$0xff] %v267_v27   ;;  %v283_v34 = vld [vmem:[%s15619_s6 + $0x1bc] sm:$0xff]  }
  0x4d   :  { %272 = vst [vmem:[#allocation4 + $0x1a4] sm:$0xf] %v271_v28  ;;  %v273_v29 = vld [vmem:[%s15619_s6 + $0x1a4] sm:$0xf]  ;;  %v275_v30 = vld [vmem:[%s15619_s6 + $0x1b4] sm:$0xf] }
  0x4e   :  { %v277_v31 = vld [vmem:[%s15619_s6 + $0x1a8] sm:$0xf]  ;;  %274 = vst [vmem:[#allocation4 + $0x1a8] sm:$0xf] %v273_v29  ;;  %276 = vst [vmem:[#allocation4 + $0x1ac] sm:$0xf] %v275_v30 }
  0x4f   :  { %278 = vst [vmem:[#allocation4 + $0x1b0] sm:$0xf] %v277_v31  ;;  %v279_v32 = vld [vmem:[%s15619_s6 + $0x1b8] sm:$0xf]  ;;  %v281_v33 = vld [vmem:[%s15619_s6 + $0x1ac] sm:$0xf] }
  0x50   :  { %280 = vst [vmem:[#allocation4 + $0x1b4] sm:$0xf] %v279_v32  ;;  %282 = vst [vmem:[#allocation4 + $0x1b8] sm:$0xf] %v281_v33  ;;  %v287_v35 = vld [vmem:[%s15619_s6 + $0x1d0] sm:$0xf] }
  0x51   :  { %284 = vst [vmem:[#allocation4 + $0x1bc] sm:$0xff] %v283_v34   ;;  %v289_v36 = vld [vmem:[%s15619_s6 + $0x1c4] sm:$0xf]  ;;  %v291_v37 = vld [vmem:[%s15619_s6 + $0x1d4] sm:$0xf]  ;;  %v299_v41 = vld [vmem:[%s15619_s6 + $0x1dc] sm:$0xff]  }
  0x52   :  { %288 = vst [vmem:[#allocation4 + $0x1c4] sm:$0xf] %v287_v35  ;;  %290 = vst [vmem:[#allocation4 + $0x1c8] sm:$0xf] %v289_v36  ;;  %v293_v38 = vld [vmem:[%s15619_s6 + $0x1c8] sm:$0xf] }
  0x53   :  { %292 = vst [vmem:[#allocation4 + $0x1cc] sm:$0xf] %v291_v37  ;;  %v295_v39 = vld [vmem:[%s15619_s6 + $0x1d8] sm:$0xf]  ;;  %v297_v40 = vld [vmem:[%s15619_s6 + $0x1cc] sm:$0xf] }
  0x54   :  { %294 = vst [vmem:[#allocation4 + $0x1d0] sm:$0xf] %v293_v38  ;;  %296 = vst [vmem:[#allocation4 + $0x1d4] sm:$0xf] %v295_v39  ;;  %v303_v42 = vld [vmem:[%s15619_s6 + $0x1f0] sm:$0xf] }
  0x55   :  { %298 = vst [vmem:[#allocation4 + $0x1d8] sm:$0xf] %v297_v40  ;;  %v305_v43 = vld [vmem:[%s15619_s6 + $0x1e4] sm:$0xf]  ;;  %300 = vst [vmem:[#allocation4 + $0x1dc] sm:$0xff] %v299_v41   ;;  %v315_v48 = vld [vmem:[%s15619_s6 + $0x1fc] sm:$0xff]  }
  0x56   :  { %304 = vst [vmem:[#allocation4 + $0x1e4] sm:$0xf] %v303_v42  ;;  %306 = vst [vmem:[#allocation4 + $0x1e8] sm:$0xf] %v305_v43  ;;  %v307_v44 = vld [vmem:[%s15619_s6 + $0x1f4] sm:$0xf] }
  0x57   :  { %v309_v45 = vld [vmem:[%s15619_s6 + $0x1e8] sm:$0xf]  ;;  %v311_v46 = vld [vmem:[%s15619_s6 + $0x1f8] sm:$0xf]  ;;  %308 = vst [vmem:[#allocation4 + $0x1ec] sm:$0xf] %v307_v44 }
  0x58   :  { %310 = vst [vmem:[#allocation4 + $0x1f0] sm:$0xf] %v309_v45  ;;  %312 = vst [vmem:[#allocation4 + $0x1f4] sm:$0xf] %v311_v46  ;;  %v313_v47 = vld [vmem:[%s15619_s6 + $0x1ec] sm:$0xf] }
  0x59   :  { %v319_v49 = vld [vmem:[%s15619_s6 + $0x210] sm:$0xf]  ;;  %314 = vst [vmem:[#allocation4 + $0x1f8] sm:$0xf] %v313_v47  ;;  %316 = vst [vmem:[#allocation4 + $0x1fc] sm:$0xff] %v315_v48   ;;  %v331_v55 = vld [vmem:[%s15619_s6 + $0x21c] sm:$0xff]  }
  0x5a   :  { %320 = vst [vmem:[#allocation4 + $0x204] sm:$0xf] %v319_v49  ;;  %v321_v50 = vld [vmem:[%s15619_s6 + $0x204] sm:$0xf]  ;;  %v323_v51 = vld [vmem:[%s15619_s6 + $0x214] sm:$0xf] }
  0x5b   :  { %v325_v52 = vld [vmem:[%s15619_s6 + $0x208] sm:$0xf]  ;;  %322 = vst [vmem:[#allocation4 + $0x208] sm:$0xf] %v321_v50  ;;  %324 = vst [vmem:[#allocation4 + $0x20c] sm:$0xf] %v323_v51 }
  0x5c   :  { %326 = vst [vmem:[#allocation4 + $0x210] sm:$0xf] %v325_v52  ;;  %v327_v53 = vld [vmem:[%s15619_s6 + $0x218] sm:$0xf]  ;;  %v329_v54 = vld [vmem:[%s15619_s6 + $0x20c] sm:$0xf] }
  0x5d   :  { %328 = vst [vmem:[#allocation4 + $0x214] sm:$0xf] %v327_v53  ;;  %330 = vst [vmem:[#allocation4 + $0x218] sm:$0xf] %v329_v54  ;;  %v335_v56 = vld [vmem:[%s15619_s6 + $0x230] sm:$0xf] }
  0x5e   :  { %332 = vst [vmem:[#allocation4 + $0x21c] sm:$0xff] %v331_v55   ;;  %v337_v57 = vld [vmem:[%s15619_s6 + $0x224] sm:$0xf]  ;;  %v339_v58 = vld [vmem:[%s15619_s6 + $0x234] sm:$0xf]  ;;  %v347_v62 = vld [vmem:[%s15619_s6 + $0x23c] sm:$0xff]  }
  0x5f   :  { %336 = vst [vmem:[#allocation4 + $0x224] sm:$0xf] %v335_v56  ;;  %338 = vst [vmem:[#allocation4 + $0x228] sm:$0xf] %v337_v57  ;;  %v341_v59 = vld [vmem:[%s15619_s6 + $0x228] sm:$0xf] }
  0x60   :  { %340 = vst [vmem:[#allocation4 + $0x22c] sm:$0xf] %v339_v58  ;;  %v343_v60 = vld [vmem:[%s15619_s6 + $0x238] sm:$0xf]  ;;  %v345_v61 = vld [vmem:[%s15619_s6 + $0x22c] sm:$0xf] }
  0x61   :  { %342 = vst [vmem:[#allocation4 + $0x230] sm:$0xf] %v341_v59  ;;  %344 = vst [vmem:[#allocation4 + $0x234] sm:$0xf] %v343_v60  ;;  %v351_v63 = vld [vmem:[%s15619_s6 + $0x250] sm:$0xf] }
  0x62   :  { %346 = vst [vmem:[#allocation4 + $0x238] sm:$0xf] %v345_v61  ;;  %v353_v0 = vld [vmem:[%s15619_s6 + $0x244] sm:$0xf]  ;;  %348 = vst [vmem:[#allocation4 + $0x23c] sm:$0xff] %v347_v62   ;;  %v363_v5 = vld [vmem:[%s15619_s6 + $0x25c] sm:$0xff]  }
  0x63   :  { %352 = vst [vmem:[#allocation4 + $0x244] sm:$0xf] %v351_v63  ;;  %354 = vst [vmem:[#allocation4 + $0x248] sm:$0xf] %v353_v0  ;;  %v355_v1 = vld [vmem:[%s15619_s6 + $0x254] sm:$0xf] }
  0x64   :  { %v357_v2 = vld [vmem:[%s15619_s6 + $0x248] sm:$0xf]  ;;  %v359_v3 = vld [vmem:[%s15619_s6 + $0x258] sm:$0xf]  ;;  %356 = vst [vmem:[#allocation4 + $0x24c] sm:$0xf] %v355_v1 }
  0x65   :  { %358 = vst [vmem:[#allocation4 + $0x250] sm:$0xf] %v357_v2  ;;  %360 = vst [vmem:[#allocation4 + $0x254] sm:$0xf] %v359_v3  ;;  %v361_v4 = vld [vmem:[%s15619_s6 + $0x24c] sm:$0xf] }
  0x66   :  { %v367_v6 = vld [vmem:[%s15619_s6 + $0x270] sm:$0xf]  ;;  %362 = vst [vmem:[#allocation4 + $0x258] sm:$0xf] %v361_v4  ;;  %364 = vst [vmem:[#allocation4 + $0x25c] sm:$0xff] %v363_v5   ;;  %v379_v12 = vld [vmem:[%s15619_s6 + $0x27c] sm:$0xff]  }
  0x67   :  { %368 = vst [vmem:[#allocation4 + $0x264] sm:$0xf] %v367_v6  ;;  %v369_v7 = vld [vmem:[%s15619_s6 + $0x264] sm:$0xf]  ;;  %v371_v8 = vld [vmem:[%s15619_s6 + $0x274] sm:$0xf] }
  0x68   :  { %v373_v9 = vld [vmem:[%s15619_s6 + $0x268] sm:$0xf]  ;;  %370 = vst [vmem:[#allocation4 + $0x268] sm:$0xf] %v369_v7  ;;  %372 = vst [vmem:[#allocation4 + $0x26c] sm:$0xf] %v371_v8 }
  0x69   :  { %374 = vst [vmem:[#allocation4 + $0x270] sm:$0xf] %v373_v9  ;;  %v375_v10 = vld [vmem:[%s15619_s6 + $0x278] sm:$0xf]  ;;  %v377_v11 = vld [vmem:[%s15619_s6 + $0x26c] sm:$0xf] }
  0x6a   :  { %376 = vst [vmem:[#allocation4 + $0x274] sm:$0xf] %v375_v10  ;;  %378 = vst [vmem:[#allocation4 + $0x278] sm:$0xf] %v377_v11  ;;  %v383_v13 = vld [vmem:[%s15619_s6 + $0x290] sm:$0xf] }
  0x6b   :  { %380 = vst [vmem:[#allocation4 + $0x27c] sm:$0xff] %v379_v12   ;;  %v385_v14 = vld [vmem:[%s15619_s6 + $0x284] sm:$0xf]  ;;  %v387_v15 = vld [vmem:[%s15619_s6 + $0x294] sm:$0xf]  ;;  %v395_v19 = vld [vmem:[%s15619_s6 + $0x29c] sm:$0xff]  }
  0x6c   :  { %384 = vst [vmem:[#allocation4 + $0x284] sm:$0xf] %v383_v13  ;;  %386 = vst [vmem:[#allocation4 + $0x288] sm:$0xf] %v385_v14  ;;  %v389_v16 = vld [vmem:[%s15619_s6 + $0x288] sm:$0xf] }
  0x6d   :  { %388 = vst [vmem:[#allocation4 + $0x28c] sm:$0xf] %v387_v15  ;;  %v391_v17 = vld [vmem:[%s15619_s6 + $0x298] sm:$0xf]  ;;  %v393_v18 = vld [vmem:[%s15619_s6 + $0x28c] sm:$0xf] }
  0x6e   :  { %390 = vst [vmem:[#allocation4 + $0x290] sm:$0xf] %v389_v16  ;;  %392 = vst [vmem:[#allocation4 + $0x294] sm:$0xf] %v391_v17  ;;  %v399_v20 = vld [vmem:[%s15619_s6 + $0x2b0] sm:$0xf] }
  0x6f   :  { %394 = vst [vmem:[#allocation4 + $0x298] sm:$0xf] %v393_v18  ;;  %v401_v21 = vld [vmem:[%s15619_s6 + $0x2a4] sm:$0xf]  ;;  %396 = vst [vmem:[#allocation4 + $0x29c] sm:$0xff] %v395_v19   ;;  %v411_v26 = vld [vmem:[%s15619_s6 + $0x2bc] sm:$0xff]  }
  0x70   :  { %400 = vst [vmem:[#allocation4 + $0x2a4] sm:$0xf] %v399_v20  ;;  %402 = vst [vmem:[#allocation4 + $0x2a8] sm:$0xf] %v401_v21  ;;  %v403_v22 = vld [vmem:[%s15619_s6 + $0x2b4] sm:$0xf] }
  0x71   :  { %v405_v23 = vld [vmem:[%s15619_s6 + $0x2a8] sm:$0xf]  ;;  %v407_v24 = vld [vmem:[%s15619_s6 + $0x2b8] sm:$0xf]  ;;  %404 = vst [vmem:[#allocation4 + $0x2ac] sm:$0xf] %v403_v22 }
  0x72   :  { %406 = vst [vmem:[#allocation4 + $0x2b0] sm:$0xf] %v405_v23  ;;  %408 = vst [vmem:[#allocation4 + $0x2b4] sm:$0xf] %v407_v24  ;;  %v409_v25 = vld [vmem:[%s15619_s6 + $0x2ac] sm:$0xf] }
  0x73   :  { %v415_v27 = vld [vmem:[%s15619_s6 + $0x2d0] sm:$0xf]  ;;  %410 = vst [vmem:[#allocation4 + $0x2b8] sm:$0xf] %v409_v25  ;;  %412 = vst [vmem:[#allocation4 + $0x2bc] sm:$0xff] %v411_v26   ;;  %v427_v33 = vld [vmem:[%s15619_s6 + $0x2dc] sm:$0xff]  }
  0x74   :  { %416 = vst [vmem:[#allocation4 + $0x2c4] sm:$0xf] %v415_v27  ;;  %v417_v28 = vld [vmem:[%s15619_s6 + $0x2c4] sm:$0xf]  ;;  %v419_v29 = vld [vmem:[%s15619_s6 + $0x2d4] sm:$0xf] }
  0x75   :  { %v421_v30 = vld [vmem:[%s15619_s6 + $0x2c8] sm:$0xf]  ;;  %418 = vst [vmem:[#allocation4 + $0x2c8] sm:$0xf] %v417_v28  ;;  %420 = vst [vmem:[#allocation4 + $0x2cc] sm:$0xf] %v419_v29 }
  0x76   :  { %422 = vst [vmem:[#allocation4 + $0x2d0] sm:$0xf] %v421_v30  ;;  %v423_v31 = vld [vmem:[%s15619_s6 + $0x2d8] sm:$0xf]  ;;  %v425_v32 = vld [vmem:[%s15619_s6 + $0x2cc] sm:$0xf] }
  0x77   :  { %424 = vst [vmem:[#allocation4 + $0x2d4] sm:$0xf] %v423_v31  ;;  %426 = vst [vmem:[#allocation4 + $0x2d8] sm:$0xf] %v425_v32  ;;  %v431_v34 = vld [vmem:[%s15619_s6 + $0x2f0] sm:$0xf] }
  0x78   :  { %428 = vst [vmem:[#allocation4 + $0x2dc] sm:$0xff] %v427_v33   ;;  %v433_v35 = vld [vmem:[%s15619_s6 + $0x2e4] sm:$0xf]  ;;  %v435_v36 = vld [vmem:[%s15619_s6 + $0x2f4] sm:$0xf]  ;;  %v443_v40 = vld [vmem:[%s15619_s6 + $0x2fc] sm:$0xff]  }
  0x79   :  { %432 = vst [vmem:[#allocation4 + $0x2e4] sm:$0xf] %v431_v34  ;;  %434 = vst [vmem:[#allocation4 + $0x2e8] sm:$0xf] %v433_v35  ;;  %v437_v37 = vld [vmem:[%s15619_s6 + $0x2e8] sm:$0xf] }
  0x7a   :  { %436 = vst [vmem:[#allocation4 + $0x2ec] sm:$0xf] %v435_v36  ;;  %v439_v38 = vld [vmem:[%s15619_s6 + $0x2f8] sm:$0xf]  ;;  %v441_v39 = vld [vmem:[%s15619_s6 + $0x2ec] sm:$0xf] }
  0x7b   :  { %438 = vst [vmem:[#allocation4 + $0x2f0] sm:$0xf] %v437_v37  ;;  %440 = vst [vmem:[#allocation4 + $0x2f4] sm:$0xf] %v439_v38  ;;  %v447_v41 = vld [vmem:[%s15619_s6 + $0x310] sm:$0xf] }
  0x7c   :  { %442 = vst [vmem:[#allocation4 + $0x2f8] sm:$0xf] %v441_v39  ;;  %v449_v42 = vld [vmem:[%s15619_s6 + $0x304] sm:$0xf]  ;;  %444 = vst [vmem:[#allocation4 + $0x2fc] sm:$0xff] %v443_v40   ;;  %v459_v47 = vld [vmem:[%s15619_s6 + $0x31c] sm:$0xff]  }
  0x7d   :  { %448 = vst [vmem:[#allocation4 + $0x304] sm:$0xf] %v447_v41  ;;  %450 = vst [vmem:[#allocation4 + $0x308] sm:$0xf] %v449_v42  ;;  %v451_v43 = vld [vmem:[%s15619_s6 + $0x314] sm:$0xf] }
  0x7e   :  { %v453_v44 = vld [vmem:[%s15619_s6 + $0x308] sm:$0xf]  ;;  %v455_v45 = vld [vmem:[%s15619_s6 + $0x318] sm:$0xf]  ;;  %452 = vst [vmem:[#allocation4 + $0x30c] sm:$0xf] %v451_v43 }
  0x7f   :  { %454 = vst [vmem:[#allocation4 + $0x310] sm:$0xf] %v453_v44  ;;  %456 = vst [vmem:[#allocation4 + $0x314] sm:$0xf] %v455_v45  ;;  %v457_v46 = vld [vmem:[%s15619_s6 + $0x30c] sm:$0xf] }
  0x80   :  { %v463_v48 = vld [vmem:[%s15619_s6 + $0x330] sm:$0xf]  ;;  %458 = vst [vmem:[#allocation4 + $0x318] sm:$0xf] %v457_v46  ;;  %460 = vst [vmem:[#allocation4 + $0x31c] sm:$0xff] %v459_v47   ;;  %v475_v54 = vld [vmem:[%s15619_s6 + $0x33c] sm:$0xff]  }
  0x81   :  { %464 = vst [vmem:[#allocation4 + $0x324] sm:$0xf] %v463_v48  ;;  %v465_v49 = vld [vmem:[%s15619_s6 + $0x324] sm:$0xf]  ;;  %v467_v50 = vld [vmem:[%s15619_s6 + $0x334] sm:$0xf] }
  0x82   :  { %v469_v51 = vld [vmem:[%s15619_s6 + $0x328] sm:$0xf]  ;;  %466 = vst [vmem:[#allocation4 + $0x328] sm:$0xf] %v465_v49  ;;  %468 = vst [vmem:[#allocation4 + $0x32c] sm:$0xf] %v467_v50 }
  0x83   :  { %470 = vst [vmem:[#allocation4 + $0x330] sm:$0xf] %v469_v51  ;;  %v471_v52 = vld [vmem:[%s15619_s6 + $0x338] sm:$0xf]  ;;  %v473_v53 = vld [vmem:[%s15619_s6 + $0x32c] sm:$0xf] }
  0x84   :  { %472 = vst [vmem:[#allocation4 + $0x334] sm:$0xf] %v471_v52  ;;  %474 = vst [vmem:[#allocation4 + $0x338] sm:$0xf] %v473_v53  ;;  %v479_v55 = vld [vmem:[%s15619_s6 + $0x350] sm:$0xf] }
  0x85   :  { %476 = vst [vmem:[#allocation4 + $0x33c] sm:$0xff] %v475_v54   ;;  %v481_v56 = vld [vmem:[%s15619_s6 + $0x344] sm:$0xf]  ;;  %v483_v57 = vld [vmem:[%s15619_s6 + $0x354] sm:$0xf]  ;;  %v491_v61 = vld [vmem:[%s15619_s6 + $0x35c] sm:$0xff]  }
  0x86   :  { %480 = vst [vmem:[#allocation4 + $0x344] sm:$0xf] %v479_v55  ;;  %482 = vst [vmem:[#allocation4 + $0x348] sm:$0xf] %v481_v56  ;;  %v485_v58 = vld [vmem:[%s15619_s6 + $0x348] sm:$0xf] }
  0x87   :  { %484 = vst [vmem:[#allocation4 + $0x34c] sm:$0xf] %v483_v57  ;;  %v487_v59 = vld [vmem:[%s15619_s6 + $0x358] sm:$0xf]  ;;  %v489_v60 = vld [vmem:[%s15619_s6 + $0x34c] sm:$0xf] }
  0x88   :  { %486 = vst [vmem:[#allocation4 + $0x350] sm:$0xf] %v485_v58  ;;  %488 = vst [vmem:[#allocation4 + $0x354] sm:$0xf] %v487_v59  ;;  %v495_v62 = vld [vmem:[%s15619_s6 + $0x370] sm:$0xf] }
  0x89   :  { %490 = vst [vmem:[#allocation4 + $0x358] sm:$0xf] %v489_v60  ;;  %v497_v63 = vld [vmem:[%s15619_s6 + $0x364] sm:$0xf]  ;;  %492 = vst [vmem:[#allocation4 + $0x35c] sm:$0xff] %v491_v61   ;;  %v507_v4 = vld [vmem:[%s15619_s6 + $0x37c] sm:$0xff]  }
  0x8a   :  { %496 = vst [vmem:[#allocation4 + $0x364] sm:$0xf] %v495_v62  ;;  %498 = vst [vmem:[#allocation4 + $0x368] sm:$0xf] %v497_v63  ;;  %v499_v0 = vld [vmem:[%s15619_s6 + $0x374] sm:$0xf] }
  0x8b   :  { %v501_v1 = vld [vmem:[%s15619_s6 + $0x368] sm:$0xf]  ;;  %v503_v2 = vld [vmem:[%s15619_s6 + $0x378] sm:$0xf]  ;;  %500 = vst [vmem:[#allocation4 + $0x36c] sm:$0xf] %v499_v0 }
  0x8c   :  { %502 = vst [vmem:[#allocation4 + $0x370] sm:$0xf] %v501_v1  ;;  %504 = vst [vmem:[#allocation4 + $0x374] sm:$0xf] %v503_v2  ;;  %v505_v3 = vld [vmem:[%s15619_s6 + $0x36c] sm:$0xf] }
  0x8d   :  { %v511_v5 = vld [vmem:[%s15619_s6 + $0x390] sm:$0xf]  ;;  %506 = vst [vmem:[#allocation4 + $0x378] sm:$0xf] %v505_v3  ;;  %508 = vst [vmem:[#allocation4 + $0x37c] sm:$0xff] %v507_v4   ;;  %v523_v11 = vld [vmem:[%s15619_s6 + $0x39c] sm:$0xff]  }
  0x8e   :  { %512 = vst [vmem:[#allocation4 + $0x384] sm:$0xf] %v511_v5  ;;  %v513_v6 = vld [vmem:[%s15619_s6 + $0x384] sm:$0xf]  ;;  %v515_v7 = vld [vmem:[%s15619_s6 + $0x394] sm:$0xf] }
  0x8f   :  { %v517_v8 = vld [vmem:[%s15619_s6 + $0x388] sm:$0xf]  ;;  %514 = vst [vmem:[#allocation4 + $0x388] sm:$0xf] %v513_v6  ;;  %516 = vst [vmem:[#allocation4 + $0x38c] sm:$0xf] %v515_v7 }
  0x90   :  { %518 = vst [vmem:[#allocation4 + $0x390] sm:$0xf] %v517_v8  ;;  %v519_v9 = vld [vmem:[%s15619_s6 + $0x398] sm:$0xf]  ;;  %v521_v10 = vld [vmem:[%s15619_s6 + $0x38c] sm:$0xf] }
  0x91   :  { %520 = vst [vmem:[#allocation4 + $0x394] sm:$0xf] %v519_v9  ;;  %522 = vst [vmem:[#allocation4 + $0x398] sm:$0xf] %v521_v10  ;;  %v527_v12 = vld [vmem:[%s15619_s6 + $0x3b0] sm:$0xf] }
  0x92   :  { %524 = vst [vmem:[#allocation4 + $0x39c] sm:$0xff] %v523_v11   ;;  %v529_v13 = vld [vmem:[%s15619_s6 + $0x3a4] sm:$0xf]  ;;  %v531_v14 = vld [vmem:[%s15619_s6 + $0x3b4] sm:$0xf]  ;;  %v539_v18 = vld [vmem:[%s15619_s6 + $0x3bc] sm:$0xff]  }
  0x93   :  { %528 = vst [vmem:[#allocation4 + $0x3a4] sm:$0xf] %v527_v12  ;;  %530 = vst [vmem:[#allocation4 + $0x3a8] sm:$0xf] %v529_v13  ;;  %v533_v15 = vld [vmem:[%s15619_s6 + $0x3a8] sm:$0xf] }
  0x94   :  { %532 = vst [vmem:[#allocation4 + $0x3ac] sm:$0xf] %v531_v14  ;;  %v535_v16 = vld [vmem:[%s15619_s6 + $0x3b8] sm:$0xf]  ;;  %v537_v17 = vld [vmem:[%s15619_s6 + $0x3ac] sm:$0xf] }
  0x95   :  { %534 = vst [vmem:[#allocation4 + $0x3b0] sm:$0xf] %v533_v15  ;;  %536 = vst [vmem:[#allocation4 + $0x3b4] sm:$0xf] %v535_v16  ;;  %v543_v19 = vld [vmem:[%s15619_s6 + $0x3d0] sm:$0xf] }
  0x96   :  { %538 = vst [vmem:[#allocation4 + $0x3b8] sm:$0xf] %v537_v17  ;;  %v545_v20 = vld [vmem:[%s15619_s6 + $0x3c4] sm:$0xf]  ;;  %540 = vst [vmem:[#allocation4 + $0x3bc] sm:$0xff] %v539_v18   ;;  %v555_v25 = vld [vmem:[%s15619_s6 + $0x3dc] sm:$0xff]  }
  0x97   :  { %544 = vst [vmem:[#allocation4 + $0x3c4] sm:$0xf] %v543_v19  ;;  %546 = vst [vmem:[#allocation4 + $0x3c8] sm:$0xf] %v545_v20  ;;  %v547_v21 = vld [vmem:[%s15619_s6 + $0x3d4] sm:$0xf] }
  0x98   :  { %v549_v22 = vld [vmem:[%s15619_s6 + $0x3c8] sm:$0xf]  ;;  %v551_v23 = vld [vmem:[%s15619_s6 + $0x3d8] sm:$0xf]  ;;  %548 = vst [vmem:[#allocation4 + $0x3cc] sm:$0xf] %v547_v21 }
  0x99   :  { %550 = vst [vmem:[#allocation4 + $0x3d0] sm:$0xf] %v549_v22  ;;  %552 = vst [vmem:[#allocation4 + $0x3d4] sm:$0xf] %v551_v23  ;;  %v553_v24 = vld [vmem:[%s15619_s6 + $0x3cc] sm:$0xf] }
  0x9a   :  { %v559_v26 = vld [vmem:[%s15619_s6 + $0x3f0] sm:$0xf]  ;;  %554 = vst [vmem:[#allocation4 + $0x3d8] sm:$0xf] %v553_v24  ;;  %556 = vst [vmem:[#allocation4 + $0x3dc] sm:$0xff] %v555_v25  }
  0x9b   :  { %560 = vst [vmem:[#allocation4 + $0x3e4] sm:$0xf] %v559_v26  ;;  %v561_v27 = vld [vmem:[%s15619_s6 + $0x3e4] sm:$0xf]  ;;  %v563_v28 = vld [vmem:[%s15619_s6 + $0x3f4] sm:$0xf] }
  0x9c   :  { %v565_v29 = vld [vmem:[%s15619_s6 + $0x3e8] sm:$0xf]  ;;  %562 = vst [vmem:[#allocation4 + $0x3e8] sm:$0xf] %v561_v27  ;;  %564 = vst [vmem:[#allocation4 + $0x3ec] sm:$0xf] %v563_v28 }
  0x9d   :  { %566 = vst [vmem:[#allocation4 + $0x3f0] sm:$0xf] %v565_v29  ;;  %v567_v30 = vld [vmem:[%s15619_s6 + $0x3f8] sm:$0xf]  ;;  %v569_v31 = vld [vmem:[%s15619_s6 + $0x3ec] sm:$0xf] }
  0x9e   :  { %v571_v32 = vld [vmem:[%s15619_s6 + $0x3fc] sm:$0xf]  ;;  %568 = vst [vmem:[#allocation4 + $0x3f4] sm:$0xf] %v567_v30  ;;  %570 = vst [vmem:[#allocation4 + $0x3f8] sm:$0xf] %v569_v31 }
  0x9f   :  { %572 = vst [vmem:[#allocation4 + $0x3fc] sm:$0xf] %v571_v32 }
  0xa0   :  { %1115 = vsyncadd [#allocation9], 16384  ;;  %v1134_v33 = vld [vmem:[%s15620_s7] sm:$0xf]  ;;  %v1136_v34 = vld [vmem:[%s15620_s7 + $0x10] sm:$0xf] }
  0xa1   :  { %1135 = vst [vmem:[#allocation5] sm:$0xf] %v1134_v33  ;;  %1137 = vst [vmem:[#allocation5 + $0x4] sm:$0xf] %v1136_v34  ;;  %v1138_v35 = vld [vmem:[%s15620_s7 + $0x4] sm:$0xf] }
  0xa2   :  { %v1140_v36 = vld [vmem:[%s15620_s7 + $0x14] sm:$0xf]  ;;  %v1142_v37 = vld [vmem:[%s15620_s7 + $0x8] sm:$0xf]  ;;  %1139 = vst [vmem:[#allocation5 + $0x8] sm:$0xf] %v1138_v35 }
  0xa3   :  { %1141 = vst [vmem:[#allocation5 + $0xc] sm:$0xf] %v1140_v36  ;;  %1143 = vst [vmem:[#allocation5 + $0x10] sm:$0xf] %v1142_v37  ;;  %v1144_v38 = vld [vmem:[%s15620_s7 + $0x18] sm:$0xf] }
  0xa4   :  { %v1146_v39 = vld [vmem:[%s15620_s7 + $0xc] sm:$0xf]  ;;  %v1148_v40 = vld [vmem:[%s15620_s7 + $0x1c] sm:$0xff]   ;;  %1145 = vst [vmem:[#allocation5 + $0x14] sm:$0xf] %v1144_v38 }
  0xa5   :  { %1147 = vst [vmem:[#allocation5 + $0x18] sm:$0xf] %v1146_v39  ;;  %1149 = vst [vmem:[#allocation5 + $0x1c] sm:$0xff] %v1148_v40   ;;  %v1152_v41 = vld [vmem:[%s15620_s7 + $0x30] sm:$0xf]  ;;  %v1164_v47 = vld [vmem:[%s15620_s7 + $0x3c] sm:$0xff]  }
  0xa6   :  { %v1154_v42 = vld [vmem:[%s15620_s7 + $0x24] sm:$0xf]  ;;  %v1156_v43 = vld [vmem:[%s15620_s7 + $0x34] sm:$0xf]  ;;  %1153 = vst [vmem:[#allocation5 + $0x24] sm:$0xf] %v1152_v41 }
  0xa7   :  { %1155 = vst [vmem:[#allocation5 + $0x28] sm:$0xf] %v1154_v42  ;;  %1157 = vst [vmem:[#allocation5 + $0x2c] sm:$0xf] %v1156_v43  ;;  %v1158_v44 = vld [vmem:[%s15620_s7 + $0x28] sm:$0xf] }
  0xa8   :  { %v1160_v45 = vld [vmem:[%s15620_s7 + $0x38] sm:$0xf]  ;;  %v1162_v46 = vld [vmem:[%s15620_s7 + $0x2c] sm:$0xf]  ;;  %1159 = vst [vmem:[#allocation5 + $0x30] sm:$0xf] %v1158_v44 }
  0xa9   :  { %1161 = vst [vmem:[#allocation5 + $0x34] sm:$0xf] %v1160_v45  ;;  %1163 = vst [vmem:[#allocation5 + $0x38] sm:$0xf] %v1162_v46  ;;  %v1168_v48 = vld [vmem:[%s15620_s7 + $0x50] sm:$0xf] }
  0xaa   :  { %v1170_v49 = vld [vmem:[%s15620_s7 + $0x44] sm:$0xf]  ;;  %1165 = vst [vmem:[#allocation5 + $0x3c] sm:$0xff] %v1164_v47   ;;  %1169 = vst [vmem:[#allocation5 + $0x44] sm:$0xf] %v1168_v48  ;;  %v1180_v54 = vld [vmem:[%s15620_s7 + $0x5c] sm:$0xff]  }
  0xab   :  { %1171 = vst [vmem:[#allocation5 + $0x48] sm:$0xf] %v1170_v49  ;;  %v1172_v50 = vld [vmem:[%s15620_s7 + $0x54] sm:$0xf]  ;;  %v1174_v51 = vld [vmem:[%s15620_s7 + $0x48] sm:$0xf] }
  0xac   :  { %v1176_v52 = vld [vmem:[%s15620_s7 + $0x58] sm:$0xf]  ;;  %1173 = vst [vmem:[#allocation5 + $0x4c] sm:$0xf] %v1172_v50  ;;  %1175 = vst [vmem:[#allocation5 + $0x50] sm:$0xf] %v1174_v51 }
  0xad   :  { %1177 = vst [vmem:[#allocation5 + $0x54] sm:$0xf] %v1176_v52  ;;  %v1178_v53 = vld [vmem:[%s15620_s7 + $0x4c] sm:$0xf]  ;;  %v1184_v55 = vld [vmem:[%s15620_s7 + $0x70] sm:$0xf] }
  0xae   :  { %1179 = vst [vmem:[#allocation5 + $0x58] sm:$0xf] %v1178_v53  ;;  %1181 = vst [vmem:[#allocation5 + $0x5c] sm:$0xff] %v1180_v54   ;;  %v1186_v56 = vld [vmem:[%s15620_s7 + $0x64] sm:$0xf]  ;;  %v1196_v61 = vld [vmem:[%s15620_s7 + $0x7c] sm:$0xff]  }
  0xaf   :  { %1185 = vst [vmem:[#allocation5 + $0x64] sm:$0xf] %v1184_v55  ;;  %v1188_v57 = vld [vmem:[%s15620_s7 + $0x74] sm:$0xf]  ;;  %v1190_v58 = vld [vmem:[%s15620_s7 + $0x68] sm:$0xf] }
  0xb0   :  { %1187 = vst [vmem:[#allocation5 + $0x68] sm:$0xf] %v1186_v56  ;;  %1189 = vst [vmem:[#allocation5 + $0x6c] sm:$0xf] %v1188_v57  ;;  %v1192_v59 = vld [vmem:[%s15620_s7 + $0x78] sm:$0xf] }
  0xb1   :  { %1191 = vst [vmem:[#allocation5 + $0x70] sm:$0xf] %v1190_v58  ;;  %v1194_v60 = vld [vmem:[%s15620_s7 + $0x6c] sm:$0xf]  ;;  %1193 = vst [vmem:[#allocation5 + $0x74] sm:$0xf] %v1192_v59 }
  0xb2   :  { %1195 = vst [vmem:[#allocation5 + $0x78] sm:$0xf] %v1194_v60  ;;  %1197 = vst [vmem:[#allocation5 + $0x7c] sm:$0xff] %v1196_v61   ;;  %v1200_v62 = vld [vmem:[%s15620_s7 + $0x90] sm:$0xf]  ;;  %v1212_v4 = vld [vmem:[%s15620_s7 + $0x9c] sm:$0xff]  }
  0xb3   :  { %v1202_v63 = vld [vmem:[%s15620_s7 + $0x84] sm:$0xf]  ;;  %v1204_v0 = vld [vmem:[%s15620_s7 + $0x94] sm:$0xf]  ;;  %1201 = vst [vmem:[#allocation5 + $0x84] sm:$0xf] %v1200_v62 }
  0xb4   :  { %1203 = vst [vmem:[#allocation5 + $0x88] sm:$0xf] %v1202_v63  ;;  %1205 = vst [vmem:[#allocation5 + $0x8c] sm:$0xf] %v1204_v0  ;;  %v1206_v1 = vld [vmem:[%s15620_s7 + $0x88] sm:$0xf] }
  0xb5   :  { %v1208_v2 = vld [vmem:[%s15620_s7 + $0x98] sm:$0xf]  ;;  %v1210_v3 = vld [vmem:[%s15620_s7 + $0x8c] sm:$0xf]  ;;  %1207 = vst [vmem:[#allocation5 + $0x90] sm:$0xf] %v1206_v1 }
  0xb6   :  { %1209 = vst [vmem:[#allocation5 + $0x94] sm:$0xf] %v1208_v2  ;;  %1211 = vst [vmem:[#allocation5 + $0x98] sm:$0xf] %v1210_v3  ;;  %v1216_v5 = vld [vmem:[%s15620_s7 + $0xb0] sm:$0xf] }
  0xb7   :  { %v1218_v6 = vld [vmem:[%s15620_s7 + $0xa4] sm:$0xf]  ;;  %1213 = vst [vmem:[#allocation5 + $0x9c] sm:$0xff] %v1212_v4   ;;  %1217 = vst [vmem:[#allocation5 + $0xa4] sm:$0xf] %v1216_v5  ;;  %v1228_v11 = vld [vmem:[%s15620_s7 + $0xbc] sm:$0xff]  }
  0xb8   :  { %1219 = vst [vmem:[#allocation5 + $0xa8] sm:$0xf] %v1218_v6  ;;  %v1220_v7 = vld [vmem:[%s15620_s7 + $0xb4] sm:$0xf]  ;;  %v1222_v8 = vld [vmem:[%s15620_s7 + $0xa8] sm:$0xf] }
  0xb9   :  { %v1224_v9 = vld [vmem:[%s15620_s7 + $0xb8] sm:$0xf]  ;;  %1221 = vst [vmem:[#allocation5 + $0xac] sm:$0xf] %v1220_v7  ;;  %1223 = vst [vmem:[#allocation5 + $0xb0] sm:$0xf] %v1222_v8 }
  0xba   :  { %1225 = vst [vmem:[#allocation5 + $0xb4] sm:$0xf] %v1224_v9  ;;  %v1226_v10 = vld [vmem:[%s15620_s7 + $0xac] sm:$0xf]  ;;  %v1232_v12 = vld [vmem:[%s15620_s7 + $0xd0] sm:$0xf] }
  0xbb   :  { %1227 = vst [vmem:[#allocation5 + $0xb8] sm:$0xf] %v1226_v10  ;;  %1229 = vst [vmem:[#allocation5 + $0xbc] sm:$0xff] %v1228_v11   ;;  %v1234_v13 = vld [vmem:[%s15620_s7 + $0xc4] sm:$0xf]  ;;  %v1244_v18 = vld [vmem:[%s15620_s7 + $0xdc] sm:$0xff]  }
  0xbc   :  { %1233 = vst [vmem:[#allocation5 + $0xc4] sm:$0xf] %v1232_v12  ;;  %v1236_v14 = vld [vmem:[%s15620_s7 + $0xd4] sm:$0xf]  ;;  %v1238_v15 = vld [vmem:[%s15620_s7 + $0xc8] sm:$0xf] }
  0xbd   :  { %1235 = vst [vmem:[#allocation5 + $0xc8] sm:$0xf] %v1234_v13  ;;  %1237 = vst [vmem:[#allocation5 + $0xcc] sm:$0xf] %v1236_v14  ;;  %v1240_v16 = vld [vmem:[%s15620_s7 + $0xd8] sm:$0xf] }
  0xbe   :  { %1239 = vst [vmem:[#allocation5 + $0xd0] sm:$0xf] %v1238_v15  ;;  %v1242_v17 = vld [vmem:[%s15620_s7 + $0xcc] sm:$0xf]  ;;  %1241 = vst [vmem:[#allocation5 + $0xd4] sm:$0xf] %v1240_v16 }
  0xbf   :  { %1243 = vst [vmem:[#allocation5 + $0xd8] sm:$0xf] %v1242_v17  ;;  %1245 = vst [vmem:[#allocation5 + $0xdc] sm:$0xff] %v1244_v18   ;;  %v1248_v19 = vld [vmem:[%s15620_s7 + $0xf0] sm:$0xf]  ;;  %v1260_v25 = vld [vmem:[%s15620_s7 + $0xfc] sm:$0xff]  }
  0xc0   :  { %v1250_v20 = vld [vmem:[%s15620_s7 + $0xe4] sm:$0xf]  ;;  %v1252_v21 = vld [vmem:[%s15620_s7 + $0xf4] sm:$0xf]  ;;  %1249 = vst [vmem:[#allocation5 + $0xe4] sm:$0xf] %v1248_v19 }
  0xc1   :  { %1251 = vst [vmem:[#allocation5 + $0xe8] sm:$0xf] %v1250_v20  ;;  %1253 = vst [vmem:[#allocation5 + $0xec] sm:$0xf] %v1252_v21  ;;  %v1254_v22 = vld [vmem:[%s15620_s7 + $0xe8] sm:$0xf] }
  0xc2   :  { %v1256_v23 = vld [vmem:[%s15620_s7 + $0xf8] sm:$0xf]  ;;  %v1258_v24 = vld [vmem:[%s15620_s7 + $0xec] sm:$0xf]  ;;  %1255 = vst [vmem:[#allocation5 + $0xf0] sm:$0xf] %v1254_v22 }
  0xc3   :  { %1257 = vst [vmem:[#allocation5 + $0xf4] sm:$0xf] %v1256_v23  ;;  %1259 = vst [vmem:[#allocation5 + $0xf8] sm:$0xf] %v1258_v24  ;;  %v1264_v26 = vld [vmem:[%s15620_s7 + $0x110] sm:$0xf] }
  0xc4   :  { %v1266_v27 = vld [vmem:[%s15620_s7 + $0x104] sm:$0xf]  ;;  %1261 = vst [vmem:[#allocation5 + $0xfc] sm:$0xff] %v1260_v25   ;;  %1265 = vst [vmem:[#allocation5 + $0x104] sm:$0xf] %v1264_v26  ;;  %v1276_v32 = vld [vmem:[%s15620_s7 + $0x11c] sm:$0xff]  }
  0xc5   :  { %1267 = vst [vmem:[#allocation5 + $0x108] sm:$0xf] %v1266_v27  ;;  %v1268_v28 = vld [vmem:[%s15620_s7 + $0x114] sm:$0xf]  ;;  %v1270_v29 = vld [vmem:[%s15620_s7 + $0x108] sm:$0xf] }
  0xc6   :  { %v1272_v30 = vld [vmem:[%s15620_s7 + $0x118] sm:$0xf]  ;;  %1269 = vst [vmem:[#allocation5 + $0x10c] sm:$0xf] %v1268_v28  ;;  %1271 = vst [vmem:[#allocation5 + $0x110] sm:$0xf] %v1270_v29 }
  0xc7   :  { %1273 = vst [vmem:[#allocation5 + $0x114] sm:$0xf] %v1272_v30  ;;  %v1274_v31 = vld [vmem:[%s15620_s7 + $0x10c] sm:$0xf]  ;;  %v1280_v33 = vld [vmem:[%s15620_s7 + $0x130] sm:$0xf] }
  0xc8   :  { %1275 = vst [vmem:[#allocation5 + $0x118] sm:$0xf] %v1274_v31  ;;  %1277 = vst [vmem:[#allocation5 + $0x11c] sm:$0xff] %v1276_v32   ;;  %v1282_v34 = vld [vmem:[%s15620_s7 + $0x124] sm:$0xf]  ;;  %v1292_v39 = vld [vmem:[%s15620_s7 + $0x13c] sm:$0xff]  }
  0xc9   :  { %1281 = vst [vmem:[#allocation5 + $0x124] sm:$0xf] %v1280_v33  ;;  %v1284_v35 = vld [vmem:[%s15620_s7 + $0x134] sm:$0xf]  ;;  %v1286_v36 = vld [vmem:[%s15620_s7 + $0x128] sm:$0xf] }
  0xca   :  { %1283 = vst [vmem:[#allocation5 + $0x128] sm:$0xf] %v1282_v34  ;;  %1285 = vst [vmem:[#allocation5 + $0x12c] sm:$0xf] %v1284_v35  ;;  %v1288_v37 = vld [vmem:[%s15620_s7 + $0x138] sm:$0xf] }
  0xcb   :  { %1287 = vst [vmem:[#allocation5 + $0x130] sm:$0xf] %v1286_v36  ;;  %v1290_v38 = vld [vmem:[%s15620_s7 + $0x12c] sm:$0xf]  ;;  %1289 = vst [vmem:[#allocation5 + $0x134] sm:$0xf] %v1288_v37 }
  0xcc   :  { %1291 = vst [vmem:[#allocation5 + $0x138] sm:$0xf] %v1290_v38  ;;  %1293 = vst [vmem:[#allocation5 + $0x13c] sm:$0xff] %v1292_v39   ;;  %v1296_v40 = vld [vmem:[%s15620_s7 + $0x150] sm:$0xf]  ;;  %v1308_v46 = vld [vmem:[%s15620_s7 + $0x15c] sm:$0xff]  }
  0xcd   :  { %v1298_v41 = vld [vmem:[%s15620_s7 + $0x144] sm:$0xf]  ;;  %v1300_v42 = vld [vmem:[%s15620_s7 + $0x154] sm:$0xf]  ;;  %1297 = vst [vmem:[#allocation5 + $0x144] sm:$0xf] %v1296_v40 }
  0xce   :  { %1299 = vst [vmem:[#allocation5 + $0x148] sm:$0xf] %v1298_v41  ;;  %1301 = vst [vmem:[#allocation5 + $0x14c] sm:$0xf] %v1300_v42  ;;  %v1302_v43 = vld [vmem:[%s15620_s7 + $0x148] sm:$0xf] }
  0xcf   :  { %v1304_v44 = vld [vmem:[%s15620_s7 + $0x158] sm:$0xf]  ;;  %v1306_v45 = vld [vmem:[%s15620_s7 + $0x14c] sm:$0xf]  ;;  %1303 = vst [vmem:[#allocation5 + $0x150] sm:$0xf] %v1302_v43 }
  0xd0   :  { %1305 = vst [vmem:[#allocation5 + $0x154] sm:$0xf] %v1304_v44  ;;  %1307 = vst [vmem:[#allocation5 + $0x158] sm:$0xf] %v1306_v45  ;;  %v1312_v47 = vld [vmem:[%s15620_s7 + $0x170] sm:$0xf] }
  0xd1   :  { %v1314_v48 = vld [vmem:[%s15620_s7 + $0x164] sm:$0xf]  ;;  %1309 = vst [vmem:[#allocation5 + $0x15c] sm:$0xff] %v1308_v46   ;;  %1313 = vst [vmem:[#allocation5 + $0x164] sm:$0xf] %v1312_v47  ;;  %v1324_v53 = vld [vmem:[%s15620_s7 + $0x17c] sm:$0xff]  }
  0xd2   :  { %1315 = vst [vmem:[#allocation5 + $0x168] sm:$0xf] %v1314_v48  ;;  %v1316_v49 = vld [vmem:[%s15620_s7 + $0x174] sm:$0xf]  ;;  %v1318_v50 = vld [vmem:[%s15620_s7 + $0x168] sm:$0xf] }
  0xd3   :  { %v1320_v51 = vld [vmem:[%s15620_s7 + $0x178] sm:$0xf]  ;;  %1317 = vst [vmem:[#allocation5 + $0x16c] sm:$0xf] %v1316_v49  ;;  %1319 = vst [vmem:[#allocation5 + $0x170] sm:$0xf] %v1318_v50 }
  0xd4   :  { %1321 = vst [vmem:[#allocation5 + $0x174] sm:$0xf] %v1320_v51  ;;  %v1322_v52 = vld [vmem:[%s15620_s7 + $0x16c] sm:$0xf]  ;;  %v1328_v54 = vld [vmem:[%s15620_s7 + $0x190] sm:$0xf] }
  0xd5   :  { %1323 = vst [vmem:[#allocation5 + $0x178] sm:$0xf] %v1322_v52  ;;  %1325 = vst [vmem:[#allocation5 + $0x17c] sm:$0xff] %v1324_v53   ;;  %v1330_v55 = vld [vmem:[%s15620_s7 + $0x184] sm:$0xf]  ;;  %v1340_v60 = vld [vmem:[%s15620_s7 + $0x19c] sm:$0xff]  }
  0xd6   :  { %1329 = vst [vmem:[#allocation5 + $0x184] sm:$0xf] %v1328_v54  ;;  %v1332_v56 = vld [vmem:[%s15620_s7 + $0x194] sm:$0xf]  ;;  %v1334_v57 = vld [vmem:[%s15620_s7 + $0x188] sm:$0xf] }
  0xd7   :  { %1331 = vst [vmem:[#allocation5 + $0x188] sm:$0xf] %v1330_v55  ;;  %1333 = vst [vmem:[#allocation5 + $0x18c] sm:$0xf] %v1332_v56  ;;  %v1336_v58 = vld [vmem:[%s15620_s7 + $0x198] sm:$0xf] }
  0xd8   :  { %1335 = vst [vmem:[#allocation5 + $0x190] sm:$0xf] %v1334_v57  ;;  %v1338_v59 = vld [vmem:[%s15620_s7 + $0x18c] sm:$0xf]  ;;  %1337 = vst [vmem:[#allocation5 + $0x194] sm:$0xf] %v1336_v58 }
  0xd9   :  { %1339 = vst [vmem:[#allocation5 + $0x198] sm:$0xf] %v1338_v59  ;;  %1341 = vst [vmem:[#allocation5 + $0x19c] sm:$0xff] %v1340_v60   ;;  %v1344_v61 = vld [vmem:[%s15620_s7 + $0x1b0] sm:$0xf]  ;;  %v1356_v3 = vld [vmem:[%s15620_s7 + $0x1bc] sm:$0xff]  }
  0xda   :  { %v1346_v62 = vld [vmem:[%s15620_s7 + $0x1a4] sm:$0xf]  ;;  %v1348_v63 = vld [vmem:[%s15620_s7 + $0x1b4] sm:$0xf]  ;;  %1345 = vst [vmem:[#allocation5 + $0x1a4] sm:$0xf] %v1344_v61 }
  0xdb   :  { %1347 = vst [vmem:[#allocation5 + $0x1a8] sm:$0xf] %v1346_v62  ;;  %1349 = vst [vmem:[#allocation5 + $0x1ac] sm:$0xf] %v1348_v63  ;;  %v1350_v0 = vld [vmem:[%s15620_s7 + $0x1a8] sm:$0xf] }
  0xdc   :  { %v1352_v1 = vld [vmem:[%s15620_s7 + $0x1b8] sm:$0xf]  ;;  %v1354_v2 = vld [vmem:[%s15620_s7 + $0x1ac] sm:$0xf]  ;;  %1351 = vst [vmem:[#allocation5 + $0x1b0] sm:$0xf] %v1350_v0 }
  0xdd   :  { %1353 = vst [vmem:[#allocation5 + $0x1b4] sm:$0xf] %v1352_v1  ;;  %1355 = vst [vmem:[#allocation5 + $0x1b8] sm:$0xf] %v1354_v2  ;;  %v1360_v4 = vld [vmem:[%s15620_s7 + $0x1d0] sm:$0xf] }
  0xde   :  { %v1362_v5 = vld [vmem:[%s15620_s7 + $0x1c4] sm:$0xf]  ;;  %1357 = vst [vmem:[#allocation5 + $0x1bc] sm:$0xff] %v1356_v3   ;;  %1361 = vst [vmem:[#allocation5 + $0x1c4] sm:$0xf] %v1360_v4  ;;  %v1372_v10 = vld [vmem:[%s15620_s7 + $0x1dc] sm:$0xff]  }
  0xdf   :  { %1363 = vst [vmem:[#allocation5 + $0x1c8] sm:$0xf] %v1362_v5  ;;  %v1364_v6 = vld [vmem:[%s15620_s7 + $0x1d4] sm:$0xf]  ;;  %v1366_v7 = vld [vmem:[%s15620_s7 + $0x1c8] sm:$0xf] }
  0xe0   :  { %v1368_v8 = vld [vmem:[%s15620_s7 + $0x1d8] sm:$0xf]  ;;  %1365 = vst [vmem:[#allocation5 + $0x1cc] sm:$0xf] %v1364_v6  ;;  %1367 = vst [vmem:[#allocation5 + $0x1d0] sm:$0xf] %v1366_v7 }
  0xe1   :  { %1369 = vst [vmem:[#allocation5 + $0x1d4] sm:$0xf] %v1368_v8  ;;  %v1370_v9 = vld [vmem:[%s15620_s7 + $0x1cc] sm:$0xf]  ;;  %v1376_v11 = vld [vmem:[%s15620_s7 + $0x1f0] sm:$0xf] }
  0xe2   :  { %1371 = vst [vmem:[#allocation5 + $0x1d8] sm:$0xf] %v1370_v9  ;;  %1373 = vst [vmem:[#allocation5 + $0x1dc] sm:$0xff] %v1372_v10   ;;  %v1378_v12 = vld [vmem:[%s15620_s7 + $0x1e4] sm:$0xf]  ;;  %v1388_v17 = vld [vmem:[%s15620_s7 + $0x1fc] sm:$0xff]  }
  0xe3   :  { %1377 = vst [vmem:[#allocation5 + $0x1e4] sm:$0xf] %v1376_v11  ;;  %v1380_v13 = vld [vmem:[%s15620_s7 + $0x1f4] sm:$0xf]  ;;  %v1382_v14 = vld [vmem:[%s15620_s7 + $0x1e8] sm:$0xf] }
  0xe4   :  { %1379 = vst [vmem:[#allocation5 + $0x1e8] sm:$0xf] %v1378_v12  ;;  %1381 = vst [vmem:[#allocation5 + $0x1ec] sm:$0xf] %v1380_v13  ;;  %v1384_v15 = vld [vmem:[%s15620_s7 + $0x1f8] sm:$0xf] }
  0xe5   :  { %1383 = vst [vmem:[#allocation5 + $0x1f0] sm:$0xf] %v1382_v14  ;;  %v1386_v16 = vld [vmem:[%s15620_s7 + $0x1ec] sm:$0xf]  ;;  %1385 = vst [vmem:[#allocation5 + $0x1f4] sm:$0xf] %v1384_v15 }
  0xe6   :  { %1387 = vst [vmem:[#allocation5 + $0x1f8] sm:$0xf] %v1386_v16  ;;  %1389 = vst [vmem:[#allocation5 + $0x1fc] sm:$0xff] %v1388_v17   ;;  %v1392_v18 = vld [vmem:[%s15620_s7 + $0x210] sm:$0xf]  ;;  %v1404_v24 = vld [vmem:[%s15620_s7 + $0x21c] sm:$0xff]  }
  0xe7   :  { %v1394_v19 = vld [vmem:[%s15620_s7 + $0x204] sm:$0xf]  ;;  %v1396_v20 = vld [vmem:[%s15620_s7 + $0x214] sm:$0xf]  ;;  %1393 = vst [vmem:[#allocation5 + $0x204] sm:$0xf] %v1392_v18 }
  0xe8   :  { %1395 = vst [vmem:[#allocation5 + $0x208] sm:$0xf] %v1394_v19  ;;  %1397 = vst [vmem:[#allocation5 + $0x20c] sm:$0xf] %v1396_v20  ;;  %v1398_v21 = vld [vmem:[%s15620_s7 + $0x208] sm:$0xf] }
  0xe9   :  { %v1400_v22 = vld [vmem:[%s15620_s7 + $0x218] sm:$0xf]  ;;  %v1402_v23 = vld [vmem:[%s15620_s7 + $0x20c] sm:$0xf]  ;;  %1399 = vst [vmem:[#allocation5 + $0x210] sm:$0xf] %v1398_v21 }
  0xea   :  { %1401 = vst [vmem:[#allocation5 + $0x214] sm:$0xf] %v1400_v22  ;;  %1403 = vst [vmem:[#allocation5 + $0x218] sm:$0xf] %v1402_v23  ;;  %v1408_v25 = vld [vmem:[%s15620_s7 + $0x230] sm:$0xf] }
  0xeb   :  { %v1410_v26 = vld [vmem:[%s15620_s7 + $0x224] sm:$0xf]  ;;  %1405 = vst [vmem:[#allocation5 + $0x21c] sm:$0xff] %v1404_v24   ;;  %1409 = vst [vmem:[#allocation5 + $0x224] sm:$0xf] %v1408_v25  ;;  %v1420_v31 = vld [vmem:[%s15620_s7 + $0x23c] sm:$0xff]  }
  0xec   :  { %1411 = vst [vmem:[#allocation5 + $0x228] sm:$0xf] %v1410_v26  ;;  %v1412_v27 = vld [vmem:[%s15620_s7 + $0x234] sm:$0xf]  ;;  %v1414_v28 = vld [vmem:[%s15620_s7 + $0x228] sm:$0xf] }
  0xed   :  { %v1416_v29 = vld [vmem:[%s15620_s7 + $0x238] sm:$0xf]  ;;  %1413 = vst [vmem:[#allocation5 + $0x22c] sm:$0xf] %v1412_v27  ;;  %1415 = vst [vmem:[#allocation5 + $0x230] sm:$0xf] %v1414_v28 }
  0xee   :  { %1417 = vst [vmem:[#allocation5 + $0x234] sm:$0xf] %v1416_v29  ;;  %v1418_v30 = vld [vmem:[%s15620_s7 + $0x22c] sm:$0xf]  ;;  %v1424_v32 = vld [vmem:[%s15620_s7 + $0x250] sm:$0xf] }
  0xef   :  { %1419 = vst [vmem:[#allocation5 + $0x238] sm:$0xf] %v1418_v30  ;;  %1421 = vst [vmem:[#allocation5 + $0x23c] sm:$0xff] %v1420_v31   ;;  %v1426_v33 = vld [vmem:[%s15620_s7 + $0x244] sm:$0xf]  ;;  %v1436_v38 = vld [vmem:[%s15620_s7 + $0x25c] sm:$0xff]  }
  0xf0   :  { %1425 = vst [vmem:[#allocation5 + $0x244] sm:$0xf] %v1424_v32  ;;  %v1428_v34 = vld [vmem:[%s15620_s7 + $0x254] sm:$0xf]  ;;  %v1430_v35 = vld [vmem:[%s15620_s7 + $0x248] sm:$0xf] }
  0xf1   :  { %1427 = vst [vmem:[#allocation5 + $0x248] sm:$0xf] %v1426_v33  ;;  %1429 = vst [vmem:[#allocation5 + $0x24c] sm:$0xf] %v1428_v34  ;;  %v1432_v36 = vld [vmem:[%s15620_s7 + $0x258] sm:$0xf] }
  0xf2   :  { %1431 = vst [vmem:[#allocation5 + $0x250] sm:$0xf] %v1430_v35  ;;  %v1434_v37 = vld [vmem:[%s15620_s7 + $0x24c] sm:$0xf]  ;;  %1433 = vst [vmem:[#allocation5 + $0x254] sm:$0xf] %v1432_v36 }
  0xf3   :  { %1435 = vst [vmem:[#allocation5 + $0x258] sm:$0xf] %v1434_v37  ;;  %1437 = vst [vmem:[#allocation5 + $0x25c] sm:$0xff] %v1436_v38   ;;  %v1440_v39 = vld [vmem:[%s15620_s7 + $0x270] sm:$0xf]  ;;  %v1452_v45 = vld [vmem:[%s15620_s7 + $0x27c] sm:$0xff]  }
  0xf4   :  { %v1442_v40 = vld [vmem:[%s15620_s7 + $0x264] sm:$0xf]  ;;  %v1444_v41 = vld [vmem:[%s15620_s7 + $0x274] sm:$0xf]  ;;  %1441 = vst [vmem:[#allocation5 + $0x264] sm:$0xf] %v1440_v39 }
  0xf5   :  { %1443 = vst [vmem:[#allocation5 + $0x268] sm:$0xf] %v1442_v40  ;;  %1445 = vst [vmem:[#allocation5 + $0x26c] sm:$0xf] %v1444_v41  ;;  %v1446_v42 = vld [vmem:[%s15620_s7 + $0x268] sm:$0xf] }
  0xf6   :  { %v1448_v43 = vld [vmem:[%s15620_s7 + $0x278] sm:$0xf]  ;;  %v1450_v44 = vld [vmem:[%s15620_s7 + $0x26c] sm:$0xf]  ;;  %1447 = vst [vmem:[#allocation5 + $0x270] sm:$0xf] %v1446_v42 }
  0xf7   :  { %1449 = vst [vmem:[#allocation5 + $0x274] sm:$0xf] %v1448_v43  ;;  %1451 = vst [vmem:[#allocation5 + $0x278] sm:$0xf] %v1450_v44  ;;  %v1456_v46 = vld [vmem:[%s15620_s7 + $0x290] sm:$0xf] }
  0xf8   :  { %v1458_v47 = vld [vmem:[%s15620_s7 + $0x284] sm:$0xf]  ;;  %1453 = vst [vmem:[#allocation5 + $0x27c] sm:$0xff] %v1452_v45   ;;  %1457 = vst [vmem:[#allocation5 + $0x284] sm:$0xf] %v1456_v46  ;;  %v1468_v52 = vld [vmem:[%s15620_s7 + $0x29c] sm:$0xff]  }
  0xf9   :  { %1459 = vst [vmem:[#allocation5 + $0x288] sm:$0xf] %v1458_v47  ;;  %v1460_v48 = vld [vmem:[%s15620_s7 + $0x294] sm:$0xf]  ;;  %v1462_v49 = vld [vmem:[%s15620_s7 + $0x288] sm:$0xf] }
  0xfa   :  { %v1464_v50 = vld [vmem:[%s15620_s7 + $0x298] sm:$0xf]  ;;  %1461 = vst [vmem:[#allocation5 + $0x28c] sm:$0xf] %v1460_v48  ;;  %1463 = vst [vmem:[#allocation5 + $0x290] sm:$0xf] %v1462_v49 }
  0xfb   :  { %1465 = vst [vmem:[#allocation5 + $0x294] sm:$0xf] %v1464_v50  ;;  %v1466_v51 = vld [vmem:[%s15620_s7 + $0x28c] sm:$0xf]  ;;  %v1472_v53 = vld [vmem:[%s15620_s7 + $0x2b0] sm:$0xf] }
  0xfc   :  { %1467 = vst [vmem:[#allocation5 + $0x298] sm:$0xf] %v1466_v51  ;;  %1469 = vst [vmem:[#allocation5 + $0x29c] sm:$0xff] %v1468_v52   ;;  %v1474_v54 = vld [vmem:[%s15620_s7 + $0x2a4] sm:$0xf]  ;;  %v1484_v59 = vld [vmem:[%s15620_s7 + $0x2bc] sm:$0xff]  }
  0xfd   :  { %1473 = vst [vmem:[#allocation5 + $0x2a4] sm:$0xf] %v1472_v53  ;;  %v1476_v55 = vld [vmem:[%s15620_s7 + $0x2b4] sm:$0xf]  ;;  %v1478_v56 = vld [vmem:[%s15620_s7 + $0x2a8] sm:$0xf] }
  0xfe   :  { %1475 = vst [vmem:[#allocation5 + $0x2a8] sm:$0xf] %v1474_v54  ;;  %1477 = vst [vmem:[#allocation5 + $0x2ac] sm:$0xf] %v1476_v55  ;;  %v1480_v57 = vld [vmem:[%s15620_s7 + $0x2b8] sm:$0xf] }
  0xff   :  { %1479 = vst [vmem:[#allocation5 + $0x2b0] sm:$0xf] %v1478_v56  ;;  %v1482_v58 = vld [vmem:[%s15620_s7 + $0x2ac] sm:$0xf]  ;;  %1481 = vst [vmem:[#allocation5 + $0x2b4] sm:$0xf] %v1480_v57 }
 0x100   :  { %1483 = vst [vmem:[#allocation5 + $0x2b8] sm:$0xf] %v1482_v58  ;;  %1485 = vst [vmem:[#allocation5 + $0x2bc] sm:$0xff] %v1484_v59   ;;  %v1488_v60 = vld [vmem:[%s15620_s7 + $0x2d0] sm:$0xf]  ;;  %v1500_v2 = vld [vmem:[%s15620_s7 + $0x2dc] sm:$0xff]  }
 0x101   :  { %v1490_v61 = vld [vmem:[%s15620_s7 + $0x2c4] sm:$0xf]  ;;  %v1492_v62 = vld [vmem:[%s15620_s7 + $0x2d4] sm:$0xf]  ;;  %1489 = vst [vmem:[#allocation5 + $0x2c4] sm:$0xf] %v1488_v60 }
 0x102   :  { %1491 = vst [vmem:[#allocation5 + $0x2c8] sm:$0xf] %v1490_v61  ;;  %1493 = vst [vmem:[#allocation5 + $0x2cc] sm:$0xf] %v1492_v62  ;;  %v1494_v63 = vld [vmem:[%s15620_s7 + $0x2c8] sm:$0xf] }
 0x103   :  { %v1496_v0 = vld [vmem:[%s15620_s7 + $0x2d8] sm:$0xf]  ;;  %v1498_v1 = vld [vmem:[%s15620_s7 + $0x2cc] sm:$0xf]  ;;  %1495 = vst [vmem:[#allocation5 + $0x2d0] sm:$0xf] %v1494_v63 }
 0x104   :  { %1497 = vst [vmem:[#allocation5 + $0x2d4] sm:$0xf] %v1496_v0  ;;  %1499 = vst [vmem:[#allocation5 + $0x2d8] sm:$0xf] %v1498_v1  ;;  %v1504_v3 = vld [vmem:[%s15620_s7 + $0x2f0] sm:$0xf] }
 0x105   :  { %v1506_v4 = vld [vmem:[%s15620_s7 + $0x2e4] sm:$0xf]  ;;  %1501 = vst [vmem:[#allocation5 + $0x2dc] sm:$0xff] %v1500_v2   ;;  %1505 = vst [vmem:[#allocation5 + $0x2e4] sm:$0xf] %v1504_v3  ;;  %v1516_v9 = vld [vmem:[%s15620_s7 + $0x2fc] sm:$0xff]  }
 0x106   :  { %1507 = vst [vmem:[#allocation5 + $0x2e8] sm:$0xf] %v1506_v4  ;;  %v1508_v5 = vld [vmem:[%s15620_s7 + $0x2f4] sm:$0xf]  ;;  %v1510_v6 = vld [vmem:[%s15620_s7 + $0x2e8] sm:$0xf] }
 0x107   :  { %v1512_v7 = vld [vmem:[%s15620_s7 + $0x2f8] sm:$0xf]  ;;  %1509 = vst [vmem:[#allocation5 + $0x2ec] sm:$0xf] %v1508_v5  ;;  %1511 = vst [vmem:[#allocation5 + $0x2f0] sm:$0xf] %v1510_v6 }
 0x108   :  { %1513 = vst [vmem:[#allocation5 + $0x2f4] sm:$0xf] %v1512_v7  ;;  %v1514_v8 = vld [vmem:[%s15620_s7 + $0x2ec] sm:$0xf]  ;;  %v1520_v10 = vld [vmem:[%s15620_s7 + $0x310] sm:$0xf] }
 0x109   :  { %1515 = vst [vmem:[#allocation5 + $0x2f8] sm:$0xf] %v1514_v8  ;;  %1517 = vst [vmem:[#allocation5 + $0x2fc] sm:$0xff] %v1516_v9   ;;  %v1522_v11 = vld [vmem:[%s15620_s7 + $0x304] sm:$0xf]  ;;  %v1532_v16 = vld [vmem:[%s15620_s7 + $0x31c] sm:$0xff]  }
 0x10a   :  { %1521 = vst [vmem:[#allocation5 + $0x304] sm:$0xf] %v1520_v10  ;;  %v1524_v12 = vld [vmem:[%s15620_s7 + $0x314] sm:$0xf]  ;;  %v1526_v13 = vld [vmem:[%s15620_s7 + $0x308] sm:$0xf] }
 0x10b   :  { %1523 = vst [vmem:[#allocation5 + $0x308] sm:$0xf] %v1522_v11  ;;  %1525 = vst [vmem:[#allocation5 + $0x30c] sm:$0xf] %v1524_v12  ;;  %v1528_v14 = vld [vmem:[%s15620_s7 + $0x318] sm:$0xf] }
 0x10c   :  { %1527 = vst [vmem:[#allocation5 + $0x310] sm:$0xf] %v1526_v13  ;;  %v1530_v15 = vld [vmem:[%s15620_s7 + $0x30c] sm:$0xf]  ;;  %1529 = vst [vmem:[#allocation5 + $0x314] sm:$0xf] %v1528_v14 }
 0x10d   :  { %1531 = vst [vmem:[#allocation5 + $0x318] sm:$0xf] %v1530_v15  ;;  %1533 = vst [vmem:[#allocation5 + $0x31c] sm:$0xff] %v1532_v16   ;;  %v1536_v17 = vld [vmem:[%s15620_s7 + $0x330] sm:$0xf]  ;;  %v1548_v23 = vld [vmem:[%s15620_s7 + $0x33c] sm:$0xff]  }
 0x10e   :  { %v1538_v18 = vld [vmem:[%s15620_s7 + $0x324] sm:$0xf]  ;;  %v1540_v19 = vld [vmem:[%s15620_s7 + $0x334] sm:$0xf]  ;;  %1537 = vst [vmem:[#allocation5 + $0x324] sm:$0xf] %v1536_v17 }
 0x10f   :  { %1539 = vst [vmem:[#allocation5 + $0x328] sm:$0xf] %v1538_v18  ;;  %1541 = vst [vmem:[#allocation5 + $0x32c] sm:$0xf] %v1540_v19  ;;  %v1542_v20 = vld [vmem:[%s15620_s7 + $0x328] sm:$0xf] }
 0x110   :  { %v1544_v21 = vld [vmem:[%s15620_s7 + $0x338] sm:$0xf]  ;;  %v1546_v22 = vld [vmem:[%s15620_s7 + $0x32c] sm:$0xf]  ;;  %1543 = vst [vmem:[#allocation5 + $0x330] sm:$0xf] %v1542_v20 }
 0x111   :  { %1545 = vst [vmem:[#allocation5 + $0x334] sm:$0xf] %v1544_v21  ;;  %1547 = vst [vmem:[#allocation5 + $0x338] sm:$0xf] %v1546_v22  ;;  %v1552_v24 = vld [vmem:[%s15620_s7 + $0x350] sm:$0xf] }
 0x112   :  { %v1554_v25 = vld [vmem:[%s15620_s7 + $0x344] sm:$0xf]  ;;  %1549 = vst [vmem:[#allocation5 + $0x33c] sm:$0xff] %v1548_v23   ;;  %1553 = vst [vmem:[#allocation5 + $0x344] sm:$0xf] %v1552_v24  ;;  %v1564_v30 = vld [vmem:[%s15620_s7 + $0x35c] sm:$0xff]  }
 0x113   :  { %1555 = vst [vmem:[#allocation5 + $0x348] sm:$0xf] %v1554_v25  ;;  %v1556_v26 = vld [vmem:[%s15620_s7 + $0x354] sm:$0xf]  ;;  %v1558_v27 = vld [vmem:[%s15620_s7 + $0x348] sm:$0xf] }
 0x114   :  { %v1560_v28 = vld [vmem:[%s15620_s7 + $0x358] sm:$0xf]  ;;  %1557 = vst [vmem:[#allocation5 + $0x34c] sm:$0xf] %v1556_v26  ;;  %1559 = vst [vmem:[#allocation5 + $0x350] sm:$0xf] %v1558_v27 }
 0x115   :  { %1561 = vst [vmem:[#allocation5 + $0x354] sm:$0xf] %v1560_v28  ;;  %v1562_v29 = vld [vmem:[%s15620_s7 + $0x34c] sm:$0xf]  ;;  %v1568_v31 = vld [vmem:[%s15620_s7 + $0x370] sm:$0xf] }
 0x116   :  { %1563 = vst [vmem:[#allocation5 + $0x358] sm:$0xf] %v1562_v29  ;;  %1565 = vst [vmem:[#allocation5 + $0x35c] sm:$0xff] %v1564_v30   ;;  %v1570_v32 = vld [vmem:[%s15620_s7 + $0x364] sm:$0xf]  ;;  %v1580_v37 = vld [vmem:[%s15620_s7 + $0x37c] sm:$0xff]  }
 0x117   :  { %1569 = vst [vmem:[#allocation5 + $0x364] sm:$0xf] %v1568_v31  ;;  %v1572_v33 = vld [vmem:[%s15620_s7 + $0x374] sm:$0xf]  ;;  %v1574_v34 = vld [vmem:[%s15620_s7 + $0x368] sm:$0xf] }
 0x118   :  { %1571 = vst [vmem:[#allocation5 + $0x368] sm:$0xf] %v1570_v32  ;;  %1573 = vst [vmem:[#allocation5 + $0x36c] sm:$0xf] %v1572_v33  ;;  %v1576_v35 = vld [vmem:[%s15620_s7 + $0x378] sm:$0xf] }
 0x119   :  { %1575 = vst [vmem:[#allocation5 + $0x370] sm:$0xf] %v1574_v34  ;;  %v1578_v36 = vld [vmem:[%s15620_s7 + $0x36c] sm:$0xf]  ;;  %1577 = vst [vmem:[#allocation5 + $0x374] sm:$0xf] %v1576_v35 }
 0x11a   :  { %1579 = vst [vmem:[#allocation5 + $0x378] sm:$0xf] %v1578_v36  ;;  %1581 = vst [vmem:[#allocation5 + $0x37c] sm:$0xff] %v1580_v37   ;;  %v1584_v38 = vld [vmem:[%s15620_s7 + $0x390] sm:$0xf]  ;;  %v1596_v44 = vld [vmem:[%s15620_s7 + $0x39c] sm:$0xff]  }
 0x11b   :  { %v1586_v39 = vld [vmem:[%s15620_s7 + $0x384] sm:$0xf]  ;;  %v1588_v40 = vld [vmem:[%s15620_s7 + $0x394] sm:$0xf]  ;;  %1585 = vst [vmem:[#allocation5 + $0x384] sm:$0xf] %v1584_v38 }
 0x11c   :  { %1587 = vst [vmem:[#allocation5 + $0x388] sm:$0xf] %v1586_v39  ;;  %1589 = vst [vmem:[#allocation5 + $0x38c] sm:$0xf] %v1588_v40  ;;  %v1590_v41 = vld [vmem:[%s15620_s7 + $0x388] sm:$0xf] }
 0x11d   :  { %v1592_v42 = vld [vmem:[%s15620_s7 + $0x398] sm:$0xf]  ;;  %v1594_v43 = vld [vmem:[%s15620_s7 + $0x38c] sm:$0xf]  ;;  %1591 = vst [vmem:[#allocation5 + $0x390] sm:$0xf] %v1590_v41 }
 0x11e   :  { %1593 = vst [vmem:[#allocation5 + $0x394] sm:$0xf] %v1592_v42  ;;  %1595 = vst [vmem:[#allocation5 + $0x398] sm:$0xf] %v1594_v43  ;;  %v1600_v45 = vld [vmem:[%s15620_s7 + $0x3b0] sm:$0xf] }
 0x11f   :  { %v1602_v46 = vld [vmem:[%s15620_s7 + $0x3a4] sm:$0xf]  ;;  %1597 = vst [vmem:[#allocation5 + $0x39c] sm:$0xff] %v1596_v44   ;;  %1601 = vst [vmem:[#allocation5 + $0x3a4] sm:$0xf] %v1600_v45  ;;  %v1612_v51 = vld [vmem:[%s15620_s7 + $0x3bc] sm:$0xff]  }
 0x120   :  { %1603 = vst [vmem:[#allocation5 + $0x3a8] sm:$0xf] %v1602_v46  ;;  %v1604_v47 = vld [vmem:[%s15620_s7 + $0x3b4] sm:$0xf]  ;;  %v1606_v48 = vld [vmem:[%s15620_s7 + $0x3a8] sm:$0xf] }
 0x121   :  { %v1608_v49 = vld [vmem:[%s15620_s7 + $0x3b8] sm:$0xf]  ;;  %1605 = vst [vmem:[#allocation5 + $0x3ac] sm:$0xf] %v1604_v47  ;;  %1607 = vst [vmem:[#allocation5 + $0x3b0] sm:$0xf] %v1606_v48 }
 0x122   :  { %1609 = vst [vmem:[#allocation5 + $0x3b4] sm:$0xf] %v1608_v49  ;;  %v1610_v50 = vld [vmem:[%s15620_s7 + $0x3ac] sm:$0xf]  ;;  %v1616_v52 = vld [vmem:[%s15620_s7 + $0x3d0] sm:$0xf] }
 0x123   :  { %1611 = vst [vmem:[#allocation5 + $0x3b8] sm:$0xf] %v1610_v50  ;;  %1613 = vst [vmem:[#allocation5 + $0x3bc] sm:$0xff] %v1612_v51   ;;  %v1618_v53 = vld [vmem:[%s15620_s7 + $0x3c4] sm:$0xf]  ;;  %v1628_v58 = vld [vmem:[%s15620_s7 + $0x3dc] sm:$0xff]  }
 0x124   :  { %1617 = vst [vmem:[#allocation5 + $0x3c4] sm:$0xf] %v1616_v52  ;;  %v1620_v54 = vld [vmem:[%s15620_s7 + $0x3d4] sm:$0xf]  ;;  %v1622_v55 = vld [vmem:[%s15620_s7 + $0x3c8] sm:$0xf] }
 0x125   :  { %1619 = vst [vmem:[#allocation5 + $0x3c8] sm:$0xf] %v1618_v53  ;;  %1621 = vst [vmem:[#allocation5 + $0x3cc] sm:$0xf] %v1620_v54  ;;  %v1624_v56 = vld [vmem:[%s15620_s7 + $0x3d8] sm:$0xf] }
 0x126   :  { %1623 = vst [vmem:[#allocation5 + $0x3d0] sm:$0xf] %v1622_v55  ;;  %v1626_v57 = vld [vmem:[%s15620_s7 + $0x3cc] sm:$0xf]  ;;  %1625 = vst [vmem:[#allocation5 + $0x3d4] sm:$0xf] %v1624_v56 }
 0x127   :  { %1627 = vst [vmem:[#allocation5 + $0x3d8] sm:$0xf] %v1626_v57  ;;  %1629 = vst [vmem:[#allocation5 + $0x3dc] sm:$0xff] %v1628_v58   ;;  %v1632_v59 = vld [vmem:[%s15620_s7 + $0x3f0] sm:$0xf]  ;;  %v1644_v1 = vld [vmem:[%s15620_s7 + $0x3fc] sm:$0xff]  }
 0x128   :  { %v1634_v60 = vld [vmem:[%s15620_s7 + $0x3e4] sm:$0xf]  ;;  %v1636_v61 = vld [vmem:[%s15620_s7 + $0x3f4] sm:$0xf]  ;;  %1633 = vst [vmem:[#allocation5 + $0x3e4] sm:$0xf] %v1632_v59 }
 0x129   :  { %1635 = vst [vmem:[#allocation5 + $0x3e8] sm:$0xf] %v1634_v60  ;;  %1637 = vst [vmem:[#allocation5 + $0x3ec] sm:$0xf] %v1636_v61  ;;  %v1638_v62 = vld [vmem:[%s15620_s7 + $0x3e8] sm:$0xf] }
 0x12a   :  { %v1640_v63 = vld [vmem:[%s15620_s7 + $0x3f8] sm:$0xf]  ;;  %v1642_v0 = vld [vmem:[%s15620_s7 + $0x3ec] sm:$0xf]  ;;  %1639 = vst [vmem:[#allocation5 + $0x3f0] sm:$0xf] %v1638_v62 }
 0x12b   :  { %1641 = vst [vmem:[#allocation5 + $0x3f4] sm:$0xf] %v1640_v63  ;;  %1643 = vst [vmem:[#allocation5 + $0x3f8] sm:$0xf] %v1642_v0  ;;  %v1648_v2 = vld [vmem:[%s15620_s7 + $0x410] sm:$0xf] }
 0x12c   :  { %v1650_v3 = vld [vmem:[%s15620_s7 + $0x404] sm:$0xf]  ;;  %1645 = vst [vmem:[#allocation5 + $0x3fc] sm:$0xff] %v1644_v1   ;;  %1649 = vst [vmem:[#allocation5 + $0x404] sm:$0xf] %v1648_v2  ;;  %v1660_v8 = vld [vmem:[%s15620_s7 + $0x41c] sm:$0xff]  }
 0x12d   :  { %1651 = vst [vmem:[#allocation5 + $0x408] sm:$0xf] %v1650_v3  ;;  %v1652_v4 = vld [vmem:[%s15620_s7 + $0x414] sm:$0xf]  ;;  %v1654_v5 = vld [vmem:[%s15620_s7 + $0x408] sm:$0xf] }
 0x12e   :  { %v1656_v6 = vld [vmem:[%s15620_s7 + $0x418] sm:$0xf]  ;;  %1653 = vst [vmem:[#allocation5 + $0x40c] sm:$0xf] %v1652_v4  ;;  %1655 = vst [vmem:[#allocation5 + $0x410] sm:$0xf] %v1654_v5 }
 0x12f   :  { %1657 = vst [vmem:[#allocation5 + $0x414] sm:$0xf] %v1656_v6  ;;  %v1658_v7 = vld [vmem:[%s15620_s7 + $0x40c] sm:$0xf]  ;;  %v1664_v9 = vld [vmem:[%s15620_s7 + $0x430] sm:$0xf] }
 0x130   :  { %1659 = vst [vmem:[#allocation5 + $0x418] sm:$0xf] %v1658_v7  ;;  %1661 = vst [vmem:[#allocation5 + $0x41c] sm:$0xff] %v1660_v8   ;;  %v1666_v10 = vld [vmem:[%s15620_s7 + $0x424] sm:$0xf]  ;;  %v1676_v15 = vld [vmem:[%s15620_s7 + $0x43c] sm:$0xff]  }
 0x131   :  { %1665 = vst [vmem:[#allocation5 + $0x424] sm:$0xf] %v1664_v9  ;;  %v1668_v11 = vld [vmem:[%s15620_s7 + $0x434] sm:$0xf]  ;;  %v1670_v12 = vld [vmem:[%s15620_s7 + $0x428] sm:$0xf] }
 0x132   :  { %1667 = vst [vmem:[#allocation5 + $0x428] sm:$0xf] %v1666_v10  ;;  %1669 = vst [vmem:[#allocation5 + $0x42c] sm:$0xf] %v1668_v11  ;;  %v1672_v13 = vld [vmem:[%s15620_s7 + $0x438] sm:$0xf] }
 0x133   :  { %1671 = vst [vmem:[#allocation5 + $0x430] sm:$0xf] %v1670_v12  ;;  %v1674_v14 = vld [vmem:[%s15620_s7 + $0x42c] sm:$0xf]  ;;  %1673 = vst [vmem:[#allocation5 + $0x434] sm:$0xf] %v1672_v13 }
 0x134   :  { %1675 = vst [vmem:[#allocation5 + $0x438] sm:$0xf] %v1674_v14  ;;  %1677 = vst [vmem:[#allocation5 + $0x43c] sm:$0xff] %v1676_v15   ;;  %v1680_v16 = vld [vmem:[%s15620_s7 + $0x450] sm:$0xf]  ;;  %v1692_v22 = vld [vmem:[%s15620_s7 + $0x45c] sm:$0xff]  }
 0x135   :  { %v1682_v17 = vld [vmem:[%s15620_s7 + $0x444] sm:$0xf]  ;;  %v1684_v18 = vld [vmem:[%s15620_s7 + $0x454] sm:$0xf]  ;;  %1681 = vst [vmem:[#allocation5 + $0x444] sm:$0xf] %v1680_v16 }
 0x136   :  { %1683 = vst [vmem:[#allocation5 + $0x448] sm:$0xf] %v1682_v17  ;;  %1685 = vst [vmem:[#allocation5 + $0x44c] sm:$0xf] %v1684_v18  ;;  %v1686_v19 = vld [vmem:[%s15620_s7 + $0x448] sm:$0xf] }
 0x137   :  { %v1688_v20 = vld [vmem:[%s15620_s7 + $0x458] sm:$0xf]  ;;  %v1690_v21 = vld [vmem:[%s15620_s7 + $0x44c] sm:$0xf]  ;;  %1687 = vst [vmem:[#allocation5 + $0x450] sm:$0xf] %v1686_v19 }
 0x138   :  { %1689 = vst [vmem:[#allocation5 + $0x454] sm:$0xf] %v1688_v20  ;;  %1691 = vst [vmem:[#allocation5 + $0x458] sm:$0xf] %v1690_v21  ;;  %v1696_v23 = vld [vmem:[%s15620_s7 + $0x470] sm:$0xf] }
 0x139   :  { %v1698_v24 = vld [vmem:[%s15620_s7 + $0x464] sm:$0xf]  ;;  %1693 = vst [vmem:[#allocation5 + $0x45c] sm:$0xff] %v1692_v22   ;;  %1697 = vst [vmem:[#allocation5 + $0x464] sm:$0xf] %v1696_v23  ;;  %v1708_v29 = vld [vmem:[%s15620_s7 + $0x47c] sm:$0xff]  }
 0x13a   :  { %1699 = vst [vmem:[#allocation5 + $0x468] sm:$0xf] %v1698_v24  ;;  %v1700_v25 = vld [vmem:[%s15620_s7 + $0x474] sm:$0xf]  ;;  %v1702_v26 = vld [vmem:[%s15620_s7 + $0x468] sm:$0xf] }
 0x13b   :  { %v1704_v27 = vld [vmem:[%s15620_s7 + $0x478] sm:$0xf]  ;;  %1701 = vst [vmem:[#allocation5 + $0x46c] sm:$0xf] %v1700_v25  ;;  %1703 = vst [vmem:[#allocation5 + $0x470] sm:$0xf] %v1702_v26 }
 0x13c   :  { %1705 = vst [vmem:[#allocation5 + $0x474] sm:$0xf] %v1704_v27  ;;  %v1706_v28 = vld [vmem:[%s15620_s7 + $0x46c] sm:$0xf]  ;;  %v1712_v30 = vld [vmem:[%s15620_s7 + $0x490] sm:$0xf] }
 0x13d   :  { %1707 = vst [vmem:[#allocation5 + $0x478] sm:$0xf] %v1706_v28  ;;  %1709 = vst [vmem:[#allocation5 + $0x47c] sm:$0xff] %v1708_v29   ;;  %v1714_v31 = vld [vmem:[%s15620_s7 + $0x484] sm:$0xf]  ;;  %v1724_v36 = vld [vmem:[%s15620_s7 + $0x49c] sm:$0xff]  }
 0x13e   :  { %1713 = vst [vmem:[#allocation5 + $0x484] sm:$0xf] %v1712_v30  ;;  %v1716_v32 = vld [vmem:[%s15620_s7 + $0x494] sm:$0xf]  ;;  %v1718_v33 = vld [vmem:[%s15620_s7 + $0x488] sm:$0xf] }
 0x13f   :  { %1715 = vst [vmem:[#allocation5 + $0x488] sm:$0xf] %v1714_v31  ;;  %1717 = vst [vmem:[#allocation5 + $0x48c] sm:$0xf] %v1716_v32  ;;  %v1720_v34 = vld [vmem:[%s15620_s7 + $0x498] sm:$0xf] }
 0x140   :  { %1719 = vst [vmem:[#allocation5 + $0x490] sm:$0xf] %v1718_v33  ;;  %v1722_v35 = vld [vmem:[%s15620_s7 + $0x48c] sm:$0xf]  ;;  %1721 = vst [vmem:[#allocation5 + $0x494] sm:$0xf] %v1720_v34 }
 0x141   :  { %1723 = vst [vmem:[#allocation5 + $0x498] sm:$0xf] %v1722_v35  ;;  %1725 = vst [vmem:[#allocation5 + $0x49c] sm:$0xff] %v1724_v36   ;;  %v1728_v37 = vld [vmem:[%s15620_s7 + $0x4b0] sm:$0xf]  ;;  %v1740_v43 = vld [vmem:[%s15620_s7 + $0x4bc] sm:$0xff]  }
 0x142   :  { %v1730_v38 = vld [vmem:[%s15620_s7 + $0x4a4] sm:$0xf]  ;;  %v1732_v39 = vld [vmem:[%s15620_s7 + $0x4b4] sm:$0xf]  ;;  %1729 = vst [vmem:[#allocation5 + $0x4a4] sm:$0xf] %v1728_v37 }
 0x143   :  { %1731 = vst [vmem:[#allocation5 + $0x4a8] sm:$0xf] %v1730_v38  ;;  %1733 = vst [vmem:[#allocation5 + $0x4ac] sm:$0xf] %v1732_v39  ;;  %v1734_v40 = vld [vmem:[%s15620_s7 + $0x4a8] sm:$0xf] }
 0x144   :  { %v1736_v41 = vld [vmem:[%s15620_s7 + $0x4b8] sm:$0xf]  ;;  %v1738_v42 = vld [vmem:[%s15620_s7 + $0x4ac] sm:$0xf]  ;;  %1735 = vst [vmem:[#allocation5 + $0x4b0] sm:$0xf] %v1734_v40 }
 0x145   :  { %1737 = vst [vmem:[#allocation5 + $0x4b4] sm:$0xf] %v1736_v41  ;;  %1739 = vst [vmem:[#allocation5 + $0x4b8] sm:$0xf] %v1738_v42  ;;  %v1744_v44 = vld [vmem:[%s15620_s7 + $0x4d0] sm:$0xf] }
 0x146   :  { %v1746_v45 = vld [vmem:[%s15620_s7 + $0x4c4] sm:$0xf]  ;;  %1741 = vst [vmem:[#allocation5 + $0x4bc] sm:$0xff] %v1740_v43   ;;  %1745 = vst [vmem:[#allocation5 + $0x4c4] sm:$0xf] %v1744_v44  ;;  %v1756_v50 = vld [vmem:[%s15620_s7 + $0x4dc] sm:$0xff]  }
 0x147   :  { %1747 = vst [vmem:[#allocation5 + $0x4c8] sm:$0xf] %v1746_v45  ;;  %v1748_v46 = vld [vmem:[%s15620_s7 + $0x4d4] sm:$0xf]  ;;  %v1750_v47 = vld [vmem:[%s15620_s7 + $0x4c8] sm:$0xf] }
 0x148   :  { %v1752_v48 = vld [vmem:[%s15620_s7 + $0x4d8] sm:$0xf]  ;;  %1749 = vst [vmem:[#allocation5 + $0x4cc] sm:$0xf] %v1748_v46  ;;  %1751 = vst [vmem:[#allocation5 + $0x4d0] sm:$0xf] %v1750_v47 }
 0x149   :  { %1753 = vst [vmem:[#allocation5 + $0x4d4] sm:$0xf] %v1752_v48  ;;  %v1754_v49 = vld [vmem:[%s15620_s7 + $0x4cc] sm:$0xf]  ;;  %v1760_v51 = vld [vmem:[%s15620_s7 + $0x4f0] sm:$0xf] }
 0x14a   :  { %1755 = vst [vmem:[#allocation5 + $0x4d8] sm:$0xf] %v1754_v49  ;;  %1757 = vst [vmem:[#allocation5 + $0x4dc] sm:$0xff] %v1756_v50   ;;  %v1762_v52 = vld [vmem:[%s15620_s7 + $0x4e4] sm:$0xf]  ;;  %v1772_v57 = vld [vmem:[%s15620_s7 + $0x4fc] sm:$0xff]  }
 0x14b   :  { %1761 = vst [vmem:[#allocation5 + $0x4e4] sm:$0xf] %v1760_v51  ;;  %v1764_v53 = vld [vmem:[%s15620_s7 + $0x4f4] sm:$0xf]  ;;  %v1766_v54 = vld [vmem:[%s15620_s7 + $0x4e8] sm:$0xf] }
 0x14c   :  { %1763 = vst [vmem:[#allocation5 + $0x4e8] sm:$0xf] %v1762_v52  ;;  %1765 = vst [vmem:[#allocation5 + $0x4ec] sm:$0xf] %v1764_v53  ;;  %v1768_v55 = vld [vmem:[%s15620_s7 + $0x4f8] sm:$0xf] }
 0x14d   :  { %1767 = vst [vmem:[#allocation5 + $0x4f0] sm:$0xf] %v1766_v54  ;;  %v1770_v56 = vld [vmem:[%s15620_s7 + $0x4ec] sm:$0xf]  ;;  %1769 = vst [vmem:[#allocation5 + $0x4f4] sm:$0xf] %v1768_v55 }
 0x14e   :  { %1771 = vst [vmem:[#allocation5 + $0x4f8] sm:$0xf] %v1770_v56  ;;  %1773 = vst [vmem:[#allocation5 + $0x4fc] sm:$0xff] %v1772_v57   ;;  %v1776_v58 = vld [vmem:[%s15620_s7 + $0x510] sm:$0xf]  ;;  %v1788_v0 = vld [vmem:[%s15620_s7 + $0x51c] sm:$0xff]  }
 0x14f   :  { %v1778_v59 = vld [vmem:[%s15620_s7 + $0x504] sm:$0xf]  ;;  %v1780_v60 = vld [vmem:[%s15620_s7 + $0x514] sm:$0xf]  ;;  %1777 = vst [vmem:[#allocation5 + $0x504] sm:$0xf] %v1776_v58 }
 0x150   :  { %1779 = vst [vmem:[#allocation5 + $0x508] sm:$0xf] %v1778_v59  ;;  %1781 = vst [vmem:[#allocation5 + $0x50c] sm:$0xf] %v1780_v60  ;;  %v1782_v61 = vld [vmem:[%s15620_s7 + $0x508] sm:$0xf] }
 0x151   :  { %v1784_v62 = vld [vmem:[%s15620_s7 + $0x518] sm:$0xf]  ;;  %v1786_v63 = vld [vmem:[%s15620_s7 + $0x50c] sm:$0xf]  ;;  %1783 = vst [vmem:[#allocation5 + $0x510] sm:$0xf] %v1782_v61 }
 0x152   :  { %1785 = vst [vmem:[#allocation5 + $0x514] sm:$0xf] %v1784_v62  ;;  %1787 = vst [vmem:[#allocation5 + $0x518] sm:$0xf] %v1786_v63  ;;  %v1792_v1 = vld [vmem:[%s15620_s7 + $0x530] sm:$0xf] }
 0x153   :  { %v1794_v2 = vld [vmem:[%s15620_s7 + $0x524] sm:$0xf]  ;;  %1789 = vst [vmem:[#allocation5 + $0x51c] sm:$0xff] %v1788_v0   ;;  %1793 = vst [vmem:[#allocation5 + $0x524] sm:$0xf] %v1792_v1  ;;  %v1804_v7 = vld [vmem:[%s15620_s7 + $0x53c] sm:$0xff]  }
 0x154   :  { %1795 = vst [vmem:[#allocation5 + $0x528] sm:$0xf] %v1794_v2  ;;  %v1796_v3 = vld [vmem:[%s15620_s7 + $0x534] sm:$0xf]  ;;  %v1798_v4 = vld [vmem:[%s15620_s7 + $0x528] sm:$0xf] }
 0x155   :  { %v1800_v5 = vld [vmem:[%s15620_s7 + $0x538] sm:$0xf]  ;;  %1797 = vst [vmem:[#allocation5 + $0x52c] sm:$0xf] %v1796_v3  ;;  %1799 = vst [vmem:[#allocation5 + $0x530] sm:$0xf] %v1798_v4 }
 0x156   :  { %1801 = vst [vmem:[#allocation5 + $0x534] sm:$0xf] %v1800_v5  ;;  %v1802_v6 = vld [vmem:[%s15620_s7 + $0x52c] sm:$0xf]  ;;  %v1808_v8 = vld [vmem:[%s15620_s7 + $0x550] sm:$0xf] }
 0x157   :  { %1803 = vst [vmem:[#allocation5 + $0x538] sm:$0xf] %v1802_v6  ;;  %1805 = vst [vmem:[#allocation5 + $0x53c] sm:$0xff] %v1804_v7   ;;  %v1810_v9 = vld [vmem:[%s15620_s7 + $0x544] sm:$0xf]  ;;  %v1820_v14 = vld [vmem:[%s15620_s7 + $0x55c] sm:$0xff]  }
 0x158   :  { %1809 = vst [vmem:[#allocation5 + $0x544] sm:$0xf] %v1808_v8  ;;  %v1812_v10 = vld [vmem:[%s15620_s7 + $0x554] sm:$0xf]  ;;  %v1814_v11 = vld [vmem:[%s15620_s7 + $0x548] sm:$0xf] }
 0x159   :  { %1811 = vst [vmem:[#allocation5 + $0x548] sm:$0xf] %v1810_v9  ;;  %1813 = vst [vmem:[#allocation5 + $0x54c] sm:$0xf] %v1812_v10  ;;  %v1816_v12 = vld [vmem:[%s15620_s7 + $0x558] sm:$0xf] }
 0x15a   :  { %1815 = vst [vmem:[#allocation5 + $0x550] sm:$0xf] %v1814_v11  ;;  %v1818_v13 = vld [vmem:[%s15620_s7 + $0x54c] sm:$0xf]  ;;  %1817 = vst [vmem:[#allocation5 + $0x554] sm:$0xf] %v1816_v12 }
 0x15b   :  { %1819 = vst [vmem:[#allocation5 + $0x558] sm:$0xf] %v1818_v13  ;;  %1821 = vst [vmem:[#allocation5 + $0x55c] sm:$0xff] %v1820_v14   ;;  %v1824_v15 = vld [vmem:[%s15620_s7 + $0x570] sm:$0xf]  ;;  %v1836_v21 = vld [vmem:[%s15620_s7 + $0x57c] sm:$0xff]  }
 0x15c   :  { %v1826_v16 = vld [vmem:[%s15620_s7 + $0x564] sm:$0xf]  ;;  %v1828_v17 = vld [vmem:[%s15620_s7 + $0x574] sm:$0xf]  ;;  %1825 = vst [vmem:[#allocation5 + $0x564] sm:$0xf] %v1824_v15 }
 0x15d   :  { %1827 = vst [vmem:[#allocation5 + $0x568] sm:$0xf] %v1826_v16  ;;  %1829 = vst [vmem:[#allocation5 + $0x56c] sm:$0xf] %v1828_v17  ;;  %v1830_v18 = vld [vmem:[%s15620_s7 + $0x568] sm:$0xf] }
 0x15e   :  { %v1832_v19 = vld [vmem:[%s15620_s7 + $0x578] sm:$0xf]  ;;  %v1834_v20 = vld [vmem:[%s15620_s7 + $0x56c] sm:$0xf]  ;;  %1831 = vst [vmem:[#allocation5 + $0x570] sm:$0xf] %v1830_v18 }
 0x15f   :  { %1833 = vst [vmem:[#allocation5 + $0x574] sm:$0xf] %v1832_v19  ;;  %1835 = vst [vmem:[#allocation5 + $0x578] sm:$0xf] %v1834_v20  ;;  %v1840_v22 = vld [vmem:[%s15620_s7 + $0x590] sm:$0xf] }
 0x160   :  { %v1842_v23 = vld [vmem:[%s15620_s7 + $0x584] sm:$0xf]  ;;  %1837 = vst [vmem:[#allocation5 + $0x57c] sm:$0xff] %v1836_v21   ;;  %1841 = vst [vmem:[#allocation5 + $0x584] sm:$0xf] %v1840_v22  ;;  %v1852_v28 = vld [vmem:[%s15620_s7 + $0x59c] sm:$0xff]  }
 0x161   :  { %1843 = vst [vmem:[#allocation5 + $0x588] sm:$0xf] %v1842_v23  ;;  %v1844_v24 = vld [vmem:[%s15620_s7 + $0x594] sm:$0xf]  ;;  %v1846_v25 = vld [vmem:[%s15620_s7 + $0x588] sm:$0xf] }
 0x162   :  { %v1848_v26 = vld [vmem:[%s15620_s7 + $0x598] sm:$0xf]  ;;  %1845 = vst [vmem:[#allocation5 + $0x58c] sm:$0xf] %v1844_v24  ;;  %1847 = vst [vmem:[#allocation5 + $0x590] sm:$0xf] %v1846_v25 }
 0x163   :  { %1849 = vst [vmem:[#allocation5 + $0x594] sm:$0xf] %v1848_v26  ;;  %v1850_v27 = vld [vmem:[%s15620_s7 + $0x58c] sm:$0xf]  ;;  %v1856_v29 = vld [vmem:[%s15620_s7 + $0x5b0] sm:$0xf] }
 0x164   :  { %1851 = vst [vmem:[#allocation5 + $0x598] sm:$0xf] %v1850_v27  ;;  %1853 = vst [vmem:[#allocation5 + $0x59c] sm:$0xff] %v1852_v28   ;;  %v1858_v30 = vld [vmem:[%s15620_s7 + $0x5a4] sm:$0xf]  ;;  %v1868_v35 = vld [vmem:[%s15620_s7 + $0x5bc] sm:$0xff]  }
 0x165   :  { %1857 = vst [vmem:[#allocation5 + $0x5a4] sm:$0xf] %v1856_v29  ;;  %v1860_v31 = vld [vmem:[%s15620_s7 + $0x5b4] sm:$0xf]  ;;  %v1862_v32 = vld [vmem:[%s15620_s7 + $0x5a8] sm:$0xf] }
 0x166   :  { %1859 = vst [vmem:[#allocation5 + $0x5a8] sm:$0xf] %v1858_v30  ;;  %1861 = vst [vmem:[#allocation5 + $0x5ac] sm:$0xf] %v1860_v31  ;;  %v1864_v33 = vld [vmem:[%s15620_s7 + $0x5b8] sm:$0xf] }
 0x167   :  { %1863 = vst [vmem:[#allocation5 + $0x5b0] sm:$0xf] %v1862_v32  ;;  %v1866_v34 = vld [vmem:[%s15620_s7 + $0x5ac] sm:$0xf]  ;;  %1865 = vst [vmem:[#allocation5 + $0x5b4] sm:$0xf] %v1864_v33 }
 0x168   :  { %1867 = vst [vmem:[#allocation5 + $0x5b8] sm:$0xf] %v1866_v34  ;;  %1869 = vst [vmem:[#allocation5 + $0x5bc] sm:$0xff] %v1868_v35   ;;  %v1872_v36 = vld [vmem:[%s15620_s7 + $0x5d0] sm:$0xf]  ;;  %v1884_v42 = vld [vmem:[%s15620_s7 + $0x5dc] sm:$0xff]  }
 0x169   :  { %v1874_v37 = vld [vmem:[%s15620_s7 + $0x5c4] sm:$0xf]  ;;  %v1876_v38 = vld [vmem:[%s15620_s7 + $0x5d4] sm:$0xf]  ;;  %1873 = vst [vmem:[#allocation5 + $0x5c4] sm:$0xf] %v1872_v36 }
 0x16a   :  { %1875 = vst [vmem:[#allocation5 + $0x5c8] sm:$0xf] %v1874_v37  ;;  %1877 = vst [vmem:[#allocation5 + $0x5cc] sm:$0xf] %v1876_v38  ;;  %v1878_v39 = vld [vmem:[%s15620_s7 + $0x5c8] sm:$0xf] }
 0x16b   :  { %v1880_v40 = vld [vmem:[%s15620_s7 + $0x5d8] sm:$0xf]  ;;  %v1882_v41 = vld [vmem:[%s15620_s7 + $0x5cc] sm:$0xf]  ;;  %1879 = vst [vmem:[#allocation5 + $0x5d0] sm:$0xf] %v1878_v39 }
 0x16c   :  { %1881 = vst [vmem:[#allocation5 + $0x5d4] sm:$0xf] %v1880_v40  ;;  %1883 = vst [vmem:[#allocation5 + $0x5d8] sm:$0xf] %v1882_v41  ;;  %v1888_v43 = vld [vmem:[%s15620_s7 + $0x5f0] sm:$0xf] }
 0x16d   :  { %v1890_v44 = vld [vmem:[%s15620_s7 + $0x5e4] sm:$0xf]  ;;  %1885 = vst [vmem:[#allocation5 + $0x5dc] sm:$0xff] %v1884_v42   ;;  %1889 = vst [vmem:[#allocation5 + $0x5e4] sm:$0xf] %v1888_v43 }
 0x16e   :  { %1891 = vst [vmem:[#allocation5 + $0x5e8] sm:$0xf] %v1890_v44  ;;  %v1892_v45 = vld [vmem:[%s15620_s7 + $0x5f4] sm:$0xf]  ;;  %v1894_v46 = vld [vmem:[%s15620_s7 + $0x5e8] sm:$0xf] }
 0x16f   :  { %v1896_v47 = vld [vmem:[%s15620_s7 + $0x5f8] sm:$0xf]  ;;  %1893 = vst [vmem:[#allocation5 + $0x5ec] sm:$0xf] %v1892_v45  ;;  %1895 = vst [vmem:[#allocation5 + $0x5f0] sm:$0xf] %v1894_v46 }
 0x170   :  { %1897 = vst [vmem:[#allocation5 + $0x5f4] sm:$0xf] %v1896_v47  ;;  %v1898_v48 = vld [vmem:[%s15620_s7 + $0x5ec] sm:$0xf]  ;;  %v1900_v49 = vld [vmem:[%s15620_s7 + $0x5fc] sm:$0xf] }
 0x171   :  { %1899 = vst [vmem:[#allocation5 + $0x5f8] sm:$0xf] %v1898_v48  ;;  %1901 = vst [vmem:[#allocation5 + $0x5fc] sm:$0xf] %v1900_v49 }
 0x172   :  { %2700 = vsyncadd [#allocation9 + $0x1], 24576  ;;  %s2706_s20 = sld [smem:[#allocation0]]   ;;  %s11899_s1 = smov [#allocation6]   ;;  %vm7025_vm0 = vcmask 1046528   ;;  %vm7699_vm1 = vcmask 1045504  }
 0x173   :  { %s2714_s18 = sshll.u32 %s11899_s1, 4  ;;  %s11900_s21 = smov 512   ;;  %s2715_s18 = int_to_ptr.vmem [resolvable:$true] %s2714_s18 }
 0x174   :  { %2718 = sst [smem:[#allocation17]] %s11900_s21  ;;  %s11901_s22 = smov 4  }
 0x175   :  { %2720 = sst [smem:[#allocation17 + $0x1]] %s11900_s21  ;;  %s11902_s23 = smov 64  }
 0x176   :  { %2722 = sst [smem:[#allocation17 + $0x2]] %s11901_s22  ;;  %s11903_s25 = smov 128  }
 0x177   :  { %2724 = sst [smem:[#allocation17 + $0x3]] %s11902_s23  ;;  %s11904_s28 = smov 2  }
 0x178   :  { %s11319_s24 = sshll.u32 %s2706_s20, 26  ;;  %2726 = sst [smem:[#allocation17 + $0x4]] %s11903_s25 }
 0x179   :  { %s11320_s26 = sadd.s32 134217728, %s11319_s24  ;;  %2728 = sst [smem:[#allocation17 + $0x5]] %s11904_s28 }
 0x17a   :  { %2730 = sst [smem:[#allocation17 + $0x6]] %s11897_s27  ;;  %s11905_s7 = smov [#allocation9 + $0x2]  }
 0x17b   :  { %2732 = sst [smem:[#allocation17 + $0x7]] %s11902_s23  ;;  %s11906_s29 = smov [#allocation16]  }
 0x17c   :  { %2734 = sst [smem:[#allocation17 + $0x8]] %s11901_s22 }
 0x17d   :  { %2736 = dma.general %s15621_s8, 16384, %s2715_s18, %s11905_s7, %s11906_s29, [#allocation17], %s11320_s26, 0  }
 0x17e   :  { %v2755_v50 = vld [vmem:[%s15622_s9] sm:$0xf]  ;;  %v2757_v51 = vld [vmem:[%s15622_s9 + $0x8] sm:$0xf]  ;;  %v2759_v52 = vld [vmem:[%s15622_s9 + $0x4] sm:$0xf] }
 0x17f   :  { %2756 = vst [vmem:[#allocation7] sm:$0xf] %v2755_v50  ;;  %2758 = vst [vmem:[#allocation7 + $0x4] sm:$0xf] %v2757_v51  ;;  %v2761_v53 = vld [vmem:[%s15622_s9 + $0xc] sm:$0xff]   ;;  %v2769_v56 = vld [vmem:[%s15622_s9 + $0x1c] sm:$0xff]  }
 0x180   :  { %2760 = vst [vmem:[#allocation7 + $0x8] sm:$0xf] %v2759_v52  ;;  %v2765_v54 = vld [vmem:[%s15622_s9 + $0x18] sm:$0xf]  ;;  %v2767_v55 = vld [vmem:[%s15622_s9 + $0x14] sm:$0xf] }
 0x181   :  { %2762 = vst [vmem:[#allocation7 + $0xc] sm:$0xff] %v2761_v53   ;;  %2766 = vst [vmem:[#allocation7 + $0x14] sm:$0xf] %v2765_v54  ;;  %v2773_v57 = vld [vmem:[%s15622_s9 + $0x28] sm:$0xf]  ;;  %v2777_v59 = vld [vmem:[%s15622_s9 + $0x2c] sm:$0xff]  }
 0x182   :  { %2768 = vst [vmem:[#allocation7 + $0x18] sm:$0xf] %v2767_v55  ;;  %v2775_v58 = vld [vmem:[%s15622_s9 + $0x24] sm:$0xf]  ;;  %2770 = vst [vmem:[#allocation7 + $0x1c] sm:$0xff] %v2769_v56   ;;  %v2785_v62 = vld [vmem:[%s15622_s9 + $0x3c] sm:$0xff]  }
 0x183   :  { %2774 = vst [vmem:[#allocation7 + $0x24] sm:$0xf] %v2773_v57  ;;  %2776 = vst [vmem:[#allocation7 + $0x28] sm:$0xf] %v2775_v58  ;;  %v2781_v60 = vld [vmem:[%s15622_s9 + $0x38] sm:$0xf] }
 0x184   :  { %v2783_v61 = vld [vmem:[%s15622_s9 + $0x34] sm:$0xf]  ;;  %2778 = vst [vmem:[#allocation7 + $0x2c] sm:$0xff] %v2777_v59   ;;  %2782 = vst [vmem:[#allocation7 + $0x34] sm:$0xf] %v2781_v60  ;;  %v2793_v1 = vld [vmem:[%s15622_s9 + $0x4c] sm:$0xff]  }
 0x185   :  { %2784 = vst [vmem:[#allocation7 + $0x38] sm:$0xf] %v2783_v61  ;;  %v2789_v63 = vld [vmem:[%s15622_s9 + $0x48] sm:$0xf]  ;;  %v2791_v0 = vld [vmem:[%s15622_s9 + $0x44] sm:$0xf] }
 0x186   :  { %2786 = vst [vmem:[#allocation7 + $0x3c] sm:$0xff] %v2785_v62   ;;  %2790 = vst [vmem:[#allocation7 + $0x44] sm:$0xf] %v2789_v63  ;;  %v2797_v2 = vld [vmem:[%s15622_s9 + $0x58] sm:$0xf]  ;;  %v2801_v4 = vld [vmem:[%s15622_s9 + $0x5c] sm:$0xff]  }
 0x187   :  { %2792 = vst [vmem:[#allocation7 + $0x48] sm:$0xf] %v2791_v0  ;;  %v2799_v3 = vld [vmem:[%s15622_s9 + $0x54] sm:$0xf]  ;;  %2794 = vst [vmem:[#allocation7 + $0x4c] sm:$0xff] %v2793_v1   ;;  %v2809_v7 = vld [vmem:[%s15622_s9 + $0x6c] sm:$0xff]  }
 0x188   :  { %2798 = vst [vmem:[#allocation7 + $0x54] sm:$0xf] %v2797_v2  ;;  %2800 = vst [vmem:[#allocation7 + $0x58] sm:$0xf] %v2799_v3  ;;  %v2805_v5 = vld [vmem:[%s15622_s9 + $0x68] sm:$0xf] }
 0x189   :  { %v2807_v6 = vld [vmem:[%s15622_s9 + $0x64] sm:$0xf]  ;;  %2802 = vst [vmem:[#allocation7 + $0x5c] sm:$0xff] %v2801_v4   ;;  %2806 = vst [vmem:[#allocation7 + $0x64] sm:$0xf] %v2805_v5  ;;  %v2817_v10 = vld [vmem:[%s15622_s9 + $0x7c] sm:$0xff]  }
 0x18a   :  { %2808 = vst [vmem:[#allocation7 + $0x68] sm:$0xf] %v2807_v6  ;;  %v2813_v8 = vld [vmem:[%s15622_s9 + $0x78] sm:$0xf]  ;;  %v2815_v9 = vld [vmem:[%s15622_s9 + $0x74] sm:$0xf] }
 0x18b   :  { %2810 = vst [vmem:[#allocation7 + $0x6c] sm:$0xff] %v2809_v7   ;;  %2814 = vst [vmem:[#allocation7 + $0x74] sm:$0xf] %v2813_v8  ;;  %v2821_v11 = vld [vmem:[%s15622_s9 + $0x88] sm:$0xf]  ;;  %v2825_v13 = vld [vmem:[%s15622_s9 + $0x8c] sm:$0xff]  }
 0x18c   :  { %2816 = vst [vmem:[#allocation7 + $0x78] sm:$0xf] %v2815_v9  ;;  %v2823_v12 = vld [vmem:[%s15622_s9 + $0x84] sm:$0xf]  ;;  %2818 = vst [vmem:[#allocation7 + $0x7c] sm:$0xff] %v2817_v10   ;;  %v2833_v16 = vld [vmem:[%s15622_s9 + $0x9c] sm:$0xff]  }
 0x18d   :  { %2822 = vst [vmem:[#allocation7 + $0x84] sm:$0xf] %v2821_v11  ;;  %2824 = vst [vmem:[#allocation7 + $0x88] sm:$0xf] %v2823_v12  ;;  %v2829_v14 = vld [vmem:[%s15622_s9 + $0x98] sm:$0xf] }
 0x18e   :  { %v2831_v15 = vld [vmem:[%s15622_s9 + $0x94] sm:$0xf]  ;;  %2826 = vst [vmem:[#allocation7 + $0x8c] sm:$0xff] %v2825_v13   ;;  %2830 = vst [vmem:[#allocation7 + $0x94] sm:$0xf] %v2829_v14  ;;  %v2841_v19 = vld [vmem:[%s15622_s9 + $0xac] sm:$0xff]  }
 0x18f   :  { %2832 = vst [vmem:[#allocation7 + $0x98] sm:$0xf] %v2831_v15  ;;  %v2837_v17 = vld [vmem:[%s15622_s9 + $0xa8] sm:$0xf]  ;;  %v2839_v18 = vld [vmem:[%s15622_s9 + $0xa4] sm:$0xf] }
 0x190   :  { %2834 = vst [vmem:[#allocation7 + $0x9c] sm:$0xff] %v2833_v16   ;;  %2838 = vst [vmem:[#allocation7 + $0xa4] sm:$0xf] %v2837_v17  ;;  %v2845_v20 = vld [vmem:[%s15622_s9 + $0xb8] sm:$0xf]  ;;  %v2849_v22 = vld [vmem:[%s15622_s9 + $0xbc] sm:$0xff]  }
 0x191   :  { %2840 = vst [vmem:[#allocation7 + $0xa8] sm:$0xf] %v2839_v18  ;;  %v2847_v21 = vld [vmem:[%s15622_s9 + $0xb4] sm:$0xf]  ;;  %2842 = vst [vmem:[#allocation7 + $0xac] sm:$0xff] %v2841_v19   ;;  %v2857_v25 = vld [vmem:[%s15622_s9 + $0xcc] sm:$0xff]  }
 0x192   :  { %2846 = vst [vmem:[#allocation7 + $0xb4] sm:$0xf] %v2845_v20  ;;  %2848 = vst [vmem:[#allocation7 + $0xb8] sm:$0xf] %v2847_v21  ;;  %v2853_v23 = vld [vmem:[%s15622_s9 + $0xc8] sm:$0xf] }
 0x193   :  { %v2855_v24 = vld [vmem:[%s15622_s9 + $0xc4] sm:$0xf]  ;;  %2850 = vst [vmem:[#allocation7 + $0xbc] sm:$0xff] %v2849_v22   ;;  %2854 = vst [vmem:[#allocation7 + $0xc4] sm:$0xf] %v2853_v23  ;;  %v2865_v28 = vld [vmem:[%s15622_s9 + $0xdc] sm:$0xff]  }
 0x194   :  { %2856 = vst [vmem:[#allocation7 + $0xc8] sm:$0xf] %v2855_v24  ;;  %v2861_v26 = vld [vmem:[%s15622_s9 + $0xd8] sm:$0xf]  ;;  %v2863_v27 = vld [vmem:[%s15622_s9 + $0xd4] sm:$0xf] }
 0x195   :  { %2858 = vst [vmem:[#allocation7 + $0xcc] sm:$0xff] %v2857_v25   ;;  %2862 = vst [vmem:[#allocation7 + $0xd4] sm:$0xf] %v2861_v26  ;;  %v2869_v29 = vld [vmem:[%s15622_s9 + $0xe8] sm:$0xf]  ;;  %v2873_v31 = vld [vmem:[%s15622_s9 + $0xec] sm:$0xff]  }
 0x196   :  { %2864 = vst [vmem:[#allocation7 + $0xd8] sm:$0xf] %v2863_v27  ;;  %v2871_v30 = vld [vmem:[%s15622_s9 + $0xe4] sm:$0xf]  ;;  %2866 = vst [vmem:[#allocation7 + $0xdc] sm:$0xff] %v2865_v28   ;;  %v2881_v34 = vld [vmem:[%s15622_s9 + $0xfc] sm:$0xff]  }
 0x197   :  { %2870 = vst [vmem:[#allocation7 + $0xe4] sm:$0xf] %v2869_v29  ;;  %2872 = vst [vmem:[#allocation7 + $0xe8] sm:$0xf] %v2871_v30  ;;  %v2877_v32 = vld [vmem:[%s15622_s9 + $0xf8] sm:$0xf] }
 0x198   :  { %v2879_v33 = vld [vmem:[%s15622_s9 + $0xf4] sm:$0xf]  ;;  %2874 = vst [vmem:[#allocation7 + $0xec] sm:$0xff] %v2873_v31   ;;  %2878 = vst [vmem:[#allocation7 + $0xf4] sm:$0xf] %v2877_v32  ;;  %v2889_v37 = vld [vmem:[%s15622_s9 + $0x10c] sm:$0xff]  }
 0x199   :  { %2880 = vst [vmem:[#allocation7 + $0xf8] sm:$0xf] %v2879_v33  ;;  %v2885_v35 = vld [vmem:[%s15622_s9 + $0x108] sm:$0xf]  ;;  %v2887_v36 = vld [vmem:[%s15622_s9 + $0x104] sm:$0xf] }
 0x19a   :  { %2882 = vst [vmem:[#allocation7 + $0xfc] sm:$0xff] %v2881_v34   ;;  %2886 = vst [vmem:[#allocation7 + $0x104] sm:$0xf] %v2885_v35  ;;  %v2893_v38 = vld [vmem:[%s15622_s9 + $0x118] sm:$0xf]  ;;  %v2897_v40 = vld [vmem:[%s15622_s9 + $0x11c] sm:$0xff]  }
 0x19b   :  { %2888 = vst [vmem:[#allocation7 + $0x108] sm:$0xf] %v2887_v36  ;;  %v2895_v39 = vld [vmem:[%s15622_s9 + $0x114] sm:$0xf]  ;;  %2890 = vst [vmem:[#allocation7 + $0x10c] sm:$0xff] %v2889_v37   ;;  %v2905_v43 = vld [vmem:[%s15622_s9 + $0x12c] sm:$0xff]  }
 0x19c   :  { %2894 = vst [vmem:[#allocation7 + $0x114] sm:$0xf] %v2893_v38  ;;  %2896 = vst [vmem:[#allocation7 + $0x118] sm:$0xf] %v2895_v39  ;;  %v2901_v41 = vld [vmem:[%s15622_s9 + $0x128] sm:$0xf] }
 0x19d   :  { %v2903_v42 = vld [vmem:[%s15622_s9 + $0x124] sm:$0xf]  ;;  %2898 = vst [vmem:[#allocation7 + $0x11c] sm:$0xff] %v2897_v40   ;;  %2902 = vst [vmem:[#allocation7 + $0x124] sm:$0xf] %v2901_v41  ;;  %v2913_v46 = vld [vmem:[%s15622_s9 + $0x13c] sm:$0xff]  }
 0x19e   :  { %2904 = vst [vmem:[#allocation7 + $0x128] sm:$0xf] %v2903_v42  ;;  %v2909_v44 = vld [vmem:[%s15622_s9 + $0x138] sm:$0xf]  ;;  %v2911_v45 = vld [vmem:[%s15622_s9 + $0x134] sm:$0xf] }
 0x19f   :  { %2906 = vst [vmem:[#allocation7 + $0x12c] sm:$0xff] %v2905_v43   ;;  %2910 = vst [vmem:[#allocation7 + $0x134] sm:$0xf] %v2909_v44  ;;  %v2917_v47 = vld [vmem:[%s15622_s9 + $0x148] sm:$0xf]  ;;  %v2921_v49 = vld [vmem:[%s15622_s9 + $0x14c] sm:$0xff]  }
 0x1a0   :  { %2912 = vst [vmem:[#allocation7 + $0x138] sm:$0xf] %v2911_v45  ;;  %v2919_v48 = vld [vmem:[%s15622_s9 + $0x144] sm:$0xf]  ;;  %2914 = vst [vmem:[#allocation7 + $0x13c] sm:$0xff] %v2913_v46   ;;  %v2929_v52 = vld [vmem:[%s15622_s9 + $0x15c] sm:$0xff]  }
 0x1a1   :  { %2918 = vst [vmem:[#allocation7 + $0x144] sm:$0xf] %v2917_v47  ;;  %2920 = vst [vmem:[#allocation7 + $0x148] sm:$0xf] %v2919_v48  ;;  %v2925_v50 = vld [vmem:[%s15622_s9 + $0x158] sm:$0xf] }
 0x1a2   :  { %v2927_v51 = vld [vmem:[%s15622_s9 + $0x154] sm:$0xf]  ;;  %2922 = vst [vmem:[#allocation7 + $0x14c] sm:$0xff] %v2921_v49   ;;  %2926 = vst [vmem:[#allocation7 + $0x154] sm:$0xf] %v2925_v50  ;;  %v2937_v55 = vld [vmem:[%s15622_s9 + $0x16c] sm:$0xff]  }
 0x1a3   :  { %2928 = vst [vmem:[#allocation7 + $0x158] sm:$0xf] %v2927_v51  ;;  %v2933_v53 = vld [vmem:[%s15622_s9 + $0x168] sm:$0xf]  ;;  %v2935_v54 = vld [vmem:[%s15622_s9 + $0x164] sm:$0xf] }
 0x1a4   :  { %2930 = vst [vmem:[#allocation7 + $0x15c] sm:$0xff] %v2929_v52   ;;  %2934 = vst [vmem:[#allocation7 + $0x164] sm:$0xf] %v2933_v53  ;;  %v2941_v56 = vld [vmem:[%s15622_s9 + $0x178] sm:$0xf]  ;;  %v2945_v58 = vld [vmem:[%s15622_s9 + $0x17c] sm:$0xff]  }
 0x1a5   :  { %2936 = vst [vmem:[#allocation7 + $0x168] sm:$0xf] %v2935_v54  ;;  %v2943_v57 = vld [vmem:[%s15622_s9 + $0x174] sm:$0xf]  ;;  %2938 = vst [vmem:[#allocation7 + $0x16c] sm:$0xff] %v2937_v55   ;;  %v2953_v61 = vld [vmem:[%s15622_s9 + $0x18c] sm:$0xff]  }
 0x1a6   :  { %2942 = vst [vmem:[#allocation7 + $0x174] sm:$0xf] %v2941_v56  ;;  %2944 = vst [vmem:[#allocation7 + $0x178] sm:$0xf] %v2943_v57  ;;  %v2949_v59 = vld [vmem:[%s15622_s9 + $0x188] sm:$0xf] }
 0x1a7   :  { %v2951_v60 = vld [vmem:[%s15622_s9 + $0x184] sm:$0xf]  ;;  %2946 = vst [vmem:[#allocation7 + $0x17c] sm:$0xff] %v2945_v58   ;;  %2950 = vst [vmem:[#allocation7 + $0x184] sm:$0xf] %v2949_v59  ;;  %v2961_v0 = vld [vmem:[%s15622_s9 + $0x19c] sm:$0xff]  }
 0x1a8   :  { %2952 = vst [vmem:[#allocation7 + $0x188] sm:$0xf] %v2951_v60  ;;  %v2957_v62 = vld [vmem:[%s15622_s9 + $0x198] sm:$0xf]  ;;  %v2959_v63 = vld [vmem:[%s15622_s9 + $0x194] sm:$0xf] }
 0x1a9   :  { %2954 = vst [vmem:[#allocation7 + $0x18c] sm:$0xff] %v2953_v61   ;;  %2958 = vst [vmem:[#allocation7 + $0x194] sm:$0xf] %v2957_v62  ;;  %v2965_v1 = vld [vmem:[%s15622_s9 + $0x1a8] sm:$0xf]  ;;  %v2969_v3 = vld [vmem:[%s15622_s9 + $0x1ac] sm:$0xff]  }
 0x1aa   :  { %2960 = vst [vmem:[#allocation7 + $0x198] sm:$0xf] %v2959_v63  ;;  %v2967_v2 = vld [vmem:[%s15622_s9 + $0x1a4] sm:$0xf]  ;;  %2962 = vst [vmem:[#allocation7 + $0x19c] sm:$0xff] %v2961_v0   ;;  %v2977_v6 = vld [vmem:[%s15622_s9 + $0x1bc] sm:$0xff]  }
 0x1ab   :  { %2966 = vst [vmem:[#allocation7 + $0x1a4] sm:$0xf] %v2965_v1  ;;  %2968 = vst [vmem:[#allocation7 + $0x1a8] sm:$0xf] %v2967_v2  ;;  %v2973_v4 = vld [vmem:[%s15622_s9 + $0x1b8] sm:$0xf] }
 0x1ac   :  { %v2975_v5 = vld [vmem:[%s15622_s9 + $0x1b4] sm:$0xf]  ;;  %2970 = vst [vmem:[#allocation7 + $0x1ac] sm:$0xff] %v2969_v3   ;;  %2974 = vst [vmem:[#allocation7 + $0x1b4] sm:$0xf] %v2973_v4  ;;  %v2985_v9 = vld [vmem:[%s15622_s9 + $0x1cc] sm:$0xff]  }
 0x1ad   :  { %2976 = vst [vmem:[#allocation7 + $0x1b8] sm:$0xf] %v2975_v5  ;;  %v2981_v7 = vld [vmem:[%s15622_s9 + $0x1c8] sm:$0xf]  ;;  %v2983_v8 = vld [vmem:[%s15622_s9 + $0x1c4] sm:$0xf] }
 0x1ae   :  { %2978 = vst [vmem:[#allocation7 + $0x1bc] sm:$0xff] %v2977_v6   ;;  %2982 = vst [vmem:[#allocation7 + $0x1c4] sm:$0xf] %v2981_v7  ;;  %v2989_v10 = vld [vmem:[%s15622_s9 + $0x1d8] sm:$0xf]  ;;  %v2993_v12 = vld [vmem:[%s15622_s9 + $0x1dc] sm:$0xff]  }
 0x1af   :  { %2984 = vst [vmem:[#allocation7 + $0x1c8] sm:$0xf] %v2983_v8  ;;  %v2991_v11 = vld [vmem:[%s15622_s9 + $0x1d4] sm:$0xf]  ;;  %2986 = vst [vmem:[#allocation7 + $0x1cc] sm:$0xff] %v2985_v9   ;;  %v3001_v15 = vld [vmem:[%s15622_s9 + $0x1ec] sm:$0xff]  }
 0x1b0   :  { %2990 = vst [vmem:[#allocation7 + $0x1d4] sm:$0xf] %v2989_v10  ;;  %2992 = vst [vmem:[#allocation7 + $0x1d8] sm:$0xf] %v2991_v11  ;;  %v2997_v13 = vld [vmem:[%s15622_s9 + $0x1e8] sm:$0xf] }
 0x1b1   :  { %v2999_v14 = vld [vmem:[%s15622_s9 + $0x1e4] sm:$0xf]  ;;  %2994 = vst [vmem:[#allocation7 + $0x1dc] sm:$0xff] %v2993_v12   ;;  %2998 = vst [vmem:[#allocation7 + $0x1e4] sm:$0xf] %v2997_v13  ;;  %v3009_v18 = vld [vmem:[%s15622_s9 + $0x1fc] sm:$0xff]  }
 0x1b2   :  { %3000 = vst [vmem:[#allocation7 + $0x1e8] sm:$0xf] %v2999_v14  ;;  %v3005_v16 = vld [vmem:[%s15622_s9 + $0x1f8] sm:$0xf]  ;;  %v3007_v17 = vld [vmem:[%s15622_s9 + $0x1f4] sm:$0xf] }
 0x1b3   :  { %3002 = vst [vmem:[#allocation7 + $0x1ec] sm:$0xff] %v3001_v15   ;;  %3006 = vst [vmem:[#allocation7 + $0x1f4] sm:$0xf] %v3005_v16  ;;  %v3013_v19 = vld [vmem:[%s15622_s9 + $0x208] sm:$0xf]  ;;  %v3017_v21 = vld [vmem:[%s15622_s9 + $0x20c] sm:$0xff]  }
 0x1b4   :  { %3008 = vst [vmem:[#allocation7 + $0x1f8] sm:$0xf] %v3007_v17  ;;  %v3015_v20 = vld [vmem:[%s15622_s9 + $0x204] sm:$0xf]  ;;  %3010 = vst [vmem:[#allocation7 + $0x1fc] sm:$0xff] %v3009_v18   ;;  %v3025_v24 = vld [vmem:[%s15622_s9 + $0x21c] sm:$0xff]  }
 0x1b5   :  { %3014 = vst [vmem:[#allocation7 + $0x204] sm:$0xf] %v3013_v19  ;;  %3016 = vst [vmem:[#allocation7 + $0x208] sm:$0xf] %v3015_v20  ;;  %v3021_v22 = vld [vmem:[%s15622_s9 + $0x218] sm:$0xf] }
 0x1b6   :  { %v3023_v23 = vld [vmem:[%s15622_s9 + $0x214] sm:$0xf]  ;;  %3018 = vst [vmem:[#allocation7 + $0x20c] sm:$0xff] %v3017_v21   ;;  %3022 = vst [vmem:[#allocation7 + $0x214] sm:$0xf] %v3021_v22  ;;  %v3033_v27 = vld [vmem:[%s15622_s9 + $0x22c] sm:$0xff]  }
 0x1b7   :  { %3024 = vst [vmem:[#allocation7 + $0x218] sm:$0xf] %v3023_v23  ;;  %v3029_v25 = vld [vmem:[%s15622_s9 + $0x228] sm:$0xf]  ;;  %v3031_v26 = vld [vmem:[%s15622_s9 + $0x224] sm:$0xf] }
 0x1b8   :  { %3026 = vst [vmem:[#allocation7 + $0x21c] sm:$0xff] %v3025_v24   ;;  %3030 = vst [vmem:[#allocation7 + $0x224] sm:$0xf] %v3029_v25  ;;  %v3037_v28 = vld [vmem:[%s15622_s9 + $0x238] sm:$0xf]  ;;  %v3041_v30 = vld [vmem:[%s15622_s9 + $0x23c] sm:$0xff]  }
 0x1b9   :  { %3032 = vst [vmem:[#allocation7 + $0x228] sm:$0xf] %v3031_v26  ;;  %v3039_v29 = vld [vmem:[%s15622_s9 + $0x234] sm:$0xf]  ;;  %3034 = vst [vmem:[#allocation7 + $0x22c] sm:$0xff] %v3033_v27   ;;  %v3049_v33 = vld [vmem:[%s15622_s9 + $0x24c] sm:$0xff]  }
 0x1ba   :  { %3038 = vst [vmem:[#allocation7 + $0x234] sm:$0xf] %v3037_v28  ;;  %3040 = vst [vmem:[#allocation7 + $0x238] sm:$0xf] %v3039_v29  ;;  %v3045_v31 = vld [vmem:[%s15622_s9 + $0x248] sm:$0xf] }
 0x1bb   :  { %v3047_v32 = vld [vmem:[%s15622_s9 + $0x244] sm:$0xf]  ;;  %3042 = vst [vmem:[#allocation7 + $0x23c] sm:$0xff] %v3041_v30   ;;  %3046 = vst [vmem:[#allocation7 + $0x244] sm:$0xf] %v3045_v31  ;;  %v3057_v36 = vld [vmem:[%s15622_s9 + $0x25c] sm:$0xff]  }
 0x1bc   :  { %3048 = vst [vmem:[#allocation7 + $0x248] sm:$0xf] %v3047_v32  ;;  %v3053_v34 = vld [vmem:[%s15622_s9 + $0x258] sm:$0xf]  ;;  %v3055_v35 = vld [vmem:[%s15622_s9 + $0x254] sm:$0xf] }
 0x1bd   :  { %3050 = vst [vmem:[#allocation7 + $0x24c] sm:$0xff] %v3049_v33   ;;  %3054 = vst [vmem:[#allocation7 + $0x254] sm:$0xf] %v3053_v34  ;;  %v3061_v37 = vld [vmem:[%s15622_s9 + $0x268] sm:$0xf]  ;;  %v3065_v39 = vld [vmem:[%s15622_s9 + $0x26c] sm:$0xff]  }
 0x1be   :  { %3056 = vst [vmem:[#allocation7 + $0x258] sm:$0xf] %v3055_v35  ;;  %v3063_v38 = vld [vmem:[%s15622_s9 + $0x264] sm:$0xf]  ;;  %3058 = vst [vmem:[#allocation7 + $0x25c] sm:$0xff] %v3057_v36   ;;  %v3073_v42 = vld [vmem:[%s15622_s9 + $0x27c] sm:$0xff]  }
 0x1bf   :  { %3062 = vst [vmem:[#allocation7 + $0x264] sm:$0xf] %v3061_v37  ;;  %3064 = vst [vmem:[#allocation7 + $0x268] sm:$0xf] %v3063_v38  ;;  %v3069_v40 = vld [vmem:[%s15622_s9 + $0x278] sm:$0xf] }
 0x1c0   :  { %v3071_v41 = vld [vmem:[%s15622_s9 + $0x274] sm:$0xf]  ;;  %3066 = vst [vmem:[#allocation7 + $0x26c] sm:$0xff] %v3065_v39   ;;  %3070 = vst [vmem:[#allocation7 + $0x274] sm:$0xf] %v3069_v40  ;;  %v3081_v45 = vld [vmem:[%s15622_s9 + $0x28c] sm:$0xff]  }
 0x1c1   :  { %3072 = vst [vmem:[#allocation7 + $0x278] sm:$0xf] %v3071_v41  ;;  %v3077_v43 = vld [vmem:[%s15622_s9 + $0x288] sm:$0xf]  ;;  %v3079_v44 = vld [vmem:[%s15622_s9 + $0x284] sm:$0xf] }
 0x1c2   :  { %3074 = vst [vmem:[#allocation7 + $0x27c] sm:$0xff] %v3073_v42   ;;  %3078 = vst [vmem:[#allocation7 + $0x284] sm:$0xf] %v3077_v43  ;;  %v3085_v46 = vld [vmem:[%s15622_s9 + $0x298] sm:$0xf]  ;;  %v3089_v48 = vld [vmem:[%s15622_s9 + $0x29c] sm:$0xff]  }
 0x1c3   :  { %3080 = vst [vmem:[#allocation7 + $0x288] sm:$0xf] %v3079_v44  ;;  %v3087_v47 = vld [vmem:[%s15622_s9 + $0x294] sm:$0xf]  ;;  %3082 = vst [vmem:[#allocation7 + $0x28c] sm:$0xff] %v3081_v45   ;;  %v3097_v51 = vld [vmem:[%s15622_s9 + $0x2ac] sm:$0xff]  }
 0x1c4   :  { %3086 = vst [vmem:[#allocation7 + $0x294] sm:$0xf] %v3085_v46  ;;  %3088 = vst [vmem:[#allocation7 + $0x298] sm:$0xf] %v3087_v47  ;;  %v3093_v49 = vld [vmem:[%s15622_s9 + $0x2a8] sm:$0xf] }
 0x1c5   :  { %v3095_v50 = vld [vmem:[%s15622_s9 + $0x2a4] sm:$0xf]  ;;  %3090 = vst [vmem:[#allocation7 + $0x29c] sm:$0xff] %v3089_v48   ;;  %3094 = vst [vmem:[#allocation7 + $0x2a4] sm:$0xf] %v3093_v49  ;;  %v3105_v54 = vld [vmem:[%s15622_s9 + $0x2bc] sm:$0xff]  }
 0x1c6   :  { %3096 = vst [vmem:[#allocation7 + $0x2a8] sm:$0xf] %v3095_v50  ;;  %v3101_v52 = vld [vmem:[%s15622_s9 + $0x2b8] sm:$0xf]  ;;  %v3103_v53 = vld [vmem:[%s15622_s9 + $0x2b4] sm:$0xf] }
 0x1c7   :  { %3098 = vst [vmem:[#allocation7 + $0x2ac] sm:$0xff] %v3097_v51   ;;  %3102 = vst [vmem:[#allocation7 + $0x2b4] sm:$0xf] %v3101_v52  ;;  %v3109_v55 = vld [vmem:[%s15622_s9 + $0x2c8] sm:$0xf]  ;;  %v3113_v57 = vld [vmem:[%s15622_s9 + $0x2cc] sm:$0xff]  }
 0x1c8   :  { %3104 = vst [vmem:[#allocation7 + $0x2b8] sm:$0xf] %v3103_v53  ;;  %v3111_v56 = vld [vmem:[%s15622_s9 + $0x2c4] sm:$0xf]  ;;  %3106 = vst [vmem:[#allocation7 + $0x2bc] sm:$0xff] %v3105_v54   ;;  %v3121_v60 = vld [vmem:[%s15622_s9 + $0x2dc] sm:$0xff]  }
 0x1c9   :  { %3110 = vst [vmem:[#allocation7 + $0x2c4] sm:$0xf] %v3109_v55  ;;  %3112 = vst [vmem:[#allocation7 + $0x2c8] sm:$0xf] %v3111_v56  ;;  %v3117_v58 = vld [vmem:[%s15622_s9 + $0x2d8] sm:$0xf] }
 0x1ca   :  { %v3119_v59 = vld [vmem:[%s15622_s9 + $0x2d4] sm:$0xf]  ;;  %3114 = vst [vmem:[#allocation7 + $0x2cc] sm:$0xff] %v3113_v57   ;;  %3118 = vst [vmem:[#allocation7 + $0x2d4] sm:$0xf] %v3117_v58  ;;  %v3129_v63 = vld [vmem:[%s15622_s9 + $0x2ec] sm:$0xff]  }
 0x1cb   :  { %3120 = vst [vmem:[#allocation7 + $0x2d8] sm:$0xf] %v3119_v59  ;;  %v3125_v61 = vld [vmem:[%s15622_s9 + $0x2e8] sm:$0xf]  ;;  %v3127_v62 = vld [vmem:[%s15622_s9 + $0x2e4] sm:$0xf] }
 0x1cc   :  { %3122 = vst [vmem:[#allocation7 + $0x2dc] sm:$0xff] %v3121_v60   ;;  %3126 = vst [vmem:[#allocation7 + $0x2e4] sm:$0xf] %v3125_v61  ;;  %v3133_v0 = vld [vmem:[%s15622_s9 + $0x2f8] sm:$0xf]  ;;  %v3137_v2 = vld [vmem:[%s15622_s9 + $0x2fc] sm:$0xff]  }
 0x1cd   :  { %3128 = vst [vmem:[#allocation7 + $0x2e8] sm:$0xf] %v3127_v62  ;;  %v3135_v1 = vld [vmem:[%s15622_s9 + $0x2f4] sm:$0xf]  ;;  %3130 = vst [vmem:[#allocation7 + $0x2ec] sm:$0xff] %v3129_v63   ;;  %v3145_v5 = vld [vmem:[%s15622_s9 + $0x30c] sm:$0xff]  }
 0x1ce   :  { %3134 = vst [vmem:[#allocation7 + $0x2f4] sm:$0xf] %v3133_v0  ;;  %3136 = vst [vmem:[#allocation7 + $0x2f8] sm:$0xf] %v3135_v1  ;;  %v3141_v3 = vld [vmem:[%s15622_s9 + $0x308] sm:$0xf] }
 0x1cf   :  { %v3143_v4 = vld [vmem:[%s15622_s9 + $0x304] sm:$0xf]  ;;  %3138 = vst [vmem:[#allocation7 + $0x2fc] sm:$0xff] %v3137_v2   ;;  %3142 = vst [vmem:[#allocation7 + $0x304] sm:$0xf] %v3141_v3  ;;  %v3153_v8 = vld [vmem:[%s15622_s9 + $0x31c] sm:$0xff]  }
 0x1d0   :  { %3144 = vst [vmem:[#allocation7 + $0x308] sm:$0xf] %v3143_v4  ;;  %v3149_v6 = vld [vmem:[%s15622_s9 + $0x318] sm:$0xf]  ;;  %v3151_v7 = vld [vmem:[%s15622_s9 + $0x314] sm:$0xf] }
 0x1d1   :  { %3146 = vst [vmem:[#allocation7 + $0x30c] sm:$0xff] %v3145_v5   ;;  %3150 = vst [vmem:[#allocation7 + $0x314] sm:$0xf] %v3149_v6  ;;  %v3157_v9 = vld [vmem:[%s15622_s9 + $0x328] sm:$0xf]  ;;  %v3161_v11 = vld [vmem:[%s15622_s9 + $0x32c] sm:$0xff]  }
 0x1d2   :  { %3152 = vst [vmem:[#allocation7 + $0x318] sm:$0xf] %v3151_v7  ;;  %v3159_v10 = vld [vmem:[%s15622_s9 + $0x324] sm:$0xf]  ;;  %3154 = vst [vmem:[#allocation7 + $0x31c] sm:$0xff] %v3153_v8   ;;  %v3169_v14 = vld [vmem:[%s15622_s9 + $0x33c] sm:$0xff]  }
 0x1d3   :  { %3158 = vst [vmem:[#allocation7 + $0x324] sm:$0xf] %v3157_v9  ;;  %3160 = vst [vmem:[#allocation7 + $0x328] sm:$0xf] %v3159_v10  ;;  %v3165_v12 = vld [vmem:[%s15622_s9 + $0x338] sm:$0xf] }
 0x1d4   :  { %v3167_v13 = vld [vmem:[%s15622_s9 + $0x334] sm:$0xf]  ;;  %3162 = vst [vmem:[#allocation7 + $0x32c] sm:$0xff] %v3161_v11   ;;  %3166 = vst [vmem:[#allocation7 + $0x334] sm:$0xf] %v3165_v12  ;;  %v3177_v17 = vld [vmem:[%s15622_s9 + $0x34c] sm:$0xff]  }
 0x1d5   :  { %3168 = vst [vmem:[#allocation7 + $0x338] sm:$0xf] %v3167_v13  ;;  %v3173_v15 = vld [vmem:[%s15622_s9 + $0x348] sm:$0xf]  ;;  %v3175_v16 = vld [vmem:[%s15622_s9 + $0x344] sm:$0xf] }
 0x1d6   :  { %3170 = vst [vmem:[#allocation7 + $0x33c] sm:$0xff] %v3169_v14   ;;  %3174 = vst [vmem:[#allocation7 + $0x344] sm:$0xf] %v3173_v15  ;;  %v3181_v18 = vld [vmem:[%s15622_s9 + $0x358] sm:$0xf]  ;;  %v3185_v20 = vld [vmem:[%s15622_s9 + $0x35c] sm:$0xff]  }
 0x1d7   :  { %3176 = vst [vmem:[#allocation7 + $0x348] sm:$0xf] %v3175_v16  ;;  %v3183_v19 = vld [vmem:[%s15622_s9 + $0x354] sm:$0xf]  ;;  %3178 = vst [vmem:[#allocation7 + $0x34c] sm:$0xff] %v3177_v17   ;;  %v3193_v23 = vld [vmem:[%s15622_s9 + $0x36c] sm:$0xff]  }
 0x1d8   :  { %3182 = vst [vmem:[#allocation7 + $0x354] sm:$0xf] %v3181_v18  ;;  %3184 = vst [vmem:[#allocation7 + $0x358] sm:$0xf] %v3183_v19  ;;  %v3189_v21 = vld [vmem:[%s15622_s9 + $0x368] sm:$0xf] }
 0x1d9   :  { %v3191_v22 = vld [vmem:[%s15622_s9 + $0x364] sm:$0xf]  ;;  %3186 = vst [vmem:[#allocation7 + $0x35c] sm:$0xff] %v3185_v20   ;;  %3190 = vst [vmem:[#allocation7 + $0x364] sm:$0xf] %v3189_v21  ;;  %v3201_v26 = vld [vmem:[%s15622_s9 + $0x37c] sm:$0xff]  }
 0x1da   :  { %3192 = vst [vmem:[#allocation7 + $0x368] sm:$0xf] %v3191_v22  ;;  %v3197_v24 = vld [vmem:[%s15622_s9 + $0x378] sm:$0xf]  ;;  %v3199_v25 = vld [vmem:[%s15622_s9 + $0x374] sm:$0xf] }
 0x1db   :  { %3194 = vst [vmem:[#allocation7 + $0x36c] sm:$0xff] %v3193_v23   ;;  %3198 = vst [vmem:[#allocation7 + $0x374] sm:$0xf] %v3197_v24  ;;  %v3205_v27 = vld [vmem:[%s15622_s9 + $0x388] sm:$0xf]  ;;  %v3209_v29 = vld [vmem:[%s15622_s9 + $0x38c] sm:$0xff]  }
 0x1dc   :  { %3200 = vst [vmem:[#allocation7 + $0x378] sm:$0xf] %v3199_v25  ;;  %v3207_v28 = vld [vmem:[%s15622_s9 + $0x384] sm:$0xf]  ;;  %3202 = vst [vmem:[#allocation7 + $0x37c] sm:$0xff] %v3201_v26   ;;  %v3217_v32 = vld [vmem:[%s15622_s9 + $0x39c] sm:$0xff]  }
 0x1dd   :  { %3206 = vst [vmem:[#allocation7 + $0x384] sm:$0xf] %v3205_v27  ;;  %3208 = vst [vmem:[#allocation7 + $0x388] sm:$0xf] %v3207_v28  ;;  %v3213_v30 = vld [vmem:[%s15622_s9 + $0x398] sm:$0xf] }
 0x1de   :  { %v3215_v31 = vld [vmem:[%s15622_s9 + $0x394] sm:$0xf]  ;;  %3210 = vst [vmem:[#allocation7 + $0x38c] sm:$0xff] %v3209_v29   ;;  %3214 = vst [vmem:[#allocation7 + $0x394] sm:$0xf] %v3213_v30  ;;  %v3225_v35 = vld [vmem:[%s15622_s9 + $0x3ac] sm:$0xff]  }
 0x1df   :  { %3216 = vst [vmem:[#allocation7 + $0x398] sm:$0xf] %v3215_v31  ;;  %v3221_v33 = vld [vmem:[%s15622_s9 + $0x3a8] sm:$0xf]  ;;  %v3223_v34 = vld [vmem:[%s15622_s9 + $0x3a4] sm:$0xf] }
 0x1e0   :  { %3218 = vst [vmem:[#allocation7 + $0x39c] sm:$0xff] %v3217_v32   ;;  %3222 = vst [vmem:[#allocation7 + $0x3a4] sm:$0xf] %v3221_v33  ;;  %v3229_v36 = vld [vmem:[%s15622_s9 + $0x3b8] sm:$0xf]  ;;  %v3233_v38 = vld [vmem:[%s15622_s9 + $0x3bc] sm:$0xff]  }
 0x1e1   :  { %3224 = vst [vmem:[#allocation7 + $0x3a8] sm:$0xf] %v3223_v34  ;;  %v3231_v37 = vld [vmem:[%s15622_s9 + $0x3b4] sm:$0xf]  ;;  %3226 = vst [vmem:[#allocation7 + $0x3ac] sm:$0xff] %v3225_v35   ;;  %v3241_v41 = vld [vmem:[%s15622_s9 + $0x3cc] sm:$0xff]  }
 0x1e2   :  { %3230 = vst [vmem:[#allocation7 + $0x3b4] sm:$0xf] %v3229_v36  ;;  %3232 = vst [vmem:[#allocation7 + $0x3b8] sm:$0xf] %v3231_v37  ;;  %v3237_v39 = vld [vmem:[%s15622_s9 + $0x3c8] sm:$0xf] }
 0x1e3   :  { %v3239_v40 = vld [vmem:[%s15622_s9 + $0x3c4] sm:$0xf]  ;;  %3234 = vst [vmem:[#allocation7 + $0x3bc] sm:$0xff] %v3233_v38   ;;  %3238 = vst [vmem:[#allocation7 + $0x3c4] sm:$0xf] %v3237_v39  ;;  %v3249_v44 = vld [vmem:[%s15622_s9 + $0x3dc] sm:$0xff]  }
 0x1e4   :  { %3240 = vst [vmem:[#allocation7 + $0x3c8] sm:$0xf] %v3239_v40  ;;  %v3245_v42 = vld [vmem:[%s15622_s9 + $0x3d8] sm:$0xf]  ;;  %v3247_v43 = vld [vmem:[%s15622_s9 + $0x3d4] sm:$0xf] }
 0x1e5   :  { %3242 = vst [vmem:[#allocation7 + $0x3cc] sm:$0xff] %v3241_v41   ;;  %3246 = vst [vmem:[#allocation7 + $0x3d4] sm:$0xf] %v3245_v42  ;;  %v3253_v45 = vld [vmem:[%s15622_s9 + $0x3e8] sm:$0xf]  ;;  %v3257_v47 = vld [vmem:[%s15622_s9 + $0x3ec] sm:$0xff]  }
 0x1e6   :  { %3248 = vst [vmem:[#allocation7 + $0x3d8] sm:$0xf] %v3247_v43  ;;  %v3255_v46 = vld [vmem:[%s15622_s9 + $0x3e4] sm:$0xf]  ;;  %3250 = vst [vmem:[#allocation7 + $0x3dc] sm:$0xff] %v3249_v44   ;;  %v3265_v50 = vld [vmem:[%s15622_s9 + $0x3fc] sm:$0xff]  }
 0x1e7   :  { %3254 = vst [vmem:[#allocation7 + $0x3e4] sm:$0xf] %v3253_v45  ;;  %3256 = vst [vmem:[#allocation7 + $0x3e8] sm:$0xf] %v3255_v46  ;;  %v3261_v48 = vld [vmem:[%s15622_s9 + $0x3f8] sm:$0xf] }
 0x1e8   :  { %v3263_v49 = vld [vmem:[%s15622_s9 + $0x3f4] sm:$0xf]  ;;  %3258 = vst [vmem:[#allocation7 + $0x3ec] sm:$0xff] %v3257_v47   ;;  %3262 = vst [vmem:[#allocation7 + $0x3f4] sm:$0xf] %v3261_v48  ;;  %v3273_v53 = vld [vmem:[%s15622_s9 + $0x40c] sm:$0xff]  }
 0x1e9   :  { %3264 = vst [vmem:[#allocation7 + $0x3f8] sm:$0xf] %v3263_v49  ;;  %v3269_v51 = vld [vmem:[%s15622_s9 + $0x408] sm:$0xf]  ;;  %v3271_v52 = vld [vmem:[%s15622_s9 + $0x404] sm:$0xf] }
 0x1ea   :  { %3266 = vst [vmem:[#allocation7 + $0x3fc] sm:$0xff] %v3265_v50   ;;  %3270 = vst [vmem:[#allocation7 + $0x404] sm:$0xf] %v3269_v51  ;;  %v3277_v54 = vld [vmem:[%s15622_s9 + $0x418] sm:$0xf]  ;;  %v3281_v56 = vld [vmem:[%s15622_s9 + $0x41c] sm:$0xff]  }
 0x1eb   :  { %3272 = vst [vmem:[#allocation7 + $0x408] sm:$0xf] %v3271_v52  ;;  %v3279_v55 = vld [vmem:[%s15622_s9 + $0x414] sm:$0xf]  ;;  %3274 = vst [vmem:[#allocation7 + $0x40c] sm:$0xff] %v3273_v53   ;;  %v3289_v59 = vld [vmem:[%s15622_s9 + $0x42c] sm:$0xff]  }
 0x1ec   :  { %3278 = vst [vmem:[#allocation7 + $0x414] sm:$0xf] %v3277_v54  ;;  %3280 = vst [vmem:[#allocation7 + $0x418] sm:$0xf] %v3279_v55  ;;  %v3285_v57 = vld [vmem:[%s15622_s9 + $0x428] sm:$0xf] }
 0x1ed   :  { %v3287_v58 = vld [vmem:[%s15622_s9 + $0x424] sm:$0xf]  ;;  %3282 = vst [vmem:[#allocation7 + $0x41c] sm:$0xff] %v3281_v56   ;;  %3286 = vst [vmem:[#allocation7 + $0x424] sm:$0xf] %v3285_v57  ;;  %v3297_v62 = vld [vmem:[%s15622_s9 + $0x43c] sm:$0xff]  }
 0x1ee   :  { %3288 = vst [vmem:[#allocation7 + $0x428] sm:$0xf] %v3287_v58  ;;  %v3293_v60 = vld [vmem:[%s15622_s9 + $0x438] sm:$0xf]  ;;  %v3295_v61 = vld [vmem:[%s15622_s9 + $0x434] sm:$0xf] }
 0x1ef   :  { %3290 = vst [vmem:[#allocation7 + $0x42c] sm:$0xff] %v3289_v59   ;;  %3294 = vst [vmem:[#allocation7 + $0x434] sm:$0xf] %v3293_v60  ;;  %v3301_v63 = vld [vmem:[%s15622_s9 + $0x448] sm:$0xf]  ;;  %v3305_v1 = vld [vmem:[%s15622_s9 + $0x44c] sm:$0xff]  }
 0x1f0   :  { %3296 = vst [vmem:[#allocation7 + $0x438] sm:$0xf] %v3295_v61  ;;  %v3303_v0 = vld [vmem:[%s15622_s9 + $0x444] sm:$0xf]  ;;  %3298 = vst [vmem:[#allocation7 + $0x43c] sm:$0xff] %v3297_v62   ;;  %v3313_v4 = vld [vmem:[%s15622_s9 + $0x45c] sm:$0xff]  }
 0x1f1   :  { %3302 = vst [vmem:[#allocation7 + $0x444] sm:$0xf] %v3301_v63  ;;  %3304 = vst [vmem:[#allocation7 + $0x448] sm:$0xf] %v3303_v0  ;;  %v3309_v2 = vld [vmem:[%s15622_s9 + $0x458] sm:$0xf] }
 0x1f2   :  { %v3311_v3 = vld [vmem:[%s15622_s9 + $0x454] sm:$0xf]  ;;  %3306 = vst [vmem:[#allocation7 + $0x44c] sm:$0xff] %v3305_v1   ;;  %3310 = vst [vmem:[#allocation7 + $0x454] sm:$0xf] %v3309_v2  ;;  %v3321_v7 = vld [vmem:[%s15622_s9 + $0x46c] sm:$0xff]  }
 0x1f3   :  { %3312 = vst [vmem:[#allocation7 + $0x458] sm:$0xf] %v3311_v3  ;;  %v3317_v5 = vld [vmem:[%s15622_s9 + $0x468] sm:$0xf]  ;;  %v3319_v6 = vld [vmem:[%s15622_s9 + $0x464] sm:$0xf] }
 0x1f4   :  { %3314 = vst [vmem:[#allocation7 + $0x45c] sm:$0xff] %v3313_v4   ;;  %3318 = vst [vmem:[#allocation7 + $0x464] sm:$0xf] %v3317_v5  ;;  %v3325_v8 = vld [vmem:[%s15622_s9 + $0x478] sm:$0xf]  ;;  %v3329_v10 = vld [vmem:[%s15622_s9 + $0x47c] sm:$0xff]  }
 0x1f5   :  { %3320 = vst [vmem:[#allocation7 + $0x468] sm:$0xf] %v3319_v6  ;;  %v3327_v9 = vld [vmem:[%s15622_s9 + $0x474] sm:$0xf]  ;;  %3322 = vst [vmem:[#allocation7 + $0x46c] sm:$0xff] %v3321_v7   ;;  %v3337_v13 = vld [vmem:[%s15622_s9 + $0x48c] sm:$0xff]  }
 0x1f6   :  { %3326 = vst [vmem:[#allocation7 + $0x474] sm:$0xf] %v3325_v8  ;;  %3328 = vst [vmem:[#allocation7 + $0x478] sm:$0xf] %v3327_v9  ;;  %v3333_v11 = vld [vmem:[%s15622_s9 + $0x488] sm:$0xf] }
 0x1f7   :  { %v3335_v12 = vld [vmem:[%s15622_s9 + $0x484] sm:$0xf]  ;;  %3330 = vst [vmem:[#allocation7 + $0x47c] sm:$0xff] %v3329_v10   ;;  %3334 = vst [vmem:[#allocation7 + $0x484] sm:$0xf] %v3333_v11  ;;  %v3345_v16 = vld [vmem:[%s15622_s9 + $0x49c] sm:$0xff]  }
 0x1f8   :  { %3336 = vst [vmem:[#allocation7 + $0x488] sm:$0xf] %v3335_v12  ;;  %v3341_v14 = vld [vmem:[%s15622_s9 + $0x498] sm:$0xf]  ;;  %v3343_v15 = vld [vmem:[%s15622_s9 + $0x494] sm:$0xf] }
 0x1f9   :  { %3338 = vst [vmem:[#allocation7 + $0x48c] sm:$0xff] %v3337_v13   ;;  %3342 = vst [vmem:[#allocation7 + $0x494] sm:$0xf] %v3341_v14  ;;  %v3349_v17 = vld [vmem:[%s15622_s9 + $0x4a8] sm:$0xf]  ;;  %v3353_v19 = vld [vmem:[%s15622_s9 + $0x4ac] sm:$0xff]  }
 0x1fa   :  { %3344 = vst [vmem:[#allocation7 + $0x498] sm:$0xf] %v3343_v15  ;;  %v3351_v18 = vld [vmem:[%s15622_s9 + $0x4a4] sm:$0xf]  ;;  %3346 = vst [vmem:[#allocation7 + $0x49c] sm:$0xff] %v3345_v16   ;;  %v3361_v22 = vld [vmem:[%s15622_s9 + $0x4bc] sm:$0xff]  }
 0x1fb   :  { %3350 = vst [vmem:[#allocation7 + $0x4a4] sm:$0xf] %v3349_v17  ;;  %3352 = vst [vmem:[#allocation7 + $0x4a8] sm:$0xf] %v3351_v18  ;;  %v3357_v20 = vld [vmem:[%s15622_s9 + $0x4b8] sm:$0xf] }
 0x1fc   :  { %v3359_v21 = vld [vmem:[%s15622_s9 + $0x4b4] sm:$0xf]  ;;  %3354 = vst [vmem:[#allocation7 + $0x4ac] sm:$0xff] %v3353_v19   ;;  %3358 = vst [vmem:[#allocation7 + $0x4b4] sm:$0xf] %v3357_v20  ;;  %v3369_v25 = vld [vmem:[%s15622_s9 + $0x4cc] sm:$0xff]  }
 0x1fd   :  { %3360 = vst [vmem:[#allocation7 + $0x4b8] sm:$0xf] %v3359_v21  ;;  %v3365_v23 = vld [vmem:[%s15622_s9 + $0x4c8] sm:$0xf]  ;;  %v3367_v24 = vld [vmem:[%s15622_s9 + $0x4c4] sm:$0xf] }
 0x1fe   :  { %3362 = vst [vmem:[#allocation7 + $0x4bc] sm:$0xff] %v3361_v22   ;;  %3366 = vst [vmem:[#allocation7 + $0x4c4] sm:$0xf] %v3365_v23  ;;  %v3373_v26 = vld [vmem:[%s15622_s9 + $0x4d8] sm:$0xf]  ;;  %v3377_v28 = vld [vmem:[%s15622_s9 + $0x4dc] sm:$0xff]  }
 0x1ff   :  { %3368 = vst [vmem:[#allocation7 + $0x4c8] sm:$0xf] %v3367_v24  ;;  %v3375_v27 = vld [vmem:[%s15622_s9 + $0x4d4] sm:$0xf]  ;;  %3370 = vst [vmem:[#allocation7 + $0x4cc] sm:$0xff] %v3369_v25   ;;  %v3385_v31 = vld [vmem:[%s15622_s9 + $0x4ec] sm:$0xff]  }
 0x200   :  { %3374 = vst [vmem:[#allocation7 + $0x4d4] sm:$0xf] %v3373_v26  ;;  %3376 = vst [vmem:[#allocation7 + $0x4d8] sm:$0xf] %v3375_v27  ;;  %v3381_v29 = vld [vmem:[%s15622_s9 + $0x4e8] sm:$0xf] }
 0x201   :  { %v3383_v30 = vld [vmem:[%s15622_s9 + $0x4e4] sm:$0xf]  ;;  %3378 = vst [vmem:[#allocation7 + $0x4dc] sm:$0xff] %v3377_v28   ;;  %3382 = vst [vmem:[#allocation7 + $0x4e4] sm:$0xf] %v3381_v29  ;;  %v3393_v34 = vld [vmem:[%s15622_s9 + $0x4fc] sm:$0xff]  }
 0x202   :  { %3384 = vst [vmem:[#allocation7 + $0x4e8] sm:$0xf] %v3383_v30  ;;  %v3389_v32 = vld [vmem:[%s15622_s9 + $0x4f8] sm:$0xf]  ;;  %v3391_v33 = vld [vmem:[%s15622_s9 + $0x4f4] sm:$0xf] }
 0x203   :  { %3386 = vst [vmem:[#allocation7 + $0x4ec] sm:$0xff] %v3385_v31   ;;  %3390 = vst [vmem:[#allocation7 + $0x4f4] sm:$0xf] %v3389_v32  ;;  %v3397_v35 = vld [vmem:[%s15622_s9 + $0x508] sm:$0xf]  ;;  %v3401_v37 = vld [vmem:[%s15622_s9 + $0x50c] sm:$0xff]  }
 0x204   :  { %3392 = vst [vmem:[#allocation7 + $0x4f8] sm:$0xf] %v3391_v33  ;;  %v3399_v36 = vld [vmem:[%s15622_s9 + $0x504] sm:$0xf]  ;;  %3394 = vst [vmem:[#allocation7 + $0x4fc] sm:$0xff] %v3393_v34   ;;  %v3409_v40 = vld [vmem:[%s15622_s9 + $0x51c] sm:$0xff]  }
 0x205   :  { %3398 = vst [vmem:[#allocation7 + $0x504] sm:$0xf] %v3397_v35  ;;  %3400 = vst [vmem:[#allocation7 + $0x508] sm:$0xf] %v3399_v36  ;;  %v3405_v38 = vld [vmem:[%s15622_s9 + $0x518] sm:$0xf] }
 0x206   :  { %v3407_v39 = vld [vmem:[%s15622_s9 + $0x514] sm:$0xf]  ;;  %3402 = vst [vmem:[#allocation7 + $0x50c] sm:$0xff] %v3401_v37   ;;  %3406 = vst [vmem:[#allocation7 + $0x514] sm:$0xf] %v3405_v38  ;;  %v3417_v43 = vld [vmem:[%s15622_s9 + $0x52c] sm:$0xff]  }
 0x207   :  { %3408 = vst [vmem:[#allocation7 + $0x518] sm:$0xf] %v3407_v39  ;;  %v3413_v41 = vld [vmem:[%s15622_s9 + $0x528] sm:$0xf]  ;;  %v3415_v42 = vld [vmem:[%s15622_s9 + $0x524] sm:$0xf] }
 0x208   :  { %3410 = vst [vmem:[#allocation7 + $0x51c] sm:$0xff] %v3409_v40   ;;  %3414 = vst [vmem:[#allocation7 + $0x524] sm:$0xf] %v3413_v41  ;;  %v3421_v44 = vld [vmem:[%s15622_s9 + $0x538] sm:$0xf]  ;;  %v3425_v46 = vld [vmem:[%s15622_s9 + $0x53c] sm:$0xff]  }
 0x209   :  { %3416 = vst [vmem:[#allocation7 + $0x528] sm:$0xf] %v3415_v42  ;;  %v3423_v45 = vld [vmem:[%s15622_s9 + $0x534] sm:$0xf]  ;;  %3418 = vst [vmem:[#allocation7 + $0x52c] sm:$0xff] %v3417_v43   ;;  %v3433_v49 = vld [vmem:[%s15622_s9 + $0x54c] sm:$0xff]  }
 0x20a   :  { %3422 = vst [vmem:[#allocation7 + $0x534] sm:$0xf] %v3421_v44  ;;  %3424 = vst [vmem:[#allocation7 + $0x538] sm:$0xf] %v3423_v45  ;;  %v3429_v47 = vld [vmem:[%s15622_s9 + $0x548] sm:$0xf] }
 0x20b   :  { %v3431_v48 = vld [vmem:[%s15622_s9 + $0x544] sm:$0xf]  ;;  %3426 = vst [vmem:[#allocation7 + $0x53c] sm:$0xff] %v3425_v46   ;;  %3430 = vst [vmem:[#allocation7 + $0x544] sm:$0xf] %v3429_v47  ;;  %v3441_v52 = vld [vmem:[%s15622_s9 + $0x55c] sm:$0xff]  }
 0x20c   :  { %3432 = vst [vmem:[#allocation7 + $0x548] sm:$0xf] %v3431_v48  ;;  %v3437_v50 = vld [vmem:[%s15622_s9 + $0x558] sm:$0xf]  ;;  %v3439_v51 = vld [vmem:[%s15622_s9 + $0x554] sm:$0xf] }
 0x20d   :  { %3434 = vst [vmem:[#allocation7 + $0x54c] sm:$0xff] %v3433_v49   ;;  %3438 = vst [vmem:[#allocation7 + $0x554] sm:$0xf] %v3437_v50  ;;  %v3445_v53 = vld [vmem:[%s15622_s9 + $0x568] sm:$0xf]  ;;  %v3449_v55 = vld [vmem:[%s15622_s9 + $0x56c] sm:$0xff]  }
 0x20e   :  { %3440 = vst [vmem:[#allocation7 + $0x558] sm:$0xf] %v3439_v51  ;;  %v3447_v54 = vld [vmem:[%s15622_s9 + $0x564] sm:$0xf]  ;;  %3442 = vst [vmem:[#allocation7 + $0x55c] sm:$0xff] %v3441_v52   ;;  %v3457_v58 = vld [vmem:[%s15622_s9 + $0x57c] sm:$0xff]  }
 0x20f   :  { %3446 = vst [vmem:[#allocation7 + $0x564] sm:$0xf] %v3445_v53  ;;  %3448 = vst [vmem:[#allocation7 + $0x568] sm:$0xf] %v3447_v54  ;;  %v3453_v56 = vld [vmem:[%s15622_s9 + $0x578] sm:$0xf] }
 0x210   :  { %v3455_v57 = vld [vmem:[%s15622_s9 + $0x574] sm:$0xf]  ;;  %3450 = vst [vmem:[#allocation7 + $0x56c] sm:$0xff] %v3449_v55   ;;  %3454 = vst [vmem:[#allocation7 + $0x574] sm:$0xf] %v3453_v56  ;;  %v3465_v61 = vld [vmem:[%s15622_s9 + $0x58c] sm:$0xff]  }
 0x211   :  { %3456 = vst [vmem:[#allocation7 + $0x578] sm:$0xf] %v3455_v57  ;;  %v3461_v59 = vld [vmem:[%s15622_s9 + $0x588] sm:$0xf]  ;;  %v3463_v60 = vld [vmem:[%s15622_s9 + $0x584] sm:$0xf] }
 0x212   :  { %3458 = vst [vmem:[#allocation7 + $0x57c] sm:$0xff] %v3457_v58   ;;  %3462 = vst [vmem:[#allocation7 + $0x584] sm:$0xf] %v3461_v59  ;;  %v3469_v62 = vld [vmem:[%s15622_s9 + $0x598] sm:$0xf]  ;;  %v3473_v0 = vld [vmem:[%s15622_s9 + $0x59c] sm:$0xff]  }
 0x213   :  { %3464 = vst [vmem:[#allocation7 + $0x588] sm:$0xf] %v3463_v60  ;;  %v3471_v63 = vld [vmem:[%s15622_s9 + $0x594] sm:$0xf]  ;;  %3466 = vst [vmem:[#allocation7 + $0x58c] sm:$0xff] %v3465_v61   ;;  %v3481_v3 = vld [vmem:[%s15622_s9 + $0x5ac] sm:$0xff]  }
 0x214   :  { %3470 = vst [vmem:[#allocation7 + $0x594] sm:$0xf] %v3469_v62  ;;  %3472 = vst [vmem:[#allocation7 + $0x598] sm:$0xf] %v3471_v63  ;;  %v3477_v1 = vld [vmem:[%s15622_s9 + $0x5a8] sm:$0xf] }
 0x215   :  { %v3479_v2 = vld [vmem:[%s15622_s9 + $0x5a4] sm:$0xf]  ;;  %3474 = vst [vmem:[#allocation7 + $0x59c] sm:$0xff] %v3473_v0   ;;  %3478 = vst [vmem:[#allocation7 + $0x5a4] sm:$0xf] %v3477_v1  ;;  %v3489_v6 = vld [vmem:[%s15622_s9 + $0x5bc] sm:$0xff]  }
 0x216   :  { %3480 = vst [vmem:[#allocation7 + $0x5a8] sm:$0xf] %v3479_v2  ;;  %v3485_v4 = vld [vmem:[%s15622_s9 + $0x5b8] sm:$0xf]  ;;  %v3487_v5 = vld [vmem:[%s15622_s9 + $0x5b4] sm:$0xf] }
 0x217   :  { %3482 = vst [vmem:[#allocation7 + $0x5ac] sm:$0xff] %v3481_v3   ;;  %3486 = vst [vmem:[#allocation7 + $0x5b4] sm:$0xf] %v3485_v4  ;;  %v3493_v7 = vld [vmem:[%s15622_s9 + $0x5c8] sm:$0xf]  ;;  %v3497_v9 = vld [vmem:[%s15622_s9 + $0x5cc] sm:$0xff]  }
 0x218   :  { %3488 = vst [vmem:[#allocation7 + $0x5b8] sm:$0xf] %v3487_v5  ;;  %v3495_v8 = vld [vmem:[%s15622_s9 + $0x5c4] sm:$0xf]  ;;  %3490 = vst [vmem:[#allocation7 + $0x5bc] sm:$0xff] %v3489_v6   ;;  %v3505_v12 = vld [vmem:[%s15622_s9 + $0x5dc] sm:$0xff]  }
 0x219   :  { %3494 = vst [vmem:[#allocation7 + $0x5c4] sm:$0xf] %v3493_v7  ;;  %3496 = vst [vmem:[#allocation7 + $0x5c8] sm:$0xf] %v3495_v8  ;;  %v3501_v10 = vld [vmem:[%s15622_s9 + $0x5d8] sm:$0xf] }
 0x21a   :  { %v3503_v11 = vld [vmem:[%s15622_s9 + $0x5d4] sm:$0xf]  ;;  %3498 = vst [vmem:[#allocation7 + $0x5cc] sm:$0xff] %v3497_v9   ;;  %3502 = vst [vmem:[#allocation7 + $0x5d4] sm:$0xf] %v3501_v10  ;;  %v3513_v15 = vld [vmem:[%s15622_s9 + $0x5ec] sm:$0xff]  }
 0x21b   :  { %3504 = vst [vmem:[#allocation7 + $0x5d8] sm:$0xf] %v3503_v11  ;;  %v3509_v13 = vld [vmem:[%s15622_s9 + $0x5e8] sm:$0xf]  ;;  %v3511_v14 = vld [vmem:[%s15622_s9 + $0x5e4] sm:$0xf] }
 0x21c   :  { %3506 = vst [vmem:[#allocation7 + $0x5dc] sm:$0xff] %v3505_v12   ;;  %3510 = vst [vmem:[#allocation7 + $0x5e4] sm:$0xf] %v3509_v13  ;;  %v3517_v16 = vld [vmem:[%s15622_s9 + $0x5f8] sm:$0xf]  ;;  %v3521_v18 = vld [vmem:[%s15622_s9 + $0x5fc] sm:$0xff]  }
 0x21d   :  { %3512 = vst [vmem:[#allocation7 + $0x5e8] sm:$0xf] %v3511_v14  ;;  %v3519_v17 = vld [vmem:[%s15622_s9 + $0x5f4] sm:$0xf]  ;;  %3514 = vst [vmem:[#allocation7 + $0x5ec] sm:$0xff] %v3513_v15   ;;  %v3529_v21 = vld [vmem:[%s15622_s9 + $0x60c] sm:$0xff]  }
 0x21e   :  { %3518 = vst [vmem:[#allocation7 + $0x5f4] sm:$0xf] %v3517_v16  ;;  %3520 = vst [vmem:[#allocation7 + $0x5f8] sm:$0xf] %v3519_v17  ;;  %v3525_v19 = vld [vmem:[%s15622_s9 + $0x608] sm:$0xf] }
 0x21f   :  { %v3527_v20 = vld [vmem:[%s15622_s9 + $0x604] sm:$0xf]  ;;  %3522 = vst [vmem:[#allocation7 + $0x5fc] sm:$0xff] %v3521_v18   ;;  %3526 = vst [vmem:[#allocation7 + $0x604] sm:$0xf] %v3525_v19  ;;  %v3537_v24 = vld [vmem:[%s15622_s9 + $0x61c] sm:$0xff]  }
 0x220   :  { %3528 = vst [vmem:[#allocation7 + $0x608] sm:$0xf] %v3527_v20  ;;  %v3533_v22 = vld [vmem:[%s15622_s9 + $0x618] sm:$0xf]  ;;  %v3535_v23 = vld [vmem:[%s15622_s9 + $0x614] sm:$0xf] }
 0x221   :  { %3530 = vst [vmem:[#allocation7 + $0x60c] sm:$0xff] %v3529_v21   ;;  %3534 = vst [vmem:[#allocation7 + $0x614] sm:$0xf] %v3533_v22  ;;  %v3541_v25 = vld [vmem:[%s15622_s9 + $0x628] sm:$0xf]  ;;  %v3545_v27 = vld [vmem:[%s15622_s9 + $0x62c] sm:$0xff]  }
 0x222   :  { %3536 = vst [vmem:[#allocation7 + $0x618] sm:$0xf] %v3535_v23  ;;  %v3543_v26 = vld [vmem:[%s15622_s9 + $0x624] sm:$0xf]  ;;  %3538 = vst [vmem:[#allocation7 + $0x61c] sm:$0xff] %v3537_v24   ;;  %v3553_v30 = vld [vmem:[%s15622_s9 + $0x63c] sm:$0xff]  }
 0x223   :  { %3542 = vst [vmem:[#allocation7 + $0x624] sm:$0xf] %v3541_v25  ;;  %3544 = vst [vmem:[#allocation7 + $0x628] sm:$0xf] %v3543_v26  ;;  %v3549_v28 = vld [vmem:[%s15622_s9 + $0x638] sm:$0xf] }
 0x224   :  { %v3551_v29 = vld [vmem:[%s15622_s9 + $0x634] sm:$0xf]  ;;  %3546 = vst [vmem:[#allocation7 + $0x62c] sm:$0xff] %v3545_v27   ;;  %3550 = vst [vmem:[#allocation7 + $0x634] sm:$0xf] %v3549_v28  ;;  %v3561_v33 = vld [vmem:[%s15622_s9 + $0x64c] sm:$0xff]  }
 0x225   :  { %3552 = vst [vmem:[#allocation7 + $0x638] sm:$0xf] %v3551_v29  ;;  %v3557_v31 = vld [vmem:[%s15622_s9 + $0x648] sm:$0xf]  ;;  %v3559_v32 = vld [vmem:[%s15622_s9 + $0x644] sm:$0xf] }
 0x226   :  { %3554 = vst [vmem:[#allocation7 + $0x63c] sm:$0xff] %v3553_v30   ;;  %3558 = vst [vmem:[#allocation7 + $0x644] sm:$0xf] %v3557_v31  ;;  %v3565_v34 = vld [vmem:[%s15622_s9 + $0x658] sm:$0xf]  ;;  %v3569_v36 = vld [vmem:[%s15622_s9 + $0x65c] sm:$0xff]  }
 0x227   :  { %3560 = vst [vmem:[#allocation7 + $0x648] sm:$0xf] %v3559_v32  ;;  %v3567_v35 = vld [vmem:[%s15622_s9 + $0x654] sm:$0xf]  ;;  %3562 = vst [vmem:[#allocation7 + $0x64c] sm:$0xff] %v3561_v33   ;;  %v3577_v39 = vld [vmem:[%s15622_s9 + $0x66c] sm:$0xff]  }
 0x228   :  { %3566 = vst [vmem:[#allocation7 + $0x654] sm:$0xf] %v3565_v34  ;;  %3568 = vst [vmem:[#allocation7 + $0x658] sm:$0xf] %v3567_v35  ;;  %v3573_v37 = vld [vmem:[%s15622_s9 + $0x668] sm:$0xf] }
 0x229   :  { %v3575_v38 = vld [vmem:[%s15622_s9 + $0x664] sm:$0xf]  ;;  %3570 = vst [vmem:[#allocation7 + $0x65c] sm:$0xff] %v3569_v36   ;;  %3574 = vst [vmem:[#allocation7 + $0x664] sm:$0xf] %v3573_v37  ;;  %v3585_v42 = vld [vmem:[%s15622_s9 + $0x67c] sm:$0xff]  }
 0x22a   :  { %3576 = vst [vmem:[#allocation7 + $0x668] sm:$0xf] %v3575_v38  ;;  %v3581_v40 = vld [vmem:[%s15622_s9 + $0x678] sm:$0xf]  ;;  %v3583_v41 = vld [vmem:[%s15622_s9 + $0x674] sm:$0xf] }
 0x22b   :  { %3578 = vst [vmem:[#allocation7 + $0x66c] sm:$0xff] %v3577_v39   ;;  %3582 = vst [vmem:[#allocation7 + $0x674] sm:$0xf] %v3581_v40  ;;  %v3589_v43 = vld [vmem:[%s15622_s9 + $0x688] sm:$0xf]  ;;  %v3593_v45 = vld [vmem:[%s15622_s9 + $0x68c] sm:$0xff]  }
 0x22c   :  { %3584 = vst [vmem:[#allocation7 + $0x678] sm:$0xf] %v3583_v41  ;;  %v3591_v44 = vld [vmem:[%s15622_s9 + $0x684] sm:$0xf]  ;;  %3586 = vst [vmem:[#allocation7 + $0x67c] sm:$0xff] %v3585_v42   ;;  %v3601_v48 = vld [vmem:[%s15622_s9 + $0x69c] sm:$0xff]  }
 0x22d   :  { %3590 = vst [vmem:[#allocation7 + $0x684] sm:$0xf] %v3589_v43  ;;  %3592 = vst [vmem:[#allocation7 + $0x688] sm:$0xf] %v3591_v44  ;;  %v3597_v46 = vld [vmem:[%s15622_s9 + $0x698] sm:$0xf] }
 0x22e   :  { %v3599_v47 = vld [vmem:[%s15622_s9 + $0x694] sm:$0xf]  ;;  %3594 = vst [vmem:[#allocation7 + $0x68c] sm:$0xff] %v3593_v45   ;;  %3598 = vst [vmem:[#allocation7 + $0x694] sm:$0xf] %v3597_v46  ;;  %v3609_v51 = vld [vmem:[%s15622_s9 + $0x6ac] sm:$0xff]  }
 0x22f   :  { %3600 = vst [vmem:[#allocation7 + $0x698] sm:$0xf] %v3599_v47  ;;  %v3605_v49 = vld [vmem:[%s15622_s9 + $0x6a8] sm:$0xf]  ;;  %v3607_v50 = vld [vmem:[%s15622_s9 + $0x6a4] sm:$0xf] }
 0x230   :  { %3602 = vst [vmem:[#allocation7 + $0x69c] sm:$0xff] %v3601_v48   ;;  %3606 = vst [vmem:[#allocation7 + $0x6a4] sm:$0xf] %v3605_v49  ;;  %v3613_v52 = vld [vmem:[%s15622_s9 + $0x6b8] sm:$0xf]  ;;  %v3617_v54 = vld [vmem:[%s15622_s9 + $0x6bc] sm:$0xff]  }
 0x231   :  { %3608 = vst [vmem:[#allocation7 + $0x6a8] sm:$0xf] %v3607_v50  ;;  %v3615_v53 = vld [vmem:[%s15622_s9 + $0x6b4] sm:$0xf]  ;;  %3610 = vst [vmem:[#allocation7 + $0x6ac] sm:$0xff] %v3609_v51   ;;  %v3625_v57 = vld [vmem:[%s15622_s9 + $0x6cc] sm:$0xff]  }
 0x232   :  { %3614 = vst [vmem:[#allocation7 + $0x6b4] sm:$0xf] %v3613_v52  ;;  %3616 = vst [vmem:[#allocation7 + $0x6b8] sm:$0xf] %v3615_v53  ;;  %v3621_v55 = vld [vmem:[%s15622_s9 + $0x6c8] sm:$0xf] }
 0x233   :  { %v3623_v56 = vld [vmem:[%s15622_s9 + $0x6c4] sm:$0xf]  ;;  %3618 = vst [vmem:[#allocation7 + $0x6bc] sm:$0xff] %v3617_v54   ;;  %3622 = vst [vmem:[#allocation7 + $0x6c4] sm:$0xf] %v3621_v55  ;;  %v3633_v60 = vld [vmem:[%s15622_s9 + $0x6dc] sm:$0xff]  }
 0x234   :  { %3624 = vst [vmem:[#allocation7 + $0x6c8] sm:$0xf] %v3623_v56  ;;  %v3629_v58 = vld [vmem:[%s15622_s9 + $0x6d8] sm:$0xf]  ;;  %v3631_v59 = vld [vmem:[%s15622_s9 + $0x6d4] sm:$0xf] }
 0x235   :  { %3626 = vst [vmem:[#allocation7 + $0x6cc] sm:$0xff] %v3625_v57   ;;  %3630 = vst [vmem:[#allocation7 + $0x6d4] sm:$0xf] %v3629_v58  ;;  %v3637_v61 = vld [vmem:[%s15622_s9 + $0x6e8] sm:$0xf]  ;;  %v3641_v63 = vld [vmem:[%s15622_s9 + $0x6ec] sm:$0xff]  }
 0x236   :  { %3632 = vst [vmem:[#allocation7 + $0x6d8] sm:$0xf] %v3631_v59  ;;  %v3639_v62 = vld [vmem:[%s15622_s9 + $0x6e4] sm:$0xf]  ;;  %3634 = vst [vmem:[#allocation7 + $0x6dc] sm:$0xff] %v3633_v60   ;;  %v3649_v2 = vld [vmem:[%s15622_s9 + $0x6fc] sm:$0xff]  }
 0x237   :  { %3638 = vst [vmem:[#allocation7 + $0x6e4] sm:$0xf] %v3637_v61  ;;  %3640 = vst [vmem:[#allocation7 + $0x6e8] sm:$0xf] %v3639_v62  ;;  %v3645_v0 = vld [vmem:[%s15622_s9 + $0x6f8] sm:$0xf] }
 0x238   :  { %v3647_v1 = vld [vmem:[%s15622_s9 + $0x6f4] sm:$0xf]  ;;  %3642 = vst [vmem:[#allocation7 + $0x6ec] sm:$0xff] %v3641_v63   ;;  %3646 = vst [vmem:[#allocation7 + $0x6f4] sm:$0xf] %v3645_v0  ;;  %v3657_v5 = vld [vmem:[%s15622_s9 + $0x70c] sm:$0xff]  }
 0x239   :  { %3648 = vst [vmem:[#allocation7 + $0x6f8] sm:$0xf] %v3647_v1  ;;  %v3653_v3 = vld [vmem:[%s15622_s9 + $0x708] sm:$0xf]  ;;  %v3655_v4 = vld [vmem:[%s15622_s9 + $0x704] sm:$0xf] }
 0x23a   :  { %3650 = vst [vmem:[#allocation7 + $0x6fc] sm:$0xff] %v3649_v2   ;;  %3654 = vst [vmem:[#allocation7 + $0x704] sm:$0xf] %v3653_v3  ;;  %v3661_v6 = vld [vmem:[%s15622_s9 + $0x718] sm:$0xf]  ;;  %v3665_v8 = vld [vmem:[%s15622_s9 + $0x71c] sm:$0xff]  }
 0x23b   :  { %3656 = vst [vmem:[#allocation7 + $0x708] sm:$0xf] %v3655_v4  ;;  %v3663_v7 = vld [vmem:[%s15622_s9 + $0x714] sm:$0xf]  ;;  %3658 = vst [vmem:[#allocation7 + $0x70c] sm:$0xff] %v3657_v5   ;;  %v3673_v11 = vld [vmem:[%s15622_s9 + $0x72c] sm:$0xff]  }
 0x23c   :  { %3662 = vst [vmem:[#allocation7 + $0x714] sm:$0xf] %v3661_v6  ;;  %3664 = vst [vmem:[#allocation7 + $0x718] sm:$0xf] %v3663_v7  ;;  %v3669_v9 = vld [vmem:[%s15622_s9 + $0x728] sm:$0xf] }
 0x23d   :  { %v3671_v10 = vld [vmem:[%s15622_s9 + $0x724] sm:$0xf]  ;;  %3666 = vst [vmem:[#allocation7 + $0x71c] sm:$0xff] %v3665_v8   ;;  %3670 = vst [vmem:[#allocation7 + $0x724] sm:$0xf] %v3669_v9  ;;  %v3681_v14 = vld [vmem:[%s15622_s9 + $0x73c] sm:$0xff]  }
 0x23e   :  { %3672 = vst [vmem:[#allocation7 + $0x728] sm:$0xf] %v3671_v10  ;;  %v3677_v12 = vld [vmem:[%s15622_s9 + $0x738] sm:$0xf]  ;;  %v3679_v13 = vld [vmem:[%s15622_s9 + $0x734] sm:$0xf] }
 0x23f   :  { %3674 = vst [vmem:[#allocation7 + $0x72c] sm:$0xff] %v3673_v11   ;;  %3678 = vst [vmem:[#allocation7 + $0x734] sm:$0xf] %v3677_v12  ;;  %v3685_v15 = vld [vmem:[%s15622_s9 + $0x748] sm:$0xf]  ;;  %v3689_v17 = vld [vmem:[%s15622_s9 + $0x74c] sm:$0xff]  }
 0x240   :  { %3680 = vst [vmem:[#allocation7 + $0x738] sm:$0xf] %v3679_v13  ;;  %v3687_v16 = vld [vmem:[%s15622_s9 + $0x744] sm:$0xf]  ;;  %3682 = vst [vmem:[#allocation7 + $0x73c] sm:$0xff] %v3681_v14   ;;  %v3697_v20 = vld [vmem:[%s15622_s9 + $0x75c] sm:$0xff]  }
 0x241   :  { %3686 = vst [vmem:[#allocation7 + $0x744] sm:$0xf] %v3685_v15  ;;  %3688 = vst [vmem:[#allocation7 + $0x748] sm:$0xf] %v3687_v16  ;;  %v3693_v18 = vld [vmem:[%s15622_s9 + $0x758] sm:$0xf] }
 0x242   :  { %v3695_v19 = vld [vmem:[%s15622_s9 + $0x754] sm:$0xf]  ;;  %3690 = vst [vmem:[#allocation7 + $0x74c] sm:$0xff] %v3689_v17   ;;  %3694 = vst [vmem:[#allocation7 + $0x754] sm:$0xf] %v3693_v18  ;;  %v3705_v23 = vld [vmem:[%s15622_s9 + $0x76c] sm:$0xff]  }
 0x243   :  { %3696 = vst [vmem:[#allocation7 + $0x758] sm:$0xf] %v3695_v19  ;;  %v3701_v21 = vld [vmem:[%s15622_s9 + $0x768] sm:$0xf]  ;;  %v3703_v22 = vld [vmem:[%s15622_s9 + $0x764] sm:$0xf] }
 0x244   :  { %3698 = vst [vmem:[#allocation7 + $0x75c] sm:$0xff] %v3697_v20   ;;  %3702 = vst [vmem:[#allocation7 + $0x764] sm:$0xf] %v3701_v21  ;;  %v3709_v24 = vld [vmem:[%s15622_s9 + $0x778] sm:$0xf]  ;;  %v3713_v26 = vld [vmem:[%s15622_s9 + $0x77c] sm:$0xff]  }
 0x245   :  { %3704 = vst [vmem:[#allocation7 + $0x768] sm:$0xf] %v3703_v22  ;;  %v3711_v25 = vld [vmem:[%s15622_s9 + $0x774] sm:$0xf]  ;;  %3706 = vst [vmem:[#allocation7 + $0x76c] sm:$0xff] %v3705_v23   ;;  %v3721_v29 = vld [vmem:[%s15622_s9 + $0x78c] sm:$0xff]  }
 0x246   :  { %3710 = vst [vmem:[#allocation7 + $0x774] sm:$0xf] %v3709_v24  ;;  %3712 = vst [vmem:[#allocation7 + $0x778] sm:$0xf] %v3711_v25  ;;  %v3717_v27 = vld [vmem:[%s15622_s9 + $0x788] sm:$0xf] }
 0x247   :  { %v3719_v28 = vld [vmem:[%s15622_s9 + $0x784] sm:$0xf]  ;;  %3714 = vst [vmem:[#allocation7 + $0x77c] sm:$0xff] %v3713_v26   ;;  %3718 = vst [vmem:[#allocation7 + $0x784] sm:$0xf] %v3717_v27  ;;  %v3729_v32 = vld [vmem:[%s15622_s9 + $0x79c] sm:$0xff]  }
 0x248   :  { %3720 = vst [vmem:[#allocation7 + $0x788] sm:$0xf] %v3719_v28  ;;  %v3725_v30 = vld [vmem:[%s15622_s9 + $0x798] sm:$0xf]  ;;  %v3727_v31 = vld [vmem:[%s15622_s9 + $0x794] sm:$0xf] }
 0x249   :  { %3722 = vst [vmem:[#allocation7 + $0x78c] sm:$0xff] %v3721_v29   ;;  %3726 = vst [vmem:[#allocation7 + $0x794] sm:$0xf] %v3725_v30  ;;  %v3733_v33 = vld [vmem:[%s15622_s9 + $0x7a8] sm:$0xf]  ;;  %v3737_v35 = vld [vmem:[%s15622_s9 + $0x7ac] sm:$0xff]  }
 0x24a   :  { %3728 = vst [vmem:[#allocation7 + $0x798] sm:$0xf] %v3727_v31  ;;  %v3735_v34 = vld [vmem:[%s15622_s9 + $0x7a4] sm:$0xf]  ;;  %3730 = vst [vmem:[#allocation7 + $0x79c] sm:$0xff] %v3729_v32   ;;  %v3745_v38 = vld [vmem:[%s15622_s9 + $0x7bc] sm:$0xff]  }
 0x24b   :  { %3734 = vst [vmem:[#allocation7 + $0x7a4] sm:$0xf] %v3733_v33  ;;  %3736 = vst [vmem:[#allocation7 + $0x7a8] sm:$0xf] %v3735_v34  ;;  %v3741_v36 = vld [vmem:[%s15622_s9 + $0x7b8] sm:$0xf] }
 0x24c   :  { %v3743_v37 = vld [vmem:[%s15622_s9 + $0x7b4] sm:$0xf]  ;;  %3738 = vst [vmem:[#allocation7 + $0x7ac] sm:$0xff] %v3737_v35   ;;  %3742 = vst [vmem:[#allocation7 + $0x7b4] sm:$0xf] %v3741_v36  ;;  %v3753_v41 = vld [vmem:[%s15622_s9 + $0x7cc] sm:$0xff]  }
 0x24d   :  { %3744 = vst [vmem:[#allocation7 + $0x7b8] sm:$0xf] %v3743_v37  ;;  %v3749_v39 = vld [vmem:[%s15622_s9 + $0x7c8] sm:$0xf]  ;;  %v3751_v40 = vld [vmem:[%s15622_s9 + $0x7c4] sm:$0xf] }
 0x24e   :  { %3746 = vst [vmem:[#allocation7 + $0x7bc] sm:$0xff] %v3745_v38   ;;  %3750 = vst [vmem:[#allocation7 + $0x7c4] sm:$0xf] %v3749_v39  ;;  %v3757_v42 = vld [vmem:[%s15622_s9 + $0x7d8] sm:$0xf]  ;;  %v3761_v44 = vld [vmem:[%s15622_s9 + $0x7dc] sm:$0xff]  }
 0x24f   :  { %3752 = vst [vmem:[#allocation7 + $0x7c8] sm:$0xf] %v3751_v40  ;;  %v3759_v43 = vld [vmem:[%s15622_s9 + $0x7d4] sm:$0xf]  ;;  %3754 = vst [vmem:[#allocation7 + $0x7cc] sm:$0xff] %v3753_v41   ;;  %v3769_v47 = vld [vmem:[%s15622_s9 + $0x7ec] sm:$0xff]  }
 0x250   :  { %3758 = vst [vmem:[#allocation7 + $0x7d4] sm:$0xf] %v3757_v42  ;;  %3760 = vst [vmem:[#allocation7 + $0x7d8] sm:$0xf] %v3759_v43  ;;  %v3765_v45 = vld [vmem:[%s15622_s9 + $0x7e8] sm:$0xf] }
 0x251   :  { %v3767_v46 = vld [vmem:[%s15622_s9 + $0x7e4] sm:$0xf]  ;;  %3762 = vst [vmem:[#allocation7 + $0x7dc] sm:$0xff] %v3761_v44   ;;  %3766 = vst [vmem:[#allocation7 + $0x7e4] sm:$0xf] %v3765_v45  ;;  %v11907_v53 = vmov 0  }
 0x252   :  { %3768 = vst [vmem:[#allocation7 + $0x7e8] sm:$0xf] %v3767_v46  ;;  %v3773_v48 = vld [vmem:[%s15622_s9 + $0x7f8] sm:$0xf]  ;;  %v3775_v49 = vld [vmem:[%s15622_s9 + $0x7f4] sm:$0xf]  ;;  %7231 = vmatprep.mubr.bf16.mxu1 %v11907_v53  ;;  %7544 = vmatprep.mubr.bf16.mxu0 %v11907_v53 }
 0x253   :  { %3770 = vst [vmem:[#allocation7 + $0x7ec] sm:$0xff] %v3769_v47   ;;  %3774 = vst [vmem:[#allocation7 + $0x7f4] sm:$0xf] %v3773_v48  ;;  %v3777_v50 = vld [vmem:[%s15622_s9 + $0x7fc] sm:$0xf]  ;;  %v14845_v19 = vld [vmem:[%s15613_s0 + $0x8] sm:$0xff]  }
 0x254   :  { %3776 = vst [vmem:[#allocation7 + $0x7f8] sm:$0xf] %v3775_v49  ;;  %3778 = vst [vmem:[#allocation7 + $0x7fc] sm:$0xf] %v3777_v50  ;;  %v11649_v51 = vld [vmem:[#allocation10 + $0x104] ss:$16 sps:$4 sm:$0xff]  }
 0x255   :  { %v11651_v52 = vld [vmem:[#allocation10 + $0x4] ss:$16 sps:$4 sm:$0xff]   ;;  %7199 = vmatprep.subr.bf16.mxu1 %v11649_v51  ;;  %v11653_v54 = vld [vmem:[#allocation10 + $0x100] ss:$16 sps:$4 sm:$0xff]   ;;  %v14836_v14 = vld [vmem:[%s15613_s0 + $0x4] sm:$0xf] }
 0x256   :  { %v11654_v55 = vld [vmem:[#allocation10] ss:$16 sps:$4 sm:$0xff]   ;;  %7512 = vmatprep.subr.bf16.mxu0 %v11651_v52  ;;  %v11655_v56 = vld [vmem:[#allocation10 + $0x124] ss:$16 sps:$4 sm:$0xff]   ;;  %7200 = vmatpush1.bf16.msra.mxu1 %v11653_v54  ;;  %v6967_v15 = vld [vmem:[%s15613_s0] sm:$0xe] }
 0x257   :  { %7513 = vmatpush1.bf16.msra.mxu0 %v11654_v55  ;;  %v11657_v57 = vld [vmem:[#allocation10 + $0x24] ss:$16 sps:$4 sm:$0xff]   ;;  %v11659_v58 = vld [vmem:[#allocation10 + $0x120] ss:$16 sps:$4 sm:$0xff]   ;;  %7201 = vmatprep.subr.bf16.mxu1 %v11655_v56  ;;  %v11325_v18 = vcombine.low %v6967_v15, %v14836_v14  ;;  %v11701_v24 = vld [vmem:[#allocation10 + $0x10c] ss:$16 sps:$4 sm:$0xff]  }
 0x258   :  { %v11660_v59 = vld [vmem:[#allocation10 + $0x20] ss:$16 sps:$4 sm:$0xff]   ;;  %7514 = vmatprep.subr.bf16.mxu0 %v11657_v57  ;;  %v11661_v60 = vld [vmem:[#allocation10 + $0x144] ss:$16 sps:$4 sm:$0xff]   ;;  %v7027_v26 = vrot.slane %v14845_v19, 1  ;;  %v14860_v33 = vld [vmem:[%s15613_s0 + $0x10] sm:$0xff]  }
 0x259   :  { %v11663_v61 = vld [vmem:[#allocation10 + $0x44] ss:$16 sps:$4 sm:$0xff]   ;;  %v11665_v62 = vld [vmem:[#allocation10 + $0x140] ss:$16 sps:$4 sm:$0xff]   ;;  %v7026_v25 = vrot.slane %v11325_v18, 1  ;;  %v7029_v38 = vrot.slane %v14860_v33, 1 }
 0x25a   :  { %v11666_v63 = vld [vmem:[#allocation10 + $0x40] ss:$16 sps:$4 sm:$0xff]   ;;  %7202 = vmatpush1.bf16.msra.mxu1 %v11659_v58  ;;  %v11667_v0 = vld [vmem:[#allocation10 + $0x164] ss:$16 sps:$4 sm:$0xff]   ;;  %v6927_v27 = vld [vmem:[%s15613_s0] sm:$0xf] }
 0x25b   :  { %7515 = vmatpush1.bf16.msra.mxu0 %v11660_v59  ;;  %7203 = vmatprep.subr.bf16.mxu1 %v11661_v60  ;;  %v11669_v1 = vld [vmem:[#allocation10 + $0x64] ss:$16 sps:$4 sm:$0xff]   ;;  %v11671_v2 = vld [vmem:[#allocation10 + $0x160] ss:$16 sps:$4 sm:$0xff]   ;;  %v11699_v29 = vld [vmem:[#allocation10 + $0x108] ss:$16 sps:$4 sm:$0xff]   ;;  %v14852_v30 = vcombine.low %v6927_v27, %v14836_v14  ;;  %v14855_v32 = vsel %vm7025_vm0, %v7026_v25, %v7027_v26  ;;  %v14868_v44 = vsel %vm7025_vm0, %v7027_v26, %v7029_v38 }
 0x25c   :  { %7516 = vmatprep.subr.bf16.mxu0 %v11663_v61  ;;  %v11672_v3 = vld [vmem:[#allocation10 + $0x60] ss:$16 sps:$4 sm:$0xff]   ;;  %v11673_v4 = vld [vmem:[#allocation10 + $0x184] ss:$16 sps:$4 sm:$0xff]   ;;  %v11708_v34 = vld [vmem:[#allocation10 + $0x12c] ss:$16 sps:$4 sm:$0xff]  }
 0x25d   :  { %v11675_v5 = vld [vmem:[#allocation10 + $0x84] ss:$16 sps:$4 sm:$0xff]   ;;  %v11677_v6 = vld [vmem:[#allocation10 + $0x180] ss:$16 sps:$4 sm:$0xff]   ;;  %v11706_v36 = vld [vmem:[#allocation10 + $0x128] ss:$16 sps:$4 sm:$0xff]  }
 0x25e   :  { %7204 = vmatpush1.bf16.msra.mxu1 %v11665_v62  ;;  %v11678_v7 = vld [vmem:[#allocation10 + $0x80] ss:$16 sps:$4 sm:$0xff]   ;;  %v11679_v8 = vld [vmem:[#allocation10 + $0x1a4] ss:$16 sps:$4 sm:$0xff]   ;;  %v11715_v39 = vld [vmem:[#allocation10 + $0x14c] ss:$16 sps:$4 sm:$0xff]  }
 0x25f   :  { %7517 = vmatpush1.bf16.msra.mxu0 %v11666_v63  ;;  %7205 = vmatprep.subr.bf16.mxu1 %v11667_v0  ;;  %v11681_v9 = vld [vmem:[#allocation10 + $0xa4] ss:$16 sps:$4 sm:$0xff]   ;;  %v11683_v10 = vld [vmem:[#allocation10 + $0x1a0] ss:$16 sps:$4 sm:$0xff]   ;;  %v11713_v41 = vld [vmem:[#allocation10 + $0x148] ss:$16 sps:$4 sm:$0xff]  }
 0x260   :  { %7518 = vmatprep.subr.bf16.mxu0 %v11669_v1  ;;  %v11684_v11 = vld [vmem:[#allocation10 + $0xa0] ss:$16 sps:$4 sm:$0xff]   ;;  %v11685_v12 = vld [vmem:[#allocation10 + $0x1c4] ss:$16 sps:$4 sm:$0xff]   ;;  %v11721_v43 = vld [vmem:[#allocation10 + $0x16c] ss:$16 sps:$4 sm:$0xff]  }
 0x261   :  { %v11687_v13 = vld [vmem:[#allocation10 + $0xc4] ss:$16 sps:$4 sm:$0xff]   ;;  %v11689_v16 = vld [vmem:[#allocation10 + $0x1c0] ss:$16 sps:$4 sm:$0xff]   ;;  %v11719_v47 = vld [vmem:[#allocation10 + $0x168] ss:$16 sps:$4 sm:$0xff]  }
 0x262   :  { %7206 = vmatpush1.bf16.msra.mxu1 %v11671_v2  ;;  %v11690_v17 = vld [vmem:[#allocation10 + $0xc0] ss:$16 sps:$4 sm:$0xff]   ;;  %v11691_v20 = vld [vmem:[#allocation10 + $0x1e4] ss:$16 sps:$4 sm:$0xff]   ;;  %v11728_v50 = vld [vmem:[#allocation10 + $0x18c] ss:$16 sps:$4 sm:$0xff]  }
 0x263   :  { %7519 = vmatpush1.bf16.msra.mxu0 %v11672_v3  ;;  %7207 = vmatprep.subr.bf16.mxu1 %v11673_v4  ;;  %v11693_v21 = vld [vmem:[#allocation10 + $0xe4] ss:$16 sps:$4 sm:$0xff]   ;;  %v11695_v22 = vld [vmem:[#allocation10 + $0x1e0] ss:$16 sps:$4 sm:$0xff]   ;;  %v11726_v52 = vld [vmem:[#allocation10 + $0x188] ss:$16 sps:$4 sm:$0xff]  }
 0x264   :  { %7520 = vmatprep.subr.bf16.mxu0 %v11675_v5  ;;  %v11696_v23 = vld [vmem:[#allocation10 + $0xe0] ss:$16 sps:$4 sm:$0xff]   ;;  %v11705_v28 = vld [vmem:[#allocation10 + $0x204] ss:$16 sps:$4 sm:$0xff]   ;;  %v11734_v56 = vld [vmem:[#allocation10 + $0x1ac] ss:$16 sps:$4 sm:$0xff]  }
 0x265   :  { %v11703_v31 = vld [vmem:[#allocation10 + $0x200] ss:$16 sps:$4 sm:$0xff]   ;;  %v11711_v35 = vld [vmem:[#allocation10 + $0x224] ss:$16 sps:$4 sm:$0xff]   ;;  %v11732_v59 = vld [vmem:[#allocation10 + $0x1a8] ss:$16 sps:$4 sm:$0xff]  }
 0x266   :  { %7208 = vmatpush1.bf16.msra.mxu1 %v11677_v6  ;;  %v11709_v37 = vld [vmem:[#allocation10 + $0x220] ss:$16 sps:$4 sm:$0xff]   ;;  %v11718_v40 = vld [vmem:[#allocation10 + $0x244] ss:$16 sps:$4 sm:$0xff]   ;;  %v11741_v62 = vld [vmem:[#allocation10 + $0x1cc] ss:$16 sps:$4 sm:$0xff]  }
 0x267   :  { %7521 = vmatpush1.bf16.msra.mxu0 %v11678_v7  ;;  %7209 = vmatprep.subr.bf16.mxu1 %v11679_v8  ;;  %v11716_v42 = vld [vmem:[#allocation10 + $0x240] ss:$16 sps:$4 sm:$0xff]   ;;  %v11724_v46 = vld [vmem:[#allocation10 + $0x264] ss:$16 sps:$4 sm:$0xff]   ;;  %v7658_v0 = vld [vmem:[%s15613_s0] sm:$0xc] }
 0x268   :  { %7522 = vmatprep.subr.bf16.mxu0 %v11681_v9  ;;  %v14873_v45 = vld [vmem:[%s15613_s0 + $0x18] sm:$0xff]   ;;  %v11738_v57 = vld [vmem:[%s15613_s0 + $0x20] ss:$0 sps:$4 sm:$0x11]   ;;  %v11747_v4 = vld [vmem:[#allocation10 + $0x1ec] ss:$16 sps:$4 sm:$0xff]   ;;  %v11395_v5 = vcombine.low %v7658_v0, %v14836_v14 }
 0x269   :  { %v11722_v48 = vld [vmem:[#allocation10 + $0x260] ss:$16 sps:$4 sm:$0xff]   ;;  %v7031_v49 = vrot.slane %v14873_v45, 1  ;;  %v11731_v51 = vld [vmem:[#allocation10 + $0x284] ss:$16 sps:$4 sm:$0xff]   ;;  %v7033_v61 = vrot.slane %v11738_v57, 1 }
 0x26a   :  { %7210 = vmatpush1.bf16.msra.mxu1 %v11683_v10  ;;  %v11729_v54 = vld [vmem:[#allocation10 + $0x280] ss:$16 sps:$4 sm:$0xff]   ;;  %v11737_v58 = vld [vmem:[#allocation10 + $0x2a4] ss:$16 sps:$4 sm:$0xff]   ;;  %v11739_v1 = vld [vmem:[#allocation10 + $0x1c8] ss:$16 sps:$4 sm:$0xff]  }
 0x26b   :  { %7523 = vmatpush1.bf16.msra.mxu0 %v11684_v11  ;;  %7211 = vmatprep.subr.bf16.mxu1 %v11685_v12  ;;  %v14881_v55 = vsel %vm7025_vm0, %v7029_v38, %v7031_v49  ;;  %v11735_v60 = vld [vmem:[#allocation10 + $0x2a0] ss:$16 sps:$4 sm:$0xff]   ;;  %v11744_v63 = vld [vmem:[#allocation10 + $0x2c4] ss:$16 sps:$4 sm:$0xff]   ;;  %v14894_v2 = vsel %vm7025_vm0, %v7031_v49, %v7033_v61  ;;  %v11745_v7 = vld [vmem:[#allocation10 + $0x1e8] ss:$16 sps:$4 sm:$0xff]  }
 0x26c   :  { %7524 = vmatprep.subr.bf16.mxu0 %v11687_v13  ;;  %v11742_v3 = vld [vmem:[#allocation10 + $0x2c0] ss:$16 sps:$4 sm:$0xff]   ;;  %v11750_v6 = vld [vmem:[#allocation10 + $0x2e4] ss:$16 sps:$4 sm:$0xff]   ;;  %v7700_v9 = vrot.slane %v11395_v5, 2  ;;  %v7701_v10 = vrot.slane %v14845_v19, 2 }
 0x26d   :  { %v11748_v8 = vld [vmem:[#allocation10 + $0x2e0] ss:$16 sps:$4 sm:$0xff]   ;;  %v11753_v11 = vld [vmem:[#allocation10 + $0xc] ss:$16 sps:$4 sm:$0xff]   ;;  %v11751_v12 = vld [vmem:[#allocation10 + $0x8] ss:$16 sps:$4 sm:$0xff]  }
 0x26e   :  { %7212 = vmatpush1.bf16.msra.mxu1 %v11689_v16  ;;  %v14903_v13 = vsel %vm7699_vm1, %v7700_v9, %v7701_v10  ;;  %v11757_v14 = vld [vmem:[#allocation10 + $0x2c] ss:$16 sps:$4 sm:$0xff]   ;;  %v11755_v15 = vld [vmem:[#allocation10 + $0x28] ss:$16 sps:$4 sm:$0xff]   ;;  %v7703_v16 = vrot.slane %v14860_v33, 2 }
 0x26f   :  { %7525 = vmatpush1.bf16.msra.mxu0 %v11690_v17  ;;  %7213 = vmatprep.subr.bf16.mxu1 %v11691_v20  ;;  %v11760_v17 = vld [vmem:[#allocation10 + $0x4c] ss:$16 sps:$4 sm:$0xff]  }
 0x270   :  { %7526 = vmatprep.subr.bf16.mxu0 %v11693_v21 }
 0x272   :  { %7214 = vmatpush1.bf16.msra.mxu1 %v11695_v22 }
 0x273   :  { %7527 = vmatpush1.bf16.msra.mxu0 %v11696_v23  ;;  %7272 = vmatprep.subr.bf16.mxu1 %v11701_v24 }
 0x274   :  { %7873 = vmatprep.subr.bf16.mxu0 %v11705_v28 }
 0x275   :  { %7232 = vmatmul.mubr.bf16.vlgmr.msra.gmra.mrb[0].mxu1 %v14855_v32 }
 0x276   :  { %7545 = vmatmul.mubr.bf16.vlgmr.msra.gmra.mrb[0].mxu0 %v14852_v30  ;;  %7273 = vmatpush1.bf16.msra.mxu1 %v11699_v29 }
 0x277   :  { %7874 = vmatpush1.bf16.msra.mxu0 %v11703_v31  ;;  %7274 = vmatprep.subr.bf16.mxu1 %v11708_v34 }
 0x278   :  { %7875 = vmatprep.subr.bf16.mxu0 %v11711_v35  ;;  %7241 = vmatprep.mubr.bf16.mxu1 %v11907_v53 }
 0x279   :  { %7554 = vmatprep.mubr.bf16.mxu0 %v11907_v53 }
 0x27a   :  { %7275 = vmatpush1.bf16.msra.mxu1 %v11706_v36 }
 0x27b   :  { %7876 = vmatpush1.bf16.msra.mxu0 %v11709_v37  ;;  %7276 = vmatprep.subr.bf16.mxu1 %v11715_v39 }
 0x27c   :  { %7877 = vmatprep.subr.bf16.mxu0 %v11718_v40 }
 0x27d   :  { %7242 = vmatmul.mubr.bf16.gmra.mrb[4].mxu1 %v14868_v44 }
 0x27e   :  { %7555 = vmatmul.mubr.bf16.gmra.mrb[4].mxu0 %v14845_v19  ;;  %7277 = vmatpush1.bf16.msra.mxu1 %v11713_v41 }
 0x27f   :  { %7878 = vmatpush1.bf16.msra.mxu0 %v11716_v42  ;;  %7278 = vmatprep.subr.bf16.mxu1 %v11721_v43 }
 0x280   :  { %7879 = vmatprep.subr.bf16.mxu0 %v11724_v46  ;;  %7251 = vmatprep.mubr.bf16.mxu1 %v11907_v53 }
 0x281   :  { %7564 = vmatprep.mubr.bf16.mxu0 %v11907_v53 }
 0x282   :  { %7279 = vmatpush1.bf16.msra.mxu1 %v11719_v47 }
 0x283   :  { %7880 = vmatpush1.bf16.msra.mxu0 %v11722_v48  ;;  %7280 = vmatprep.subr.bf16.mxu1 %v11728_v50 }
 0x284   :  { %7881 = vmatprep.subr.bf16.mxu0 %v11731_v51 }
 0x285   :  { %7252 = vmatmul.mubr.bf16.gmra.mrb[8].mxu1 %v14881_v55 }
 0x286   :  { %7565 = vmatmul.mubr.bf16.gmra.mrb[8].mxu0 %v14860_v33  ;;  %7281 = vmatpush1.bf16.msra.mxu1 %v11726_v52 }
 0x287   :  { %7882 = vmatpush1.bf16.msra.mxu0 %v11729_v54  ;;  %7282 = vmatprep.subr.bf16.mxu1 %v11734_v56 }
 0x288   :  { %7883 = vmatprep.subr.bf16.mxu0 %v11737_v58  ;;  %7261 = vmatprep.mubr.bf16.mxu1 %v11907_v53 }
 0x289   :  { %7574 = vmatprep.mubr.bf16.mxu0 %v11907_v53 }
 0x28a   :  { %7283 = vmatpush1.bf16.msra.mxu1 %v11732_v59 }
 0x28b   :  { %7884 = vmatpush1.bf16.msra.mxu0 %v11735_v60  ;;  %7284 = vmatprep.subr.bf16.mxu1 %v11741_v62 }
 0x28c   :  { %7885 = vmatprep.subr.bf16.mxu0 %v11744_v63 }
 0x28d   :  { %7262 = vmatmul.mubr.bf16.gmra.mrb[12].mxu1 %v14894_v2 }
 0x28e   :  { %7575 = vmatmul.mubr.bf16.gmra.mrb[12].mxu0 %v14873_v45  ;;  %7285 = vmatpush1.bf16.msra.mxu1 %v11739_v1 }
 0x28f   :  { %7886 = vmatpush1.bf16.msra.mxu0 %v11742_v3  ;;  %7286 = vmatprep.subr.bf16.mxu1 %v11747_v4 }
 0x290   :  { %7887 = vmatprep.subr.bf16.mxu0 %v11750_v6  ;;  %7304 = vmatprep.mubr.bf16.mxu1 %v11907_v53 }
 0x291   :  { %7905 = vmatprep.mubr.bf16.mxu0 %v11907_v53 }
 0x292   :  { %7287 = vmatpush1.bf16.msra.mxu1 %v11745_v7 }
 0x293   :  { %7888 = vmatpush1.bf16.msra.mxu0 %v11748_v8  ;;  %7585 = vmatprep.subr.bf16.mxu1 %v11753_v11 }
 0x295   :  { %7305 = vmatmul.mubr.bf16.vlgmr.msra.gmra.mrb[16].mxu1 %v14855_v32 }
 0x296   :  { %7906 = vmatmul.mubr.bf16.vlgmr.msra.gmra.mrb[0].mxu0 %v14903_v13  ;;  %7586 = vmatpush1.bf16.msra.mxu1 %v11751_v12 }
 0x297   :  { %7314 = vmatprep.mubr.bf16.mxu1 %v11907_v53  ;;  %7587 = vmatprep.subr.bf16.mxu1 %v11757_v14 }
 0x298   :  { %7915 = vmatprep.mubr.bf16.mxu0 %v11907_v53 }
 0x299   :  { %6914 = vsyncadd [#allocation9 + $0x3], 32768  ;;  %v11758_v18 = vld [vmem:[#allocation10 + $0x48] ss:$16 sps:$4 sm:$0xff]   ;;  %v14911_v20 = vsel %vm7699_vm1, %v7701_v10, %v7703_v16  ;;  %v11763_v21 = vld [vmem:[#allocation10 + $0x6c] ss:$16 sps:$4 sm:$0xff]  }
 0x29a   :  { %7588 = vmatpush1.bf16.msra.mxu1 %v11755_v15  ;;  %v11761_v22 = vld [vmem:[#allocation10 + $0x68] ss:$16 sps:$4 sm:$0xff]   ;;  %v7705_v23 = vrot.slane %v14873_v45, 2  ;;  %v11766_v24 = vld [vmem:[#allocation10 + $0x8c] ss:$16 sps:$4 sm:$0xff]   ;;  %s11838_s8 = scalar_lea.hbm %s15623_s10, 2048 }
 0x29b   :  { %7589 = vmatprep.subr.bf16.mxu1 %v11760_v17  ;;  %v11764_v25 = vld [vmem:[#allocation10 + $0x88] ss:$16 sps:$4 sm:$0xff]   ;;  %v11769_v28 = vld [vmem:[#allocation10 + $0xac] ss:$16 sps:$4 sm:$0xff]   ;;  %p11839_p8 = scmp.ne.s32.totalorder %s15623_s10, %s11838_s8  ;;  %p11842_p9 = scmp.lt.u32.totalorder %s11838_s8, %s15623_s10 }
 0x29c   :  { %v14919_v26 = vsel %vm7699_vm1, %v7703_v16, %v7705_v23  ;;  %v11773_v27 = vld [vmem:[%s15613_s0 + $0x20] ss:$0 sps:$4 sm:$0x33]   ;;  %v11772_v32 = vld [vmem:[#allocation10 + $0xcc] ss:$16 sps:$4 sm:$0xff]   ;;  %s11908_s0 = smov [#allocation8]  }
 0x29d   :  { %7315 = vmatmul.mubr.bf16.gmra.mrb[20].mxu1 %v14868_v44  ;;  %v11767_v29 = vld [vmem:[#allocation10 + $0xa8] ss:$16 sps:$4 sm:$0xff]   ;;  %v7707_v31 = vrot.slane %v11773_v27, 2  ;;  %v11776_v36 = vld [vmem:[#allocation10 + $0xec] ss:$16 sps:$4 sm:$0xff]   ;;  %s6923_s17 = sshll.u32 %s11908_s0, 4  ;;  %p11844_p10 = pnand %p11842_p9, %p11839_p8  ;;  %s6924_s17 = int_to_ptr.vmem [resolvable:$true] %s6923_s17 }
 0x29e   :  { %7916 = vmatmul.mubr.bf16.gmra.mrb[4].mxu0 %v14911_v20  ;;  %7590 = vmatpush1.bf16.msra.mxu1 %v11758_v18  ;;  %v11770_v34 = vld [vmem:[#allocation10 + $0xc8] ss:$16 sps:$4 sm:$0xff]   ;;  %v11779_v38 = vld [vmem:[#allocation10 + $0x20c] ss:$16 sps:$4 sm:$0xff]  }
 0x29f   :  { %7324 = vmatprep.mubr.bf16.mxu1 %v11907_v53  ;;  %7591 = vmatprep.subr.bf16.mxu1 %v11763_v21  ;;  %v7708_v35 = vsel %vm7699_vm1, %v7705_v23, %v7707_v31  ;;  %v11774_v37 = vld [vmem:[#allocation10 + $0xe8] ss:$16 sps:$4 sm:$0xff]   ;;  %v11782_v40 = vld [vmem:[#allocation10 + $0x22c] ss:$16 sps:$4 sm:$0xff]  }
 0x2a0   :  { %7925 = vmatprep.mubr.bf16.mxu0 %v11907_v53  ;;  %v11777_v39 = vld [vmem:[#allocation10 + $0x208] ss:$16 sps:$4 sm:$0xff]   ;;  %v11785_v42 = vld [vmem:[#allocation10 + $0x24c] ss:$16 sps:$4 sm:$0xff]  }
 0x2a1   :  { %v11780_v41 = vld [vmem:[#allocation10 + $0x228] ss:$16 sps:$4 sm:$0xff]   ;;  %v11788_v44 = vld [vmem:[#allocation10 + $0x26c] ss:$16 sps:$4 sm:$0xff]  }
 0x2a2   :  { %7592 = vmatpush1.bf16.msra.mxu1 %v11761_v22  ;;  %v11783_v43 = vld [vmem:[#allocation10 + $0x248] ss:$16 sps:$4 sm:$0xff]   ;;  %v11791_v47 = vld [vmem:[#allocation10 + $0x28c] ss:$16 sps:$4 sm:$0xff]  }
 0x2a3   :  { %7593 = vmatprep.subr.bf16.mxu1 %v11766_v24  ;;  %v11786_v46 = vld [vmem:[#allocation10 + $0x268] ss:$16 sps:$4 sm:$0xff]   ;;  %v11794_v48 = vld [vmem:[#allocation10 + $0x2ac] ss:$16 sps:$4 sm:$0xff]  }
 0x2a4   :  { %v11792_v49 = vld [vmem:[#allocation10 + $0x2a8] ss:$16 sps:$4 sm:$0xff]   ;;  %v11797_v50 = vld [vmem:[#allocation10 + $0x2cc] ss:$16 sps:$4 sm:$0xff]  }
 0x2a5   :  { %7325 = vmatmul.mubr.bf16.gmra.mrb[24].mxu1 %v14881_v55  ;;  %v11800_v51 = vld [vmem:[#allocation10 + $0x2ec] ss:$16 sps:$4 sm:$0xff]   ;;  %v11798_v52 = vld [vmem:[#allocation10 + $0x2e8] ss:$16 sps:$4 sm:$0xff]  }
 0x2a6   :  { %7926 = vmatmul.mubr.bf16.gmra.mrb[8].mxu0 %v14919_v26  ;;  %7594 = vmatpush1.bf16.msra.mxu1 %v11764_v25 }
 0x2a7   :  { %7334 = vmatprep.mubr.bf16.mxu1 %v11907_v53  ;;  %7595 = vmatprep.subr.bf16.mxu1 %v11769_v28 }
 0x2a8   :  { %7935 = vmatprep.mubr.bf16.mxu0 %v11907_v53 }
 0x2aa   :  { %7596 = vmatpush1.bf16.msra.mxu1 %v11767_v29 }
 0x2ab   :  { %7597 = vmatprep.subr.bf16.mxu1 %v11772_v32 }
 0x2ad   :  { %7335 = vmatmul.mubr.bf16.gmra.mrb[28].mxu1 %v14894_v2 }
 0x2ae   :  { %7936 = vmatmul.mubr.bf16.gmra.mrb[12].mxu0 %v7708_v35  ;;  %7598 = vmatpush1.bf16.msra.mxu1 %v11770_v34 }
 0x2af   :  { %7617 = vmatprep.mubr.bf16.mxu1 %v11907_v53  ;;  %7599 = vmatprep.subr.bf16.mxu1 %v11776_v36 }
 0x2b2   :  { %7600 = vmatpush1.bf16.msra.mxu1 %v11774_v37 }
 0x2b3   :  { %7946 = vmatprep.subr.bf16.mxu1 %v11779_v38 }
 0x2b5   :  { %7618 = vmatmul.mubr.bf16.vlgmr.msra.gmra.mrb[16].mxu1 %v14852_v30  ;;  %v11789_v30 = vld [vmem:[#allocation10 + $0x288] ss:$16 sps:$4 sm:$0xff]  }
 0x2b6   :  { %7947 = vmatpush1.bf16.msra.mxu1 %v11777_v39  ;;  %7627 = vmatprep.mubr.bf16.mxu1 %v11907_v53 }
 0x2b7   :  { %7948 = vmatprep.subr.bf16.mxu1 %v11782_v40 }
 0x2ba   :  { %7949 = vmatpush1.bf16.msra.mxu1 %v11780_v41 }
 0x2bb   :  { %7950 = vmatprep.subr.bf16.mxu1 %v11785_v42 }
 0x2bd   :  { %7628 = vmatmul.mubr.bf16.gmra.mrb[20].mxu1 %v14845_v19  ;;  %v11795_v19 = vld [vmem:[#allocation10 + $0x2c8] ss:$16 sps:$4 sm:$0xff]  }
 0x2be   :  { %7951 = vmatpush1.bf16.msra.mxu1 %v11783_v43  ;;  %7637 = vmatprep.mubr.bf16.mxu1 %v11907_v53 }
 0x2bf   :  { %7952 = vmatprep.subr.bf16.mxu1 %v11788_v44 }
 0x2c2   :  { %7953 = vmatpush1.bf16.msra.mxu1 %v11786_v46 }
 0x2c3   :  { %7954 = vmatprep.subr.bf16.mxu1 %v11791_v47 }
 0x2c5   :  { %7638 = vmatmul.mubr.bf16.gmra.mrb[24].mxu1 %v14860_v33 }
 0x2c6   :  { %7955 = vmatpush1.bf16.msra.mxu1 %v11789_v30  ;;  %7647 = vmatprep.mubr.bf16.mxu1 %v11907_v53 }
 0x2c7   :  { %7956 = vmatprep.subr.bf16.mxu1 %v11794_v48 }
 0x2ca   :  { %7957 = vmatpush1.bf16.msra.mxu1 %v11792_v49 }
 0x2cb   :  { %7958 = vmatprep.subr.bf16.mxu1 %v11797_v50 }
 0x2cd   :  { %7648 = vmatmul.mubr.bf16.gmra.mrb[28].mxu1 %v14873_v45 }
 0x2ce   :  { %7959 = vmatpush1.bf16.msra.mxu1 %v11795_v19  ;;  %7978 = vmatprep.mubr.bf16.mxu1 %v11907_v53 }
 0x2cf   :  { %7960 = vmatprep.subr.bf16.mxu1 %v11800_v51 }
 0x2d2   :  { %7961 = vmatpush1.bf16.msra.mxu1 %v11798_v52 }
 0x2d5   :  { %7979 = vmatmul.mubr.bf16.vlgmr.msra.gmra.mrb[16].mxu1 %v14903_v13 }
 0x2d6   :  { %7988 = vmatprep.mubr.bf16.mxu1 %v11907_v53 }
 0x2dd   :  { %7989 = vmatmul.mubr.bf16.gmra.mrb[20].mxu1 %v14911_v20 }
 0x2de   :  { %7998 = vmatprep.mubr.bf16.mxu1 %v11907_v53 }
 0x2e5   :  { %7999 = vmatmul.mubr.bf16.gmra.mrb[24].mxu1 %v14919_v26 }
 0x2e6   :  { %8008 = vmatprep.mubr.bf16.mxu1 %v11907_v53 }
 0x2ed   :  { %8009 = vmatmul.mubr.bf16.gmra.mrb[28].mxu1 %v7708_v35 }
 0x2ee   :  { %11847 = shalt.err (!%p11844_p10)  }
 0x2ef   :  { %s11848_s21 = scalar_lea.vmem %s6924_s17, 2048  ;;  %p11853_p12 = scmp.lt.s32.totalorder %s6924_s17, %s6924_s17 }
 0x2f0   :  { %p11849_p11 = scmp.ne.s32.totalorder %s6924_s17, %s11848_s21  ;;  %p11854_p13 = scmp.lt.s32.totalorder %s11848_s21, %s11848_s21 }
 0x2f2   :  { %p11855_p0 = por %p11854_p13, %p11853_p12 }
 0x2f4   :  { %p11856_p1 = pnand %p11855_p0, %p11849_p11 }
 0x2f6   :  { %11859 = shalt.err (!%p11856_p1)  }
 0x2f7   :  { %6926 = dma.hbm_to_vmem [thread:$0]  %s15623_s10, 2048, %s6924_s17, [#allocation9 + $0x4]  ;;  %v8053_v0 = vlaneseq  ;;  %v14967_v7 = vld [vmem:[%s15615_s2] sm:$0xf] }
 0x2f9   :  { %v14957_v1 = vshrl.u32 %v8053_v0, 7 }
 0x2fb   :  { %v14962_v6 = vsub.s32 0, %v14957_v1  ;;  %v14970_v8 = vsub.s32 1, %v14957_v1 }
 0x2fd   :  { %v8056_v9 = vrot.slane %v14967_v7, %v14962_v6  ;;  %v8060_v11 = vrot.slane %v14967_v7, %v14970_v8 }
 0x348   :  { %v7233_v33 = vpop.f32.mrb[0].mxu1 }
 0x349   :  { %v7235_v45 = vpop.f32.mrb[1].mxu1 }
 0x34a   :  { %v7237_v54 = vpop.f32.mrb[2].mxu1 }
 0x34b   :  { %v7239_v55 = vpop.f32.mrb[3].mxu1 }
 0x350   :  { %v7243_v56 = vpop.f32.mrb[4].mxu1 }
 0x351   :  { %v7245_v57 = vpop.f32.mrb[5].mxu1 }
 0x352   :  { %v7247_v58 = vpop.f32.mrb[6].mxu1 }
 0x353   :  { %v7249_v59 = vpop.f32.mrb[7].mxu1 }
 0x358   :  { %v7253_v60 = vpop.f32.mrb[8].mxu1 }
 0x359   :  { %v7255_v61 = vpop.f32.mrb[9].mxu1 }
 0x35a   :  { %v7257_v62 = vpop.f32.mrb[10].mxu1 }
 0x35b   :  { %v7259_v63 = vpop.f32.mrb[11].mxu1 }
 0x360   :  { %v7263_v2 = vpop.f32.mrb[12].mxu1 }
 0x361   :  { %v7265_v3 = vpop.f32.mrb[13].mxu1 }
 0x362   :  { %v7267_v4 = vpop.f32.mrb[14].mxu1 }
 0x363   :  { %v14959_v5 = vpop.f32.mrb[15].mxu1 }
 0x369   :  { %v7907_v10 = vpop.f32.mrb[0].mxu0 }
 0x36a   :  { %v11483_v12 = vadd.f32 %v7907_v10, %v7233_v33  ;;  %v7909_v13 = vpop.f32.mrb[1].mxu0 }
 0x36b   :  { %v11484_v14 = vadd.f32 %v7909_v13, %v7235_v45  ;;  %v7911_v15 = vpop.f32.mrb[2].mxu0 }
 0x36c   :  { %v14976_v16 = vadd.f32 %v11483_v12, %v8056_v9  ;;  %v11485_v17 = vadd.f32 %v7911_v15, %v7237_v54  ;;  %v7913_v18 = vpop.f32.mrb[3].mxu0 }
 0x36d   :  { %v14978_v20 = vadd.f32 %v11484_v14, %v8060_v11  ;;  %v11486_v21 = vadd.f32 %v7913_v18, %v7239_v55 }
 0x36e   :  { %v8105_v22 = vmax.f32 %v14976_v16, 0.0  ;;  %v14981_v23 = vadd.f32 %v11485_v17, %v8056_v9 }
 0x36f   :  { %v8106_v24 = vmax.f32 %v14978_v20, 0.0  ;;  %v14984_v25 = vadd.f32 %v11486_v21, %v8060_v11 }
 0x370   :  { %v8109_v26 = vmax.f32 %v14981_v23, 0.0 }
 0x371   :  { %v8110_v27 = vmax.f32 %v14984_v25, 0.0  ;;  %v7917_v28 = vpop.f32.mrb[4].mxu0 }
 0x372   :  { %v11487_v29 = vadd.f32 %v7917_v28, %v7243_v56  ;;  %v7919_v31 = vpop.f32.mrb[5].mxu0 }
 0x373   :  { %v11488_v32 = vadd.f32 %v7919_v31, %v7245_v57  ;;  %v7921_v34 = vpop.f32.mrb[6].mxu0 }
 0x374   :  { %v14988_v35 = vadd.f32 %v11487_v29, %v8056_v9  ;;  %v11489_v36 = vadd.f32 %v7921_v34, %v7247_v58  ;;  %v7923_v37 = vpop.f32.mrb[7].mxu0  ;;  %v15626_v29 = vsub.s32 2, %v14957_v1 }
 0x375   :  { %v14990_v38 = vadd.f32 %v11488_v32, %v8060_v11  ;;  %v11490_v39 = vadd.f32 %v7923_v37, %v7249_v59 }
 0x376   :  { %v8113_v40 = vmax.f32 %v14988_v35, 0.0  ;;  %v14993_v41 = vadd.f32 %v11489_v36, %v8056_v9 }
 0x377   :  { %v8114_v42 = vmax.f32 %v14990_v38, 0.0  ;;  %v14996_v43 = vadd.f32 %v11490_v39, %v8060_v11 }
 0x378   :  { %v8117_v44 = vmax.f32 %v14993_v41, 0.0 }
 0x379   :  { %v8118_v46 = vmax.f32 %v14996_v43, 0.0  ;;  %v7927_v47 = vpop.f32.mrb[8].mxu0 }
 0x37a   :  { %v11491_v30 = vadd.f32 %v7927_v47, %v7253_v60  ;;  %v7929_v48 = vpop.f32.mrb[9].mxu0 }
 0x37b   :  { %v11492_v49 = vadd.f32 %v7929_v48, %v7255_v61  ;;  %v7931_v50 = vpop.f32.mrb[10].mxu0 }
 0x37c   :  { %v15000_v19 = vadd.f32 %v11491_v30, %v8056_v9  ;;  %v11493_v51 = vadd.f32 %v7931_v50, %v7257_v62  ;;  %v7933_v52 = vpop.f32.mrb[11].mxu0 }
 0x37d   :  { %v15002_v33 = vadd.f32 %v11492_v49, %v8060_v11  ;;  %v11494_v45 = vadd.f32 %v7933_v52, %v7259_v63 }
 0x37e   :  { %v8121_v54 = vmax.f32 %v15000_v19, 0.0  ;;  %v15005_v55 = vadd.f32 %v11493_v51, %v8056_v9 }
 0x37f   :  { %v8122_v56 = vmax.f32 %v15002_v33, 0.0  ;;  %v15008_v57 = vadd.f32 %v11494_v45, %v8060_v11 }
 0x380   :  { %v8125_v58 = vmax.f32 %v15005_v55, 0.0 }
 0x381   :  { %v8126_v59 = vmax.f32 %v15008_v57, 0.0  ;;  %v7937_v60 = vpop.f32.mrb[12].mxu0 }
 0x382   :  { %v11495_v61 = vadd.f32 %v7937_v60, %v7263_v2  ;;  %v7939_v0 = vpop.f32.mrb[13].mxu0 }
 0x383   :  { %v11496_v62 = vadd.f32 %v7939_v0, %v7265_v3  ;;  %v7941_v10 = vpop.f32.mrb[14].mxu0 }
 0x384   :  { %v15012_v12 = vadd.f32 %v11495_v61, %v8056_v9  ;;  %v11497_v63 = vadd.f32 %v7941_v10, %v7267_v4  ;;  %v7943_v13 = vpop.f32.mrb[15].mxu0  ;;  %v15625_v4 = vsub.s32 3, %v14957_v1 }
 0x385   :  { %v15014_v14 = vadd.f32 %v11496_v62, %v8060_v11  ;;  %v11498_v15 = vadd.f32 %v7943_v13, %v14959_v5  ;;  %v8064_v5 = vrot.slane %v14967_v7, %v15626_v29 }
 0x386   :  { %v8129_v17 = vmax.f32 %v15012_v12, 0.0  ;;  %v15018_v18 = vadd.f32 %v11497_v63, %v8056_v9  ;;  %v8068_v9 = vrot.slane %v14967_v7, %v15625_v4 }
 0x387   :  { %v8130_v21 = vmax.f32 %v15014_v14, 0.0  ;;  %v15021_v28 = vadd.f32 %v11498_v15, %v8060_v11 }
 0x3a8   :  { %v7980_v31 = vpop.f32.mrb[16].mxu1 }
 0x3a9   :  { %v8075_v32 = vadd.f32 %v8064_v5, %v7980_v31  ;;  %v7982_v11 = vpop.f32.mrb[17].mxu1 }
 0x3aa   :  { %v8076_v34 = vadd.f32 %v8068_v9, %v7982_v11  ;;  %v7984_v36 = vpop.f32.mrb[18].mxu1 }
 0x3ab   :  { %v8107_v37 = vmax.f32 %v8075_v32, 0.0  ;;  %v8079_v39 = vadd.f32 %v8064_v5, %v7984_v36  ;;  %v7986_v47 = vpop.f32.mrb[19].mxu1 }
 0x3ac   :  { %v8108_v30 = vmax.f32 %v8076_v34, 0.0  ;;  %v8080_v48 = vadd.f32 %v8068_v9, %v7986_v47 }
 0x3ad   :  { %v8111_v49 = vmax.f32 %v8079_v39, 0.0 }
 0x3ae   :  { %v8112_v50 = vmax.f32 %v8080_v48, 0.0 }
 0x3b0   :  { %v7990_v51 = vpop.f32.mrb[20].mxu1 }
 0x3b1   :  { %v8083_v52 = vadd.f32 %v8064_v5, %v7990_v51  ;;  %v7992_v45 = vpop.f32.mrb[21].mxu1 }
 0x3b2   :  { %v8084_v60 = vadd.f32 %v8068_v9, %v7992_v45  ;;  %v7994_v61 = vpop.f32.mrb[22].mxu1 }
 0x3b3   :  { %v8115_v0 = vmax.f32 %v8083_v52, 0.0  ;;  %v8087_v62 = vadd.f32 %v8064_v5, %v7994_v61  ;;  %v7996_v7 = vpop.f32.mrb[23].mxu1 }
 0x3b4   :  { %v8116_v10 = vmax.f32 %v8084_v60, 0.0  ;;  %v8088_v63 = vadd.f32 %v8068_v9, %v7996_v7 }
 0x3b5   :  { %v8119_v13 = vmax.f32 %v8087_v62, 0.0 }
 0x3b6   :  { %v8120_v15 = vmax.f32 %v8088_v63, 0.0 }
 0x3b8   :  { %v8000_v31 = vpop.f32.mrb[24].mxu1 }
 0x3b9   :  { %v15033_v32 = vadd.f32 %v8064_v5, %v8000_v31  ;;  %v8002_v11 = vpop.f32.mrb[25].mxu1 }
 0x3ba   :  { %v15035_v34 = vadd.f32 %v8068_v9, %v8002_v11  ;;  %v8004_v36 = vpop.f32.mrb[26].mxu1 }
 0x3bb   :  { %v8123_v39 = vmax.f32 %v15033_v32, 0.0  ;;  %v15038_v47 = vadd.f32 %v8064_v5, %v8004_v36  ;;  %v8006_v48 = vpop.f32.mrb[27].mxu1 }
 0x3bc   :  { %v8124_v51 = vmax.f32 %v15035_v34, 0.0  ;;  %v15041_v52 = vadd.f32 %v8068_v9, %v8006_v48 }
 0x3bd   :  { %v8127_v45 = vmax.f32 %v15038_v47, 0.0 }
 0x3be   :  { %v8128_v60 = vmax.f32 %v15041_v52, 0.0 }
 0x3c0   :  { %v8010_v61 = vpop.f32.mrb[28].mxu1 }
 0x3c1   :  { %v15045_v62 = vadd.f32 %v8064_v5, %v8010_v61  ;;  %v8012_v7 = vpop.f32.mrb[29].mxu1 }
 0x3c2   :  { %v15047_v63 = vadd.f32 %v8068_v9, %v8012_v7  ;;  %v8014_v31 = vpop.f32.mrb[30].mxu1 }
 0x3c3   :  { %v15050_v36 = vadd.f32 %v8064_v5, %v8014_v31  ;;  %v8016_v4 = vpop.f32.mrb[31].mxu1 }
 0x3c4   :  { %v15053_v48 = vadd.f32 %v8068_v9, %v8016_v4 }
 0x3c5   :  { %11884 = dma.done.wait [#allocation9], 16384 }
 0x3c6   :  { %11885 = vsyncadd [#allocation9], 4294950912  ;;  %9041 = vst [vmem:[#allocation2] sm:$0x11] %v11907_v53  ;;  %v11909_v61 = vmov 1983009808   ;;  %v8301_v5 = vcombine.low %v8105_v22, %v8106_v24  ;;  %v8302_v4 = vcombine.high %v8105_v22, %v8106_v24  ;;  %v8303_v9 = vcombine.low %v8107_v37, %v8108_v30 }
 0x3c7   :  { %9042 = vst [vmem:[#allocation2 + $0x20] sm:$0x22] %v11907_v53  ;;  %v8306_v7 = vunpack.c.l.s4 %v11909_v61  ;;  %v8304_v31 = vcombine.high %v8107_v37, %v8108_v30  ;;  %v8337_v53 = vcombine.low %v8109_v26, %v8110_v27  ;;  %v8338_v61 = vcombine.high %v8109_v26, %v8110_v27  ;;  %v8142_v27 = vld [vmem:[#allocation4 + $0x8] sm:$0xff]  ;;  %v8141_v38 = vld [vmem:[#allocation4] sm:$0xff] }
 0x3c8   :  { %v8339_v3 = vcombine.low %v8111_v49, %v8112_v50  ;;  %v8340_v11 = vcombine.high %v8111_v49, %v8112_v50  ;;  %v8373_v16 = vcombine.low %v8113_v40, %v8114_v42  ;;  %v8374_v20 = vcombine.high %v8113_v40, %v8114_v42  ;;  %v8146_v37 = vld [vmem:[#allocation4 + $0x28] sm:$0xff]  ;;  %8821 = vmatprep.subr.bf16.mxu1 %v8142_v27  ;;  %v8157_v55 = vld [vmem:[#allocation4 + $0x80] sm:$0xff] }
 0x3c9   :  { %v8307_v2 = vunpack.c.0.s8 %v8306_v7  ;;  %v8375_v22 = vcombine.low %v8115_v0, %v8116_v10  ;;  %v8376_v25 = vcombine.high %v8115_v0, %v8116_v10  ;;  %v8409_v23 = vcombine.low %v8117_v44, %v8118_v46  ;;  %8822 = vmatpush1.bf16.msra.mxu1 %v8141_v38  ;;  %v8145_v10 = vld [vmem:[#allocation4 + $0x20] sm:$0xff] }
 0x3ca   :  { %v8410_v26 = vcombine.high %v8117_v44, %v8118_v46  ;;  %v8411_v35 = vcombine.low %v8119_v13, %v8120_v15  ;;  %v8412_v40 = vcombine.high %v8119_v13, %v8120_v15  ;;  %v15098_v42 = vcombine.low %v8121_v54, %v8122_v56  ;;  %8823 = vmatprep.subr.bf16.mxu1 %v8146_v37 }
 0x3cb   :  { %v15084_v24 = vsub.s32 %v8307_v2, %v14957_v1  ;;  %v15104_v2 = vcombine.low %v8123_v39, %v8124_v51  ;;  %v8481_v33 = vcombine.low %v8125_v58, %v8126_v59  ;;  %v8483_v32 = vcombine.low %v8127_v45, %v8128_v60 }
 0x3cc   :  { %v15628_v52 = vmax.f32 %v15045_v62, 0.0  ;;  %vm9063_vm2 = vcmask 1040384   ;;  %vm9064_vm3 = vcmask 1044484  }
 0x3cd   :  { %v8311_v41 = vrot.slane %v8301_v5, %v15084_v24  ;;  %v8318_v43 = vrot.slane %v8302_v4, %v15084_v24  ;;  %v8325_v44 = vrot.slane %v8303_v9, %v15084_v24  ;;  %v8332_v46 = vrot.slane %v8304_v31, %v15084_v24  ;;  %v8150_v4 = vld [vmem:[#allocation4 + $0x48] sm:$0xff]  ;;  %8824 = vmatpush1.bf16.msra.mxu1 %v8145_v10  ;;  %vm15308_vm4 = vmor %vm9063_vm2, %vm9064_vm3 }
 0x3ce   :  { %v8347_v30 = vrot.slane %v8337_v53, %v15084_v24  ;;  %v8354_v49 = vrot.slane %v8338_v61, %v15084_v24  ;;  %v8361_v50 = vrot.slane %v8339_v3, %v15084_v24  ;;  %v8368_v0 = vrot.slane %v8340_v11, %v15084_v24  ;;  %8825 = vmatprep.subr.bf16.mxu1 %v8150_v4 }
 0x3cf   :  { %v8333_v13 = vcombine.low %v8311_v41, %v8325_v44  ;;  %v8334_v15 = vcombine.high %v8311_v41, %v8325_v44  ;;  %v8335_v7 = vcombine.low %v8318_v43, %v8332_v46  ;;  %v8336_v5 = vcombine.high %v8318_v43, %v8332_v46  ;;  %v8149_v44 = vld [vmem:[#allocation4 + $0x40] sm:$0xff] }
 0x3d0   :  { %v8369_v27 = vcombine.low %v8347_v30, %v8361_v50  ;;  %v8370_v9 = vcombine.high %v8347_v30, %v8361_v50  ;;  %v8371_v29 = vcombine.low %v8354_v49, %v8368_v0  ;;  %v8372_v31 = vcombine.high %v8354_v49, %v8368_v0 }
 0x3d1   :  { %v8383_v38 = vrot.slane %v8373_v16, %v15084_v24  ;;  %v8390_v53 = vrot.slane %v8374_v20, %v15084_v24  ;;  %v8397_v61 = vrot.slane %v8375_v22, %v15084_v24  ;;  %v8404_v3 = vrot.slane %v8376_v25, %v15084_v24  ;;  %v8154_v20 = vld [vmem:[#allocation4 + $0x68] sm:$0xff]  ;;  %8826 = vmatpush1.bf16.msra.mxu1 %v8149_v44 }
 0x3d2   :  { %v8419_v11 = vrot.slane %v8409_v23, %v15084_v24  ;;  %v8426_v37 = vrot.slane %v8410_v26, %v15084_v24  ;;  %v8433_v41 = vrot.slane %v8411_v35, %v15084_v24  ;;  %v8440_v43 = vrot.slane %v8412_v40, %v15084_v24  ;;  %8827 = vmatprep.subr.bf16.mxu1 %v8154_v20 }
 0x3d3   :  { %v8405_v46 = vcombine.low %v8383_v38, %v8397_v61  ;;  %v8406_v30 = vcombine.high %v8383_v38, %v8397_v61  ;;  %v8407_v16 = vcombine.low %v8390_v53, %v8404_v3  ;;  %v8408_v49 = vcombine.high %v8390_v53, %v8404_v3  ;;  %v8153_v61 = vld [vmem:[#allocation4 + $0x60] sm:$0xff] }
 0x3d4   :  { %v8441_v50 = vcombine.low %v8419_v11, %v8433_v41  ;;  %v8442_v22 = vcombine.high %v8419_v11, %v8433_v41  ;;  %v8443_v0 = vcombine.low %v8426_v37, %v8440_v43  ;;  %v8444_v25 = vcombine.high %v8426_v37, %v8440_v43 }
 0x3d5   :  { %v15122_v10 = vmax.f32 %v8333_v13, %v8334_v15  ;;  %v15124_v23 = vmax.f32 %v8335_v7, %v8336_v5  ;;  %v15126_v26 = vmax.f32 %v8369_v27, %v8370_v9  ;;  %v15128_v35 = vmax.f32 %v8371_v29, %v8372_v31  ;;  %v8158_v7 = vld [vmem:[#allocation4 + $0x88] sm:$0xff]  ;;  %8828 = vmatpush1.bf16.msra.mxu1 %v8153_v61 }
 0x3d6   :  { %v15130_v40 = vmax.f32 %v8405_v46, %v8406_v30  ;;  %v15132_v4 = vmax.f32 %v8407_v16, %v8408_v49  ;;  %v15134_v38 = vmax.f32 %v8441_v50, %v8442_v22  ;;  %v15136_v53 = vmax.f32 %v8443_v0, %v8444_v25  ;;  %8829 = vmatprep.subr.bf16.mxu1 %v8158_v7  ;;  %v8161_v46 = vld [vmem:[#allocation4 + $0xa0] sm:$0xff]  ;;  %v8166_v49 = vld [vmem:[#allocation4 + $0xc8] sm:$0xff] }
 0x3d7   :  { %v8653_v13 = vcombine.low %v15122_v10, %v15124_v23  ;;  %v8655_v15 = vcombine.low %v15126_v26, %v15128_v35  ;;  %v8446_v29 = vcombine.high %v8121_v54, %v8122_v56  ;;  %v8448_v9 = vcombine.high %v8123_v39, %v8124_v51 }
 0x3d8   :  { %v8689_v5 = vcombine.low %v15130_v40, %v15132_v4  ;;  %v8691_v27 = vcombine.low %v15134_v38, %v15136_v53  ;;  %v8482_v56 = vcombine.high %v8125_v58, %v8126_v59  ;;  %v8455_v51 = vrot.slane %v15098_v42, %v15084_v24 }
 0x3d9   :  { %v15159_v19 = vrot.slane %v8653_v13, %v15084_v24  ;;  %v15162_v54 = vrot.slane %v8655_v15, %v15084_v24  ;;  %v8469_v57 = vrot.slane %v15104_v2, %v15084_v24  ;;  %v8484_v59 = vcombine.high %v8127_v45, %v8128_v60  ;;  %v8162_v2 = vld [vmem:[#allocation4 + $0xa8] sm:$0xff]  ;;  %8830 = vmatpush1.bf16.msra.mxu1 %v8157_v55  ;;  %v8165_v55 = vld [vmem:[#allocation4 + $0xc0] sm:$0xff] }
 0x3da   :  { %v15173_v34 = vrot.slane %v8689_v5, %v15084_v24  ;;  %v15176_v39 = vrot.slane %v8691_v27, %v15084_v24  ;;  %v8517_v31 = vcombine.low %v8129_v17, %v8130_v21  ;;  %v8518_v42 = vcombine.high %v8129_v17, %v8130_v21  ;;  %8831 = vmatprep.subr.bf16.mxu1 %v8162_v2  ;;  %v8170_v2 = vld [vmem:[#allocation4 + $0xe8] sm:$0xff] }
 0x3db   :  { %v8686_v58 = vcombine.high %v15159_v19, %v15162_v54  ;;  %v15627_v11 = vmax.f32 %v15047_v63, 0.0  ;;  %v15630_v60 = vmov %v15628_v52  ;;  %v8462_v41 = vrot.slane %v8446_v29, %v15084_v24 }
 0x3dc   :  { %v8722_v3 = vcombine.high %v15173_v34, %v15176_v39  ;;  %v8476_v14 = vrot.slane %v8448_v9, %v15084_v24  ;;  %v8491_v12 = vrot.slane %v8481_v33, %v15084_v24  ;;  %v8477_v21 = vcombine.low %v8455_v51, %v8469_v57 }
 0x3dd   :  { %v8519_v47 = vcombine.low %v15628_v52, %v15627_v11  ;;  %v15629_v45 = vmov %v15627_v11  ;;  %v8498_v43 = vrot.slane %v8482_v56, %v15084_v24  ;;  %v8505_v44 = vrot.slane %v8483_v32, %v15084_v24  ;;  %8832 = vmatpush1.bf16.msra.mxu1 %v8161_v46 }
 0x3de   :  { %v8520_v37 = vcombine.high %v15630_v60, %v15629_v45  ;;  %v15209_v17 = vpack.c.bf16 %v8722_v3, %v8686_v58  ;;  %v8478_v63 = vcombine.high %v8455_v51, %v8469_v57  ;;  %v8512_v62 = vrot.slane %v8484_v59, %v15084_v24  ;;  %8833 = vmatprep.subr.bf16.mxu1 %v8166_v49 }
 0x3df   :  { %v8527_v30 = vrot.slane %v8517_v31, %v15084_v24  ;;  %v8534_v16 = vrot.slane %v8518_v42, %v15084_v24  ;;  %v8541_v20 = vrot.slane %v8519_v47, %v15084_v24  ;;  %v15631_v22 = vmax.f32 %v15021_v28, 0.0 }
 0x3e0   :  { %8853 = vmatprep.mubr.bf16.mxu1 %v15209_v17  ;;  %v8548_v50 = vrot.slane %v8520_v37, %v15084_v24  ;;  %v15632_v0 = vmax.f32 %v15018_v18, 0.0  ;;  %v8479_v29 = vcombine.low %v8462_v41, %v8476_v14  ;;  %v8480_v7 = vcombine.high %v8462_v41, %v8476_v14  ;;  %v8169_v37 = vld [vmem:[#allocation4 + $0xe0] sm:$0xff] }
 0x3e1   :  { %v15633_v61 = vmov %v15631_v22  ;;  %v15635_v5 = vmax.f32 %v15053_v48, 0.0  ;;  %v15636_v27 = vmax.f32 %v15050_v36, 0.0  ;;  %v8513_v51 = vcombine.low %v8491_v12, %v8505_v44  ;;  %8834 = vmatpush1.bf16.msra.mxu1 %v8165_v55  ;;  %v8194_v55 = vld [vmem:[#allocation4 + $0x1a8] sm:$0xff] }
 0x3e2   :  { %v8553_v25 = vcombine.low %v15632_v0, %v15631_v22  ;;  %v15634_v13 = vmov %v15632_v0  ;;  %v8514_v57 = vcombine.high %v8491_v12, %v8505_v44  ;;  %v8515_v58 = vcombine.low %v8498_v43, %v8512_v62  ;;  %8835 = vmatprep.subr.bf16.mxu1 %v8170_v2  ;;  %v8174_v12 = vld [vmem:[#allocation4 + $0x108] sm:$0xff]  ;;  %v8193_v2 = vld [vmem:[#allocation4 + $0x1a0] sm:$0xff] }
 0x3e3   :  { %v8554_v15 = vcombine.high %v15634_v13, %v15633_v61  ;;  %v8555_v9 = vcombine.low %v15636_v27, %v15635_v5  ;;  %v15637_v33 = vmov %v15635_v5  ;;  %v15638_v56 = vmov %v15636_v27 }
 0x3e4   :  { %v8556_v32 = vcombine.high %v15638_v56, %v15637_v33  ;;  %v8563_v28 = vrot.slane %v8553_v25, %v15084_v24  ;;  %v8516_v59 = vcombine.high %v8498_v43, %v8512_v62  ;;  %v8549_v48 = vcombine.low %v8527_v30, %v8541_v20  ;;  %v8178_v25 = vld [vmem:[#allocation4 + $0x128] sm:$0xff] }
 0x3e5   :  { %v8570_v18 = vrot.slane %v8554_v15, %v15084_v24  ;;  %v8577_v31 = vrot.slane %v8555_v9, %v15084_v24  ;;  %v8550_v3 = vcombine.high %v8527_v30, %v8541_v20  ;;  %v8551_v36 = vcombine.low %v8534_v16, %v8548_v50  ;;  %8836 = vmatpush1.bf16.msra.mxu1 %v8169_v37  ;;  %v8182_v9 = vld [vmem:[#allocation4 + $0x148] sm:$0xff] }
 0x3e6   :  { %v8584_v42 = vrot.slane %v8556_v32, %v15084_v24  ;;  %v8552_v11 = vcombine.high %v8534_v16, %v8548_v50  ;;  %v8629_v41 = vmax.f32 %v8477_v21, %v8478_v63  ;;  %v8630_v14 = vmax.f32 %v8479_v29, %v8480_v7  ;;  %8837 = vmatprep.subr.bf16.mxu1 %v8174_v12  ;;  %v8173_v50 = vld [vmem:[#allocation4 + $0x100] sm:$0xff] }
 0x3e7   :  { %v8585_v52 = vcombine.low %v8563_v28, %v8577_v31  ;;  %v8586_v47 = vcombine.high %v8563_v28, %v8577_v31  ;;  %v8631_v43 = vmax.f32 %v8513_v51, %v8514_v57  ;;  %v8632_v44 = vmax.f32 %v8515_v58, %v8516_v59  ;;  %v8177_v7 = vld [vmem:[#allocation4 + $0x120] sm:$0xff]  ;;  %v8186_v51 = vld [vmem:[#allocation4 + $0x168] sm:$0xff] }
 0x3e8   :  { %v8587_v45 = vcombine.low %v8570_v18, %v8584_v42  ;;  %v8588_v60 = vcombine.high %v8570_v18, %v8584_v42  ;;  %v8633_v46 = vmax.f32 %v8549_v48, %v8550_v3  ;;  %v8634_v62 = vmax.f32 %v8551_v36, %v8552_v11  ;;  %v8181_v32 = vld [vmem:[#allocation4 + $0x140] sm:$0xff]  ;;  %v8190_v28 = vld [vmem:[#allocation4 + $0x188] sm:$0xff] }
 0x3e9   :  { %v8635_v49 = vmax.f32 %v8585_v52, %v8586_v47  ;;  %v8726_v30 = vcombine.high %v8629_v41, %v8630_v14  ;;  %v8728_v20 = vcombine.high %v8631_v43, %v8632_v44  ;;  %8838 = vmatpush1.bf16.msra.mxu1 %v8173_v50  ;;  %v8185_v57 = vld [vmem:[#allocation4 + $0x160] sm:$0xff]  ;;  %v8725_v58 = vcombine.low %v8629_v41, %v8630_v14  ;;  %v8198_v48 = vld [vmem:[#allocation4 + $0x1c8] sm:$0xff] }
 0x3ea   :  { %v8636_v22 = vmax.f32 %v8587_v45, %v8588_v60  ;;  %v8762_v16 = vcombine.high %v8633_v46, %v8634_v62  ;;  %8839 = vmatprep.subr.bf16.mxu1 %v8178_v25  ;;  %v8189_v18 = vld [vmem:[#allocation4 + $0x180] sm:$0xff]  ;;  %v8727_v59 = vcombine.low %v8631_v43, %v8632_v44  ;;  %v8761_v31 = vcombine.low %v8633_v46, %v8634_v62  ;;  %v8202_v45 = vld [vmem:[#allocation4 + $0x1e8] sm:$0xff] }
 0x3eb   :  { %v8742_v61 = vrot.slane %v8726_v30, %v15084_v24  ;;  %v8756_v21 = vrot.slane %v8728_v20, %v15084_v24  ;;  %v8735_v3 = vrot.slane %v8725_v58, %v15084_v24  ;;  %v8197_v47 = vld [vmem:[#allocation4 + $0x1c0] sm:$0xff]  ;;  %v8685_v60 = vcombine.low %v15159_v19, %v15162_v54  ;;  %v8206_v54 = vld [vmem:[#allocation4 + $0x208] sm:$0xff] }
 0x3ec   :  { %v8764_v0 = vcombine.high %v8635_v49, %v8636_v22  ;;  %v8778_v63 = vrot.slane %v8762_v16, %v15084_v24  ;;  %v8763_v42 = vcombine.low %v8635_v49, %v8636_v22  ;;  %v8749_v36 = vrot.slane %v8727_v59, %v15084_v24  ;;  %v8201_v19 = vld [vmem:[#allocation4 + $0x1e0] sm:$0xff]  ;;  %v8214_v30 = vld [vmem:[#allocation4 + $0x248] sm:$0xff] }
 0x3ed   :  { %v8760_v15 = vcombine.high %v8742_v61, %v8756_v21  ;;  %v8759_v29 = vcombine.low %v8742_v61, %v8756_v21  ;;  %8840 = vmatpush1.bf16.msra.mxu1 %v8177_v7  ;;  %v8771_v11 = vrot.slane %v8761_v31, %v15084_v24  ;;  %v8721_v37 = vcombine.low %v15173_v34, %v15176_v39  ;;  %v8209_v22 = vld [vmem:[#allocation4 + $0x220] sm:$0xff]  ;;  %v8222_v61 = vld [vmem:[#allocation4 + $0x288] sm:$0xff] }
 0x3ee   :  { %v8792_v13 = vrot.slane %v8764_v0, %v15084_v24  ;;  %8841 = vmatprep.subr.bf16.mxu1 %v8182_v9  ;;  %v8785_v52 = vrot.slane %v8763_v42, %v15084_v24  ;;  %v8654_v41 = vcombine.high %v15122_v10, %v15124_v23  ;;  %v8656_v14 = vcombine.high %v15126_v26, %v15128_v35  ;;  %v8213_v50 = vld [vmem:[#allocation4 + $0x240] sm:$0xff]  ;;  %v8218_v0 = vld [vmem:[#allocation4 + $0x268] sm:$0xff] }
 0x3ef   :  { %v8758_v12 = vcombine.high %v8735_v3, %v8749_v36  ;;  %v8690_v44 = vcombine.high %v15130_v40, %v15132_v4  ;;  %v8692_v46 = vcombine.high %v15134_v38, %v15136_v53  ;;  %v15263_v62 = vpack.c.bf16 %v8721_v37, %v8685_v60  ;;  %v8205_v40 = vld [vmem:[#allocation4 + $0x200] sm:$0xff]  ;;  %v8210_v4 = vld [vmem:[#allocation4 + $0x228] sm:$0xff]  ;;  %v8143_v60 = vld [vmem:[#allocation4 + $0x10] sm:$0xff] }
 0x3f0   :  { %v8796_v5 = vcombine.high %v8778_v63, %v8792_v13  ;;  %v8795_v27 = vcombine.low %v8778_v63, %v8792_v13  ;;  %v8794_v43 = vcombine.high %v8771_v11, %v8785_v52  ;;  %v15266_v34 = vrot.slane %v8654_v41, %v15084_v24  ;;  %v8217_v25 = vld [vmem:[#allocation4 + $0x260] sm:$0xff]  ;;  %v8226_v63 = vld [vmem:[#allocation4 + $0x2a8] sm:$0xff]  ;;  %v8148_v37 = vld [vmem:[#allocation4 + $0x38] sm:$0xff] }
 0x3f1   :  { %8842 = vmatpush1.bf16.msra.mxu1 %v8181_v32  ;;  %v15271_v23 = vrot.slane %v8656_v14, %v15084_v24  ;;  %v15274_v26 = vrot.slane %v8690_v44, %v15084_v24  ;;  %v15277_v35 = vrot.slane %v8692_v46, %v15084_v24  ;;  %v8757_v38 = vcombine.low %v8735_v3, %v8749_v36  ;;  %v8221_v21 = vld [vmem:[#allocation4 + $0x280] sm:$0xff]  ;;  %v8234_v7 = vld [vmem:[#allocation4 + $0x2e8] sm:$0xff]  ;;  %v8147_v41 = vld [vmem:[#allocation4 + $0x30] sm:$0xff] }
 0x3f2   :  { %v15243_v33 = vpack.c.bf16 %v8796_v5, %v8760_v15  ;;  %v15245_v56 = vpack.c.bf16 %v8795_v27, %v8759_v29  ;;  %8843 = vmatprep.subr.bf16.mxu1 %v8186_v51  ;;  %v15268_v10 = vpack.c.bf16 %v8794_v43, %v8758_v12  ;;  %v8793_v53 = vcombine.low %v8771_v11, %v8785_v52  ;;  %v8225_v13 = vld [vmem:[#allocation4 + $0x2a0] sm:$0xff]  ;;  %v8230_v15 = vld [vmem:[#allocation4 + $0x2c8] sm:$0xff]  ;;  %v8152_v14 = vld [vmem:[#allocation4 + $0x58] sm:$0xff] }
 0x3f3   :  { %v8688_v39 = vcombine.high %v15266_v34, %v15271_v23  ;;  %v8724_v49 = vcombine.high %v15274_v26, %v15277_v35  ;;  %v8229_v29 = vld [vmem:[#allocation4 + $0x2c0] sm:$0xff]  ;;  %v8238_v27 = vld [vmem:[#allocation4 + $0x308] sm:$0xff]  ;;  %v8687_v36 = vcombine.low %v15266_v34, %v15271_v23  ;;  %v8723_v11 = vcombine.low %v15274_v26, %v15277_v35  ;;  %v8151_v12 = vld [vmem:[#allocation4 + $0x50] sm:$0xff] }
 0x3f4   :  { %v15285_v20 = vpack.c.bf16 %v8793_v53, %v8757_v38  ;;  %v8233_v5 = vld [vmem:[#allocation4 + $0x2e0] sm:$0xff]  ;;  %v8242_v32 = vld [vmem:[#allocation4 + $0x328] sm:$0xff]  ;;  %v8156_v43 = vld [vmem:[#allocation4 + $0x78] sm:$0xff] }
 0x3f5   :  { %8844 = vmatpush1.bf16.msra.mxu1 %v8185_v57  ;;  %v15287_v16 = vpack.c.bf16 %v8724_v49, %v8688_v39  ;;  %v8237_v9 = vld [vmem:[#allocation4 + $0x300] sm:$0xff]  ;;  %v8246_v57 = vld [vmem:[#allocation4 + $0x348] sm:$0xff]  ;;  %v8155_v44 = vld [vmem:[#allocation4 + $0x70] sm:$0xff] }
 0x3f6   :  { %8845 = vmatprep.subr.bf16.mxu1 %v8190_v28  ;;  %v8241_v51 = vld [vmem:[#allocation4 + $0x320] sm:$0xff]  ;;  %v8254_v58 = vld [vmem:[#allocation4 + $0x388] sm:$0xff]  ;;  %v8160_v46 = vld [vmem:[#allocation4 + $0x98] sm:$0xff] }
 0x3f7   :  { %v8245_v28 = vld [vmem:[#allocation4 + $0x340] sm:$0xff]  ;;  %v8258_v31 = vld [vmem:[#allocation4 + $0x3a8] sm:$0xff]  ;;  %v8163_v34 = vld [vmem:[#allocation4 + $0xb0] sm:$0xff] }
 0x3f8   :  { %v8253_v59 = vld [vmem:[#allocation4 + $0x380] sm:$0xff]  ;;  %v8266_v3 = vld [vmem:[#allocation4 + $0x3e8] sm:$0xff]  ;;  %v8168_v23 = vld [vmem:[#allocation4 + $0xd8] sm:$0xff] }
 0x3f9   :  { %8846 = vmatpush1.bf16.msra.mxu1 %v8189_v18  ;;  %v8250_v18 = vld [vmem:[#allocation4 + $0x368] sm:$0xff]  ;;  %v8257_v42 = vld [vmem:[#allocation4 + $0x3a0] sm:$0xff]  ;;  %v8167_v26 = vld [vmem:[#allocation4 + $0xd0] sm:$0xff] }
 0x3fa   :  { %8847 = vmatprep.subr.bf16.mxu1 %v8194_v55  ;;  %v8249_v55 = vld [vmem:[#allocation4 + $0x360] sm:$0xff]  ;;  %v8172_v35 = vld [vmem:[#allocation4 + $0xf8] sm:$0xff]  ;;  %v8179_v53 = vld [vmem:[#allocation4 + $0x130] sm:$0xff] }
 0x3fb   :  { %v8265_v52 = vld [vmem:[#allocation4 + $0x3e0] sm:$0xff]  ;;  %v8180_v38 = vld [vmem:[#allocation4 + $0x138] sm:$0xff]  ;;  %v8183_v49 = vld [vmem:[#allocation4 + $0x150] sm:$0xff] }
 0x3fc   :  { %v8184_v39 = vld [vmem:[#allocation4 + $0x158] sm:$0xff] }
 0x3fd   :  { %8848 = vmatpush1.bf16.msra.mxu1 %v8193_v2  ;;  %v8262_v2 = vld [vmem:[#allocation4 + $0x3c8] sm:$0xff] }
 0x3fe   :  { %8849 = vmatprep.subr.bf16.mxu1 %v8198_v48  ;;  %v8261_v48 = vld [vmem:[#allocation4 + $0x3c0] sm:$0xff] }
 0x401   :  { %8850 = vmatpush1.bf16.msra.mxu1 %v8197_v47  ;;  %v8144_v47 = vld [vmem:[#allocation4 + $0x18] sm:$0xff] }
 0x402   :  { %8851 = vmatprep.subr.bf16.mxu1 %v8202_v45  ;;  %v15295_v45 = vpack.c.bf16 %v8723_v11, %v8687_v36  ;;  %v8252_v36 = vld [vmem:[#allocation4 + $0x378] sm:$0xff]  ;;  %v8251_v11 = vld [vmem:[#allocation4 + $0x370] sm:$0xff] }
 0x405   :  { %8852 = vmatpush1.bf16.msra.mxu1 %v8201_v19  ;;  %v8159_v19 = vld [vmem:[#allocation4 + $0x90] sm:$0xff] }
 0x406   :  { %8874 = vmatprep.subr.bf16.mxu1 %v8206_v54  ;;  %v8164_v54 = vld [vmem:[#allocation4 + $0xb8] sm:$0xff] }
 0x408   :  { %8854 = vmatmul.mubr.bf16.vlgmr.msra.gmra.mrb[32].mxu1 %v15263_v62 }
 0x409   :  { %8875 = vmatpush1.bf16.msra.mxu1 %v8205_v40  ;;  %8863 = vmatprep.mubr.bf16.mxu1 %v15268_v10  ;;  %v8171_v40 = vld [vmem:[#allocation4 + $0xf0] sm:$0xff] }
 0x40a   :  { %8876 = vmatprep.subr.bf16.mxu1 %v8210_v4  ;;  %v8176_v4 = vld [vmem:[#allocation4 + $0x118] sm:$0xff] }
 0x40d   :  { %8877 = vmatpush1.bf16.msra.mxu1 %v8209_v22  ;;  %v8188_v22 = vld [vmem:[#allocation4 + $0x178] sm:$0xff] }
 0x40e   :  { %8878 = vmatprep.subr.bf16.mxu1 %v8214_v30  ;;  %v8187_v30 = vld [vmem:[#allocation4 + $0x170] sm:$0xff] }
 0x410   :  { %8864 = vmatmul.mubr.bf16.gmra.mrb[36].mxu1 %v15285_v20 }
 0x411   :  { %8879 = vmatpush1.bf16.msra.mxu1 %v8213_v50  ;;  %8906 = vmatprep.mubr.bf16.mxu1 %v15287_v16  ;;  %v8192_v50 = vld [vmem:[#allocation4 + $0x198] sm:$0xff] }
 0x412   :  { %8880 = vmatprep.subr.bf16.mxu1 %v8218_v0  ;;  %v8191_v0 = vld [vmem:[#allocation4 + $0x190] sm:$0xff] }
 0x415   :  { %8881 = vmatpush1.bf16.msra.mxu1 %v8217_v25  ;;  %v8196_v25 = vld [vmem:[#allocation4 + $0x1b8] sm:$0xff] }
 0x416   :  { %8882 = vmatprep.subr.bf16.mxu1 %v8222_v61  ;;  %v8195_v61 = vld [vmem:[#allocation4 + $0x1b0] sm:$0xff] }
 0x419   :  { %8883 = vmatpush1.bf16.msra.mxu1 %v8221_v21  ;;  %v8200_v21 = vld [vmem:[#allocation4 + $0x1d8] sm:$0xff] }
 0x41a   :  { %8884 = vmatprep.subr.bf16.mxu1 %v8226_v63  ;;  %v8199_v63 = vld [vmem:[#allocation4 + $0x1d0] sm:$0xff] }
 0x41d   :  { %8885 = vmatpush1.bf16.msra.mxu1 %v8225_v13  ;;  %v8204_v13 = vld [vmem:[#allocation4 + $0x1f8] sm:$0xff] }
 0x41e   :  { %8886 = vmatprep.subr.bf16.mxu1 %v8230_v15  ;;  %v8203_v15 = vld [vmem:[#allocation4 + $0x1f0] sm:$0xff] }
 0x421   :  { %8887 = vmatpush1.bf16.msra.mxu1 %v8229_v29  ;;  %v8208_v29 = vld [vmem:[#allocation4 + $0x218] sm:$0xff] }
 0x422   :  { %8888 = vmatprep.subr.bf16.mxu1 %v8234_v7  ;;  %v8207_v7 = vld [vmem:[#allocation4 + $0x210] sm:$0xff] }
 0x425   :  { %8889 = vmatpush1.bf16.msra.mxu1 %v8233_v5  ;;  %v8212_v5 = vld [vmem:[#allocation4 + $0x238] sm:$0xff] }
 0x426   :  { %8890 = vmatprep.subr.bf16.mxu1 %v8238_v27  ;;  %v8211_v27 = vld [vmem:[#allocation4 + $0x230] sm:$0xff] }
 0x429   :  { %8891 = vmatpush1.bf16.msra.mxu1 %v8237_v9  ;;  %v8216_v9 = vld [vmem:[#allocation4 + $0x258] sm:$0xff] }
 0x42a   :  { %8892 = vmatprep.subr.bf16.mxu1 %v8242_v32  ;;  %v8215_v32 = vld [vmem:[#allocation4 + $0x250] sm:$0xff] }
 0x42d   :  { %8893 = vmatpush1.bf16.msra.mxu1 %v8241_v51  ;;  %v8220_v51 = vld [vmem:[#allocation4 + $0x278] sm:$0xff] }
 0x42e   :  { %8894 = vmatprep.subr.bf16.mxu1 %v8246_v57  ;;  %v8219_v57 = vld [vmem:[#allocation4 + $0x270] sm:$0xff] }
 0x431   :  { %8895 = vmatpush1.bf16.msra.mxu1 %v8245_v28  ;;  %v8224_v28 = vld [vmem:[#allocation4 + $0x298] sm:$0xff] }
 0x432   :  { %8896 = vmatprep.subr.bf16.mxu1 %v8250_v18  ;;  %v8228_v18 = vld [vmem:[#allocation4 + $0x2b8] sm:$0xff] }
 0x435   :  { %8897 = vmatpush1.bf16.msra.mxu1 %v8249_v55  ;;  %v8232_v55 = vld [vmem:[#allocation4 + $0x2d8] sm:$0xff] }
 0x436   :  { %8898 = vmatprep.subr.bf16.mxu1 %v8254_v58  ;;  %v8231_v58 = vld [vmem:[#allocation4 + $0x2d0] sm:$0xff] }
 0x439   :  { %8899 = vmatpush1.bf16.msra.mxu1 %v8253_v59  ;;  %v8236_v59 = vld [vmem:[#allocation4 + $0x2f8] sm:$0xff] }
 0x43a   :  { %8900 = vmatprep.subr.bf16.mxu1 %v8258_v31  ;;  %v8240_v31 = vld [vmem:[#allocation4 + $0x318] sm:$0xff] }
 0x43d   :  { %8901 = vmatpush1.bf16.msra.mxu1 %v8257_v42  ;;  %v8244_v42 = vld [vmem:[#allocation4 + $0x338] sm:$0xff] }
 0x43e   :  { %8902 = vmatprep.subr.bf16.mxu1 %v8262_v2  ;;  %v8243_v2 = vld [vmem:[#allocation4 + $0x330] sm:$0xff] }
 0x441   :  { %8903 = vmatpush1.bf16.msra.mxu1 %v8261_v48  ;;  %v8248_v48 = vld [vmem:[#allocation4 + $0x358] sm:$0xff] }
 0x442   :  { %8904 = vmatprep.subr.bf16.mxu1 %v8266_v3  ;;  %v8247_v3 = vld [vmem:[#allocation4 + $0x350] sm:$0xff] }
 0x445   :  { %8905 = vmatpush1.bf16.msra.mxu1 %v8265_v52  ;;  %v8256_v52 = vld [vmem:[#allocation4 + $0x398] sm:$0xff] }
 0x446   :  { %8927 = vmatprep.subr.bf16.mxu1 %v8144_v47  ;;  %v8255_v47 = vld [vmem:[#allocation4 + $0x390] sm:$0xff] }
 0x448   :  { %8907 = vmatmul.mubr.bf16.vlgmr.msra.gmra.mrb[32].mxu1 %v15295_v45 }
 0x449   :  { %8928 = vmatpush1.bf16.msra.mxu1 %v8143_v60  ;;  %8916 = vmatprep.mubr.bf16.mxu1 %v15243_v33  ;;  %v8260_v60 = vld [vmem:[#allocation4 + $0x3b8] sm:$0xff] }
 0x44a   :  { %8929 = vmatprep.subr.bf16.mxu1 %v8148_v37  ;;  %v8259_v37 = vld [vmem:[#allocation4 + $0x3b0] sm:$0xff] }
 0x44d   :  { %8930 = vmatpush1.bf16.msra.mxu1 %v8147_v41  ;;  %v8264_v41 = vld [vmem:[#allocation4 + $0x3d8] sm:$0xff] }
 0x44e   :  { %8931 = vmatprep.subr.bf16.mxu1 %v8152_v14  ;;  %v8263_v14 = vld [vmem:[#allocation4 + $0x3d0] sm:$0xff] }
 0x450   :  { %8917 = vmatmul.mubr.bf16.gmra.mrb[36].mxu1 %v15245_v56 }
 0x451   :  { %8932 = vmatpush1.bf16.msra.mxu1 %v8151_v12  ;;  %8959 = vmatprep.mubr.bf16.mxu1 %v15209_v17  ;;  %v8175_v17 = vld [vmem:[#allocation4 + $0x110] sm:$0xff]  ;;  %v8268_v12 = vld [vmem:[#allocation4 + $0x3f8] sm:$0xff] }
 0x452   :  { %8933 = vmatprep.subr.bf16.mxu1 %v8156_v43  ;;  %v8267_v43 = vld [vmem:[#allocation4 + $0x3f0] sm:$0xff] }
 0x455   :  { %8934 = vmatpush1.bf16.msra.mxu1 %v8155_v44 }
 0x456   :  { %8935 = vmatprep.subr.bf16.mxu1 %v8160_v46 }
 0x459   :  { %8936 = vmatpush1.bf16.msra.mxu1 %v8159_v19 }
 0x45a   :  { %8937 = vmatprep.subr.bf16.mxu1 %v8164_v54 }
 0x45d   :  { %8938 = vmatpush1.bf16.msra.mxu1 %v8163_v34 }
 0x45e   :  { %8939 = vmatprep.subr.bf16.mxu1 %v8168_v23 }
 0x461   :  { %8940 = vmatpush1.bf16.msra.mxu1 %v8167_v26 }
 0x462   :  { %8941 = vmatprep.subr.bf16.mxu1 %v8172_v35 }
 0x465   :  { %8942 = vmatpush1.bf16.msra.mxu1 %v8171_v40 }
 0x466   :  { %8943 = vmatprep.subr.bf16.mxu1 %v8176_v4 }
 0x469   :  { %8944 = vmatpush1.bf16.msra.mxu1 %v8175_v17 }
 0x46a   :  { %8945 = vmatprep.subr.bf16.mxu1 %v8180_v38 }
 0x46d   :  { %8946 = vmatpush1.bf16.msra.mxu1 %v8179_v53 }
 0x46e   :  { %8947 = vmatprep.subr.bf16.mxu1 %v8184_v39 }
 0x471   :  { %8948 = vmatpush1.bf16.msra.mxu1 %v8183_v49 }
 0x472   :  { %8949 = vmatprep.subr.bf16.mxu1 %v8188_v22 }
 0x475   :  { %8950 = vmatpush1.bf16.msra.mxu1 %v8187_v30 }
 0x476   :  { %8951 = vmatprep.subr.bf16.mxu1 %v8192_v50 }
 0x479   :  { %8952 = vmatpush1.bf16.msra.mxu1 %v8191_v0 }
 0x47a   :  { %8953 = vmatprep.subr.bf16.mxu1 %v8196_v25 }
 0x47d   :  { %8954 = vmatpush1.bf16.msra.mxu1 %v8195_v61 }
 0x47e   :  { %8955 = vmatprep.subr.bf16.mxu1 %v8200_v21 }
 0x481   :  { %8956 = vmatpush1.bf16.msra.mxu1 %v8199_v63 }
 0x482   :  { %8957 = vmatprep.subr.bf16.mxu1 %v8204_v13 }
 0x485   :  { %8958 = vmatpush1.bf16.msra.mxu1 %v8203_v15 }
 0x486   :  { %8980 = vmatprep.subr.bf16.mxu1 %v8208_v29 }
 0x488   :  { %8960 = vmatmul.mubr.bf16.vlgmr.msra.gmra.mrb[40].mxu1 %v15263_v62  ;;  %v8223_v62 = vld [vmem:[#allocation4 + $0x290] sm:$0xff] }
 0x489   :  { %8981 = vmatpush1.bf16.msra.mxu1 %v8207_v7  ;;  %8969 = vmatprep.mubr.bf16.mxu1 %v15268_v10  ;;  %v8227_v10 = vld [vmem:[#allocation4 + $0x2b0] sm:$0xff] }
 0x48a   :  { %8982 = vmatprep.subr.bf16.mxu1 %v8212_v5 }
 0x48d   :  { %8983 = vmatpush1.bf16.msra.mxu1 %v8211_v27 }
 0x48e   :  { %8984 = vmatprep.subr.bf16.mxu1 %v8216_v9 }
 0x490   :  { %8970 = vmatmul.mubr.bf16.gmra.mrb[44].mxu1 %v15285_v20  ;;  %v8235_v20 = vld [vmem:[#allocation4 + $0x2f0] sm:$0xff] }
 0x491   :  { %8985 = vmatpush1.bf16.msra.mxu1 %v8215_v32  ;;  %9012 = vmatprep.mubr.bf16.mxu1 %v15287_v16  ;;  %v8239_v16 = vld [vmem:[#allocation4 + $0x310] sm:$0xff] }
 0x492   :  { %8986 = vmatprep.subr.bf16.mxu1 %v8220_v51 }
 0x495   :  { %8987 = vmatpush1.bf16.msra.mxu1 %v8219_v57 }
 0x496   :  { %8988 = vmatprep.subr.bf16.mxu1 %v8224_v28 }
 0x499   :  { %8989 = vmatpush1.bf16.msra.mxu1 %v8223_v62 }
 0x49a   :  { %8990 = vmatprep.subr.bf16.mxu1 %v8228_v18 }
 0x49d   :  { %8991 = vmatpush1.bf16.msra.mxu1 %v8227_v10 }
 0x49e   :  { %8992 = vmatprep.subr.bf16.mxu1 %v8232_v55 }
 0x4a1   :  { %8993 = vmatpush1.bf16.msra.mxu1 %v8231_v58 }
 0x4a2   :  { %8994 = vmatprep.subr.bf16.mxu1 %v8236_v59 }
 0x4a5   :  { %8995 = vmatpush1.bf16.msra.mxu1 %v8235_v20 }
 0x4a6   :  { %8996 = vmatprep.subr.bf16.mxu1 %v8240_v31 }
 0x4a9   :  { %8997 = vmatpush1.bf16.msra.mxu1 %v8239_v16 }
 0x4aa   :  { %8998 = vmatprep.subr.bf16.mxu1 %v8244_v42 }
 0x4ad   :  { %8999 = vmatpush1.bf16.msra.mxu1 %v8243_v2 }
 0x4ae   :  { %9000 = vmatprep.subr.bf16.mxu1 %v8248_v48 }
 0x4b1   :  { %9001 = vmatpush1.bf16.msra.mxu1 %v8247_v3 }
 0x4b2   :  { %9002 = vmatprep.subr.bf16.mxu1 %v8252_v36 }
 0x4b5   :  { %9003 = vmatpush1.bf16.msra.mxu1 %v8251_v11 }
 0x4b6   :  { %9004 = vmatprep.subr.bf16.mxu1 %v8256_v52 }
 0x4b9   :  { %9005 = vmatpush1.bf16.msra.mxu1 %v8255_v47 }
 0x4ba   :  { %9006 = vmatprep.subr.bf16.mxu1 %v8260_v60 }
 0x4bd   :  { %9007 = vmatpush1.bf16.msra.mxu1 %v8259_v37 }
 0x4be   :  { %9008 = vmatprep.subr.bf16.mxu1 %v8264_v41 }
 0x4c1   :  { %9009 = vmatpush1.bf16.msra.mxu1 %v8263_v14 }
 0x4c2   :  { %9010 = vmatprep.subr.bf16.mxu1 %v8268_v12 }
 0x4c5   :  { %9011 = vmatpush1.bf16.msra.mxu1 %v8267_v43 }
 0x4c8   :  { %9013 = vmatmul.mubr.bf16.vlgmr.msra.gmra.mrb[40].mxu1 %v15295_v45 }
 0x4c9   :  { %9022 = vmatprep.mubr.bf16.mxu1 %v15243_v33 }
 0x4d0   :  { %9023 = vmatmul.mubr.bf16.gmra.mrb[44].mxu1 %v15245_v56 }
 0x51b   :  { %v8908_v44 = vpop.f32.mrb[32].mxu1 }
 0x51c   :  { %v8910_v46 = vpop.f32.mrb[33].mxu1 }
 0x51d   :  { %v8912_v19 = vpop.f32.mrb[34].mxu1 }
 0x51e   :  { %v8914_v54 = vpop.f32.mrb[35].mxu1 }
 0x523   :  { %v8918_v34 = vpop.f32.mrb[36].mxu1 }
 0x524   :  { %v8920_v23 = vpop.f32.mrb[37].mxu1 }
 0x525   :  { %v8922_v26 = vpop.f32.mrb[38].mxu1 }
 0x526   :  { %v8924_v35 = vpop.f32.mrb[39].mxu1 }
 0x59b   :  { %v9014_v40 = vpop.f32.mrb[40].mxu1 }
 0x59c   :  { %v9033_v4 = vmax.f32 %v8908_v44, %v9014_v40  ;;  %v9016_v17 = vpop.f32.mrb[41].mxu1 }
 0x59d   :  { %v9034_v38 = vmax.f32 %v8910_v46, %v9016_v17  ;;  %v9018_v53 = vpop.f32.mrb[42].mxu1 }
 0x59e   :  { %v9035_v39 = vmax.f32 %v8912_v19, %v9018_v53  ;;  %v9020_v49 = vpop.f32.mrb[43].mxu1 }
 0x59f   :  { %v11457_v45 = vpack.c.bf16 %v9034_v38, %v9033_v4  ;;  %v9036_v22 = vmax.f32 %v8914_v54, %v9020_v49 }
 0x5a1   :  { %v9066_v33 = vrot.slane %v11457_v45, 7  ;;  %v11458_v56 = vpack.c.bf16 %v9036_v22, %v9035_v39 }
 0x5a3   :  { %v9067_v50 = vrot.slane %v9066_v33, 4  ;;  %9082 = vst [vmem:[#allocation2] sm:$0xee] %v9066_v33  ;;  %v9068_v0 = vrot.slane %v11458_v56, 7  ;;  %v9024_v25 = vpop.f32.mrb[44].mxu1 }
 0x5a4   :  { %v9037_v61 = vmax.f32 %v8918_v34, %v9024_v25  ;;  %v9026_v21 = vpop.f32.mrb[45].mxu1 }
 0x5a5   :  { %v9069_v63 = vsel %vm15308_vm4, %v9067_v50, %v9068_v0  ;;  %v9038_v13 = vmax.f32 %v8920_v23, %v9026_v21  ;;  %v9028_v15 = vpop.f32.mrb[46].mxu1  ;;  %v9070_v9 = vrot.slane %v9068_v0, 4 }
 0x5a6   :  { %9083 = vst [vmem:[#allocation2 + $0x8] sm:$0xff] %v9069_v63  ;;  %v9039_v29 = vmax.f32 %v8922_v26, %v9028_v15  ;;  %v9030_v7 = vpop.f32.mrb[47].mxu1 }
 0x5a7   :  { %v11459_v5 = vpack.c.bf16 %v9038_v13, %v9037_v61  ;;  %v9040_v27 = vmax.f32 %v8924_v35, %v9030_v7 }
 0x5a9   :  { %v9071_v32 = vrot.slane %v11459_v5, 7  ;;  %v11460_v51 = vpack.c.bf16 %v9040_v27, %v9039_v29 }
 0x5ab   :  { %v9072_v57 = vsel %vm15308_vm4, %v9070_v9, %v9071_v32  ;;  %v9073_v28 = vrot.slane %v9071_v32, 4  ;;  %v9074_v62 = vrot.slane %v11460_v51, 7 }
 0x5ac   :  { %9084 = vst [vmem:[#allocation2 + $0x10] sm:$0xff] %v9072_v57 }
 0x5ad   :  { %v9075_v18 = vsel %vm15308_vm4, %v9073_v28, %v9074_v62  ;;  %v9076_v10 = vrot.slane %v9074_v62, 4 }
 0x5ae   :  { %9085 = vst [vmem:[#allocation2 + $0x18] sm:$0xff] %v9075_v18 }
 0x5af   :  { %9086 = vst [vmem:[#allocation2 + $0x20] sm:$0x11] %v9076_v10 }
 0x5b0   :  { %11886 = dma.done.wait [#allocation9 + $0x1], 24576 }
 0x5b1   :  { %11887 = vsyncadd [#allocation9 + $0x1], 4294942720  ;;  %v9164_v55 = vld [vmem:[#allocation5 + $0x208] sm:$0xff]  ;;  %v9163_v59 = vld [vmem:[#allocation5 + $0x200] sm:$0xff] }
 0x5b2   :  { %v9097_v58 = vld [vmem:[#allocation5 + $0x8] sm:$0xff]  ;;  %9262 = vmatprep.subr.bf16.mxu1 %v9164_v55  ;;  %v9096_v20 = vld [vmem:[#allocation5] sm:$0xff]  ;;  %v15318_v26 = vld [vmem:[#allocation2 + $0x8] sm:$0xff] }
 0x5b3   :  { %9377 = vmatprep.subr.bf16.mxu0 %v9097_v58  ;;  %v9168_v31 = vld [vmem:[#allocation5 + $0x228] sm:$0xff]  ;;  %9263 = vmatpush1.bf16.msra.mxu1 %v9163_v59  ;;  %v9167_v42 = vld [vmem:[#allocation5 + $0x220] sm:$0xff] }
 0x5b4   :  { %v9101_v16 = vld [vmem:[#allocation5 + $0x28] sm:$0xff]  ;;  %9378 = vmatpush1.bf16.msra.mxu0 %v9096_v20  ;;  %9264 = vmatprep.subr.bf16.mxu1 %v9168_v31  ;;  %v9100_v2 = vld [vmem:[#allocation5 + $0x20] sm:$0xff] }
 0x5b5   :  { %9379 = vmatprep.subr.bf16.mxu0 %v9101_v16  ;;  %v9172_v48 = vld [vmem:[#allocation5 + $0x248] sm:$0xff]  ;;  %v9171_v36 = vld [vmem:[#allocation5 + $0x240] sm:$0xff] }
 0x5b6   :  { %v9105_v3 = vld [vmem:[#allocation5 + $0x48] sm:$0xff]  ;;  %v9104_v11 = vld [vmem:[#allocation5 + $0x40] sm:$0xff] }
 0x5b7   :  { %9265 = vmatpush1.bf16.msra.mxu1 %v9167_v42  ;;  %v9176_v52 = vld [vmem:[#allocation5 + $0x268] sm:$0xff]  ;;  %v9175_v60 = vld [vmem:[#allocation5 + $0x260] sm:$0xff] }
 0x5b8   :  { %9380 = vmatpush1.bf16.msra.mxu0 %v9100_v2  ;;  %9266 = vmatprep.subr.bf16.mxu1 %v9172_v48  ;;  %v9109_v47 = vld [vmem:[#allocation5 + $0x68] sm:$0xff]  ;;  %v9108_v37 = vld [vmem:[#allocation5 + $0x60] sm:$0xff] }
 0x5b9   :  { %9381 = vmatprep.subr.bf16.mxu0 %v9105_v3  ;;  %v9180_v41 = vld [vmem:[#allocation5 + $0x288] sm:$0xff]  ;;  %v9179_v12 = vld [vmem:[#allocation5 + $0x280] sm:$0xff] }
 0x5ba   :  { %v9113_v14 = vld [vmem:[#allocation5 + $0x88] sm:$0xff]  ;;  %v9112_v43 = vld [vmem:[#allocation5 + $0x80] sm:$0xff] }
 0x5bb   :  { %9267 = vmatpush1.bf16.msra.mxu1 %v9171_v36  ;;  %v9184_v44 = vld [vmem:[#allocation5 + $0x2a8] sm:$0xff]  ;;  %v9183_v19 = vld [vmem:[#allocation5 + $0x2a0] sm:$0xff] }
 0x5bc   :  { %9382 = vmatpush1.bf16.msra.mxu0 %v9104_v11  ;;  %9268 = vmatprep.subr.bf16.mxu1 %v9176_v52  ;;  %v9117_v46 = vld [vmem:[#allocation5 + $0xa8] sm:$0xff]  ;;  %v9116_v54 = vld [vmem:[#allocation5 + $0xa0] sm:$0xff] }
 0x5bd   :  { %9383 = vmatprep.subr.bf16.mxu0 %v9109_v47  ;;  %v9188_v34 = vld [vmem:[#allocation5 + $0x2c8] sm:$0xff]  ;;  %v15322_v40 = vld [vmem:[#allocation2 + $0x14] ss:$8 sps:$4 sm:$0xff]   ;;  %v15342_v48 = vld [vmem:[#allocation2 + $0x10] ss:$8 sps:$4 sm:$0xff]  }
 0x5be   :  { %v9121_v23 = vld [vmem:[#allocation5 + $0xc8] sm:$0xff]  ;;  %v9187_v4 = vld [vmem:[#allocation5 + $0x2c0] sm:$0xff]  ;;  %v9252_v45 = vrot.slane %v15322_v40, 1 }
 0x5bf   :  { %9269 = vmatpush1.bf16.msra.mxu1 %v9175_v60  ;;  %v15320_v35 = vld [vmem:[#allocation2] sm:$0xee]  ;;  %v9120_v17 = vld [vmem:[#allocation5 + $0xc0] sm:$0xff]  ;;  %v9161_v3 = vld [vmem:[#allocation2 + $0x20] sm:$0x11] }
 0x5c0   :  { %9384 = vmatpush1.bf16.msra.mxu0 %v9108_v37  ;;  %9270 = vmatprep.subr.bf16.mxu1 %v9180_v41  ;;  %v11434_v38 = vcombine.high %v15320_v35, %v15318_v26  ;;  %v15326_v53 = vld [vmem:[#allocation2] sm:$0xff]  ;;  %v9191_v56 = vld [vmem:[#allocation5 + $0x2e0] sm:$0xff]  ;;  %v11433_v2 = vcombine.low %v15320_v35, %v15318_v26  ;;  %v11438_v60 = vcombine.high %v9161_v3, %v9161_v3  ;;  %v9249_v41 = vrot.slane %v15342_v48, 1  ;;  %v9165_v35 = vld [vmem:[#allocation5 + $0x210] sm:$0xff] }
 0x5c1   :  { %9385 = vmatprep.subr.bf16.mxu0 %v9113_v14  ;;  %v9192_v39 = vld [vmem:[#allocation5 + $0x2e8] sm:$0xff]  ;;  %v15331_v22 = vcombine.high %v15326_v53, %v15318_v26  ;;  %v9124_v30 = vld [vmem:[#allocation5 + $0xe0] sm:$0xff] }
 0x5c2   :  { %v9125_v49 = vld [vmem:[#allocation5 + $0xe8] sm:$0xff]  ;;  %v9251_v33 = vrot.slane %v11434_v38, 1  ;;  %v9195_v61 = vld [vmem:[#allocation5 + $0x300] sm:$0xff]  ;;  %v9248_v37 = vrot.slane %v11433_v2, 1 }
 0x5c3   :  { %9271 = vmatpush1.bf16.msra.mxu1 %v9179_v12  ;;  %v9196_v0 = vld [vmem:[#allocation5 + $0x308] sm:$0xff]  ;;  %9409 = vmatprep.mubr.bf16.mxu0 %v15331_v22  ;;  %v9128_v21 = vld [vmem:[#allocation5 + $0x100] sm:$0xff] }
 0x5c4   :  { %9386 = vmatpush1.bf16.msra.mxu0 %v9112_v43  ;;  %9272 = vmatprep.subr.bf16.mxu1 %v9184_v44  ;;  %v15336_v50 = vsel %vm7025_vm0, %v9251_v33, %v9252_v45  ;;  %v9129_v25 = vld [vmem:[#allocation5 + $0x108] sm:$0xff]  ;;  %v9199_v15 = vld [vmem:[#allocation5 + $0x320] sm:$0xff]  ;;  %v9166_v43 = vld [vmem:[#allocation5 + $0x218] sm:$0xff] }
 0x5c5   :  { %9387 = vmatprep.subr.bf16.mxu0 %v9117_v46  ;;  %9294 = vmatprep.mubr.bf16.mxu1 %v15336_v50  ;;  %v9200_v63 = vld [vmem:[#allocation5 + $0x328] sm:$0xff]  ;;  %v9132_v29 = vld [vmem:[#allocation5 + $0x120] sm:$0xff]  ;;  %v15347_v46 = vcombine.low %v15326_v53, %v15318_v26  ;;  %v9169_v33 = vld [vmem:[#allocation5 + $0x230] sm:$0xff] }
 0x5c6   :  { %v9133_v13 = vld [vmem:[#allocation5 + $0x128] sm:$0xff]  ;;  %v9203_v27 = vld [vmem:[#allocation5 + $0x340] sm:$0xff] }
 0x5c7   :  { %9273 = vmatpush1.bf16.msra.mxu1 %v9183_v19  ;;  %v9204_v7 = vld [vmem:[#allocation5 + $0x348] sm:$0xff]  ;;  %v9136_v9 = vld [vmem:[#allocation5 + $0x140] sm:$0xff]  ;;  %v9256_v19 = vrot.slane %v11438_v60, 1 }
 0x5c8   :  { %9388 = vmatpush1.bf16.msra.mxu0 %v9116_v54  ;;  %9274 = vmatprep.subr.bf16.mxu1 %v9188_v34  ;;  %v9137_v5 = vld [vmem:[#allocation5 + $0x148] sm:$0xff]  ;;  %v9207_v57 = vld [vmem:[#allocation5 + $0x360] sm:$0xff]  ;;  %v15350_v54 = vsel %vm7025_vm0, %v9248_v37, %v9249_v41  ;;  %v11437_v34 = vcombine.low %v9161_v3, %v9161_v3  ;;  %v9197_v3 = vld [vmem:[#allocation5 + $0x310] sm:$0xff] }
 0x5c9   :  { %9389 = vmatprep.subr.bf16.mxu0 %v9121_v23  ;;  %v9208_v32 = vld [vmem:[#allocation5 + $0x368] sm:$0xff]  ;;  %v9140_v28 = vld [vmem:[#allocation5 + $0x160] sm:$0xff]  ;;  %v15359_v53 = vsel %vm7025_vm0, %v9252_v45, %v9256_v19  ;;  %v9564_v45 = vrot.slane %v15322_v40, 2  ;;  %v9206_v37 = vld [vmem:[#allocation5 + $0x358] sm:$0xff] }
 0x5ca   :  { %v9141_v51 = vld [vmem:[#allocation5 + $0x168] sm:$0xff]  ;;  %v9211_v10 = vld [vmem:[#allocation5 + $0x380] sm:$0xff]  ;;  %v9209_v19 = vld [vmem:[#allocation5 + $0x370] sm:$0xff] }
 0x5cb   :  { %9275 = vmatpush1.bf16.msra.mxu1 %v9187_v4  ;;  %v9212_v62 = vld [vmem:[#allocation5 + $0x388] sm:$0xff]  ;;  %v9144_v55 = vld [vmem:[#allocation5 + $0x180] sm:$0xff] }
 0x5cc   :  { %9390 = vmatpush1.bf16.msra.mxu0 %v9120_v17  ;;  %9276 = vmatprep.subr.bf16.mxu1 %v9192_v39  ;;  %v9145_v18 = vld [vmem:[#allocation5 + $0x188] sm:$0xff]  ;;  %v9215_v20 = vld [vmem:[#allocation5 + $0x3a0] sm:$0xff]  ;;  %v9170_v17 = vld [vmem:[#allocation5 + $0x238] sm:$0xff] }
 0x5cd   :  { %9391 = vmatprep.subr.bf16.mxu0 %v9125_v49  ;;  %v9216_v58 = vld [vmem:[#allocation5 + $0x3a8] sm:$0xff]  ;;  %v9148_v31 = vld [vmem:[#allocation5 + $0x1a0] sm:$0xff]  ;;  %v9254_v49 = vrot.slane %v11437_v34, 1 }
 0x5ce   :  { %v9149_v59 = vld [vmem:[#allocation5 + $0x1a8] sm:$0xff]  ;;  %v9219_v36 = vld [vmem:[#allocation5 + $0x3c0] sm:$0xff] }
 0x5cf   :  { %9277 = vmatpush1.bf16.msra.mxu1 %v9191_v56  ;;  %v9220_v16 = vld [vmem:[#allocation5 + $0x3c8] sm:$0xff]  ;;  %v9152_v11 = vld [vmem:[#allocation5 + $0x1c0] sm:$0xff] }
 0x5d0   :  { %9392 = vmatpush1.bf16.msra.mxu0 %v9124_v30  ;;  %9278 = vmatprep.subr.bf16.mxu1 %v9196_v0  ;;  %v9153_v42 = vld [vmem:[#allocation5 + $0x1c8] sm:$0xff]  ;;  %v9223_v14 = vld [vmem:[#allocation5 + $0x3e0] sm:$0xff]  ;;  %v9174_v30 = vld [vmem:[#allocation5 + $0x258] sm:$0xff] }
 0x5d1   :  { %9393 = vmatprep.subr.bf16.mxu0 %v9129_v25  ;;  %v9224_v52 = vld [vmem:[#allocation5 + $0x3e8] sm:$0xff]  ;;  %v9156_v12 = vld [vmem:[#allocation5 + $0x1e0] sm:$0xff] }
 0x5d2   :  { %v9157_v47 = vld [vmem:[#allocation5 + $0x1e8] sm:$0xff]  ;;  %v9486_v4 = vld [vmem:[#allocation5 + $0x400] sm:$0xff] }
 0x5d3   :  { %9279 = vmatpush1.bf16.msra.mxu1 %v9195_v61  ;;  %v9487_v44 = vld [vmem:[#allocation5 + $0x408] sm:$0xff]  ;;  %v9490_v56 = vld [vmem:[#allocation5 + $0x420] sm:$0xff]  ;;  %v15367_v61 = vsel %vm7025_vm0, %v9249_v41, %v9254_v49 }
 0x5d4   :  { %9394 = vmatpush1.bf16.msra.mxu0 %v9128_v21  ;;  %9280 = vmatprep.subr.bf16.mxu1 %v9200_v63  ;;  %v15352_v23 = vld [vmem:[#allocation2] sm:$0xcc]  ;;  %v9173_v21 = vld [vmem:[#allocation5 + $0x250] sm:$0xff]  ;;  %v9494_v63 = vld [vmem:[#allocation5 + $0x440] sm:$0xff] }
 0x5d5   :  { %9395 = vmatprep.subr.bf16.mxu0 %v9133_v13  ;;  %v9491_v38 = vld [vmem:[#allocation5 + $0x428] sm:$0xff]  ;;  %v11442_v39 = vcombine.high %v15352_v23, %v15318_v26  ;;  %v9178_v13 = vld [vmem:[#allocation5 + $0x278] sm:$0xff]  ;;  %v9522_v60 = vld [vmem:[#allocation5 + $0x520] sm:$0xff] }
 0x5d6   :  { %v9495_v0 = vld [vmem:[#allocation5 + $0x448] sm:$0xff]  ;;  %v9530_v34 = vld [vmem:[#allocation5 + $0x560] sm:$0xff] }
 0x5d7   :  { %9281 = vmatpush1.bf16.msra.mxu1 %v9199_v15  ;;  %v9563_v25 = vrot.slane %v11442_v39, 2  ;;  %v9499_v15 = vld [vmem:[#allocation5 + $0x468] sm:$0xff]  ;;  %v9218_v39 = vld [vmem:[#allocation5 + $0x3b8] sm:$0xff] }
 0x5d8   :  { %9396 = vmatpush1.bf16.msra.mxu0 %v9132_v29  ;;  %9282 = vmatprep.subr.bf16.mxu1 %v9204_v7  ;;  %v9177_v7 = vld [vmem:[#allocation5 + $0x270] sm:$0xff]  ;;  %v9519_v2 = vld [vmem:[#allocation5 + $0x508] sm:$0xff] }
 0x5d9   :  { %9397 = vmatprep.subr.bf16.mxu0 %v9137_v5  ;;  %v15374_v29 = vsel %vm7699_vm1, %v9563_v25, %v9564_v45  ;;  %v9498_v5 = vld [vmem:[#allocation5 + $0x460] sm:$0xff]  ;;  %v9527_v41 = vld [vmem:[#allocation5 + $0x548] sm:$0xff] }
 0x5da   :  { %v9539_v49 = vld [vmem:[#allocation5 + $0x5a8] sm:$0xff] }
 0x5db   :  { %9283 = vmatpush1.bf16.msra.mxu1 %v9203_v27  ;;  %v9182_v27 = vld [vmem:[#allocation5 + $0x298] sm:$0xff]  ;;  %v9484_v25 = vld [vmem:[#allocation2 + $0x20] sm:$0x33] }
 0x5dc   :  { %9398 = vmatpush1.bf16.msra.mxu0 %v9136_v9  ;;  %9284 = vmatprep.subr.bf16.mxu1 %v9208_v32  ;;  %v9503_v9 = vld [vmem:[#allocation5 + $0x488] sm:$0xff]  ;;  %v9181_v32 = vld [vmem:[#allocation5 + $0x290] sm:$0xff] }
 0x5dd   :  { %9399 = vmatprep.subr.bf16.mxu0 %v9141_v51  ;;  %v9502_v51 = vld [vmem:[#allocation5 + $0x480] sm:$0xff] }
 0x5df   :  { %9285 = vmatpush1.bf16.msra.mxu1 %v9207_v57  ;;  %v9186_v57 = vld [vmem:[#allocation5 + $0x2b8] sm:$0xff] }
 0x5e0   :  { %9400 = vmatpush1.bf16.msra.mxu0 %v9140_v28  ;;  %9286 = vmatprep.subr.bf16.mxu1 %v9212_v62  ;;  %v9507_v28 = vld [vmem:[#allocation5 + $0x4a8] sm:$0xff]  ;;  %v9185_v62 = vld [vmem:[#allocation5 + $0x2b0] sm:$0xff] }
 0x5e1   :  { %9401 = vmatprep.subr.bf16.mxu0 %v9145_v18  ;;  %v9506_v18 = vld [vmem:[#allocation5 + $0x4a0] sm:$0xff] }
 0x5e3   :  { %9287 = vmatpush1.bf16.msra.mxu1 %v9211_v10  ;;  %v9190_v10 = vld [vmem:[#allocation5 + $0x2d8] sm:$0xff] }
 0x5e4   :  { %9402 = vmatpush1.bf16.msra.mxu0 %v9144_v55  ;;  %9288 = vmatprep.subr.bf16.mxu1 %v9216_v58  ;;  %v9511_v55 = vld [vmem:[#allocation5 + $0x4c8] sm:$0xff]  ;;  %v9510_v58 = vld [vmem:[#allocation5 + $0x4c0] sm:$0xff] }
 0x5e5   :  { %9403 = vmatprep.subr.bf16.mxu0 %v9149_v59  ;;  %v9194_v59 = vld [vmem:[#allocation5 + $0x2f8] sm:$0xff] }
 0x5e7   :  { %9289 = vmatpush1.bf16.msra.mxu1 %v9215_v20  ;;  %v9515_v20 = vld [vmem:[#allocation5 + $0x4e8] sm:$0xff] }
 0x5e8   :  { %9404 = vmatpush1.bf16.msra.mxu0 %v9148_v31  ;;  %9290 = vmatprep.subr.bf16.mxu1 %v9220_v16  ;;  %v9193_v31 = vld [vmem:[#allocation5 + $0x2f0] sm:$0xff]  ;;  %v9514_v16 = vld [vmem:[#allocation5 + $0x4e0] sm:$0xff] }
 0x5e9   :  { %9405 = vmatprep.subr.bf16.mxu0 %v9153_v42  ;;  %v9198_v42 = vld [vmem:[#allocation5 + $0x318] sm:$0xff] }
 0x5eb   :  { %9291 = vmatpush1.bf16.msra.mxu1 %v9219_v36  ;;  %v9518_v36 = vld [vmem:[#allocation5 + $0x500] sm:$0xff] }
 0x5ec   :  { %9406 = vmatpush1.bf16.msra.mxu0 %v9152_v11  ;;  %9292 = vmatprep.subr.bf16.mxu1 %v9224_v52  ;;  %v9202_v11 = vld [vmem:[#allocation5 + $0x338] sm:$0xff]  ;;  %v9523_v52 = vld [vmem:[#allocation5 + $0x528] sm:$0xff] }
 0x5ed   :  { %9407 = vmatprep.subr.bf16.mxu0 %v9157_v47  ;;  %v9201_v47 = vld [vmem:[#allocation5 + $0x330] sm:$0xff] }
 0x5ef   :  { %9293 = vmatpush1.bf16.msra.mxu1 %v9223_v14  ;;  %v9205_v14 = vld [vmem:[#allocation5 + $0x350] sm:$0xff] }
 0x5f0   :  { %9408 = vmatpush1.bf16.msra.mxu0 %v9156_v12  ;;  %9315 = vmatprep.subr.bf16.mxu1 %v9166_v43  ;;  %v9526_v12 = vld [vmem:[#allocation5 + $0x540] sm:$0xff]  ;;  %v9210_v43 = vld [vmem:[#allocation5 + $0x378] sm:$0xff] }
 0x5f1   :  { %9574 = vmatprep.subr.bf16.mxu0 %v9487_v44  ;;  %v9531_v44 = vld [vmem:[#allocation5 + $0x568] sm:$0xff] }
 0x5f2   :  { %9295 = vmatmul.mubr.bf16.vlgmr.msra.gmra.mrb[48].mxu1 %v15350_v54 }
 0x5f3   :  { %9410 = vmatmul.mubr.bf16.vlgmr.msra.gmra.mrb[16].mxu0 %v15347_v46  ;;  %9316 = vmatpush1.bf16.msra.mxu1 %v9165_v35  ;;  %v9214_v35 = vld [vmem:[#allocation5 + $0x398] sm:$0xff] }
 0x5f4   :  { %9575 = vmatpush1.bf16.msra.mxu0 %v9486_v4  ;;  %9317 = vmatprep.subr.bf16.mxu1 %v9170_v17  ;;  %v9535_v4 = vld [vmem:[#allocation5 + $0x588] sm:$0xff]  ;;  %v9213_v17 = vld [vmem:[#allocation5 + $0x390] sm:$0xff] }
 0x5f5   :  { %9576 = vmatprep.subr.bf16.mxu0 %v9491_v38  ;;  %9304 = vmatprep.mubr.bf16.mxu1 %v15359_v53  ;;  %v9534_v38 = vld [vmem:[#allocation5 + $0x580] sm:$0xff] }
 0x5f6   :  { %9419 = vmatprep.mubr.bf16.mxu0 %v15322_v40 }
 0x5f7   :  { %9318 = vmatpush1.bf16.msra.mxu1 %v9169_v33  ;;  %v9217_v33 = vld [vmem:[#allocation5 + $0x3b0] sm:$0xff] }
 0x5f8   :  { %9577 = vmatpush1.bf16.msra.mxu0 %v9490_v56  ;;  %9319 = vmatprep.subr.bf16.mxu1 %v9174_v30  ;;  %v9538_v56 = vld [vmem:[#allocation5 + $0x5a0] sm:$0xff]  ;;  %v9222_v30 = vld [vmem:[#allocation5 + $0x3d8] sm:$0xff] }
 0x5f9   :  { %9578 = vmatprep.subr.bf16.mxu0 %v9495_v0  ;;  %v9543_v0 = vld [vmem:[#allocation5 + $0x5c8] sm:$0xff] }
 0x5fa   :  { %9305 = vmatmul.mubr.bf16.gmra.mrb[52].mxu1 %v15367_v61 }
 0x5fb   :  { %9420 = vmatmul.mubr.bf16.gmra.mrb[20].mxu0 %v15342_v48  ;;  %9320 = vmatpush1.bf16.msra.mxu1 %v9173_v21  ;;  %v11441_v21 = vcombine.low %v15352_v23, %v15318_v26  ;;  %v11443_v23 = vcombine.low %v9484_v25, %v9484_v25 }
 0x5fc   :  { %9579 = vmatpush1.bf16.msra.mxu0 %v9494_v63  ;;  %9321 = vmatprep.subr.bf16.mxu1 %v9178_v13  ;;  %v9221_v63 = vld [vmem:[#allocation5 + $0x3d0] sm:$0xff]  ;;  %v9542_v13 = vld [vmem:[#allocation5 + $0x5c0] sm:$0xff] }
 0x5fd   :  { %9580 = vmatprep.subr.bf16.mxu0 %v9499_v15  ;;  %9606 = vmatprep.mubr.bf16.mxu0 %v15374_v29  ;;  %v11444_v15 = vcombine.high %v9484_v25, %v9484_v25  ;;  %v9500_v25 = vld [vmem:[#allocation5 + $0x470] sm:$0xff] }
 0x5fe   :  { %9347 = vmatprep.mubr.bf16.mxu1 %v15336_v50  ;;  %v9189_v50 = vld [vmem:[#allocation5 + $0x2d0] sm:$0xff] }
 0x5ff   :  { %9322 = vmatpush1.bf16.msra.mxu1 %v9177_v7  ;;  %v9226_v7 = vld [vmem:[#allocation5 + $0x3f8] sm:$0xff] }
 0x600   :  { %9581 = vmatpush1.bf16.msra.mxu0 %v9498_v5  ;;  %9323 = vmatprep.subr.bf16.mxu1 %v9182_v27  ;;  %v9547_v5 = vld [vmem:[#allocation5 + $0x5e8] sm:$0xff]  ;;  %v9560_v27 = vrot.slane %v11441_v21, 2  ;;  %v9505_v21 = vld [vmem:[#allocation5 + $0x498] sm:$0xff] }
 0x601   :  { %9582 = vmatprep.subr.bf16.mxu0 %v9503_v9  ;;  %v9561_v9 = vrot.slane %v15342_v48, 2 }
 0x603   :  { %9324 = vmatpush1.bf16.msra.mxu1 %v9181_v32  ;;  %v9225_v32 = vld [vmem:[#allocation5 + $0x3f0] sm:$0xff]  ;;  %v15382_v26 = vsel %vm7699_vm1, %v9560_v27, %v9561_v9  ;;  %v9525_v27 = vld [vmem:[#allocation5 + $0x538] sm:$0xff] }
 0x604   :  { %9583 = vmatpush1.bf16.msra.mxu0 %v9502_v51  ;;  %9325 = vmatprep.subr.bf16.mxu1 %v9186_v57  ;;  %v9546_v51 = vld [vmem:[#allocation5 + $0x5e0] sm:$0xff]  ;;  %v9568_v57 = vrot.slane %v11444_v15, 2  ;;  %v9512_v15 = vld [vmem:[#allocation5 + $0x4d0] sm:$0xff] }
 0x605   :  { %9584 = vmatprep.subr.bf16.mxu0 %v9507_v28  ;;  %v9099_v28 = vld [vmem:[#allocation5 + $0x18] sm:$0xff] }
 0x607   :  { %9326 = vmatpush1.bf16.msra.mxu1 %v9185_v62  ;;  %v9098_v62 = vld [vmem:[#allocation5 + $0x10] sm:$0xff] }
 0x608   :  { %9585 = vmatpush1.bf16.msra.mxu0 %v9506_v18  ;;  %9327 = vmatprep.subr.bf16.mxu1 %v9190_v10  ;;  %v15387_v18 = vsel %vm7699_vm1, %v9564_v45, %v9568_v57  ;;  %v9103_v10 = vld [vmem:[#allocation5 + $0x38] sm:$0xff]  ;;  %v9106_v45 = vld [vmem:[#allocation5 + $0x50] sm:$0xff] }
 0x609   :  { %9586 = vmatprep.subr.bf16.mxu0 %v9511_v55  ;;  %v9566_v55 = vrot.slane %v11443_v23, 2  ;;  %v9533_v57 = vld [vmem:[#allocation5 + $0x578] sm:$0xff] }
 0x60a   :  { %v9537_v23 = vld [vmem:[#allocation5 + $0x598] sm:$0xff] }
 0x60b   :  { %9328 = vmatpush1.bf16.msra.mxu1 %v9189_v50  ;;  %v9102_v50 = vld [vmem:[#allocation5 + $0x30] sm:$0xff] }
 0x60c   :  { %9587 = vmatpush1.bf16.msra.mxu0 %v9510_v58  ;;  %9329 = vmatprep.subr.bf16.mxu1 %v9194_v59  ;;  %v9107_v58 = vld [vmem:[#allocation5 + $0x58] sm:$0xff]  ;;  %v15394_v59 = vsel %vm7699_vm1, %v9561_v9, %v9566_v55  ;;  %v9524_v9 = vld [vmem:[#allocation5 + $0x530] sm:$0xff] }
 0x60d   :  { %9588 = vmatprep.subr.bf16.mxu0 %v9515_v20  ;;  %v9111_v20 = vld [vmem:[#allocation5 + $0x78] sm:$0xff]  ;;  %v9540_v55 = vld [vmem:[#allocation5 + $0x5b0] sm:$0xff] }
 0x60f   :  { %9330 = vmatpush1.bf16.msra.mxu1 %v9193_v31  ;;  %v9115_v31 = vld [vmem:[#allocation5 + $0x98] sm:$0xff] }
 0x610   :  { %9589 = vmatpush1.bf16.msra.mxu0 %v9514_v16  ;;  %9331 = vmatprep.subr.bf16.mxu1 %v9198_v42  ;;  %v9119_v16 = vld [vmem:[#allocation5 + $0xb8] sm:$0xff]  ;;  %v9118_v42 = vld [vmem:[#allocation5 + $0xb0] sm:$0xff] }
 0x611   :  { %9590 = vmatprep.subr.bf16.mxu0 %v9519_v2  ;;  %v9123_v2 = vld [vmem:[#allocation5 + $0xd8] sm:$0xff] }
 0x613   :  { %9332 = vmatpush1.bf16.msra.mxu1 %v9197_v3  ;;  %v9122_v3 = vld [vmem:[#allocation5 + $0xd0] sm:$0xff] }
 0x614   :  { %9591 = vmatpush1.bf16.msra.mxu0 %v9518_v36  ;;  %9333 = vmatprep.subr.bf16.mxu1 %v9202_v11  ;;  %v9127_v36 = vld [vmem:[#allocation5 + $0xf8] sm:$0xff] }
 0x615   :  { %9592 = vmatprep.subr.bf16.mxu0 %v9523_v52  ;;  %v9131_v11 = vld [vmem:[#allocation5 + $0x118] sm:$0xff] }
 0x616   :  { %v9135_v52 = vld [vmem:[#allocation5 + $0x138] sm:$0xff] }
 0x617   :  { %9334 = vmatpush1.bf16.msra.mxu1 %v9201_v47  ;;  %v9134_v47 = vld [vmem:[#allocation5 + $0x130] sm:$0xff] }
 0x618   :  { %9593 = vmatpush1.bf16.msra.mxu0 %v9522_v60  ;;  %9335 = vmatprep.subr.bf16.mxu1 %v9206_v37  ;;  %v9139_v60 = vld [vmem:[#allocation5 + $0x158] sm:$0xff]  ;;  %v9138_v37 = vld [vmem:[#allocation5 + $0x150] sm:$0xff] }
 0x619   :  { %9594 = vmatprep.subr.bf16.mxu0 %v9527_v41  ;;  %v9143_v41 = vld [vmem:[#allocation5 + $0x178] sm:$0xff] }
 0x61b   :  { %9336 = vmatpush1.bf16.msra.mxu1 %v9205_v14  ;;  %v9142_v14 = vld [vmem:[#allocation5 + $0x170] sm:$0xff] }
 0x61c   :  { %9595 = vmatpush1.bf16.msra.mxu0 %v9526_v12  ;;  %9337 = vmatprep.subr.bf16.mxu1 %v9210_v43  ;;  %v9147_v12 = vld [vmem:[#allocation5 + $0x198] sm:$0xff]  ;;  %v9146_v43 = vld [vmem:[#allocation5 + $0x190] sm:$0xff] }
 0x61d   :  { %9596 = vmatprep.subr.bf16.mxu0 %v9531_v44  ;;  %v9151_v44 = vld [vmem:[#allocation5 + $0x1b8] sm:$0xff] }
 0x61f   :  { %9338 = vmatpush1.bf16.msra.mxu1 %v9209_v19  ;;  %v9150_v19 = vld [vmem:[#allocation5 + $0x1b0] sm:$0xff] }
 0x620   :  { %9597 = vmatpush1.bf16.msra.mxu0 %v9530_v34  ;;  %9339 = vmatprep.subr.bf16.mxu1 %v9214_v35  ;;  %v9155_v34 = vld [vmem:[#allocation5 + $0x1d8] sm:$0xff]  ;;  %v9154_v35 = vld [vmem:[#allocation5 + $0x1d0] sm:$0xff] }
 0x621   :  { %9598 = vmatprep.subr.bf16.mxu0 %v9535_v4  ;;  %v9159_v4 = vld [vmem:[#allocation5 + $0x1f8] sm:$0xff] }
 0x623   :  { %9340 = vmatpush1.bf16.msra.mxu1 %v9213_v17  ;;  %v9158_v17 = vld [vmem:[#allocation5 + $0x1f0] sm:$0xff] }
 0x624   :  { %9599 = vmatpush1.bf16.msra.mxu0 %v9534_v38  ;;  %9341 = vmatprep.subr.bf16.mxu1 %v9218_v39  ;;  %v9489_v38 = vld [vmem:[#allocation5 + $0x418] sm:$0xff]  ;;  %v9488_v39 = vld [vmem:[#allocation5 + $0x410] sm:$0xff] }
 0x625   :  { %9600 = vmatprep.subr.bf16.mxu0 %v9539_v49  ;;  %v9493_v49 = vld [vmem:[#allocation5 + $0x438] sm:$0xff] }
 0x627   :  { %9342 = vmatpush1.bf16.msra.mxu1 %v9217_v33  ;;  %v9492_v33 = vld [vmem:[#allocation5 + $0x430] sm:$0xff] }
 0x628   :  { %9601 = vmatpush1.bf16.msra.mxu0 %v9538_v56  ;;  %9343 = vmatprep.subr.bf16.mxu1 %v9222_v30  ;;  %v9497_v56 = vld [vmem:[#allocation5 + $0x458] sm:$0xff]  ;;  %v9496_v30 = vld [vmem:[#allocation5 + $0x450] sm:$0xff] }
 0x629   :  { %9602 = vmatprep.subr.bf16.mxu0 %v9543_v0  ;;  %v9501_v0 = vld [vmem:[#allocation5 + $0x478] sm:$0xff] }
 0x62b   :  { %9344 = vmatpush1.bf16.msra.mxu1 %v9221_v63  ;;  %v9509_v63 = vld [vmem:[#allocation5 + $0x4b8] sm:$0xff] }
 0x62c   :  { %9603 = vmatpush1.bf16.msra.mxu0 %v9542_v13  ;;  %9345 = vmatprep.subr.bf16.mxu1 %v9226_v7  ;;  %v9513_v13 = vld [vmem:[#allocation5 + $0x4d8] sm:$0xff] }
 0x62d   :  { %9604 = vmatprep.subr.bf16.mxu0 %v9547_v5  ;;  %v9517_v7 = vld [vmem:[#allocation5 + $0x4f8] sm:$0xff] }
 0x62e   :  { %v9521_v5 = vld [vmem:[#allocation5 + $0x518] sm:$0xff] }
 0x62f   :  { %9346 = vmatpush1.bf16.msra.mxu1 %v9225_v32  ;;  %v9529_v32 = vld [vmem:[#allocation5 + $0x558] sm:$0xff] }
 0x630   :  { %9605 = vmatpush1.bf16.msra.mxu0 %v9546_v51  ;;  %9430 = vmatprep.subr.bf16.mxu1 %v9099_v28  ;;  %v9528_v51 = vld [vmem:[#allocation5 + $0x550] sm:$0xff] }
 0x631   :  { %v9532_v28 = vld [vmem:[#allocation5 + $0x570] sm:$0xff] }
 0x632   :  { %9348 = vmatmul.mubr.bf16.vlgmr.msra.gmra.mrb[56].mxu1 %v15350_v54  ;;  %v9110_v54 = vld [vmem:[#allocation5 + $0x70] sm:$0xff] }
 0x633   :  { %9607 = vmatmul.mubr.bf16.vlgmr.msra.gmra.mrb[16].mxu0 %v15382_v26  ;;  %9431 = vmatpush1.bf16.msra.mxu1 %v9098_v62  ;;  %v9536_v62 = vld [vmem:[#allocation5 + $0x590] sm:$0xff] }
 0x634   :  { %9616 = vmatprep.mubr.bf16.mxu0 %v15387_v18  ;;  %9432 = vmatprep.subr.bf16.mxu1 %v9103_v10  ;;  %v9541_v10 = vld [vmem:[#allocation5 + $0x5b8] sm:$0xff] }
 0x635   :  { %9357 = vmatprep.mubr.bf16.mxu1 %v15359_v53  ;;  %v9114_v53 = vld [vmem:[#allocation5 + $0x90] sm:$0xff] }
 0x637   :  { %9433 = vmatpush1.bf16.msra.mxu1 %v9102_v50  ;;  %v9545_v50 = vld [vmem:[#allocation5 + $0x5d8] sm:$0xff] }
 0x638   :  { %9434 = vmatprep.subr.bf16.mxu1 %v9107_v58  ;;  %v9544_v58 = vld [vmem:[#allocation5 + $0x5d0] sm:$0xff] }
 0x63a   :  { %9358 = vmatmul.mubr.bf16.gmra.mrb[60].mxu1 %v15367_v61  ;;  %v9126_v61 = vld [vmem:[#allocation5 + $0xf0] sm:$0xff] }
 0x63b   :  { %9617 = vmatmul.mubr.bf16.gmra.mrb[20].mxu0 %v15394_v59  ;;  %9435 = vmatpush1.bf16.msra.mxu1 %v9106_v45  ;;  %v9549_v45 = vld [vmem:[#allocation5 + $0x5f8] sm:$0xff] }
 0x63c   :  { %9462 = vmatprep.mubr.bf16.mxu1 %v15331_v22  ;;  %9436 = vmatprep.subr.bf16.mxu1 %v9111_v20  ;;  %v9130_v22 = vld [vmem:[#allocation5 + $0x110] sm:$0xff] }
 0x63d   :  { %v9548_v20 = vld [vmem:[#allocation5 + $0x5f0] sm:$0xff] }
 0x63f   :  { %9437 = vmatpush1.bf16.msra.mxu1 %v9110_v54 }
 0x640   :  { %9438 = vmatprep.subr.bf16.mxu1 %v9115_v31 }
 0x643   :  { %9439 = vmatpush1.bf16.msra.mxu1 %v9114_v53 }
 0x644   :  { %9440 = vmatprep.subr.bf16.mxu1 %v9119_v16 }
 0x647   :  { %9441 = vmatpush1.bf16.msra.mxu1 %v9118_v42 }
 0x648   :  { %9442 = vmatprep.subr.bf16.mxu1 %v9123_v2 }
 0x64b   :  { %9443 = vmatpush1.bf16.msra.mxu1 %v9122_v3 }
 0x64c   :  { %9444 = vmatprep.subr.bf16.mxu1 %v9127_v36 }
 0x64f   :  { %9445 = vmatpush1.bf16.msra.mxu1 %v9126_v61  ;;  %v9696_v61 = vld [vmem:[%s15616_s3] sm:$0xf] }
 0x650   :  { %9446 = vmatprep.subr.bf16.mxu1 %v9131_v11  ;;  %v9701_v11 = vrot.slane %v9696_v61, %v14962_v6 }
 0x653   :  { %9447 = vmatpush1.bf16.msra.mxu1 %v9130_v22 }
 0x654   :  { %9448 = vmatprep.subr.bf16.mxu1 %v9135_v52 }
 0x657   :  { %9449 = vmatpush1.bf16.msra.mxu1 %v9134_v47 }
 0x658   :  { %9450 = vmatprep.subr.bf16.mxu1 %v9139_v60 }
 0x65b   :  { %9451 = vmatpush1.bf16.msra.mxu1 %v9138_v37 }
 0x65c   :  { %9452 = vmatprep.subr.bf16.mxu1 %v9143_v41 }
 0x65f   :  { %9453 = vmatpush1.bf16.msra.mxu1 %v9142_v14 }
 0x660   :  { %9454 = vmatprep.subr.bf16.mxu1 %v9147_v12 }
 0x663   :  { %9455 = vmatpush1.bf16.msra.mxu1 %v9146_v43 }
 0x664   :  { %9456 = vmatprep.subr.bf16.mxu1 %v9151_v44 }
 0x667   :  { %9457 = vmatpush1.bf16.msra.mxu1 %v9150_v19 }
 0x668   :  { %9458 = vmatprep.subr.bf16.mxu1 %v9155_v34 }
 0x66b   :  { %9459 = vmatpush1.bf16.msra.mxu1 %v9154_v35 }
 0x66c   :  { %9460 = vmatprep.subr.bf16.mxu1 %v9159_v4 }
 0x66f   :  { %9461 = vmatpush1.bf16.msra.mxu1 %v9158_v17 }
 0x670   :  { %9627 = vmatprep.subr.bf16.mxu1 %v9489_v38 }
 0x672   :  { %9463 = vmatmul.mubr.bf16.vlgmr.msra.gmra.mrb[56].mxu1 %v15347_v46  ;;  %v9504_v46 = vld [vmem:[#allocation5 + $0x490] sm:$0xff] }
 0x673   :  { %9628 = vmatpush1.bf16.msra.mxu1 %v9488_v39  ;;  %9472 = vmatprep.mubr.bf16.mxu1 %v15322_v40  ;;  %v9508_v40 = vld [vmem:[#allocation5 + $0x4b0] sm:$0xff] }
 0x674   :  { %9629 = vmatprep.subr.bf16.mxu1 %v9493_v49 }
 0x677   :  { %9630 = vmatpush1.bf16.msra.mxu1 %v9492_v33 }
 0x678   :  { %9631 = vmatprep.subr.bf16.mxu1 %v9497_v56 }
 0x67a   :  { %9473 = vmatmul.mubr.bf16.gmra.mrb[60].mxu1 %v15342_v48  ;;  %v9516_v48 = vld [vmem:[#allocation5 + $0x4f0] sm:$0xff] }
 0x67b   :  { %9632 = vmatpush1.bf16.msra.mxu1 %v9496_v30  ;;  %9659 = vmatprep.mubr.bf16.mxu1 %v15374_v29  ;;  %v9520_v29 = vld [vmem:[#allocation5 + $0x510] sm:$0xff] }
 0x67c   :  { %9633 = vmatprep.subr.bf16.mxu1 %v9501_v0 }
 0x67f   :  { %9634 = vmatpush1.bf16.msra.mxu1 %v9500_v25 }
 0x680   :  { %9635 = vmatprep.subr.bf16.mxu1 %v9505_v21 }
 0x683   :  { %9636 = vmatpush1.bf16.msra.mxu1 %v9504_v46 }
 0x684   :  { %9637 = vmatprep.subr.bf16.mxu1 %v9509_v63 }
 0x687   :  { %9638 = vmatpush1.bf16.msra.mxu1 %v9508_v40 }
 0x688   :  { %9639 = vmatprep.subr.bf16.mxu1 %v9513_v13 }
 0x68b   :  { %9640 = vmatpush1.bf16.msra.mxu1 %v9512_v15 }
 0x68c   :  { %9641 = vmatprep.subr.bf16.mxu1 %v9517_v7 }
 0x68f   :  { %9642 = vmatpush1.bf16.msra.mxu1 %v9516_v48  ;;  %v15641_v48 = vsub.s32 2, %v14957_v1 }
 0x690   :  { %9643 = vmatprep.subr.bf16.mxu1 %v9521_v5 }
 0x691   :  { %v9709_v5 = vrot.slane %v9696_v61, %v15641_v48 }
 0x693   :  { %9644 = vmatpush1.bf16.msra.mxu1 %v9520_v29  ;;  %v15642_v29 = vsub.s32 3, %v14957_v1 }
 0x694   :  { %9645 = vmatprep.subr.bf16.mxu1 %v9525_v27 }
 0x695   :  { %v9713_v27 = vrot.slane %v9696_v61, %v15642_v29 }
 0x697   :  { %9646 = vmatpush1.bf16.msra.mxu1 %v9524_v9 }
 0x698   :  { %9647 = vmatprep.subr.bf16.mxu1 %v9529_v32 }
 0x69b   :  { %9648 = vmatpush1.bf16.msra.mxu1 %v9528_v51 }
 0x69c   :  { %9649 = vmatprep.subr.bf16.mxu1 %v9533_v57 }
 0x69f   :  { %9650 = vmatpush1.bf16.msra.mxu1 %v9532_v28 }
 0x6a0   :  { %9651 = vmatprep.subr.bf16.mxu1 %v9537_v23 }
 0x6a3   :  { %9652 = vmatpush1.bf16.msra.mxu1 %v9536_v62 }
 0x6a4   :  { %9653 = vmatprep.subr.bf16.mxu1 %v9541_v10 }
 0x6a7   :  { %9654 = vmatpush1.bf16.msra.mxu1 %v9540_v55 }
 0x6a8   :  { %9655 = vmatprep.subr.bf16.mxu1 %v9545_v50 }
 0x6ab   :  { %9656 = vmatpush1.bf16.msra.mxu1 %v9544_v58 }
 0x6ac   :  { %9657 = vmatprep.subr.bf16.mxu1 %v9549_v45 }
 0x6af   :  { %9658 = vmatpush1.bf16.msra.mxu1 %v9548_v20 }
 0x6b2   :  { %9660 = vmatmul.mubr.bf16.vlgmr.msra.gmra.mrb[56].mxu1 %v15382_v26  ;;  %v9705_v26 = vrot.slane %v9696_v61, %v14970_v8 }
 0x6b3   :  { %9669 = vmatprep.mubr.bf16.mxu1 %v15387_v18 }
 0x6ba   :  { %9670 = vmatmul.mubr.bf16.gmra.mrb[60].mxu1 %v15394_v59 }
 0x6c5   :  { %v9296_v54 = vpop.f32.mrb[48].mxu1 }
 0x6c6   :  { %v9298_v31 = vpop.f32.mrb[49].mxu1 }
 0x6c7   :  { %v9300_v53 = vpop.f32.mrb[50].mxu1 }
 0x6c8   :  { %v9302_v16 = vpop.f32.mrb[51].mxu1 }
 0x6cd   :  { %v9306_v42 = vpop.f32.mrb[52].mxu1 }
 0x6ce   :  { %v9308_v2 = vpop.f32.mrb[53].mxu1 }
 0x6cf   :  { %v9310_v3 = vpop.f32.mrb[54].mxu1 }
 0x6d0   :  { %v9312_v36 = vpop.f32.mrb[55].mxu1 }
 0x706   :  { %v9608_v22 = vpop.f32.mrb[16].mxu0 }
 0x707   :  { %v11499_v18 = vadd.f32 %v9608_v22, %v9296_v54  ;;  %v9610_v52 = vpop.f32.mrb[17].mxu0 }
 0x708   :  { %v11500_v59 = vadd.f32 %v9610_v52, %v9298_v31  ;;  %v9612_v47 = vpop.f32.mrb[18].mxu0 }
 0x709   :  { %v9718_v60 = vadd.f32 %v11499_v18, %v9701_v11  ;;  %v11501_v37 = vadd.f32 %v9612_v47, %v9300_v53  ;;  %v9614_v41 = vpop.f32.mrb[19].mxu0 }
 0x70a   :  { %v9719_v14 = vadd.f32 %v11500_v59, %v9705_v26  ;;  %v11502_v12 = vadd.f32 %v9614_v41, %v9302_v16 }
 0x70b   :  { %v9734_v43 = vmax.f32 %v9718_v60, 0.0  ;;  %v9722_v44 = vadd.f32 %v11501_v37, %v9701_v11 }
 0x70c   :  { %v9735_v19 = vmax.f32 %v9719_v14, 0.0  ;;  %v9723_v34 = vadd.f32 %v11502_v12, %v9705_v26 }
 0x70d   :  { %v9738_v35 = vmax.f32 %v9722_v44, 0.0 }
 0x70e   :  { %v9739_v4 = vmax.f32 %v9723_v34, 0.0  ;;  %v9618_v17 = vpop.f32.mrb[20].mxu0 }
 0x70f   :  { %v11503_v38 = vadd.f32 %v9618_v17, %v9306_v42  ;;  %v9620_v39 = vpop.f32.mrb[21].mxu0 }
 0x710   :  { %v11504_v49 = vadd.f32 %v9620_v39, %v9308_v2  ;;  %v9622_v33 = vpop.f32.mrb[22].mxu0 }
 0x711   :  { %v15411_v56 = vadd.f32 %v11503_v38, %v9701_v11  ;;  %v11505_v30 = vadd.f32 %v9622_v33, %v9310_v3  ;;  %v9624_v0 = vpop.f32.mrb[23].mxu0 }
 0x712   :  { %v9727_v25 = vadd.f32 %v11504_v49, %v9705_v26  ;;  %v11506_v21 = vadd.f32 %v9624_v0, %v9312_v36 }
 0x713   :  { %v9742_v46 = vmax.f32 %v15411_v56, 0.0  ;;  %v15414_v63 = vadd.f32 %v11505_v30, %v9701_v11 }
 0x714   :  { %v9743_v40 = vmax.f32 %v9727_v25, 0.0  ;;  %v15416_v13 = vadd.f32 %v11506_v21, %v9705_v26 }
 0x715   :  { %v9746_v15 = vmax.f32 %v15414_v63, 0.0 }
 0x716   :  { %v9747_v7 = vmax.f32 %v15416_v13, 0.0 }
 0x785   :  { %v9661_v9 = vpop.f32.mrb[56].mxu1 }
 0x786   :  { %v9720_v32 = vadd.f32 %v9709_v5, %v9661_v9  ;;  %v9663_v51 = vpop.f32.mrb[57].mxu1 }
 0x787   :  { %v9721_v57 = vadd.f32 %v9713_v27, %v9663_v51  ;;  %v9665_v28 = vpop.f32.mrb[58].mxu1 }
 0x788   :  { %v9736_v23 = vmax.f32 %v9720_v32, 0.0  ;;  %v9724_v62 = vadd.f32 %v9709_v5, %v9665_v28  ;;  %v9667_v10 = vpop.f32.mrb[59].mxu1 }
 0x789   :  { %v9737_v55 = vmax.f32 %v9721_v57, 0.0  ;;  %v9725_v50 = vadd.f32 %v9713_v27, %v9667_v10 }
 0x78a   :  { %v9740_v58 = vmax.f32 %v9724_v62, 0.0 }
 0x78b   :  { %v9741_v45 = vmax.f32 %v9725_v50, 0.0 }
 0x78d   :  { %v9671_v20 = vpop.f32.mrb[60].mxu1 }
 0x78e   :  { %v9728_v54 = vadd.f32 %v9709_v5, %v9671_v20  ;;  %v9673_v31 = vpop.f32.mrb[61].mxu1 }
 0x78f   :  { %v9729_v53 = vadd.f32 %v9713_v27, %v9673_v31  ;;  %v9675_v16 = vpop.f32.mrb[62].mxu1 }
 0x790   :  { %v9744_v42 = vmax.f32 %v9728_v54, 0.0  ;;  %v9732_v2 = vadd.f32 %v9709_v5, %v9675_v16  ;;  %v9677_v3 = vpop.f32.mrb[63].mxu1 }
 0x791   :  { %v9745_v36 = vmax.f32 %v9729_v53, 0.0  ;;  %v9733_v61 = vadd.f32 %v9713_v27, %v9677_v3 }
 0x792   :  { %v9748_v11 = vmax.f32 %v9732_v2, 0.0 }
 0x793   :  { %v9749_v22 = vmax.f32 %v9733_v61, 0.0 }
 0x794   :  { %11888 = dma.done.wait [#allocation9 + $0x2], 16384 }
 0x795   :  { %11889 = vsyncadd [#allocation9 + $0x2], 4294950912  ;;  %v9896_v26 = vcombine.low %v9734_v43, %v9735_v19  ;;  %v9897_v18 = vcombine.high %v9734_v43, %v9735_v19  ;;  %v9898_v52 = vcombine.low %v9736_v23, %v9737_v55  ;;  %v9899_v59 = vcombine.high %v9736_v23, %v9737_v55  ;;  %v9753_v48 = vld [vmem:[#allocation6 + $0x8] sm:$0xff]  ;;  %v9755_v5 = vld [vmem:[#allocation6 + $0x18] sm:$0xff] }
 0x796   :  { %v9932_v47 = vcombine.low %v9738_v35, %v9739_v4  ;;  %v9933_v60 = vcombine.high %v9738_v35, %v9739_v4  ;;  %v9934_v37 = vcombine.low %v9740_v58, %v9741_v45  ;;  %v9935_v41 = vcombine.high %v9740_v58, %v9741_v45  ;;  %v9752_v29 = vld [vmem:[#allocation6] sm:$0xff]  ;;  %10156 = vmatprep.subr.bf16.mxu0 %v9753_v48  ;;  %v9754_v57 = vld [vmem:[#allocation6 + $0x10] sm:$0xff]  ;;  %v9757_v28 = vld [vmem:[#allocation6 + $0x28] sm:$0xff] }
 0x797   :  { %v9906_v14 = vrot.slane %v9896_v26, %v15084_v24  ;;  %v9913_v12 = vrot.slane %v9897_v18, %v15084_v24  ;;  %v9920_v44 = vrot.slane %v9898_v52, %v15084_v24  ;;  %v9927_v34 = vrot.slane %v9899_v59, %v15084_v24  ;;  %10242 = vmatprep.subr.bf16.mxu1 %v9755_v5  ;;  %v9759_v23 = vld [vmem:[#allocation6 + $0x38] sm:$0xff]  ;;  %v9758_v50 = vld [vmem:[#allocation6 + $0x30] sm:$0xff]  ;;  %v9761_v54 = vld [vmem:[#allocation6 + $0x48] sm:$0xff] }
 0x798   :  { %v9942_v17 = vrot.slane %v9932_v47, %v15084_v24  ;;  %v9949_v38 = vrot.slane %v9933_v60, %v15084_v24  ;;  %v9956_v43 = vrot.slane %v9934_v37, %v15084_v24  ;;  %v9963_v19 = vrot.slane %v9935_v41, %v15084_v24  ;;  %10157 = vmatpush1.bf16.msra.mxu0 %v9752_v29  ;;  %v9763_v31 = vld [vmem:[#allocation6 + $0x58] sm:$0xff]  ;;  %v9760_v52 = vld [vmem:[#allocation6 + $0x40] sm:$0xff]  ;;  %v9762_v59 = vld [vmem:[#allocation6 + $0x50] sm:$0xff] }
 0x799   :  { %v9928_v39 = vcombine.low %v9906_v14, %v9920_v44  ;;  %v9929_v35 = vcombine.high %v9906_v14, %v9920_v44  ;;  %v9930_v4 = vcombine.low %v9913_v12, %v9927_v34  ;;  %v9931_v49 = vcombine.high %v9913_v12, %v9927_v34  ;;  %10243 = vmatpush1.bf16.msra.mxu1 %v9754_v57  ;;  %v9765_v41 = vld [vmem:[#allocation6 + $0x68] sm:$0xff]  ;;  %v9767_v14 = vld [vmem:[#allocation6 + $0x78] sm:$0xff]  ;;  %v9772_v5 = vld [vmem:[#allocation6 + $0xa0] sm:$0xff] }
 0x79a   :  { %v9964_v33 = vcombine.low %v9942_v17, %v9956_v43  ;;  %v9965_v56 = vcombine.high %v9942_v17, %v9956_v43  ;;  %v9966_v30 = vcombine.low %v9949_v38, %v9963_v19  ;;  %v9967_v0 = vcombine.high %v9949_v38, %v9963_v19  ;;  %10158 = vmatprep.subr.bf16.mxu0 %v9757_v28  ;;  %v9774_v29 = vld [vmem:[#allocation6 + $0xb0] sm:$0xff]  ;;  %v9781_v57 = vld [vmem:[#allocation6 + $0xe8] sm:$0xff]  ;;  %v9783_v28 = vld [vmem:[#allocation6 + $0xf8] sm:$0xff] }
 0x79b   :  { %v9968_v25 = vcombine.low %v9742_v46, %v9743_v40  ;;  %v9969_v21 = vcombine.high %v9742_v46, %v9743_v40  ;;  %v9970_v63 = vcombine.low %v9744_v42, %v9745_v36  ;;  %v9971_v13 = vcombine.high %v9744_v42, %v9745_v36  ;;  %10244 = vmatprep.subr.bf16.mxu1 %v9759_v23  ;;  %v9780_v23 = vld [vmem:[#allocation6 + $0xe0] sm:$0xff] }
 0x79c   :  { %v10004_v27 = vcombine.low %v9746_v15, %v9747_v7  ;;  %v10005_v9 = vcombine.high %v9746_v15, %v9747_v7  ;;  %v10006_v32 = vcombine.low %v9748_v11, %v9749_v22  ;;  %v10007_v51 = vcombine.high %v9748_v11, %v9749_v22  ;;  %v9756_v7 = vld [vmem:[#allocation6 + $0x20] sm:$0xff] }
 0x79d   :  { %v9978_v62 = vrot.slane %v9968_v25, %v15084_v24  ;;  %v9985_v10 = vrot.slane %v9969_v21, %v15084_v24  ;;  %v9992_v46 = vrot.slane %v9970_v63, %v15084_v24  ;;  %v9999_v40 = vrot.slane %v9971_v13, %v15084_v24  ;;  %10159 = vmatpush1.bf16.msra.mxu0 %v9756_v7  ;;  %v9768_v25 = vld [vmem:[#allocation6 + $0x80] sm:$0xff]  ;;  %v9770_v21 = vld [vmem:[#allocation6 + $0x90] sm:$0xff]  ;;  %v9773_v63 = vld [vmem:[#allocation6 + $0xa8] sm:$0xff] }
 0x79e   :  { %v10014_v55 = vrot.slane %v10004_v27, %v15084_v24  ;;  %v10021_v15 = vrot.slane %v10005_v9, %v15084_v24  ;;  %v10028_v20 = vrot.slane %v10006_v32, %v15084_v24  ;;  %v10035_v42 = vrot.slane %v10007_v51, %v15084_v24  ;;  %10245 = vmatpush1.bf16.msra.mxu1 %v9758_v50  ;;  %v9775_v13 = vld [vmem:[#allocation6 + $0xb8] sm:$0xff]  ;;  %v9777_v27 = vld [vmem:[#allocation6 + $0xc8] sm:$0xff]  ;;  %v9776_v32 = vld [vmem:[#allocation6 + $0xc0] sm:$0xff] }
 0x79f   :  { %v10000_v58 = vcombine.low %v9978_v62, %v9992_v46  ;;  %v10001_v45 = vcombine.high %v9978_v62, %v9992_v46  ;;  %v10002_v53 = vcombine.low %v9985_v10, %v9999_v40  ;;  %v10003_v16 = vcombine.high %v9985_v10, %v9999_v40  ;;  %10160 = vmatprep.subr.bf16.mxu0 %v9761_v54  ;;  %v9779_v9 = vld [vmem:[#allocation6 + $0xd8] sm:$0xff]  ;;  %v9778_v51 = vld [vmem:[#allocation6 + $0xd0] sm:$0xff]  ;;  %v9785_v10 = vld [vmem:[#allocation6 + $0x108] sm:$0xff] }
 0x7a0   :  { %v15440_v2 = vmax.f32 %v9928_v39, %v9929_v35  ;;  %v10036_v3 = vcombine.low %v10014_v55, %v10028_v20  ;;  %v10037_v36 = vcombine.high %v10014_v55, %v10028_v20  ;;  %v15442_v61 = vmax.f32 %v9930_v4, %v9931_v49  ;;  %10246 = vmatprep.subr.bf16.mxu1 %v9763_v31  ;;  %v9764_v39 = vld [vmem:[#allocation6 + $0x60] sm:$0xff]  ;;  %v9766_v35 = vld [vmem:[#allocation6 + $0x70] sm:$0xff]  ;;  %v9769_v49 = vld [vmem:[#allocation6 + $0x88] sm:$0xff] }
 0x7a1   :  { %v15444_v11 = vmax.f32 %v9964_v33, %v9965_v56  ;;  %v10038_v22 = vcombine.low %v10021_v15, %v10035_v42  ;;  %v10039_v26 = vcombine.high %v10021_v15, %v10035_v42  ;;  %v15446_v18 = vmax.f32 %v9966_v30, %v9967_v0  ;;  %10161 = vmatpush1.bf16.msra.mxu0 %v9760_v52  ;;  %v9771_v33 = vld [vmem:[#allocation6 + $0x98] sm:$0xff]  ;;  %v9782_v62 = vld [vmem:[#allocation6 + $0xf0] sm:$0xff]  ;;  %v9784_v40 = vld [vmem:[#allocation6 + $0x100] sm:$0xff] }
 0x7a2   :  { %v15448_v47 = vmax.f32 %v10000_v58, %v10001_v45  ;;  %v15450_v60 = vmax.f32 %v10002_v53, %v10003_v16  ;;  %v15452_v37 = vmax.f32 %v10036_v3, %v10037_v36  ;;  %v10072_v44 = vcombine.low %v15440_v2, %v15442_v61  ;;  %10247 = vmatpush1.bf16.msra.mxu1 %v9762_v59  ;;  %v9787_v46 = vld [vmem:[#allocation6 + $0x118] sm:$0xff]  ;;  %v9786_v55 = vld [vmem:[#allocation6 + $0x110] sm:$0xff]  ;;  %v9789_v15 = vld [vmem:[#allocation6 + $0x128] sm:$0xff] }
 0x7a3   :  { %v15454_v12 = vmax.f32 %v10038_v22, %v10039_v26  ;;  %v10074_v34 = vcombine.low %v15444_v11, %v15446_v18  ;;  %10162 = vmatprep.subr.bf16.mxu0 %v9765_v41  ;;  %10248 = vmatprep.subr.bf16.mxu1 %v9767_v14  ;;  %v9791_v7 = vld [vmem:[#allocation6 + $0x138] sm:$0xff]  ;;  %v9788_v50 = vld [vmem:[#allocation6 + $0x120] sm:$0xff]  ;;  %v9790_v58 = vld [vmem:[#allocation6 + $0x130] sm:$0xff] }
 0x7a4   :  { %v10108_v17 = vcombine.low %v15448_v47, %v15450_v60  ;;  %v15463_v38 = vrot.slane %v10072_v44, %v15084_v24  ;;  %v9793_v45 = vld [vmem:[#allocation6 + $0x148] sm:$0xff]  ;;  %v9795_v20 = vld [vmem:[#allocation6 + $0x158] sm:$0xff]  ;;  %v9792_v54 = vld [vmem:[#allocation6 + $0x140] sm:$0xff] }
 0x7a5   :  { %v15466_v43 = vrot.slane %v10074_v34, %v15084_v24  ;;  %v10110_v19 = vcombine.low %v15452_v37, %v15454_v12  ;;  %10163 = vmatpush1.bf16.msra.mxu0 %v9764_v39  ;;  %v9794_v31 = vld [vmem:[#allocation6 + $0x150] sm:$0xff]  ;;  %v9797_v53 = vld [vmem:[#allocation6 + $0x168] sm:$0xff]  ;;  %v9799_v16 = vld [vmem:[#allocation6 + $0x178] sm:$0xff]  ;;  %v10075_v39 = vcombine.high %v15444_v11, %v15446_v18 }
 0x7a6   :  { %v15471_v4 = vrot.slane %v10108_v17, %v15084_v24  ;;  %10249 = vmatpush1.bf16.msra.mxu1 %v9766_v35  ;;  %10164 = vmatprep.subr.bf16.mxu0 %v9769_v49  ;;  %v9796_v42 = vld [vmem:[#allocation6 + $0x160] sm:$0xff]  ;;  %v9798_v3 = vld [vmem:[#allocation6 + $0x170] sm:$0xff]  ;;  %v9801_v36 = vld [vmem:[#allocation6 + $0x188] sm:$0xff]  ;;  %v10109_v35 = vcombine.high %v15448_v47, %v15450_v60  ;;  %v10111_v49 = vcombine.high %v15452_v37, %v15454_v12 }
 0x7a7   :  { %v10105_v56 = vcombine.high %v15463_v38, %v15466_v43  ;;  %v15476_v30 = vrot.slane %v10110_v19, %v15084_v24  ;;  %10250 = vmatprep.subr.bf16.mxu1 %v9771_v33  ;;  %v9803_v22 = vld [vmem:[#allocation6 + $0x198] sm:$0xff]  ;;  %v9800_v26 = vld [vmem:[#allocation6 + $0x180] sm:$0xff]  ;;  %v9802_v52 = vld [vmem:[#allocation6 + $0x190] sm:$0xff]  ;;  %v10073_v19 = vcombine.high %v15440_v2, %v15442_v61  ;;  %v15492_v2 = vrot.slane %v10075_v39, %v15084_v24 }
 0x7a8   :  { %v9805_v59 = vld [vmem:[#allocation6 + $0x1a8] sm:$0xff]  ;;  %v9807_v41 = vld [vmem:[#allocation6 + $0x1b8] sm:$0xff]  ;;  %v9804_v14 = vld [vmem:[#allocation6 + $0x1a0] sm:$0xff]  ;;  %v15495_v61 = vrot.slane %v10109_v35, %v15084_v24  ;;  %v15498_v11 = vrot.slane %v10111_v49, %v15084_v24  ;;  %v10104_v18 = vcombine.low %v15463_v38, %v15466_v43 }
 0x7a9   :  { %v10141_v0 = vcombine.high %v15471_v4, %v15476_v30  ;;  %10165 = vmatpush1.bf16.msra.mxu0 %v9768_v25  ;;  %v9806_v44 = vld [vmem:[#allocation6 + $0x1b0] sm:$0xff]  ;;  %v9809_v34 = vld [vmem:[#allocation6 + $0x1c8] sm:$0xff]  ;;  %v9811_v17 = vld [vmem:[#allocation6 + $0x1d8] sm:$0xff]  ;;  %v10140_v47 = vcombine.low %v15471_v4, %v15476_v30 }
 0x7aa   :  { %10251 = vmatpush1.bf16.msra.mxu1 %v9770_v21  ;;  %10166 = vmatprep.subr.bf16.mxu0 %v9773_v63  ;;  %v9808_v33 = vld [vmem:[#allocation6 + $0x1c0] sm:$0xff]  ;;  %v9815_v25 = vld [vmem:[#allocation6 + $0x1f8] sm:$0xff]  ;;  %v15489_v21 = vrot.slane %v10073_v19, %v15084_v24  ;;  %v9814_v37 = vld [vmem:[#allocation6 + $0x1f0] sm:$0xff]  ;;  %v10143_v24 = vcombine.high %v15495_v61, %v15498_v11 }
 0x7ab   :  { %v10153_v48 = vpack.c.bf16 %v10141_v0, %v10105_v56  ;;  %10252 = vmatprep.subr.bf16.mxu1 %v9775_v13  ;;  %v9810_v56 = vld [vmem:[#allocation6 + $0x1d0] sm:$0xff]  ;;  %v9813_v0 = vld [vmem:[#allocation6 + $0x1e8] sm:$0xff]  ;;  %v9812_v60 = vld [vmem:[#allocation6 + $0x1e0] sm:$0xff] }
 0x7ac   :  { %v9817_v12 = vld [vmem:[#allocation6 + $0x208] sm:$0xff]  ;;  %v9819_v63 = vld [vmem:[#allocation6 + $0x218] sm:$0xff]  ;;  %v10107_v13 = vcombine.high %v15489_v21, %v15492_v2  ;;  %v9816_v38 = vld [vmem:[#allocation6 + $0x200] sm:$0xff] }
 0x7ad   :  { %10188 = vmatprep.mubr.bf16.mxu0 %v10153_v48  ;;  %10274 = vmatprep.mubr.bf16.mxu1 %v10153_v48  ;;  %v10152_v48 = vpack.c.bf16 %v10140_v47, %v10104_v18  ;;  %v9818_v43 = vld [vmem:[#allocation6 + $0x210] sm:$0xff]  ;;  %v9821_v4 = vld [vmem:[#allocation6 + $0x228] sm:$0xff]  ;;  %v9823_v30 = vld [vmem:[#allocation6 + $0x238] sm:$0xff] }
 0x7ae   :  { %10167 = vmatpush1.bf16.msra.mxu0 %v9772_v5  ;;  %10253 = vmatpush1.bf16.msra.mxu1 %v9774_v29  ;;  %v10155_v5 = vpack.c.bf16 %v10143_v24, %v10107_v13  ;;  %v9820_v29 = vld [vmem:[#allocation6 + $0x220] sm:$0xff]  ;;  %v9859_v19 = vld [vmem:[#allocation6 + $0x358] sm:$0xff]  ;;  %v9858_v35 = vld [vmem:[#allocation6 + $0x350] sm:$0xff] }
 0x7af   :  { %10168 = vmatprep.subr.bf16.mxu0 %v9777_v27  ;;  %10254 = vmatprep.subr.bf16.mxu1 %v9779_v9  ;;  %v9822_v27 = vld [vmem:[#allocation6 + $0x230] sm:$0xff]  ;;  %v9825_v9 = vld [vmem:[#allocation6 + $0x248] sm:$0xff]  ;;  %v9856_v39 = vld [vmem:[#allocation6 + $0x340] sm:$0xff] }
 0x7b0   :  { %v9861_v49 = vld [vmem:[#allocation6 + $0x368] sm:$0xff]  ;;  %v9867_v18 = vld [vmem:[#allocation6 + $0x398] sm:$0xff]  ;;  %v9864_v47 = vld [vmem:[#allocation6 + $0x380] sm:$0xff] }
 0x7b1   :  { %v9870_v13 = vld [vmem:[#allocation6 + $0x3b0] sm:$0xff]  ;;  %v9873_v24 = vld [vmem:[#allocation6 + $0x3c8] sm:$0xff] }
 0x7b2   :  { %10169 = vmatpush1.bf16.msra.mxu0 %v9776_v32  ;;  %10255 = vmatpush1.bf16.msra.mxu1 %v9778_v51  ;;  %v9827_v32 = vld [vmem:[#allocation6 + $0x258] sm:$0xff]  ;;  %v9824_v51 = vld [vmem:[#allocation6 + $0x240] sm:$0xff] }
 0x7b3   :  { %10170 = vmatprep.subr.bf16.mxu0 %v9781_v57  ;;  %10256 = vmatprep.subr.bf16.mxu1 %v9783_v28  ;;  %v9826_v57 = vld [vmem:[#allocation6 + $0x250] sm:$0xff]  ;;  %v9829_v28 = vld [vmem:[#allocation6 + $0x268] sm:$0xff] }
 0x7b6   :  { %10171 = vmatpush1.bf16.msra.mxu0 %v9780_v23  ;;  %10257 = vmatpush1.bf16.msra.mxu1 %v9782_v62  ;;  %v9831_v23 = vld [vmem:[#allocation6 + $0x278] sm:$0xff]  ;;  %v9828_v62 = vld [vmem:[#allocation6 + $0x260] sm:$0xff] }
 0x7b7   :  { %10172 = vmatprep.subr.bf16.mxu0 %v9785_v10  ;;  %10258 = vmatprep.subr.bf16.mxu1 %v9787_v46  ;;  %v9830_v10 = vld [vmem:[#allocation6 + $0x270] sm:$0xff]  ;;  %v9833_v46 = vld [vmem:[#allocation6 + $0x288] sm:$0xff] }
 0x7ba   :  { %10173 = vmatpush1.bf16.msra.mxu0 %v9784_v40  ;;  %10259 = vmatpush1.bf16.msra.mxu1 %v9786_v55  ;;  %v9835_v40 = vld [vmem:[#allocation6 + $0x298] sm:$0xff]  ;;  %v9832_v55 = vld [vmem:[#allocation6 + $0x280] sm:$0xff] }
 0x7bb   :  { %10174 = vmatprep.subr.bf16.mxu0 %v9789_v15  ;;  %10260 = vmatprep.subr.bf16.mxu1 %v9791_v7  ;;  %v9834_v15 = vld [vmem:[#allocation6 + $0x290] sm:$0xff]  ;;  %v9837_v7 = vld [vmem:[#allocation6 + $0x2a8] sm:$0xff] }
 0x7be   :  { %10175 = vmatpush1.bf16.msra.mxu0 %v9788_v50  ;;  %10261 = vmatpush1.bf16.msra.mxu1 %v9790_v58  ;;  %v9839_v50 = vld [vmem:[#allocation6 + $0x2b8] sm:$0xff]  ;;  %v9836_v58 = vld [vmem:[#allocation6 + $0x2a0] sm:$0xff] }
 0x7bf   :  { %10176 = vmatprep.subr.bf16.mxu0 %v9793_v45  ;;  %10262 = vmatprep.subr.bf16.mxu1 %v9795_v20  ;;  %v9838_v45 = vld [vmem:[#allocation6 + $0x2b0] sm:$0xff]  ;;  %v9841_v20 = vld [vmem:[#allocation6 + $0x2c8] sm:$0xff] }
 0x7c2   :  { %10177 = vmatpush1.bf16.msra.mxu0 %v9792_v54  ;;  %10263 = vmatpush1.bf16.msra.mxu1 %v9794_v31  ;;  %v9843_v54 = vld [vmem:[#allocation6 + $0x2d8] sm:$0xff]  ;;  %v9840_v31 = vld [vmem:[#allocation6 + $0x2c0] sm:$0xff] }
 0x7c3   :  { %10178 = vmatprep.subr.bf16.mxu0 %v9797_v53  ;;  %10264 = vmatprep.subr.bf16.mxu1 %v9799_v16  ;;  %v9842_v53 = vld [vmem:[#allocation6 + $0x2d0] sm:$0xff]  ;;  %v9845_v16 = vld [vmem:[#allocation6 + $0x2e8] sm:$0xff] }
 0x7c6   :  { %10179 = vmatpush1.bf16.msra.mxu0 %v9796_v42  ;;  %10265 = vmatpush1.bf16.msra.mxu1 %v9798_v3  ;;  %v9847_v42 = vld [vmem:[#allocation6 + $0x2f8] sm:$0xff]  ;;  %v9844_v3 = vld [vmem:[#allocation6 + $0x2e0] sm:$0xff] }
 0x7c7   :  { %10180 = vmatprep.subr.bf16.mxu0 %v9801_v36  ;;  %10266 = vmatprep.subr.bf16.mxu1 %v9803_v22  ;;  %v9846_v36 = vld [vmem:[#allocation6 + $0x2f0] sm:$0xff]  ;;  %v9849_v22 = vld [vmem:[#allocation6 + $0x308] sm:$0xff] }
 0x7ca   :  { %10181 = vmatpush1.bf16.msra.mxu0 %v9800_v26  ;;  %10267 = vmatpush1.bf16.msra.mxu1 %v9802_v52  ;;  %v9851_v26 = vld [vmem:[#allocation6 + $0x318] sm:$0xff]  ;;  %v9848_v52 = vld [vmem:[#allocation6 + $0x300] sm:$0xff] }
 0x7cb   :  { %10182 = vmatprep.subr.bf16.mxu0 %v9805_v59  ;;  %10268 = vmatprep.subr.bf16.mxu1 %v9807_v41  ;;  %v9850_v59 = vld [vmem:[#allocation6 + $0x310] sm:$0xff]  ;;  %v9853_v41 = vld [vmem:[#allocation6 + $0x328] sm:$0xff] }
 0x7ce   :  { %10183 = vmatpush1.bf16.msra.mxu0 %v9804_v14  ;;  %10269 = vmatpush1.bf16.msra.mxu1 %v9806_v44  ;;  %v9855_v14 = vld [vmem:[#allocation6 + $0x338] sm:$0xff]  ;;  %v9852_v44 = vld [vmem:[#allocation6 + $0x320] sm:$0xff] }
 0x7cf   :  { %10184 = vmatprep.subr.bf16.mxu0 %v9809_v34  ;;  %10270 = vmatprep.subr.bf16.mxu1 %v9811_v17  ;;  %v9854_v34 = vld [vmem:[#allocation6 + $0x330] sm:$0xff]  ;;  %v9857_v17 = vld [vmem:[#allocation6 + $0x348] sm:$0xff] }
 0x7d2   :  { %10185 = vmatpush1.bf16.msra.mxu0 %v9808_v33  ;;  %10271 = vmatpush1.bf16.msra.mxu1 %v9810_v56  ;;  %v9863_v33 = vld [vmem:[#allocation6 + $0x378] sm:$0xff]  ;;  %v9860_v56 = vld [vmem:[#allocation6 + $0x360] sm:$0xff] }
 0x7d3   :  { %10186 = vmatprep.subr.bf16.mxu0 %v9813_v0  ;;  %10272 = vmatprep.subr.bf16.mxu1 %v9815_v25  ;;  %v9862_v0 = vld [vmem:[#allocation6 + $0x370] sm:$0xff]  ;;  %v9865_v25 = vld [vmem:[#allocation6 + $0x388] sm:$0xff] }
 0x7d6   :  { %10187 = vmatpush1.bf16.msra.mxu0 %v9812_v60  ;;  %10273 = vmatpush1.bf16.msra.mxu1 %v9814_v37  ;;  %v9866_v60 = vld [vmem:[#allocation6 + $0x390] sm:$0xff]  ;;  %v9869_v37 = vld [vmem:[#allocation6 + $0x3a8] sm:$0xff] }
 0x7d7   :  { %10199 = vmatprep.subr.bf16.mxu0 %v9817_v12  ;;  %10285 = vmatprep.subr.bf16.mxu1 %v9819_v63  ;;  %v9871_v12 = vld [vmem:[#allocation6 + $0x3b8] sm:$0xff]  ;;  %v9868_v63 = vld [vmem:[#allocation6 + $0x3a0] sm:$0xff] }
 0x7d9   :  { %10189 = vmatmul.mubr.bf16.vlgmr.msra.gmra.mrb[24].mxu0 %v10152_v48  ;;  %10275 = vmatmul.mubr.bf16.vlgmr.msra.gmra.mrb[64].mxu1 %v10152_v48  ;;  %v9875_v48 = vld [vmem:[#allocation6 + $0x3d8] sm:$0xff] }
 0x7da   :  { %10200 = vmatpush1.bf16.msra.mxu0 %v9816_v38  ;;  %10286 = vmatpush1.bf16.msra.mxu1 %v9818_v43  ;;  %v9872_v38 = vld [vmem:[#allocation6 + $0x3c0] sm:$0xff]  ;;  %v9874_v43 = vld [vmem:[#allocation6 + $0x3d0] sm:$0xff] }
 0x7db   :  { %10201 = vmatprep.subr.bf16.mxu0 %v9821_v4  ;;  %10287 = vmatprep.subr.bf16.mxu1 %v9823_v30  ;;  %v9877_v4 = vld [vmem:[#allocation6 + $0x3e8] sm:$0xff]  ;;  %v9879_v30 = vld [vmem:[#allocation6 + $0x3f8] sm:$0xff] }
 0x7dc   :  { %10231 = vmatprep.mubr.bf16.mxu0 %v10155_v5  ;;  %10317 = vmatprep.mubr.bf16.mxu1 %v10155_v5  ;;  %v10106_v5 = vcombine.low %v15489_v21, %v15492_v2 }
 0x7de   :  { %10202 = vmatpush1.bf16.msra.mxu0 %v9820_v29  ;;  %10288 = vmatpush1.bf16.msra.mxu1 %v9822_v27  ;;  %v10142_v29 = vcombine.low %v15495_v61, %v15498_v11  ;;  %v9876_v27 = vld [vmem:[#allocation6 + $0x3e0] sm:$0xff] }
 0x7df   :  { %10203 = vmatprep.subr.bf16.mxu0 %v9825_v9  ;;  %10289 = vmatprep.subr.bf16.mxu1 %v9827_v32  ;;  %v9878_v9 = vld [vmem:[#allocation6 + $0x3f0] sm:$0xff] }
 0x7e0   :  { %v10154_v32 = vpack.c.bf16 %v10142_v29, %v10106_v5 }
 0x7e2   :  { %10204 = vmatpush1.bf16.msra.mxu0 %v9824_v51  ;;  %10290 = vmatpush1.bf16.msra.mxu1 %v9826_v57  ;;  %v11910_v51 = vmov 1966171168  }
 0x7e3   :  { %10205 = vmatprep.subr.bf16.mxu0 %v9829_v28  ;;  %10291 = vmatprep.subr.bf16.mxu1 %v9831_v23  ;;  %v10338_v57 = vunpack.c.l.s4 %v11910_v51 }
 0x7e5   :  { %v10339_v28 = vunpack.c.0.s8 %v10338_v57 }
 0x7e6   :  { %10206 = vmatpush1.bf16.msra.mxu0 %v9828_v62  ;;  %10292 = vmatpush1.bf16.msra.mxu1 %v9830_v10 }
 0x7e7   :  { %10207 = vmatprep.subr.bf16.mxu0 %v9833_v46  ;;  %10293 = vmatprep.subr.bf16.mxu1 %v9835_v40  ;;  %v15513_v11 = vsub.s32 %v10339_v28, %v14957_v1 }
 0x7ea   :  { %10208 = vmatpush1.bf16.msra.mxu0 %v9832_v55  ;;  %10294 = vmatpush1.bf16.msra.mxu1 %v9834_v15 }
 0x7eb   :  { %10209 = vmatprep.subr.bf16.mxu0 %v9837_v7  ;;  %10295 = vmatprep.subr.bf16.mxu1 %v9839_v50 }
 0x7ee   :  { %10210 = vmatpush1.bf16.msra.mxu0 %v9836_v58  ;;  %10296 = vmatpush1.bf16.msra.mxu1 %v9838_v45 }
 0x7ef   :  { %10211 = vmatprep.subr.bf16.mxu0 %v9841_v20  ;;  %10297 = vmatprep.subr.bf16.mxu1 %v9843_v54 }
 0x7f2   :  { %10212 = vmatpush1.bf16.msra.mxu0 %v9840_v31  ;;  %10298 = vmatpush1.bf16.msra.mxu1 %v9842_v53 }
 0x7f3   :  { %10213 = vmatprep.subr.bf16.mxu0 %v9845_v16  ;;  %10299 = vmatprep.subr.bf16.mxu1 %v9847_v42 }
 0x7f6   :  { %10214 = vmatpush1.bf16.msra.mxu0 %v9844_v3  ;;  %10300 = vmatpush1.bf16.msra.mxu1 %v9846_v36 }
 0x7f7   :  { %10215 = vmatprep.subr.bf16.mxu0 %v9849_v22  ;;  %10301 = vmatprep.subr.bf16.mxu1 %v9851_v26 }
 0x7fa   :  { %10216 = vmatpush1.bf16.msra.mxu0 %v9848_v52  ;;  %10302 = vmatpush1.bf16.msra.mxu1 %v9850_v59 }
 0x7fb   :  { %10217 = vmatprep.subr.bf16.mxu0 %v9853_v41  ;;  %10303 = vmatprep.subr.bf16.mxu1 %v9855_v14 }
 0x7fe   :  { %10218 = vmatpush1.bf16.msra.mxu0 %v9852_v44  ;;  %10304 = vmatpush1.bf16.msra.mxu1 %v9854_v34 }
 0x7ff   :  { %10219 = vmatprep.subr.bf16.mxu0 %v9857_v17  ;;  %10305 = vmatprep.subr.bf16.mxu1 %v9859_v19 }
 0x802   :  { %10220 = vmatpush1.bf16.msra.mxu0 %v9856_v39  ;;  %10306 = vmatpush1.bf16.msra.mxu1 %v9858_v35 }
 0x803   :  { %10221 = vmatprep.subr.bf16.mxu0 %v9861_v49  ;;  %10307 = vmatprep.subr.bf16.mxu1 %v9863_v33 }
 0x806   :  { %10222 = vmatpush1.bf16.msra.mxu0 %v9860_v56  ;;  %10308 = vmatpush1.bf16.msra.mxu1 %v9862_v0 }
 0x807   :  { %10223 = vmatprep.subr.bf16.mxu0 %v9865_v25  ;;  %10309 = vmatprep.subr.bf16.mxu1 %v9867_v18 }
 0x80a   :  { %10224 = vmatpush1.bf16.msra.mxu0 %v9864_v47  ;;  %10310 = vmatpush1.bf16.msra.mxu1 %v9866_v60 }
 0x80b   :  { %10225 = vmatprep.subr.bf16.mxu0 %v9869_v37  ;;  %10311 = vmatprep.subr.bf16.mxu1 %v9871_v12 }
 0x80e   :  { %10226 = vmatpush1.bf16.msra.mxu0 %v9868_v63  ;;  %10312 = vmatpush1.bf16.msra.mxu1 %v9870_v13 }
 0x80f   :  { %10227 = vmatprep.subr.bf16.mxu0 %v9873_v24  ;;  %10313 = vmatprep.subr.bf16.mxu1 %v9875_v48 }
 0x812   :  { %10228 = vmatpush1.bf16.msra.mxu0 %v9872_v38  ;;  %10314 = vmatpush1.bf16.msra.mxu1 %v9874_v43 }
 0x813   :  { %10229 = vmatprep.subr.bf16.mxu0 %v9877_v4  ;;  %10315 = vmatprep.subr.bf16.mxu1 %v9879_v30 }
 0x816   :  { %10230 = vmatpush1.bf16.msra.mxu0 %v9876_v27  ;;  %10316 = vmatpush1.bf16.msra.mxu1 %v9878_v9 }
 0x819   :  { %10232 = vmatmul.mubr.bf16.vlgmr.msra.gmra.mrb[24].mxu0 %v10154_v32  ;;  %10318 = vmatmul.mubr.bf16.vlgmr.msra.gmra.mrb[64].mxu1 %v10154_v32 }
 0x8ec   :  { %v10233_v23 = vpop.f32.mrb[24].mxu0  ;;  %v10319_v62 = vpop.f32.mrb[64].mxu1 }
 0x8ed   :  { %v10328_v21 = vmax.f32 %v10233_v23, %v10319_v62  ;;  %v10235_v2 = vpop.f32.mrb[25].mxu0  ;;  %v10321_v10 = vpop.f32.mrb[65].mxu1 }
 0x8ee   :  { %v10329_v61 = vmax.f32 %v10235_v2, %v10321_v10  ;;  %v10237_v46 = vpop.f32.mrb[26].mxu0  ;;  %v10323_v40 = vpop.f32.mrb[66].mxu1 }
 0x8ef   :  { %v10330_v55 = vmax.f32 %v10237_v46, %v10323_v40  ;;  %v10239_v15 = vpop.f32.mrb[27].mxu0  ;;  %v10325_v7 = vpop.f32.mrb[67].mxu1 }
 0x8f0   :  { %v11445_v50 = vpack.c.bf16 %v10329_v61, %v10328_v21  ;;  %v10331_v58 = vmax.f32 %v10239_v15, %v10325_v7 }
 0x8f2   :  { %v10343_v45 = vrot.slane %v11445_v50, %v15513_v11  ;;  %v11448_v20 = vpack.c.bf16 %v10331_v58, %v10330_v55 }
 0x8f4   :  { %v10350_v54 = vrot.slane %v10343_v45, %v15513_v11  ;;  %11446 = vst.sshfl [vmem:[#allocation3] sm:$0x5 pattern:$0x73625140] %v10343_v45  ;;  %v10353_v31 = vcombine.high %v10343_v45, %v10343_v45  ;;  %v10380_v53 = vrot.slane %v11448_v20, %v15513_v11 }
 0x8f6   :  { %v10360_v16 = vrot.slane %v10353_v31, %v15513_v11  ;;  %11447 = vst.sshfl [vmem:[#allocation3 + $0x2] sm:$0x5 pattern:$0x73625140] %v10353_v31  ;;  %v10363_v1 = vcombine.high %v10350_v54, %v10350_v54  ;;  %v10387_v42 = vrot.slane %v10380_v53, %v15513_v11  ;;  %v10390_v3 = vcombine.high %v10380_v53, %v10380_v53 }
 0x8f7   :  { %11449 = vst.sshfl [vmem:[#allocation3 + $0x8] sm:$0x5 pattern:$0x73625140] %v10380_v53 }
 0x8f8   :  { %10365 = vst [vmem:[#allocation3 + $0x4] sm:$0x3] %v10363_v1  ;;  %v10366_v36 = vcombine.high %v10360_v16, %v10360_v16  ;;  %v10397_v22 = vrot.slane %v10390_v3, %v15513_v11  ;;  %11450 = vst.sshfl [vmem:[#allocation3 + $0xa] sm:$0x5 pattern:$0x73625140] %v10390_v3  ;;  %v10400_v26 = vcombine.high %v10387_v42, %v10387_v42 }
 0x8fa   :  { %10368 = vst [vmem:[#allocation3 + $0x6] sm:$0x3] %v10366_v36  ;;  %10402 = vst [vmem:[#allocation3 + $0xc] sm:$0x3] %v10400_v26  ;;  %v10403_v52 = vcombine.high %v10397_v22, %v10397_v22 }
 0x8fc   :  { %10405 = vst [vmem:[#allocation3 + $0xe] sm:$0x3] %v10403_v52 }
 0x8fd   :  { %11890 = dma.done.wait [#allocation9 + $0x3], 32768 }
 0x8fe   :  { %11891 = vsyncadd [#allocation9 + $0x3], 4294934528  ;;  %v10413_v59 = vld [vmem:[#allocation7 + $0x8] sm:$0xff]  ;;  %v10412_v41 = vld [vmem:[#allocation7] sm:$0xff] }
 0x8ff   :  { %v10415_v14 = vld [vmem:[#allocation7 + $0x18] sm:$0xff]  ;;  %10796 = vmatprep.subr.bf16.mxu0 %v10413_v59  ;;  %v10414_v44 = vld [vmem:[#allocation7 + $0x10] sm:$0xff]  ;;  %v10417_v34 = vld [vmem:[#allocation7 + $0x28] sm:$0xff] }
 0x900   :  { %10797 = vmatpush1.bf16.msra.mxu0 %v10412_v41  ;;  %v10416_v17 = vld [vmem:[#allocation7 + $0x20] sm:$0xff]  ;;  %v10419_v19 = vld [vmem:[#allocation7 + $0x38] sm:$0xff]  ;;  %v10418_v35 = vld [vmem:[#allocation7 + $0x30] sm:$0xff] }
 0x901   :  { %10798 = vmatprep.subr.bf16.mxu0 %v10415_v14  ;;  %v15521_v39 = vld [vmem:[#allocation3] sm:$0xff]  ;;  %v10421_v33 = vld [vmem:[#allocation7 + $0x48] sm:$0xff]  ;;  %v10420_v0 = vld [vmem:[#allocation7 + $0x40] sm:$0xff] }
 0x902   :  { %v10689_v49 = vrot.slane %v15521_v39, %v15513_v11  ;;  %v10423_v18 = vld [vmem:[#allocation7 + $0x58] sm:$0xff]  ;;  %v10422_v47 = vld [vmem:[#allocation7 + $0x50] sm:$0xff]  ;;  %v10425_v60 = vld [vmem:[#allocation7 + $0x68] sm:$0xff] }
 0x903   :  { %v10424_v37 = vld [vmem:[#allocation7 + $0x60] sm:$0xff]  ;;  %v10427_v12 = vld [vmem:[#allocation7 + $0x78] sm:$0xff]  ;;  %v10426_v63 = vld [vmem:[#allocation7 + $0x70] sm:$0xff] }
 0x904   :  { %10799 = vmatpush1.bf16.msra.mxu0 %v10414_v44  ;;  %v10697_v56 = vcombine.high %v10689_v49, %v10689_v49  ;;  %v10429_v13 = vld [vmem:[#allocation7 + $0x88] sm:$0xff]  ;;  %v10428_v24 = vld [vmem:[#allocation7 + $0x80] sm:$0xff]  ;;  %v10431_v48 = vld [vmem:[#allocation7 + $0x98] sm:$0xff]  ;;  %v15527_v21 = vrot.slane %v10689_v49, %v15513_v11 }
 0x905   :  { %10800 = vmatprep.subr.bf16.mxu0 %v10417_v34  ;;  %v10430_v38 = vld [vmem:[#allocation7 + $0x90] sm:$0xff]  ;;  %v10433_v43 = vld [vmem:[#allocation7 + $0xa8] sm:$0xff]  ;;  %v10432_v4 = vld [vmem:[#allocation7 + $0xa0] sm:$0xff]  ;;  %v10682_v34 = vcombine.high %v15521_v39, %v15521_v39 }
 0x906   :  { %v10719_v25 = vrot.slane %v10697_v56, %v15513_v11  ;;  %v10435_v30 = vld [vmem:[#allocation7 + $0xb8] sm:$0xff]  ;;  %v10434_v5 = vld [vmem:[#allocation7 + $0xb0] sm:$0xff]  ;;  %v10437_v29 = vld [vmem:[#allocation7 + $0xc8] sm:$0xff]  ;;  %v10727_v39 = vcombine.high %v15527_v21, %v15527_v21 }
 0x907   :  { %v10436_v27 = vld [vmem:[#allocation7 + $0xc0] sm:$0xff]  ;;  %v10439_v9 = vld [vmem:[#allocation7 + $0xd8] sm:$0xff]  ;;  %v10438_v32 = vld [vmem:[#allocation7 + $0xd0] sm:$0xff] }
 0x908   :  { %10801 = vmatpush1.bf16.msra.mxu0 %v10416_v17  ;;  %10828 = vmatprep.mubr.bf16.mxu0 %v10719_v25  ;;  %v10441_v51 = vld [vmem:[#allocation7 + $0xe8] sm:$0xff]  ;;  %v10440_v57 = vld [vmem:[#allocation7 + $0xe0] sm:$0xff]  ;;  %v10443_v28 = vld [vmem:[#allocation7 + $0xf8] sm:$0xff]  ;;  %v10729_v2 = vcombine.high %v10719_v25, %v10719_v25 }
 0x909   :  { %10802 = vmatprep.subr.bf16.mxu0 %v10419_v19  ;;  %v10442_v23 = vld [vmem:[#allocation7 + $0xf0] sm:$0xff]  ;;  %v10445_v62 = vld [vmem:[#allocation7 + $0x108] sm:$0xff]  ;;  %v10444_v10 = vld [vmem:[#allocation7 + $0x100] sm:$0xff] }
 0x90a   :  { %v10447_v61 = vld [vmem:[#allocation7 + $0x118] sm:$0xff]  ;;  %v10446_v46 = vld [vmem:[#allocation7 + $0x110] sm:$0xff]  ;;  %v10449_v40 = vld [vmem:[#allocation7 + $0x128] sm:$0xff] }
 0x90b   :  { %v10448_v55 = vld [vmem:[#allocation7 + $0x120] sm:$0xff]  ;;  %v10451_v15 = vld [vmem:[#allocation7 + $0x138] sm:$0xff]  ;;  %v10450_v7 = vld [vmem:[#allocation7 + $0x130] sm:$0xff] }
 0x90c   :  { %10803 = vmatpush1.bf16.msra.mxu0 %v10418_v35  ;;  %v10453_v50 = vld [vmem:[#allocation7 + $0x148] sm:$0xff]  ;;  %v10452_v58 = vld [vmem:[#allocation7 + $0x140] sm:$0xff]  ;;  %v10455_v45 = vld [vmem:[#allocation7 + $0x158] sm:$0xff]  ;;  %v15533_v35 = vrot.slane %v10682_v34, %v15513_v11 }
 0x90d   :  { %10804 = vmatprep.subr.bf16.mxu0 %v10421_v33  ;;  %v10454_v20 = vld [vmem:[#allocation7 + $0x150] sm:$0xff]  ;;  %v10457_v54 = vld [vmem:[#allocation7 + $0x168] sm:$0xff]  ;;  %v10456_v31 = vld [vmem:[#allocation7 + $0x160] sm:$0xff] }
 0x90e   :  { %v10459_v53 = vld [vmem:[#allocation7 + $0x178] sm:$0xff]  ;;  %v10458_v16 = vld [vmem:[#allocation7 + $0x170] sm:$0xff]  ;;  %v10461_v1 = vld [vmem:[#allocation7 + $0x188] sm:$0xff]  ;;  %v10698_v56 = vcombine.high %v15533_v35, %v15533_v35 }
 0x90f   :  { %v10460_v42 = vld [vmem:[#allocation7 + $0x180] sm:$0xff]  ;;  %v10463_v3 = vld [vmem:[#allocation7 + $0x198] sm:$0xff]  ;;  %v10462_v36 = vld [vmem:[#allocation7 + $0x190] sm:$0xff] }
 0x910   :  { %10805 = vmatpush1.bf16.msra.mxu0 %v10420_v0  ;;  %v10465_v22 = vld [vmem:[#allocation7 + $0x1a8] sm:$0xff]  ;;  %v10464_v26 = vld [vmem:[#allocation7 + $0x1a0] sm:$0xff]  ;;  %v10467_v52 = vld [vmem:[#allocation7 + $0x1b8] sm:$0xff] }
 0x911   :  { %10806 = vmatprep.subr.bf16.mxu0 %v10423_v18  ;;  %v10466_v59 = vld [vmem:[#allocation7 + $0x1b0] sm:$0xff]  ;;  %v10469_v41 = vld [vmem:[#allocation7 + $0x1c8] sm:$0xff]  ;;  %v10468_v14 = vld [vmem:[#allocation7 + $0x1c0] sm:$0xff]  ;;  %v15540_v18 = vrot.slane %v10698_v56, %v15513_v11 }
 0x912   :  { %v10471_v44 = vld [vmem:[#allocation7 + $0x1d8] sm:$0xff]  ;;  %v10470_v17 = vld [vmem:[#allocation7 + $0x1d0] sm:$0xff]  ;;  %v10473_v19 = vld [vmem:[#allocation7 + $0x1e8] sm:$0xff] }
 0x913   :  { %v10472_v49 = vld [vmem:[#allocation7 + $0x1e0] sm:$0xff]  ;;  %v10475_v33 = vld [vmem:[#allocation7 + $0x1f8] sm:$0xff]  ;;  %v10474_v0 = vld [vmem:[#allocation7 + $0x1f0] sm:$0xff] }
 0x914   :  { %10807 = vmatpush1.bf16.msra.mxu0 %v10422_v47  ;;  %v10477_v25 = vld [vmem:[#allocation7 + $0x208] sm:$0xff]  ;;  %v10476_v47 = vld [vmem:[#allocation7 + $0x200] sm:$0xff]  ;;  %v10530_v56 = vld [vmem:[#allocation7 + $0x3b0] sm:$0xff] }
 0x915   :  { %10808 = vmatprep.subr.bf16.mxu0 %v10425_v60  ;;  %v10479_v60 = vld [vmem:[#allocation7 + $0x218] sm:$0xff]  ;;  %v10524_v34 = vld [vmem:[#allocation7 + $0x380] sm:$0xff] }
 0x918   :  { %10809 = vmatpush1.bf16.msra.mxu0 %v10424_v37  ;;  %v10478_v37 = vld [vmem:[#allocation7 + $0x210] sm:$0xff] }
 0x919   :  { %10810 = vmatprep.subr.bf16.mxu0 %v10427_v12  ;;  %v10481_v12 = vld [vmem:[#allocation7 + $0x228] sm:$0xff] }
 0x91c   :  { %10811 = vmatpush1.bf16.msra.mxu0 %v10426_v63  ;;  %v10480_v63 = vld [vmem:[#allocation7 + $0x220] sm:$0xff] }
 0x91d   :  { %10812 = vmatprep.subr.bf16.mxu0 %v10429_v13  ;;  %v10483_v13 = vld [vmem:[#allocation7 + $0x238] sm:$0xff] }
 0x920   :  { %10813 = vmatpush1.bf16.msra.mxu0 %v10428_v24  ;;  %v10482_v24 = vld [vmem:[#allocation7 + $0x230] sm:$0xff] }
 0x921   :  { %10814 = vmatprep.subr.bf16.mxu0 %v10431_v48  ;;  %v10485_v48 = vld [vmem:[#allocation7 + $0x248] sm:$0xff] }
 0x924   :  { %10815 = vmatpush1.bf16.msra.mxu0 %v10430_v38  ;;  %v10484_v38 = vld [vmem:[#allocation7 + $0x240] sm:$0xff] }
 0x925   :  { %10816 = vmatprep.subr.bf16.mxu0 %v10433_v43  ;;  %v10487_v43 = vld [vmem:[#allocation7 + $0x258] sm:$0xff] }
 0x928   :  { %10817 = vmatpush1.bf16.msra.mxu0 %v10432_v4  ;;  %v10486_v4 = vld [vmem:[#allocation7 + $0x250] sm:$0xff] }
 0x929   :  { %10818 = vmatprep.subr.bf16.mxu0 %v10435_v30  ;;  %v10489_v30 = vld [vmem:[#allocation7 + $0x268] sm:$0xff] }
 0x92c   :  { %10819 = vmatpush1.bf16.msra.mxu0 %v10434_v5  ;;  %v10488_v5 = vld [vmem:[#allocation7 + $0x260] sm:$0xff] }
 0x92d   :  { %10820 = vmatprep.subr.bf16.mxu0 %v10437_v29  ;;  %v10491_v29 = vld [vmem:[#allocation7 + $0x278] sm:$0xff] }
 0x930   :  { %10821 = vmatpush1.bf16.msra.mxu0 %v10436_v27  ;;  %v10490_v27 = vld [vmem:[#allocation7 + $0x270] sm:$0xff] }
 0x931   :  { %10822 = vmatprep.subr.bf16.mxu0 %v10439_v9  ;;  %v10493_v9 = vld [vmem:[#allocation7 + $0x288] sm:$0xff] }
 0x934   :  { %10823 = vmatpush1.bf16.msra.mxu0 %v10438_v32  ;;  %v10492_v32 = vld [vmem:[#allocation7 + $0x280] sm:$0xff] }
 0x935   :  { %10824 = vmatprep.subr.bf16.mxu0 %v10441_v51  ;;  %v10495_v51 = vld [vmem:[#allocation7 + $0x298] sm:$0xff] }
 0x938   :  { %10825 = vmatpush1.bf16.msra.mxu0 %v10440_v57  ;;  %v10494_v57 = vld [vmem:[#allocation7 + $0x290] sm:$0xff] }
 0x939   :  { %10826 = vmatprep.subr.bf16.mxu0 %v10443_v28  ;;  %v10497_v28 = vld [vmem:[#allocation7 + $0x2a8] sm:$0xff] }
 0x93c   :  { %10827 = vmatpush1.bf16.msra.mxu0 %v10442_v23  ;;  %v10496_v23 = vld [vmem:[#allocation7 + $0x2a0] sm:$0xff] }
 0x93d   :  { %10837 = vmatprep.subr.bf16.mxu0 %v10445_v62  ;;  %v10499_v62 = vld [vmem:[#allocation7 + $0x2b8] sm:$0xff] }
 0x93f   :  { %10829 = vmatmul.mubr.bf16.vlgmr.msra.gmra.mrb[28].mxu0 %v15527_v21  ;;  %v10498_v21 = vld [vmem:[#allocation7 + $0x2b0] sm:$0xff] }
 0x940   :  { %10838 = vmatpush1.bf16.msra.mxu0 %v10444_v10  ;;  %10869 = vmatprep.mubr.bf16.mxu0 %v10729_v2  ;;  %v10501_v2 = vld [vmem:[#allocation7 + $0x2c8] sm:$0xff]  ;;  %v10500_v10 = vld [vmem:[#allocation7 + $0x2c0] sm:$0xff] }
 0x941   :  { %10839 = vmatprep.subr.bf16.mxu0 %v10447_v61  ;;  %v10503_v61 = vld [vmem:[#allocation7 + $0x2d8] sm:$0xff] }
 0x944   :  { %10840 = vmatpush1.bf16.msra.mxu0 %v10446_v46  ;;  %v10502_v46 = vld [vmem:[#allocation7 + $0x2d0] sm:$0xff] }
 0x945   :  { %10841 = vmatprep.subr.bf16.mxu0 %v10449_v40  ;;  %v10505_v40 = vld [vmem:[#allocation7 + $0x2e8] sm:$0xff] }
 0x948   :  { %10842 = vmatpush1.bf16.msra.mxu0 %v10448_v55  ;;  %v10504_v55 = vld [vmem:[#allocation7 + $0x2e0] sm:$0xff] }
 0x949   :  { %10843 = vmatprep.subr.bf16.mxu0 %v10451_v15  ;;  %v10507_v15 = vld [vmem:[#allocation7 + $0x2f8] sm:$0xff] }
 0x94c   :  { %10844 = vmatpush1.bf16.msra.mxu0 %v10450_v7  ;;  %v10506_v7 = vld [vmem:[#allocation7 + $0x2f0] sm:$0xff] }
 0x94d   :  { %10845 = vmatprep.subr.bf16.mxu0 %v10453_v50  ;;  %v10509_v50 = vld [vmem:[#allocation7 + $0x308] sm:$0xff] }
 0x950   :  { %10846 = vmatpush1.bf16.msra.mxu0 %v10452_v58  ;;  %v15545_v58 = vrot.slane %v15533_v35, %v15513_v11  ;;  %v10529_v35 = vld [vmem:[#allocation7 + $0x3a8] sm:$0xff] }
 0x951   :  { %10847 = vmatprep.subr.bf16.mxu0 %v10455_v45  ;;  %v10730_v45 = vcombine.high %v15540_v18, %v15540_v18 }
 0x954   :  { %10848 = vmatpush1.bf16.msra.mxu0 %v10454_v20  ;;  %v10508_v20 = vld [vmem:[#allocation7 + $0x300] sm:$0xff] }
 0x955   :  { %10849 = vmatprep.subr.bf16.mxu0 %v10457_v54  ;;  %v10511_v54 = vld [vmem:[#allocation7 + $0x318] sm:$0xff] }
 0x958   :  { %10850 = vmatpush1.bf16.msra.mxu0 %v10456_v31  ;;  %v10510_v31 = vld [vmem:[#allocation7 + $0x310] sm:$0xff] }
 0x959   :  { %10851 = vmatprep.subr.bf16.mxu0 %v10459_v53  ;;  %v10513_v53 = vld [vmem:[#allocation7 + $0x328] sm:$0xff] }
 0x95c   :  { %10852 = vmatpush1.bf16.msra.mxu0 %v10458_v16  ;;  %v10512_v16 = vld [vmem:[#allocation7 + $0x320] sm:$0xff] }
 0x95d   :  { %10853 = vmatprep.subr.bf16.mxu0 %v10461_v1  ;;  %v10515_v1 = vld [vmem:[#allocation7 + $0x338] sm:$0xff] }
 0x960   :  { %10854 = vmatpush1.bf16.msra.mxu0 %v10460_v42  ;;  %v10514_v42 = vld [vmem:[#allocation7 + $0x330] sm:$0xff] }
 0x961   :  { %10855 = vmatprep.subr.bf16.mxu0 %v10463_v3  ;;  %v10517_v3 = vld [vmem:[#allocation7 + $0x348] sm:$0xff] }
 0x964   :  { %10856 = vmatpush1.bf16.msra.mxu0 %v10462_v36  ;;  %v10516_v36 = vld [vmem:[#allocation7 + $0x340] sm:$0xff] }
 0x965   :  { %10857 = vmatprep.subr.bf16.mxu0 %v10465_v22  ;;  %v10519_v22 = vld [vmem:[#allocation7 + $0x358] sm:$0xff] }
 0x968   :  { %10858 = vmatpush1.bf16.msra.mxu0 %v10464_v26  ;;  %v10518_v26 = vld [vmem:[#allocation7 + $0x350] sm:$0xff] }
 0x969   :  { %10859 = vmatprep.subr.bf16.mxu0 %v10467_v52  ;;  %v10521_v52 = vld [vmem:[#allocation7 + $0x368] sm:$0xff] }
 0x96c   :  { %10860 = vmatpush1.bf16.msra.mxu0 %v10466_v59  ;;  %v10520_v59 = vld [vmem:[#allocation7 + $0x360] sm:$0xff] }
 0x96d   :  { %10861 = vmatprep.subr.bf16.mxu0 %v10469_v41  ;;  %v10523_v41 = vld [vmem:[#allocation7 + $0x378] sm:$0xff] }
 0x970   :  { %10862 = vmatpush1.bf16.msra.mxu0 %v10468_v14  ;;  %v10522_v14 = vld [vmem:[#allocation7 + $0x370] sm:$0xff] }
 0x971   :  { %10863 = vmatprep.subr.bf16.mxu0 %v10471_v44  ;;  %v10525_v44 = vld [vmem:[#allocation7 + $0x388] sm:$0xff] }
 0x974   :  { %10864 = vmatpush1.bf16.msra.mxu0 %v10470_v17  ;;  %v10527_v17 = vld [vmem:[#allocation7 + $0x398] sm:$0xff] }
 0x975   :  { %10865 = vmatprep.subr.bf16.mxu0 %v10473_v19  ;;  %v10526_v19 = vld [vmem:[#allocation7 + $0x390] sm:$0xff] }
 0x978   :  { %10866 = vmatpush1.bf16.msra.mxu0 %v10472_v49  ;;  %v10528_v49 = vld [vmem:[#allocation7 + $0x3a0] sm:$0xff] }
 0x979   :  { %10867 = vmatprep.subr.bf16.mxu0 %v10475_v33  ;;  %v10531_v33 = vld [vmem:[#allocation7 + $0x3b8] sm:$0xff] }
 0x97c   :  { %10868 = vmatpush1.bf16.msra.mxu0 %v10474_v0  ;;  %v10533_v0 = vld [vmem:[#allocation7 + $0x3c8] sm:$0xff] }
 0x97d   :  { %10878 = vmatprep.subr.bf16.mxu0 %v10477_v25  ;;  %v10532_v25 = vld [vmem:[#allocation7 + $0x3c0] sm:$0xff] }
 0x97f   :  { %10870 = vmatmul.mubr.bf16.vlgmr.msra.gmra.mrb[28].mxu0 %v10727_v39  ;;  %v10535_v39 = vld [vmem:[#allocation7 + $0x3d8] sm:$0xff] }
 0x980   :  { %10879 = vmatpush1.bf16.msra.mxu0 %v10476_v47  ;;  %10910 = vmatprep.mubr.bf16.mxu0 %v15540_v18  ;;  %v10534_v18 = vld [vmem:[#allocation7 + $0x3d0] sm:$0xff]  ;;  %v15550_v47 = vld [vmem:[#allocation3 + $0x8] sm:$0xff] }
 0x981   :  { %10880 = vmatprep.subr.bf16.mxu0 %v10479_v60  ;;  %v10537_v60 = vld [vmem:[#allocation7 + $0x3e8] sm:$0xff] }
 0x984   :  { %10881 = vmatpush1.bf16.msra.mxu0 %v10478_v37  ;;  %v15554_v37 = vrot.slane %v15550_v47, %v15513_v11 }
 0x985   :  { %10882 = vmatprep.subr.bf16.mxu0 %v10481_v12  ;;  %v10536_v12 = vld [vmem:[#allocation7 + $0x3e0] sm:$0xff] }
 0x988   :  { %10883 = vmatpush1.bf16.msra.mxu0 %v10480_v63  ;;  %v10539_v63 = vld [vmem:[#allocation7 + $0x3f8] sm:$0xff] }
 0x989   :  { %10884 = vmatprep.subr.bf16.mxu0 %v10483_v13  ;;  %v10746_v13 = vcombine.high %v15554_v37, %v15554_v37 }
 0x98c   :  { %10885 = vmatpush1.bf16.msra.mxu0 %v10482_v24  ;;  %v10538_v24 = vld [vmem:[#allocation7 + $0x3f0] sm:$0xff] }
 0x98d   :  { %10886 = vmatprep.subr.bf16.mxu0 %v10485_v48  ;;  %v10541_v48 = vld [vmem:[#allocation7 + $0x408] sm:$0xff] }
 0x990   :  { %10887 = vmatpush1.bf16.msra.mxu0 %v10484_v38  ;;  %v10728_v38 = vcombine.high %v15545_v58, %v15545_v58 }
 0x991   :  { %10888 = vmatprep.subr.bf16.mxu0 %v10487_v43  ;;  %v15561_v43 = vrot.slane %v10746_v13, %v15513_v11  ;;  %v10595_v13 = vld [vmem:[#allocation7 + $0x5b8] sm:$0xff] }
 0x994   :  { %10889 = vmatpush1.bf16.msra.mxu0 %v10486_v4  ;;  %v10540_v4 = vld [vmem:[#allocation7 + $0x400] sm:$0xff] }
 0x995   :  { %10890 = vmatprep.subr.bf16.mxu0 %v10489_v30  ;;  %v10543_v30 = vld [vmem:[#allocation7 + $0x418] sm:$0xff] }
 0x998   :  { %10891 = vmatpush1.bf16.msra.mxu0 %v10488_v5  ;;  %v10542_v5 = vld [vmem:[#allocation7 + $0x410] sm:$0xff] }
 0x999   :  { %10892 = vmatprep.subr.bf16.mxu0 %v10491_v29  ;;  %v10545_v29 = vld [vmem:[#allocation7 + $0x428] sm:$0xff] }
 0x99c   :  { %10893 = vmatpush1.bf16.msra.mxu0 %v10490_v27  ;;  %v10544_v27 = vld [vmem:[#allocation7 + $0x420] sm:$0xff] }
 0x99d   :  { %10894 = vmatprep.subr.bf16.mxu0 %v10493_v9  ;;  %v10547_v9 = vld [vmem:[#allocation7 + $0x438] sm:$0xff] }
 0x9a0   :  { %10895 = vmatpush1.bf16.msra.mxu0 %v10492_v32  ;;  %v10546_v32 = vld [vmem:[#allocation7 + $0x430] sm:$0xff] }
 0x9a1   :  { %10896 = vmatprep.subr.bf16.mxu0 %v10495_v51  ;;  %v10549_v51 = vld [vmem:[#allocation7 + $0x448] sm:$0xff] }
 0x9a4   :  { %10897 = vmatpush1.bf16.msra.mxu0 %v10494_v57  ;;  %v10548_v57 = vld [vmem:[#allocation7 + $0x440] sm:$0xff] }
 0x9a5   :  { %10898 = vmatprep.subr.bf16.mxu0 %v10497_v28  ;;  %v10551_v28 = vld [vmem:[#allocation7 + $0x458] sm:$0xff] }
 0x9a8   :  { %10899 = vmatpush1.bf16.msra.mxu0 %v10496_v23  ;;  %v10550_v23 = vld [vmem:[#allocation7 + $0x450] sm:$0xff] }
 0x9a9   :  { %10900 = vmatprep.subr.bf16.mxu0 %v10499_v62  ;;  %v10553_v62 = vld [vmem:[#allocation7 + $0x468] sm:$0xff] }
 0x9ac   :  { %10901 = vmatpush1.bf16.msra.mxu0 %v10498_v21  ;;  %v10552_v21 = vld [vmem:[#allocation7 + $0x460] sm:$0xff] }
 0x9ad   :  { %10902 = vmatprep.subr.bf16.mxu0 %v10501_v2  ;;  %v10555_v2 = vld [vmem:[#allocation7 + $0x478] sm:$0xff] }
 0x9b0   :  { %10903 = vmatpush1.bf16.msra.mxu0 %v10500_v10  ;;  %v10554_v10 = vld [vmem:[#allocation7 + $0x470] sm:$0xff] }
 0x9b1   :  { %10904 = vmatprep.subr.bf16.mxu0 %v10503_v61  ;;  %v10557_v61 = vld [vmem:[#allocation7 + $0x488] sm:$0xff] }
 0x9b4   :  { %10905 = vmatpush1.bf16.msra.mxu0 %v10502_v46  ;;  %v10556_v46 = vld [vmem:[#allocation7 + $0x480] sm:$0xff] }
 0x9b5   :  { %10906 = vmatprep.subr.bf16.mxu0 %v10505_v40  ;;  %v10559_v40 = vld [vmem:[#allocation7 + $0x498] sm:$0xff] }
 0x9b8   :  { %10907 = vmatpush1.bf16.msra.mxu0 %v10504_v55  ;;  %v10558_v55 = vld [vmem:[#allocation7 + $0x490] sm:$0xff] }
 0x9b9   :  { %10908 = vmatprep.subr.bf16.mxu0 %v10507_v15  ;;  %v10561_v15 = vld [vmem:[#allocation7 + $0x4a8] sm:$0xff] }
 0x9bc   :  { %10909 = vmatpush1.bf16.msra.mxu0 %v10506_v7  ;;  %v10560_v7 = vld [vmem:[#allocation7 + $0x4a0] sm:$0xff] }
 0x9bd   :  { %10919 = vmatprep.subr.bf16.mxu0 %v10509_v50  ;;  %v10563_v50 = vld [vmem:[#allocation7 + $0x4b8] sm:$0xff] }
 0x9bf   :  { %10911 = vmatmul.mubr.bf16.vlgmr.msra.gmra.mrb[28].mxu0 %v15545_v58  ;;  %v10562_v58 = vld [vmem:[#allocation7 + $0x4b0] sm:$0xff] }
 0x9c0   :  { %10920 = vmatpush1.bf16.msra.mxu0 %v10508_v20  ;;  %10951 = vmatprep.mubr.bf16.mxu0 %v10730_v45  ;;  %v10565_v45 = vld [vmem:[#allocation7 + $0x4c8] sm:$0xff]  ;;  %v10564_v20 = vld [vmem:[#allocation7 + $0x4c0] sm:$0xff] }
 0x9c1   :  { %10921 = vmatprep.subr.bf16.mxu0 %v10511_v54  ;;  %v10567_v54 = vld [vmem:[#allocation7 + $0x4d8] sm:$0xff] }
 0x9c4   :  { %10922 = vmatpush1.bf16.msra.mxu0 %v10510_v31  ;;  %v10566_v31 = vld [vmem:[#allocation7 + $0x4d0] sm:$0xff] }
 0x9c5   :  { %10923 = vmatprep.subr.bf16.mxu0 %v10513_v53  ;;  %v10569_v53 = vld [vmem:[#allocation7 + $0x4e8] sm:$0xff] }
 0x9c8   :  { %10924 = vmatpush1.bf16.msra.mxu0 %v10512_v16  ;;  %v10568_v16 = vld [vmem:[#allocation7 + $0x4e0] sm:$0xff] }
 0x9c9   :  { %10925 = vmatprep.subr.bf16.mxu0 %v10515_v1  ;;  %v10571_v1 = vld [vmem:[#allocation7 + $0x4f8] sm:$0xff] }
 0x9cc   :  { %10926 = vmatpush1.bf16.msra.mxu0 %v10514_v42  ;;  %v10570_v42 = vld [vmem:[#allocation7 + $0x4f0] sm:$0xff] }
 0x9cd   :  { %10927 = vmatprep.subr.bf16.mxu0 %v10517_v3  ;;  %v10573_v3 = vld [vmem:[#allocation7 + $0x508] sm:$0xff] }
 0x9d0   :  { %10928 = vmatpush1.bf16.msra.mxu0 %v10516_v36  ;;  %v15566_v36 = vrot.slane %v15554_v37, %v15513_v11  ;;  %v10590_v37 = vld [vmem:[#allocation7 + $0x590] sm:$0xff] }
 0x9d1   :  { %10929 = vmatprep.subr.bf16.mxu0 %v10519_v22  ;;  %v10778_v22 = vcombine.high %v15561_v43, %v15561_v43 }
 0x9d4   :  { %10930 = vmatpush1.bf16.msra.mxu0 %v10518_v26  ;;  %v10572_v26 = vld [vmem:[#allocation7 + $0x500] sm:$0xff] }
 0x9d5   :  { %10931 = vmatprep.subr.bf16.mxu0 %v10521_v52  ;;  %v10575_v52 = vld [vmem:[#allocation7 + $0x518] sm:$0xff] }
 0x9d8   :  { %10932 = vmatpush1.bf16.msra.mxu0 %v10520_v59  ;;  %v10574_v59 = vld [vmem:[#allocation7 + $0x510] sm:$0xff] }
 0x9d9   :  { %10933 = vmatprep.subr.bf16.mxu0 %v10523_v41  ;;  %v10577_v41 = vld [vmem:[#allocation7 + $0x528] sm:$0xff] }
 0x9dc   :  { %10934 = vmatpush1.bf16.msra.mxu0 %v10522_v14  ;;  %v10576_v14 = vld [vmem:[#allocation7 + $0x520] sm:$0xff] }
 0x9dd   :  { %10935 = vmatprep.subr.bf16.mxu0 %v10525_v44  ;;  %v10579_v44 = vld [vmem:[#allocation7 + $0x538] sm:$0xff] }
 0x9e0   :  { %10936 = vmatpush1.bf16.msra.mxu0 %v10524_v34  ;;  %v10578_v34 = vld [vmem:[#allocation7 + $0x530] sm:$0xff] }
 0x9e1   :  { %10937 = vmatprep.subr.bf16.mxu0 %v10527_v17  ;;  %v10581_v17 = vld [vmem:[#allocation7 + $0x548] sm:$0xff] }
 0x9e4   :  { %10938 = vmatpush1.bf16.msra.mxu0 %v10526_v19  ;;  %v10580_v19 = vld [vmem:[#allocation7 + $0x540] sm:$0xff] }
 0x9e5   :  { %10939 = vmatprep.subr.bf16.mxu0 %v10529_v35  ;;  %v10583_v35 = vld [vmem:[#allocation7 + $0x558] sm:$0xff] }
 0x9e8   :  { %10940 = vmatpush1.bf16.msra.mxu0 %v10528_v49  ;;  %v10582_v49 = vld [vmem:[#allocation7 + $0x550] sm:$0xff] }
 0x9e9   :  { %10941 = vmatprep.subr.bf16.mxu0 %v10531_v33  ;;  %v10585_v33 = vld [vmem:[#allocation7 + $0x568] sm:$0xff] }
 0x9ec   :  { %10942 = vmatpush1.bf16.msra.mxu0 %v10530_v56  ;;  %v10584_v56 = vld [vmem:[#allocation7 + $0x560] sm:$0xff] }
 0x9ed   :  { %10943 = vmatprep.subr.bf16.mxu0 %v10533_v0  ;;  %v10587_v0 = vld [vmem:[#allocation7 + $0x578] sm:$0xff] }
 0x9f0   :  { %10944 = vmatpush1.bf16.msra.mxu0 %v10532_v25  ;;  %v10586_v25 = vld [vmem:[#allocation7 + $0x570] sm:$0xff] }
 0x9f1   :  { %10945 = vmatprep.subr.bf16.mxu0 %v10535_v39  ;;  %v10589_v39 = vld [vmem:[#allocation7 + $0x588] sm:$0xff] }
 0x9f4   :  { %10946 = vmatpush1.bf16.msra.mxu0 %v10534_v18  ;;  %v10588_v18 = vld [vmem:[#allocation7 + $0x580] sm:$0xff] }
 0x9f5   :  { %10947 = vmatprep.subr.bf16.mxu0 %v10537_v60  ;;  %v10591_v60 = vld [vmem:[#allocation7 + $0x598] sm:$0xff] }
 0x9f8   :  { %10948 = vmatpush1.bf16.msra.mxu0 %v10536_v12  ;;  %v10593_v12 = vld [vmem:[#allocation7 + $0x5a8] sm:$0xff] }
 0x9f9   :  { %10949 = vmatprep.subr.bf16.mxu0 %v10539_v63  ;;  %v10592_v63 = vld [vmem:[#allocation7 + $0x5a0] sm:$0xff] }
 0x9fc   :  { %10950 = vmatpush1.bf16.msra.mxu0 %v10538_v24  ;;  %v10594_v24 = vld [vmem:[#allocation7 + $0x5b0] sm:$0xff] }
 0x9fd   :  { %10960 = vmatprep.subr.bf16.mxu0 %v10541_v48  ;;  %v10597_v48 = vld [vmem:[#allocation7 + $0x5c8] sm:$0xff] }
 0x9ff   :  { %10952 = vmatmul.mubr.bf16.vlgmr.msra.gmra.mrb[28].mxu0 %v10728_v38  ;;  %v10596_v38 = vld [vmem:[#allocation7 + $0x5c0] sm:$0xff] }
 0xa00   :  { %10961 = vmatpush1.bf16.msra.mxu0 %v10540_v4  ;;  %10992 = vmatprep.mubr.bf16.mxu0 %v15561_v43  ;;  %v10599_v43 = vld [vmem:[#allocation7 + $0x5d8] sm:$0xff]  ;;  %v10731_v4 = vcombine.high %v15550_v47, %v15550_v47  ;;  %v10776_v47 = vcombine.high %v15566_v36, %v15566_v36 }
 0xa01   :  { %10962 = vmatprep.subr.bf16.mxu0 %v10543_v30  ;;  %v10598_v30 = vld [vmem:[#allocation7 + $0x5d0] sm:$0xff] }
 0xa04   :  { %10963 = vmatpush1.bf16.msra.mxu0 %v10542_v5  ;;  %v10601_v5 = vld [vmem:[#allocation7 + $0x5e8] sm:$0xff] }
 0xa05   :  { %10964 = vmatprep.subr.bf16.mxu0 %v10545_v29  ;;  %v15574_v29 = vrot.slane %v10731_v4, %v15513_v11  ;;  %v10655_v4 = vld [vmem:[#allocation7 + $0x798] sm:$0xff] }
 0xa08   :  { %10965 = vmatpush1.bf16.msra.mxu0 %v10544_v27  ;;  %v10600_v27 = vld [vmem:[#allocation7 + $0x5e0] sm:$0xff] }
 0xa09   :  { %10966 = vmatprep.subr.bf16.mxu0 %v10547_v9  ;;  %v10603_v9 = vld [vmem:[#allocation7 + $0x5f8] sm:$0xff] }
 0xa0c   :  { %10967 = vmatpush1.bf16.msra.mxu0 %v10546_v32  ;;  %v10747_v32 = vcombine.high %v15574_v29, %v15574_v29 }
 0xa0d   :  { %10968 = vmatprep.subr.bf16.mxu0 %v10549_v51  ;;  %v10602_v51 = vld [vmem:[#allocation7 + $0x5f0] sm:$0xff] }
 0xa10   :  { %10969 = vmatpush1.bf16.msra.mxu0 %v10548_v57  ;;  %v10605_v57 = vld [vmem:[#allocation7 + $0x608] sm:$0xff] }
 0xa11   :  { %10970 = vmatprep.subr.bf16.mxu0 %v10551_v28  ;;  %v15581_v28 = vrot.slane %v10747_v32, %v15513_v11  ;;  %v10661_v32 = vld [vmem:[#allocation7 + $0x7c8] sm:$0xff] }
 0xa14   :  { %10971 = vmatpush1.bf16.msra.mxu0 %v10550_v23  ;;  %v10604_v23 = vld [vmem:[#allocation7 + $0x600] sm:$0xff] }
 0xa15   :  { %10972 = vmatprep.subr.bf16.mxu0 %v10553_v62  ;;  %v10607_v62 = vld [vmem:[#allocation7 + $0x618] sm:$0xff] }
 0xa18   :  { %10973 = vmatpush1.bf16.msra.mxu0 %v10552_v21  ;;  %v10606_v21 = vld [vmem:[#allocation7 + $0x610] sm:$0xff] }
 0xa19   :  { %10974 = vmatprep.subr.bf16.mxu0 %v10555_v2  ;;  %v10609_v2 = vld [vmem:[#allocation7 + $0x628] sm:$0xff] }
 0xa1c   :  { %10975 = vmatpush1.bf16.msra.mxu0 %v10554_v10  ;;  %v10608_v10 = vld [vmem:[#allocation7 + $0x620] sm:$0xff] }
 0xa1d   :  { %10976 = vmatprep.subr.bf16.mxu0 %v10557_v61  ;;  %v10611_v61 = vld [vmem:[#allocation7 + $0x638] sm:$0xff] }
 0xa20   :  { %10977 = vmatpush1.bf16.msra.mxu0 %v10556_v46  ;;  %v10610_v46 = vld [vmem:[#allocation7 + $0x630] sm:$0xff] }
 0xa21   :  { %10978 = vmatprep.subr.bf16.mxu0 %v10559_v40  ;;  %v10613_v40 = vld [vmem:[#allocation7 + $0x648] sm:$0xff] }
 0xa24   :  { %10979 = vmatpush1.bf16.msra.mxu0 %v10558_v55  ;;  %v10612_v55 = vld [vmem:[#allocation7 + $0x640] sm:$0xff] }
 0xa25   :  { %10980 = vmatprep.subr.bf16.mxu0 %v10561_v15  ;;  %v10615_v15 = vld [vmem:[#allocation7 + $0x658] sm:$0xff] }
 0xa28   :  { %10981 = vmatpush1.bf16.msra.mxu0 %v10560_v7  ;;  %v10614_v7 = vld [vmem:[#allocation7 + $0x650] sm:$0xff] }
 0xa29   :  { %10982 = vmatprep.subr.bf16.mxu0 %v10563_v50  ;;  %v10617_v50 = vld [vmem:[#allocation7 + $0x668] sm:$0xff] }
 0xa2c   :  { %10983 = vmatpush1.bf16.msra.mxu0 %v10562_v58  ;;  %v10616_v58 = vld [vmem:[#allocation7 + $0x660] sm:$0xff] }
 0xa2d   :  { %10984 = vmatprep.subr.bf16.mxu0 %v10565_v45  ;;  %v10619_v45 = vld [vmem:[#allocation7 + $0x678] sm:$0xff] }
 0xa30   :  { %10985 = vmatpush1.bf16.msra.mxu0 %v10564_v20  ;;  %v10618_v20 = vld [vmem:[#allocation7 + $0x670] sm:$0xff] }
 0xa31   :  { %10986 = vmatprep.subr.bf16.mxu0 %v10567_v54  ;;  %v10621_v54 = vld [vmem:[#allocation7 + $0x688] sm:$0xff] }
 0xa34   :  { %10987 = vmatpush1.bf16.msra.mxu0 %v10566_v31  ;;  %v10620_v31 = vld [vmem:[#allocation7 + $0x680] sm:$0xff] }
 0xa35   :  { %10988 = vmatprep.subr.bf16.mxu0 %v10569_v53  ;;  %v10623_v53 = vld [vmem:[#allocation7 + $0x698] sm:$0xff] }
 0xa38   :  { %10989 = vmatpush1.bf16.msra.mxu0 %v10568_v16  ;;  %v10622_v16 = vld [vmem:[#allocation7 + $0x690] sm:$0xff] }
 0xa39   :  { %10990 = vmatprep.subr.bf16.mxu0 %v10571_v1  ;;  %v10625_v1 = vld [vmem:[#allocation7 + $0x6a8] sm:$0xff] }
 0xa3c   :  { %10991 = vmatpush1.bf16.msra.mxu0 %v10570_v42  ;;  %v10624_v42 = vld [vmem:[#allocation7 + $0x6a0] sm:$0xff] }
 0xa3d   :  { %11001 = vmatprep.subr.bf16.mxu0 %v10573_v3  ;;  %v10627_v3 = vld [vmem:[#allocation7 + $0x6b8] sm:$0xff] }
 0xa3f   :  { %10993 = vmatmul.mubr.bf16.vlgmr.msra.gmra.mrb[28].mxu0 %v15566_v36  ;;  %v10626_v36 = vld [vmem:[#allocation7 + $0x6b0] sm:$0xff] }
 0xa40   :  { %11002 = vmatpush1.bf16.msra.mxu0 %v10572_v26  ;;  %11033 = vmatprep.mubr.bf16.mxu0 %v10778_v22  ;;  %v10629_v22 = vld [vmem:[#allocation7 + $0x6c8] sm:$0xff]  ;;  %v10628_v26 = vld [vmem:[#allocation7 + $0x6c0] sm:$0xff] }
 0xa41   :  { %11003 = vmatprep.subr.bf16.mxu0 %v10575_v52  ;;  %v10631_v52 = vld [vmem:[#allocation7 + $0x6d8] sm:$0xff] }
 0xa44   :  { %11004 = vmatpush1.bf16.msra.mxu0 %v10574_v59  ;;  %v10630_v59 = vld [vmem:[#allocation7 + $0x6d0] sm:$0xff] }
 0xa45   :  { %11005 = vmatprep.subr.bf16.mxu0 %v10577_v41  ;;  %v10633_v41 = vld [vmem:[#allocation7 + $0x6e8] sm:$0xff] }
 0xa48   :  { %11006 = vmatpush1.bf16.msra.mxu0 %v10576_v14  ;;  %v10632_v14 = vld [vmem:[#allocation7 + $0x6e0] sm:$0xff] }
 0xa49   :  { %11007 = vmatprep.subr.bf16.mxu0 %v10579_v44  ;;  %v10635_v44 = vld [vmem:[#allocation7 + $0x6f8] sm:$0xff] }
 0xa4c   :  { %11008 = vmatpush1.bf16.msra.mxu0 %v10578_v34  ;;  %v10634_v34 = vld [vmem:[#allocation7 + $0x6f0] sm:$0xff] }
 0xa4d   :  { %11009 = vmatprep.subr.bf16.mxu0 %v10581_v17  ;;  %v10637_v17 = vld [vmem:[#allocation7 + $0x708] sm:$0xff] }
 0xa50   :  { %11010 = vmatpush1.bf16.msra.mxu0 %v10580_v19  ;;  %v15586_v19 = vrot.slane %v15574_v29, %v15513_v11  ;;  %v10642_v11 = vld [vmem:[#allocation7 + $0x730] sm:$0xff]  ;;  %v10656_v29 = vld [vmem:[#allocation7 + $0x7a0] sm:$0xff] }
 0xa51   :  { %11011 = vmatprep.subr.bf16.mxu0 %v10583_v35  ;;  %v10779_v35 = vcombine.high %v15581_v28, %v15581_v28 }
 0xa54   :  { %11012 = vmatpush1.bf16.msra.mxu0 %v10582_v49  ;;  %v10636_v49 = vld [vmem:[#allocation7 + $0x700] sm:$0xff] }
 0xa55   :  { %11013 = vmatprep.subr.bf16.mxu0 %v10585_v33  ;;  %v10639_v33 = vld [vmem:[#allocation7 + $0x718] sm:$0xff] }
 0xa58   :  { %11014 = vmatpush1.bf16.msra.mxu0 %v10584_v56  ;;  %v10638_v56 = vld [vmem:[#allocation7 + $0x710] sm:$0xff] }
 0xa59   :  { %11015 = vmatprep.subr.bf16.mxu0 %v10587_v0  ;;  %v10641_v0 = vld [vmem:[#allocation7 + $0x728] sm:$0xff] }
 0xa5c   :  { %11016 = vmatpush1.bf16.msra.mxu0 %v10586_v25  ;;  %v10640_v25 = vld [vmem:[#allocation7 + $0x720] sm:$0xff] }
 0xa5d   :  { %11017 = vmatprep.subr.bf16.mxu0 %v10589_v39  ;;  %v10643_v39 = vld [vmem:[#allocation7 + $0x738] sm:$0xff] }
 0xa60   :  { %11018 = vmatpush1.bf16.msra.mxu0 %v10588_v18  ;;  %v10645_v18 = vld [vmem:[#allocation7 + $0x748] sm:$0xff] }
 0xa61   :  { %11019 = vmatprep.subr.bf16.mxu0 %v10591_v60  ;;  %v10644_v60 = vld [vmem:[#allocation7 + $0x740] sm:$0xff] }
 0xa64   :  { %11020 = vmatpush1.bf16.msra.mxu0 %v10590_v37  ;;  %v10647_v37 = vld [vmem:[#allocation7 + $0x758] sm:$0xff] }
 0xa65   :  { %11021 = vmatprep.subr.bf16.mxu0 %v10593_v12  ;;  %v10646_v12 = vld [vmem:[#allocation7 + $0x750] sm:$0xff] }
 0xa68   :  { %11022 = vmatpush1.bf16.msra.mxu0 %v10592_v63  ;;  %v10649_v63 = vld [vmem:[#allocation7 + $0x768] sm:$0xff] }
 0xa69   :  { %11023 = vmatprep.subr.bf16.mxu0 %v10595_v13  ;;  %v10648_v13 = vld [vmem:[#allocation7 + $0x760] sm:$0xff] }
 0xa6c   :  { %11024 = vmatpush1.bf16.msra.mxu0 %v10594_v24  ;;  %v10651_v24 = vld [vmem:[#allocation7 + $0x778] sm:$0xff] }
 0xa6d   :  { %11025 = vmatprep.subr.bf16.mxu0 %v10597_v48  ;;  %v10650_v48 = vld [vmem:[#allocation7 + $0x770] sm:$0xff] }
 0xa70   :  { %11026 = vmatpush1.bf16.msra.mxu0 %v10596_v38  ;;  %v10653_v38 = vld [vmem:[#allocation7 + $0x788] sm:$0xff] }
 0xa71   :  { %11027 = vmatprep.subr.bf16.mxu0 %v10599_v43  ;;  %v10652_v43 = vld [vmem:[#allocation7 + $0x780] sm:$0xff] }
 0xa74   :  { %11028 = vmatpush1.bf16.msra.mxu0 %v10598_v30  ;;  %v10654_v30 = vld [vmem:[#allocation7 + $0x790] sm:$0xff] }
 0xa75   :  { %11029 = vmatprep.subr.bf16.mxu0 %v10601_v5  ;;  %v10657_v5 = vld [vmem:[#allocation7 + $0x7a8] sm:$0xff] }
 0xa78   :  { %11030 = vmatpush1.bf16.msra.mxu0 %v10600_v27  ;;  %v10659_v27 = vld [vmem:[#allocation7 + $0x7b8] sm:$0xff] }
 0xa79   :  { %11031 = vmatprep.subr.bf16.mxu0 %v10603_v9  ;;  %v10658_v9 = vld [vmem:[#allocation7 + $0x7b0] sm:$0xff] }
 0xa7c   :  { %11032 = vmatpush1.bf16.msra.mxu0 %v10602_v51  ;;  %v10660_v51 = vld [vmem:[#allocation7 + $0x7c0] sm:$0xff] }
 0xa7d   :  { %11042 = vmatprep.subr.bf16.mxu0 %v10605_v57  ;;  %v10663_v57 = vld [vmem:[#allocation7 + $0x7d8] sm:$0xff] }
 0xa7f   :  { %11034 = vmatmul.mubr.bf16.vlgmr.msra.gmra.mrb[28].mxu0 %v10776_v47  ;;  %v10662_v47 = vld [vmem:[#allocation7 + $0x7d0] sm:$0xff] }
 0xa80   :  { %11043 = vmatpush1.bf16.msra.mxu0 %v10604_v23  ;;  %11074 = vmatprep.mubr.bf16.mxu0 %v15581_v28  ;;  %v10665_v28 = vld [vmem:[#allocation7 + $0x7e8] sm:$0xff]  ;;  %v10664_v23 = vld [vmem:[#allocation7 + $0x7e0] sm:$0xff] }
 0xa81   :  { %11044 = vmatprep.subr.bf16.mxu0 %v10607_v62  ;;  %v10667_v62 = vld [vmem:[#allocation7 + $0x7f8] sm:$0xff] }
 0xa84   :  { %11045 = vmatpush1.bf16.msra.mxu0 %v10606_v21  ;;  %v10666_v21 = vld [vmem:[#allocation7 + $0x7f0] sm:$0xff] }
 0xa85   :  { %11046 = vmatprep.subr.bf16.mxu0 %v10609_v2  ;;  %v10777_v2 = vcombine.high %v15586_v19, %v15586_v19 }
 0xa88   :  { %11047 = vmatpush1.bf16.msra.mxu0 %v10608_v10  ;;  %v10668_v10 = vld [vmem:[%s15617_s4] sm:$0x3] }
 0xa89   :  { %11048 = vmatprep.subr.bf16.mxu0 %v10611_v61  ;;  %v10673_v61 = vrot.slane %v10668_v10, %v14962_v6 }
 0xa8c   :  { %11049 = vmatpush1.bf16.msra.mxu0 %v10610_v46  ;;  %v10677_v46 = vrot.slane %v10668_v10, %v14970_v8 }
 0xa8d   :  { %11050 = vmatprep.subr.bf16.mxu0 %v10613_v40 }
 0xa90   :  { %11051 = vmatpush1.bf16.msra.mxu0 %v10612_v55 }
 0xa91   :  { %11052 = vmatprep.subr.bf16.mxu0 %v10615_v15 }
 0xa94   :  { %11053 = vmatpush1.bf16.msra.mxu0 %v10614_v7 }
 0xa95   :  { %11054 = vmatprep.subr.bf16.mxu0 %v10617_v50 }
 0xa98   :  { %11055 = vmatpush1.bf16.msra.mxu0 %v10616_v58 }
 0xa99   :  { %11056 = vmatprep.subr.bf16.mxu0 %v10619_v45 }
 0xa9c   :  { %11057 = vmatpush1.bf16.msra.mxu0 %v10618_v20 }
 0xa9d   :  { %11058 = vmatprep.subr.bf16.mxu0 %v10621_v54 }
 0xaa0   :  { %11059 = vmatpush1.bf16.msra.mxu0 %v10620_v31 }
 0xaa1   :  { %11060 = vmatprep.subr.bf16.mxu0 %v10623_v53 }
 0xaa4   :  { %11061 = vmatpush1.bf16.msra.mxu0 %v10622_v16 }
 0xaa5   :  { %11062 = vmatprep.subr.bf16.mxu0 %v10625_v1 }
 0xaa8   :  { %11063 = vmatpush1.bf16.msra.mxu0 %v10624_v42 }
 0xaa9   :  { %11064 = vmatprep.subr.bf16.mxu0 %v10627_v3 }
 0xaac   :  { %11065 = vmatpush1.bf16.msra.mxu0 %v10626_v36 }
 0xaad   :  { %11066 = vmatprep.subr.bf16.mxu0 %v10629_v22 }
 0xab0   :  { %11067 = vmatpush1.bf16.msra.mxu0 %v10628_v26 }
 0xab1   :  { %11068 = vmatprep.subr.bf16.mxu0 %v10631_v52 }
 0xab4   :  { %11069 = vmatpush1.bf16.msra.mxu0 %v10630_v59 }
 0xab5   :  { %11070 = vmatprep.subr.bf16.mxu0 %v10633_v41 }
 0xab8   :  { %11071 = vmatpush1.bf16.msra.mxu0 %v10632_v14 }
 0xab9   :  { %11072 = vmatprep.subr.bf16.mxu0 %v10635_v44 }
 0xabc   :  { %11073 = vmatpush1.bf16.msra.mxu0 %v10634_v34 }
 0xabd   :  { %11083 = vmatprep.subr.bf16.mxu0 %v10637_v17 }
 0xabf   :  { %11075 = vmatmul.mubr.bf16.vlgmr.msra.gmra.mrb[28].mxu0 %v15586_v19 }
 0xac0   :  { %11084 = vmatpush1.bf16.msra.mxu0 %v10636_v49  ;;  %11115 = vmatprep.mubr.bf16.mxu0 %v10779_v35 }
 0xac1   :  { %11085 = vmatprep.subr.bf16.mxu0 %v10639_v33 }
 0xac4   :  { %11086 = vmatpush1.bf16.msra.mxu0 %v10638_v56 }
 0xac5   :  { %11087 = vmatprep.subr.bf16.mxu0 %v10641_v0 }
 0xac8   :  { %11088 = vmatpush1.bf16.msra.mxu0 %v10640_v25 }
 0xac9   :  { %11089 = vmatprep.subr.bf16.mxu0 %v10643_v39 }
 0xacc   :  { %11090 = vmatpush1.bf16.msra.mxu0 %v10642_v11 }
 0xacd   :  { %11091 = vmatprep.subr.bf16.mxu0 %v10645_v18 }
 0xad0   :  { %11092 = vmatpush1.bf16.msra.mxu0 %v10644_v60 }
 0xad1   :  { %11093 = vmatprep.subr.bf16.mxu0 %v10647_v37 }
 0xad4   :  { %11094 = vmatpush1.bf16.msra.mxu0 %v10646_v12 }
 0xad5   :  { %11095 = vmatprep.subr.bf16.mxu0 %v10649_v63 }
 0xad8   :  { %11096 = vmatpush1.bf16.msra.mxu0 %v10648_v13 }
 0xad9   :  { %11097 = vmatprep.subr.bf16.mxu0 %v10651_v24 }
 0xadc   :  { %11098 = vmatpush1.bf16.msra.mxu0 %v10650_v48 }
 0xadd   :  { %11099 = vmatprep.subr.bf16.mxu0 %v10653_v38 }
 0xae0   :  { %11100 = vmatpush1.bf16.msra.mxu0 %v10652_v43 }
 0xae1   :  { %11101 = vmatprep.subr.bf16.mxu0 %v10655_v4 }
 0xae4   :  { %11102 = vmatpush1.bf16.msra.mxu0 %v10654_v30 }
 0xae5   :  { %11103 = vmatprep.subr.bf16.mxu0 %v10657_v5 }
 0xae8   :  { %11104 = vmatpush1.bf16.msra.mxu0 %v10656_v29 }
 0xae9   :  { %11105 = vmatprep.subr.bf16.mxu0 %v10659_v27 }
 0xaec   :  { %11106 = vmatpush1.bf16.msra.mxu0 %v10658_v9 }
 0xaed   :  { %11107 = vmatprep.subr.bf16.mxu0 %v10661_v32 }
 0xaf0   :  { %11108 = vmatpush1.bf16.msra.mxu0 %v10660_v51 }
 0xaf1   :  { %11109 = vmatprep.subr.bf16.mxu0 %v10663_v57 }
 0xaf4   :  { %11110 = vmatpush1.bf16.msra.mxu0 %v10662_v47 }
 0xaf5   :  { %11111 = vmatprep.subr.bf16.mxu0 %v10665_v28 }
 0xaf8   :  { %11112 = vmatpush1.bf16.msra.mxu0 %v10664_v23 }
 0xaf9   :  { %11113 = vmatprep.subr.bf16.mxu0 %v10667_v62 }
 0xafc   :  { %11114 = vmatpush1.bf16.msra.mxu0 %v10666_v21 }
 0xaff   :  { %11116 = vmatmul.mubr.bf16.vlgmr.msra.gmra.mrb[28].mxu0 %v10777_v2 }
 0xbd2   :  { %v11117_v40 = vpop.f32.mrb[28].mxu0 }
 0xbd3   :  { %v11507_v55 = vadd.f32 %v11117_v40, %v10673_v61  ;;  %v11119_v15 = vpop.f32.mrb[29].mxu0 }
 0xbd4   :  { %v11508_v7 = vadd.f32 %v11119_v15, %v10677_v46  ;;  %v11121_v50 = vpop.f32.mrb[30].mxu0 }
 0xbd5   :  { %v11124_v58 = vmax.f32 %v11507_v55, 0.0  ;;  %v11122_v45 = vpop.f32.mrb[31].mxu0 }
 0xbd6   :  { %v11125_v20 = vmax.f32 %v11508_v7, 0.0 }
 0xbd7   :  { %11892 = dma.done.wait [#allocation9 + $0x4], 2048 }
 0xbd8   :  { %11893 = vsyncadd [#allocation9 + $0x4], 4294965248  ;;  %v11131_v54 = vpack.c.bf16 %v11125_v20, %v11125_v20  ;;  %v11140_v31 = vld [vmem:[#allocation8 + $0x40] sm:$0xff]  ;;  %v11141_v16 = vld [vmem:[#allocation8 + $0x48] sm:$0xff]  ;;  %v11130_v34 = vpack.c.bf16 %v11124_v58, %v11124_v58  ;;  %s11911_s7 = smov [#allocation13]  }
 0xbd9   :  { %v11132_v53 = vld [vmem:[#allocation8] sm:$0xff]  ;;  %11461 = vmatprep.subr.bf16.mxu1 %v11140_v31  ;;  %v11133_v6 = vld [vmem:[#allocation8 + $0x8] sm:$0xff]  ;;  %v11142_v8 = vld [vmem:[#allocation8 + $0x50] sm:$0xff]  ;;  %s11202_s29 = sshll.u32 %s11911_s7, 4  ;;  %s11203_s29 = int_to_ptr.vmem [resolvable:$true] %s11202_s29 }
 0xbda   :  { %11187 = vmatprep.mubr.bf16.mxu1 %v11131_v54  ;;  %11462 = vmatpush3.bf16.msra.mxu1 %v11132_v53  ;;  %v11134_v1 = vld [vmem:[#allocation8 + $0x10] sm:$0xff]  ;;  %v11143_v42 = vld [vmem:[#allocation8 + $0x58] sm:$0xff]  ;;  %v11144_v36 = vld [vmem:[#allocation8 + $0x60] sm:$0xff]  ;;  %s11860_s30 = scalar_lea.vmem %s11203_s29, 32  ;;  %p11865_p3 = scmp.lt.s32.totalorder %s11203_s29, %s11203_s29 }
 0xbdb   :  { %11463 = vmatprep.subr.bf16.mxu1 %v11141_v16  ;;  %v11135_v3 = vld [vmem:[#allocation8 + $0x18] sm:$0xff]  ;;  %v11136_v22 = vld [vmem:[#allocation8 + $0x20] sm:$0xff]  ;;  %v11145_v26 = vld [vmem:[#allocation8 + $0x68] sm:$0xff]  ;;  %p11861_p2 = scmp.ne.s32.totalorder %s11203_s29, %s11860_s30  ;;  %p11866_p4 = scmp.lt.s32.totalorder %s11860_s30, %s11860_s30 }
 0xbdc   :  { %v11137_v52 = vld [vmem:[#allocation8 + $0x28] sm:$0xff]  ;;  %v11146_v59 = vld [vmem:[#allocation8 + $0x70] sm:$0xff]  ;;  %v11147_v14 = vld [vmem:[#allocation8 + $0x78] sm:$0xff] }
 0xbdd   :  { %v11138_v41 = vld [vmem:[#allocation8 + $0x30] sm:$0xff]  ;;  %v11139_v44 = vld [vmem:[#allocation8 + $0x38] sm:$0xff]  ;;  %v11451_v19 = vld [vmem:[%s15618_s5] ss:$0 sm:$0xff]  ;;  %p11867_p5 = por %p11866_p4, %p11865_p3 }
 0xbde   :  { %11464 = vmatpush3.bf16.msra.mxu1 %v11133_v6 }
 0xbdf   :  { %11465 = vmatprep.subr.bf16.mxu1 %v11142_v8  ;;  %p11868_p6 = pnand %p11867_p5, %p11861_p2 }
 0xbe2   :  { %11466 = vmatpush3.bf16.msra.mxu1 %v11134_v1 }
 0xbe3   :  { %11467 = vmatprep.subr.bf16.mxu1 %v11143_v42 }
 0xbe6   :  { %11468 = vmatpush3.bf16.msra.mxu1 %v11135_v3 }
 0xbe7   :  { %11469 = vmatprep.subr.bf16.mxu1 %v11144_v36 }
 0xbea   :  { %11470 = vmatpush3.bf16.msra.mxu1 %v11136_v22 }
 0xbeb   :  { %11471 = vmatprep.subr.bf16.mxu1 %v11145_v26 }
 0xbee   :  { %11472 = vmatpush3.bf16.msra.mxu1 %v11137_v52 }
 0xbef   :  { %11473 = vmatprep.subr.bf16.mxu1 %v11146_v59 }
 0xbf2   :  { %11474 = vmatpush3.bf16.msra.mxu1 %v11138_v41 }
 0xbf3   :  { %11475 = vmatprep.subr.bf16.mxu1 %v11147_v14 }
 0xbf6   :  { %11476 = vmatpush3.bf16.msra.mxu1 %v11139_v44 }
 0xbf9   :  { %11188 = vmatmul.mubr.bf16.vlgmr.msra.gmra.mrb[68].mxu1 %v11130_v34 }
 0xccc   :  { %v11477_v17 = vpop.f32.mrb[68].mxu1 }
 0xccd   :  { %v11478_v35 = vpop.f32.mrb[69].mxu1 }
 0xcce   :  { %v11479_v49 = vadd.f32 %v11478_v35, %v11477_v17  ;;  %v11480_v33 = vpop.f32.mrb[70].mxu1 }
 0xccf   :  { %v11481_v56 = vpop.f32.mrb[71].mxu1 }
 0xcd0   :  { %v11190_v0 = vadd.f32 %v11479_v49, %v11451_v19 }
 0xcd2   :  { %11195 = vst [vmem:[#allocation13] sm:$0x3] %v11190_v0 }
 0xcd3   :  { %11871 = shalt.err (!%p11868_p6)
}
 0xcd4   :  { %s11872_s5 = scalar_lea.hbm %s15624_s11, 32 }
 0xcd5   :  { %p11873_p7 = scmp.ne.s32.totalorder %s15624_s11, %s11872_s5  ;;  %p11876_p8 = scmp.lt.u32.totalorder %s11872_s5, %s15624_s11 }
 0xcd7   :  { %p11878_p9 = pnand %p11876_p8, %p11873_p7 }
 0xcd9   :  { %11881 = shalt.err (!%p11878_p9)
}
 0xcda   :  { %11205 = dma.vmem_to_hbm [thread:$0]  %s11203_s29, 32, %s15624_s11, [#allocation12]  }
 0xcdb   :  { %11894 = dma.done.wait [#allocation12], 32  }
 0xcdc   :  { %11895 = vsyncadd [#allocation12], 4294967264 }
 0xcdd   :  { %11209 = vsyncpa [#allocation11], 1 }
 0xcde   :  { %11210 = vsyncpa [#allocation12], 1 }
 0xcdf   :  { %11211 = vsyncmov [#allocation9] }
 0xce2   :  { %s11212_s27 = vpop.sfrf %11211 }
 0xce3   :  { %p11452_p10 = scmp.ne.s32.totalorder %s11212_s27, 0 }
 0xce5   :  { %11216 = shalt.err (%p11452_p10)  }
 0xce6   :  { %11218 = vsyncmov [#allocation9 + $0x1] }
 0xce9   :  { %s11219_s19 = vpop.sfrf %11218 }
 0xcea   :  { %p11453_p11 = scmp.ne.s32.totalorder %s11219_s19, 0 }
 0xcec   :  { %11223 = shalt.err (%p11453_p11)  }
 0xced   :  { %11225 = vsyncmov [#allocation9 + $0x2] }
 0xcf0   :  { %s11226_s8 = vpop.sfrf %11225 }
 0xcf1   :  { %p11454_p12 = scmp.ne.s32.totalorder %s11226_s8, 0 }
 0xcf3   :  { %11230 = shalt.err (%p11454_p12)  }
 0xcf4   :  { %11232 = vsyncmov [#allocation9 + $0x3] }
 0xcf7   :  { %s11233_s20 = vpop.sfrf %11232 }
 0xcf8   :  { %p11455_p13 = scmp.ne.s32.totalorder %s11233_s20, 0 }
 0xcfa   :  { %11237 = shalt.err (%p11455_p13)  }
 0xcfb   :  { %11239 = vsyncmov [#allocation9 + $0x4] }
 0xcfe   :  { %s11240_s11 = vpop.sfrf %11239 }
 0xcff   :  { %p11456_p0 = scmp.ne.s32.totalorder %s11240_s11, 0 }
 0xd01   :  { %11244 = shalt.err (%p11456_p0)  }

</bundles_post_ra>
